<compile_context>
chip_gen: v6e
topology: v6e:2x2x1
jax: 0.10.0
libtpu: 0.0.40
codegen_flags: <defaults>
</compile_context>

<pallas_src>
import functools

import jax
import jax.numpy as jnp
from jax import lax
from jax.experimental import pallas as pl
from jax.experimental.pallas import tpu as pltpu

LANE = 128

# Tap order matches the folded weight layout: t = kh*3 + kw, (dh, dw) = (kh-1, kw-1).
_TAPS = tuple((kh - 1, kw - 1) for kh in range(3) for kw in range(3))


def _round_up(x, m):
    return (x + m - 1) // m * m


def _conv3x3_accum(src2d, w_ref, shift_row, *, H, W):
    """3x3 same-padded conv as 9 accumulating MXU matmuls + (folded bias/BN shift, ReLU).

    src2d:     (H*W, Cin_p) activation, flat index p = h*W + w, channels on lanes.
    w_ref:     (9, Cin_p, Cout_p) folded weights, tap t = kh*3 + kw.
    shift_row: (1, Cout_p) f32 folded bias + BN shift.
    Returns    (H*W, Cout_p) f32 (post-ReLU).
    """
    HW = H * W
    # Flat spatial index along the sublane axis, broadcast across lanes; used to zero the
    # tap rows whose source pixel falls outside the image (the conv's zero padding).
    idx = lax.broadcasted_iota(jnp.int32, src2d.shape, 0)
    acc = None
    for t, (dh, dw) in enumerate(_TAPS):
        d = dh * W + dw
        if d == 0:
            tap = src2d
        else:
            # tap[p] = src2d[(p + d) mod HW]; the rows that wrap around are exactly the
            # rows the border mask below zeros out.  XLU rotate -- no relayout copy.
            tap = pltpu.roll(src2d, shift=(-d) % HW, axis=0)
        bad = None
        if dh == -1:
            bad = idx < W                       # h == 0
        elif dh == 1:
            bad = idx >= (H - 1) * W            # h == H-1
        if dw == -1:
            c = (idx % W) == 0                  # w == 0
            bad = c if bad is None else (bad | c)
        elif dw == 1:
            c = (idx % W) == (W - 1)            # w == W-1
            bad = c if bad is None else (bad | c)
        if bad is not None:
            tap = jnp.where(bad, jnp.zeros_like(tap), tap)
        part = jnp.dot(tap, w_ref[t], preferred_element_type=jnp.float32)
        acc = part if acc is None else acc + part
    return jnp.maximum(acc + shift_row, 0.0)


def _double_conv_kernel(x_ref, w1_ref, s1_ref, w2_ref, s2_ref, o_ref, h_ref, *, H, W):
    """Fused (conv3x3 + BN + ReLU) x 2 on one batch element, NHWC flattened to (H*W, C).

    x_ref:  (1, H*W, C1p)    channel-padded input
    w1_ref: (9, C1p, C2p)    conv1 weights with BN1 scale folded
    s1_ref: (1, C2p)         conv1 folded bias + BN shift
    w2_ref: (9, C2p, C2p)    conv2 weights with BN2 scale folded
    s2_ref: (1, C2p)
    o_ref:  (1, H*W, C2p)    lane-dense output
    h_ref:  (H*W, C2p)       VMEM scratch for the intermediate activation
    """
    cdt = h_ref.dtype
    # Stage 1: conv + BN + ReLU; intermediate stays in VMEM (never goes to HBM).
    y1 = _conv3x3_accum(x_ref[0], w1_ref, s1_ref[...], H=H, W=W)
    h_ref[...] = y1.astype(cdt)
    # Stage 2.
    # TODO(synk): once row tiles grow past ~512 rows, chunk the matmul + epilogue over M to
    # bound the live f32 accumulator under the 64-vreg file.
    y2 = _conv3x3_accum(h_ref[...], w2_ref, s2_ref[...], H=H, W=W)
    o_ref[0] = y2.astype(o_ref.dtype)


def _fold_conv_bn(w_oihw, b, gamma, beta, mean, var, cin_p, cout_p, dtype, eps=1e-5):
    """Fold eval-mode BN into the conv weights and pad channels to the lane width.

    Returns (w, shift): w is (9, cin_p, cout_p) with t = kh*3 + kw;
    sum_t tap_t @ w[t] + shift == BN(conv(x) + b).
    """
    cout, cin = w_oihw.shape[0], w_oihw.shape[1]
    scale = gamma / jnp.sqrt(var + eps)                       # (cout,)
    shift = (b - mean) * scale + beta                         # (cout,)
    w = w_oihw * scale[:, None, None, None]                   # fold scale per out-channel
    w = jnp.transpose(w, (2, 3, 1, 0))                        # OIHW -> (3, 3, cin, cout)
    w = jnp.pad(w, ((0, 0), (0, 0), (0, cin_p - cin), (0, cout_p - cout)))
    w = w.reshape(9, cin_p, cout_p).astype(dtype)
    shift = jnp.pad(shift, (0, cout_p - cout)).reshape(1, cout_p).astype(jnp.float32)
    return w, shift


def double_conv_forward(x_nchw, p, *, compute_dtype=jnp.float32):
    """DoubleConv forward, NCHW in/out like the PyTorch module (eval-mode BN)."""
    N, Cin, H, W = x_nchw.shape
    Cout = p["w1"].shape[0]
    C1p = _round_up(Cin, LANE)     # lane-dense channels: dense stores + dense MXU K/N
    C2p = _round_up(Cout, LANE)
    HW = H * W

    # TODO(synk): small-Cin stem layers (Cin=3/4) pad K to 128 per tap (>90% zeros); pack
    # the 9 taps into one K=round_up(9*Cin,128) matmul for stage 1 to cut MXU passes ~9x.
    w1, s1 = _fold_conv_bn(p["w1"], p["b1"], p["g1"], p["be1"], p["m1"], p["v1"],
                           C1p, C2p, compute_dtype)
    w2, s2 = _fold_conv_bn(p["w2"], p["b2"], p["g2"], p["be2"], p["m2"], p["v2"],
                           C2p, C2p, compute_dtype)

    # NCHW -> NHWC (channels on lanes), pad channels once, flatten spatial.
    # TODO(synk): when chaining DoubleConv blocks (UNet), keep activations NHWC and
    # channel-padded end-to-end to drop these wrapper transpose/pad/slice HBM passes.
    x = jnp.transpose(x_nchw, (0, 2, 3, 1))
    x = jnp.pad(x, ((0, 0), (0, 0), (0, 0), (0, C1p - Cin))).astype(compute_dtype)
    x = x.reshape(N, HW, C1p)

    # TODO(synk): for production H, W add a row-tile grid axis (2-row halo for the fused
    # conv pair via overlapping-index or manual DMA), mark it "parallel" so v7x's two
    # TensorCores get work at N=1, single-buffer the grid-invariant weight blocks, and set
    # per-generation VMEM budgets (<48 MiB on v7x). The whole-image-per-batch block below
    # is sized for small test images only.
    kernel = functools.partial(_double_conv_kernel, H=H, W=W)
    grid_spec = pltpu.PrefetchScalarGridSpec(
        num_scalar_prefetch=0,
        grid=(N,),
        in_specs=[
            pl.BlockSpec((1, HW, C1p), lambda n: (n, 0, 0)),
            pl.BlockSpec((9, C1p, C2p), lambda n: (0, 0, 0)),
            pl.BlockSpec((1, C2p), lambda n: (0, 0)),
            pl.BlockSpec((9, C2p, C2p), lambda n: (0, 0, 0)),
            pl.BlockSpec((1, C2p), lambda n: (0, 0)),
        ],
        out_specs=pl.BlockSpec((1, HW, C2p), lambda n: (n, 0, 0)),
        scratch_shapes=[pltpu.VMEM((HW, C2p), compute_dtype)],   # intermediate activation
    )
    out = pl.pallas_call(
        kernel,
        out_shape=jax.ShapeDtypeStruct((N, HW, C2p), jnp.float32),
        grid_spec=grid_spec,
        compiler_params=pltpu.CompilerParams(
            dimension_semantics=("parallel",),
            vmem_limit_bytes=32 * 1024 * 1024,
        ),
    )(x, w1, s1, w2, s2)

    out = out[:, :, :Cout].reshape(N, H, W, Cout)
    return jnp.transpose(out, (0, 3, 1, 2))                   # NHWC -> NCHW


def init_double_conv_params(key, cin, cout):
    ks = jax.random.split(key, 12)
    return {
        "w1": jax.random.normal(ks[0], (cout, cin, 3, 3), jnp.float32) * 0.1,
        "b1": jax.random.normal(ks[1], (cout,), jnp.float32) * 0.1,
        "g1": 0.5 + jax.random.uniform(ks[2], (cout,), jnp.float32),
        "be1": jax.random.normal(ks[3], (cout,), jnp.float32) * 0.1,
        "m1": jax.random.normal(ks[4], (cout,), jnp.float32) * 0.1,
        "v1": 0.5 + jax.random.uniform(ks[5], (cout,), jnp.float32),
        "w2": jax.random.normal(ks[6], (cout, cout, 3, 3), jnp.float32) * 0.1,
        "b2": jax.random.normal(ks[7], (cout,), jnp.float32) * 0.1,
        "g2": 0.5 + jax.random.uniform(ks[8], (cout,), jnp.float32),
        "be2": jax.random.normal(ks[9], (cout,), jnp.float32) * 0.1,
        "m2": jax.random.normal(ks[10], (cout,), jnp.float32) * 0.1,
        "v2": 0.5 + jax.random.uniform(ks[11], (cout,), jnp.float32),
    }


# ---------- pure-JAX reference (NCHW, PyTorch eval-mode semantics) ----------
def _ref_conv_bn_relu(x, w, b, g, be, m, v, eps=1e-5):
    y = lax.conv_general_dilated(x, w, (1, 1), ((1, 1), (1, 1)),
                                 dimension_numbers=("NCHW", "OIHW", "NCHW"),
                                 precision=lax.Precision.HIGHEST)
    y = y + b[None, :, None, None]
    y = (y - m[None, :, None, None]) / jnp.sqrt(v[None, :, None, None] + eps)
    y = y * g[None, :, None, None] + be[None, :, None, None]
    return jnp.maximum(y, 0.0)


def double_conv_reference(x, p):
    y = _ref_conv_bn_relu(x, p["w1"], p["b1"], p["g1"], p["be1"], p["m1"], p["v1"])
    y = _ref_conv_bn_relu(y, p["w2"], p["b2"], p["g2"], p["be2"], p["m2"], p["v2"])
    return y


if __name__ == "__main__":
    N, Cin, Cout, H, W = 2, 4, 8, 16, 16
    key = jax.random.PRNGKey(0)
    k_x, k_p = jax.random.split(key)
    x = jax.random.normal(k_x, (N, Cin, H, W), jnp.float32)   # NCHW, like PyTorch
    params = init_double_conv_params(k_p, Cin, Cout)

    out = jax.jit(double_conv_forward)(x, params)
    out = jax.block_until_ready(out)

    ref = double_conv_reference(x, params)
    assert out.shape == (N, Cout, H, W), out.shape
    max_err = float(jnp.max(jnp.abs(out - ref)))
    assert jnp.allclose(out, ref, atol=1e-3, rtol=1e-3), max_err
    print("KERNEL_OK")
</pallas_src>

<mosaic_0001>
module attributes {stable_mosaic.version = 11 : i64} {
  func.func @_double_conv_kernel(%arg0: i32, %arg1: memref<1x256x128xf32, #tpu.memory_space<vmem>>, %arg2: memref<9x128x128xf32, #tpu.memory_space<vmem>>, %arg3: memref<1x128xf32, #tpu.memory_space<vmem>>, %arg4: memref<9x128x128xf32, #tpu.memory_space<vmem>>, %arg5: memref<1x128xf32, #tpu.memory_space<vmem>>, %arg6: memref<1x256x128xf32, #tpu.memory_space<vmem>>, %arg7: memref<256x128xf32, #tpu.memory_space<vmem>>) attributes {dimension_semantics = [#tpu.dimension_semantics<parallel>], iteration_bounds = array<i64: 2>, scalar_prefetch = 0 : i64, scratch_operands = 1 : i64, tpu.core_type = #tpu.core_type<tc>, window_params = [{transform_indices = @transform_0, window_bounds = array<i64: 1, 256, 128>}, {pipeline_mode = #tpu.pipeline_mode<synchronous>, transform_indices = @transform_1, window_bounds = array<i64: 9, 128, 128>}, {pipeline_mode = #tpu.pipeline_mode<synchronous>, transform_indices = @transform_2, window_bounds = array<i64: 1, 128>}, {pipeline_mode = #tpu.pipeline_mode<synchronous>, transform_indices = @transform_3, window_bounds = array<i64: 9, 128, 128>}, {pipeline_mode = #tpu.pipeline_mode<synchronous>, transform_indices = @transform_4, window_bounds = array<i64: 1, 128>}, {transform_indices = @transform_5, window_bounds = array<i64: 1, 256, 128>}]} {
    %c0 = arith.constant 0 : index
    %c0_0 = arith.constant 0 : index
    %c0_1 = arith.constant 0 : index
    %0 = vector.load %arg1[%c0, %c0_0, %c0_1] : memref<1x256x128xf32, #tpu.memory_space<vmem>>, vector<1x256x128xf32>
    %1 = vector.shape_cast %0 : vector<1x256x128xf32> to vector<256x128xf32>
    %c0_2 = arith.constant 0 : index
    %c0_3 = arith.constant 0 : index
    %2 = vector.load %arg3[%c0_2, %c0_3] : memref<1x128xf32, #tpu.memory_space<vmem>>, vector<1x128xf32>
    %3 = tpu.iota {dimensions = array<i32: 0>} : vector<256x128xi32>
    %c17_i32 = arith.constant 17 : i32
    %4 = tpu.dynamic_rotate %1 by %c17_i32 dim 0 : vector<256x128xf32>, i32 -> vector<256x128xf32>
    %c16_i32 = arith.constant 16 : i32
    %5 = vector.broadcast %c16_i32 : i32 to vector<256x128xi32>
    %6 = arith.cmpi slt, %3, %5 : vector<256x128xi32>
    %c16_i32_4 = arith.constant 16 : i32
    %c0_i32 = arith.constant 0 : i32
    %7 = arith.cmpi eq, %c16_i32_4, %c0_i32 : i32
    %c1_i32 = arith.constant 1 : i32
    %8 = arith.select %7, %c1_i32, %c16_i32_4 : i32
    %9 = vector.broadcast %8 : i32 to vector<256x128xi32>
    %10 = arith.remsi %3, %9 : vector<256x128xi32>
    %c0_i32_5 = arith.constant 0 : i32
    %11 = vector.broadcast %c0_i32_5 : i32 to vector<256x128xi32>
    %12 = arith.cmpi ne, %10, %11 : vector<256x128xi32>
    %c0_i32_6 = arith.constant 0 : i32
    %13 = vector.broadcast %c0_i32_6 : i32 to vector<256x128xi32>
    %14 = arith.cmpi slt, %10, %13 : vector<256x128xi32>
    %c0_i32_7 = arith.constant 0 : i32
    %15 = arith.cmpi slt, %8, %c0_i32_7 : i32
    %16 = vector.broadcast %15 : i1 to vector<256x128xi1>
    %17 = vector.broadcast %16 : vector<256x128xi1> to vector<256x128xi1>
    %18 = arith.xori %14, %17 : vector<256x128xi1>
    %19 = arith.andi %18, %12 : vector<256x128xi1>
    %20 = vector.broadcast %8 : i32 to vector<256x128xi32>
    %21 = arith.addi %10, %20 : vector<256x128xi32>
    %22 = arith.select %19, %21, %10 : vector<256x128xi1>, vector<256x128xi32>
    %c0_i32_8 = arith.constant 0 : i32
    %23 = vector.broadcast %c0_i32_8 : i32 to vector<256x128xi32>
    %24 = arith.cmpi eq, %22, %23 : vector<256x128xi32>
    %25 = arith.ori %6, %24 : vector<256x128xi1>
    %cst = arith.constant 0.000000e+00 : f32
    %26 = vector.broadcast %cst : f32 to vector<256x128xf32>
    %27 = arith.select %25, %26, %4 : vector<256x128xi1>, vector<256x128xf32>
    %c0_9 = arith.constant 0 : index
    %c0_10 = arith.constant 0 : index
    %c0_11 = arith.constant 0 : index
    %28 = vector.load %arg2[%c0_9, %c0_10, %c0_11] : memref<9x128x128xf32, #tpu.memory_space<vmem>>, vector<1x128x128xf32>
    %29 = vector.shape_cast %28 : vector<1x128x128xf32> to vector<128x128xf32>
    %cst_12 = arith.constant dense<0.000000e+00> : vector<256x128xf32>
    %30 = tpu.matmul %27, %29, %cst_12 {dimension_numbers = #tpu.dot_dimension_numbers<[1], [0], [0], [1], [0, 0, 1, 1], [], []>} : vector<256x128xf32>, vector<128x128xf32>, vector<256x128xf32> -> vector<256x128xf32>
    %c16_i32_13 = arith.constant 16 : i32
    %31 = tpu.dynamic_rotate %1 by %c16_i32_13 dim 0 : vector<256x128xf32>, i32 -> vector<256x128xf32>
    %c16_i32_14 = arith.constant 16 : i32
    %32 = vector.broadcast %c16_i32_14 : i32 to vector<256x128xi32>
    %33 = arith.cmpi slt, %3, %32 : vector<256x128xi32>
    %cst_15 = arith.constant 0.000000e+00 : f32
    %34 = vector.broadcast %cst_15 : f32 to vector<256x128xf32>
    %35 = arith.select %33, %34, %31 : vector<256x128xi1>, vector<256x128xf32>
    %c1 = arith.constant 1 : index
    %c0_16 = arith.constant 0 : index
    %c0_17 = arith.constant 0 : index
    %36 = vector.load %arg2[%c1, %c0_16, %c0_17] : memref<9x128x128xf32, #tpu.memory_space<vmem>>, vector<1x128x128xf32>
    %37 = vector.shape_cast %36 : vector<1x128x128xf32> to vector<128x128xf32>
    %cst_18 = arith.constant dense<0.000000e+00> : vector<256x128xf32>
    %38 = tpu.matmul %35, %37, %cst_18 {dimension_numbers = #tpu.dot_dimension_numbers<[1], [0], [0], [1], [0, 0, 1, 1], [], []>} : vector<256x128xf32>, vector<128x128xf32>, vector<256x128xf32> -> vector<256x128xf32>
    %39 = arith.addf %30, %38 : vector<256x128xf32>
    %c15_i32 = arith.constant 15 : i32
    %40 = tpu.dynamic_rotate %1 by %c15_i32 dim 0 : vector<256x128xf32>, i32 -> vector<256x128xf32>
    %c16_i32_19 = arith.constant 16 : i32
    %41 = vector.broadcast %c16_i32_19 : i32 to vector<256x128xi32>
    %42 = arith.cmpi slt, %3, %41 : vector<256x128xi32>
    %c16_i32_20 = arith.constant 16 : i32
    %c0_i32_21 = arith.constant 0 : i32
    %43 = arith.cmpi eq, %c16_i32_20, %c0_i32_21 : i32
    %c1_i32_22 = arith.constant 1 : i32
    %44 = arith.select %43, %c1_i32_22, %c16_i32_20 : i32
    %45 = vector.broadcast %44 : i32 to vector<256x128xi32>
    %46 = arith.remsi %3, %45 : vector<256x128xi32>
    %c0_i32_23 = arith.constant 0 : i32
    %47 = vector.broadcast %c0_i32_23 : i32 to vector<256x128xi32>
    %48 = arith.cmpi ne, %46, %47 : vector<256x128xi32>
    %c0_i32_24 = arith.constant 0 : i32
    %49 = vector.broadcast %c0_i32_24 : i32 to vector<256x128xi32>
    %50 = arith.cmpi slt, %46, %49 : vector<256x128xi32>
    %c0_i32_25 = arith.constant 0 : i32
    %51 = arith.cmpi slt, %44, %c0_i32_25 : i32
    %52 = vector.broadcast %51 : i1 to vector<256x128xi1>
    %53 = vector.broadcast %52 : vector<256x128xi1> to vector<256x128xi1>
    %54 = arith.xori %50, %53 : vector<256x128xi1>
    %55 = arith.andi %54, %48 : vector<256x128xi1>
    %56 = vector.broadcast %44 : i32 to vector<256x128xi32>
    %57 = arith.addi %46, %56 : vector<256x128xi32>
    %58 = arith.select %55, %57, %46 : vector<256x128xi1>, vector<256x128xi32>
    %c15_i32_26 = arith.constant 15 : i32
    %59 = vector.broadcast %c15_i32_26 : i32 to vector<256x128xi32>
    %60 = arith.cmpi eq, %58, %59 : vector<256x128xi32>
    %61 = arith.ori %42, %60 : vector<256x128xi1>
    %cst_27 = arith.constant 0.000000e+00 : f32
    %62 = vector.broadcast %cst_27 : f32 to vector<256x128xf32>
    %63 = arith.select %61, %62, %40 : vector<256x128xi1>, vector<256x128xf32>
    %c2 = arith.constant 2 : index
    %c0_28 = arith.constant 0 : index
    %c0_29 = arith.constant 0 : index
    %64 = vector.load %arg2[%c2, %c0_28, %c0_29] : memref<9x128x128xf32, #tpu.memory_space<vmem>>, vector<1x128x128xf32>
    %65 = vector.shape_cast %64 : vector<1x128x128xf32> to vector<128x128xf32>
    %cst_30 = arith.constant dense<0.000000e+00> : vector<256x128xf32>
    %66 = tpu.matmul %63, %65, %cst_30 {dimension_numbers = #tpu.dot_dimension_numbers<[1], [0], [0], [1], [0, 0, 1, 1], [], []>} : vector<256x128xf32>, vector<128x128xf32>, vector<256x128xf32> -> vector<256x128xf32>
    %67 = arith.addf %39, %66 : vector<256x128xf32>
    %c1_i32_31 = arith.constant 1 : i32
    %68 = tpu.dynamic_rotate %1 by %c1_i32_31 dim 0 : vector<256x128xf32>, i32 -> vector<256x128xf32>
    %c16_i32_32 = arith.constant 16 : i32
    %c0_i32_33 = arith.constant 0 : i32
    %69 = arith.cmpi eq, %c16_i32_32, %c0_i32_33 : i32
    %c1_i32_34 = arith.constant 1 : i32
    %70 = arith.select %69, %c1_i32_34, %c16_i32_32 : i32
    %71 = vector.broadcast %70 : i32 to vector<256x128xi32>
    %72 = arith.remsi %3, %71 : vector<256x128xi32>
    %c0_i32_35 = arith.constant 0 : i32
    %73 = vector.broadcast %c0_i32_35 : i32 to vector<256x128xi32>
    %74 = arith.cmpi ne, %72, %73 : vector<256x128xi32>
    %c0_i32_36 = arith.constant 0 : i32
    %75 = vector.broadcast %c0_i32_36 : i32 to vector<256x128xi32>
    %76 = arith.cmpi slt, %72, %75 : vector<256x128xi32>
    %c0_i32_37 = arith.constant 0 : i32
    %77 = arith.cmpi slt, %70, %c0_i32_37 : i32
    %78 = vector.broadcast %77 : i1 to vector<256x128xi1>
    %79 = vector.broadcast %78 : vector<256x128xi1> to vector<256x128xi1>
    %80 = arith.xori %76, %79 : vector<256x128xi1>
    %81 = arith.andi %80, %74 : vector<256x128xi1>
    %82 = vector.broadcast %70 : i32 to vector<256x128xi32>
    %83 = arith.addi %72, %82 : vector<256x128xi32>
    %84 = arith.select %81, %83, %72 : vector<256x128xi1>, vector<256x128xi32>
    %c0_i32_38 = arith.constant 0 : i32
    %85 = vector.broadcast %c0_i32_38 : i32 to vector<256x128xi32>
    %86 = arith.cmpi eq, %84, %85 : vector<256x128xi32>
    %cst_39 = arith.constant 0.000000e+00 : f32
    %87 = vector.broadcast %cst_39 : f32 to vector<256x128xf32>
    %88 = arith.select %86, %87, %68 : vector<256x128xi1>, vector<256x128xf32>
    %c3 = arith.constant 3 : index
    %c0_40 = arith.constant 0 : index
    %c0_41 = arith.constant 0 : index
    %89 = vector.load %arg2[%c3, %c0_40, %c0_41] : memref<9x128x128xf32, #tpu.memory_space<vmem>>, vector<1x128x128xf32>
    %90 = vector.shape_cast %89 : vector<1x128x128xf32> to vector<128x128xf32>
    %cst_42 = arith.constant dense<0.000000e+00> : vector<256x128xf32>
    %91 = tpu.matmul %88, %90, %cst_42 {dimension_numbers = #tpu.dot_dimension_numbers<[1], [0], [0], [1], [0, 0, 1, 1], [], []>} : vector<256x128xf32>, vector<128x128xf32>, vector<256x128xf32> -> vector<256x128xf32>
    %92 = arith.addf %67, %91 : vector<256x128xf32>
    %c4 = arith.constant 4 : index
    %c0_43 = arith.constant 0 : index
    %c0_44 = arith.constant 0 : index
    %93 = vector.load %arg2[%c4, %c0_43, %c0_44] : memref<9x128x128xf32, #tpu.memory_space<vmem>>, vector<1x128x128xf32>
    %94 = vector.shape_cast %93 : vector<1x128x128xf32> to vector<128x128xf32>
    %cst_45 = arith.constant dense<0.000000e+00> : vector<256x128xf32>
    %95 = tpu.matmul %1, %94, %cst_45 {dimension_numbers = #tpu.dot_dimension_numbers<[1], [0], [0], [1], [0, 0, 1, 1], [], []>} : vector<256x128xf32>, vector<128x128xf32>, vector<256x128xf32> -> vector<256x128xf32>
    %96 = arith.addf %92, %95 : vector<256x128xf32>
    %c255_i32 = arith.constant 255 : i32
    %97 = tpu.dynamic_rotate %1 by %c255_i32 dim 0 : vector<256x128xf32>, i32 -> vector<256x128xf32>
    %c16_i32_46 = arith.constant 16 : i32
    %c0_i32_47 = arith.constant 0 : i32
    %98 = arith.cmpi eq, %c16_i32_46, %c0_i32_47 : i32
    %c1_i32_48 = arith.constant 1 : i32
    %99 = arith.select %98, %c1_i32_48, %c16_i32_46 : i32
    %100 = vector.broadcast %99 : i32 to vector<256x128xi32>
    %101 = arith.remsi %3, %100 : vector<256x128xi32>
    %c0_i32_49 = arith.constant 0 : i32
    %102 = vector.broadcast %c0_i32_49 : i32 to vector<256x128xi32>
    %103 = arith.cmpi ne, %101, %102 : vector<256x128xi32>
    %c0_i32_50 = arith.constant 0 : i32
    %104 = vector.broadcast %c0_i32_50 : i32 to vector<256x128xi32>
    %105 = arith.cmpi slt, %101, %104 : vector<256x128xi32>
    %c0_i32_51 = arith.constant 0 : i32
    %106 = arith.cmpi slt, %99, %c0_i32_51 : i32
    %107 = vector.broadcast %106 : i1 to vector<256x128xi1>
    %108 = vector.broadcast %107 : vector<256x128xi1> to vector<256x128xi1>
    %109 = arith.xori %105, %108 : vector<256x128xi1>
    %110 = arith.andi %109, %103 : vector<256x128xi1>
    %111 = vector.broadcast %99 : i32 to vector<256x128xi32>
    %112 = arith.addi %101, %111 : vector<256x128xi32>
    %113 = arith.select %110, %112, %101 : vector<256x128xi1>, vector<256x128xi32>
    %c15_i32_52 = arith.constant 15 : i32
    %114 = vector.broadcast %c15_i32_52 : i32 to vector<256x128xi32>
    %115 = arith.cmpi eq, %113, %114 : vector<256x128xi32>
    %cst_53 = arith.constant 0.000000e+00 : f32
    %116 = vector.broadcast %cst_53 : f32 to vector<256x128xf32>
    %117 = arith.select %115, %116, %97 : vector<256x128xi1>, vector<256x128xf32>
    %c5 = arith.constant 5 : index
    %c0_54 = arith.constant 0 : index
    %c0_55 = arith.constant 0 : index
    %118 = vector.load %arg2[%c5, %c0_54, %c0_55] : memref<9x128x128xf32, #tpu.memory_space<vmem>>, vector<1x128x128xf32>
    %119 = vector.shape_cast %118 : vector<1x128x128xf32> to vector<128x128xf32>
    %cst_56 = arith.constant dense<0.000000e+00> : vector<256x128xf32>
    %120 = tpu.matmul %117, %119, %cst_56 {dimension_numbers = #tpu.dot_dimension_numbers<[1], [0], [0], [1], [0, 0, 1, 1], [], []>} : vector<256x128xf32>, vector<128x128xf32>, vector<256x128xf32> -> vector<256x128xf32>
    %121 = arith.addf %96, %120 : vector<256x128xf32>
    %c241_i32 = arith.constant 241 : i32
    %122 = tpu.dynamic_rotate %1 by %c241_i32 dim 0 : vector<256x128xf32>, i32 -> vector<256x128xf32>
    %c240_i32 = arith.constant 240 : i32
    %123 = vector.broadcast %c240_i32 : i32 to vector<256x128xi32>
    %124 = arith.cmpi sge, %3, %123 : vector<256x128xi32>
    %c16_i32_57 = arith.constant 16 : i32
    %c0_i32_58 = arith.constant 0 : i32
    %125 = arith.cmpi eq, %c16_i32_57, %c0_i32_58 : i32
    %c1_i32_59 = arith.constant 1 : i32
    %126 = arith.select %125, %c1_i32_59, %c16_i32_57 : i32
    %127 = vector.broadcast %126 : i32 to vector<256x128xi32>
    %128 = arith.remsi %3, %127 : vector<256x128xi32>
    %c0_i32_60 = arith.constant 0 : i32
    %129 = vector.broadcast %c0_i32_60 : i32 to vector<256x128xi32>
    %130 = arith.cmpi ne, %128, %129 : vector<256x128xi32>
    %c0_i32_61 = arith.constant 0 : i32
    %131 = vector.broadcast %c0_i32_61 : i32 to vector<256x128xi32>
    %132 = arith.cmpi slt, %128, %131 : vector<256x128xi32>
    %c0_i32_62 = arith.constant 0 : i32
    %133 = arith.cmpi slt, %126, %c0_i32_62 : i32
    %134 = vector.broadcast %133 : i1 to vector<256x128xi1>
    %135 = vector.broadcast %134 : vector<256x128xi1> to vector<256x128xi1>
    %136 = arith.xori %132, %135 : vector<256x128xi1>
    %137 = arith.andi %136, %130 : vector<256x128xi1>
    %138 = vector.broadcast %126 : i32 to vector<256x128xi32>
    %139 = arith.addi %128, %138 : vector<256x128xi32>
    %140 = arith.select %137, %139, %128 : vector<256x128xi1>, vector<256x128xi32>
    %c0_i32_63 = arith.constant 0 : i32
    %141 = vector.broadcast %c0_i32_63 : i32 to vector<256x128xi32>
    %142 = arith.cmpi eq, %140, %141 : vector<256x128xi32>
    %143 = arith.ori %124, %142 : vector<256x128xi1>
    %cst_64 = arith.constant 0.000000e+00 : f32
    %144 = vector.broadcast %cst_64 : f32 to vector<256x128xf32>
    %145 = arith.select %143, %144, %122 : vector<256x128xi1>, vector<256x128xf32>
    %c6 = arith.constant 6 : index
    %c0_65 = arith.constant 0 : index
    %c0_66 = arith.constant 0 : index
    %146 = vector.load %arg2[%c6, %c0_65, %c0_66] : memref<9x128x128xf32, #tpu.memory_space<vmem>>, vector<1x128x128xf32>
    %147 = vector.shape_cast %146 : vector<1x128x128xf32> to vector<128x128xf32>
    %cst_67 = arith.constant dense<0.000000e+00> : vector<256x128xf32>
    %148 = tpu.matmul %145, %147, %cst_67 {dimension_numbers = #tpu.dot_dimension_numbers<[1], [0], [0], [1], [0, 0, 1, 1], [], []>} : vector<256x128xf32>, vector<128x128xf32>, vector<256x128xf32> -> vector<256x128xf32>
    %149 = arith.addf %121, %148 : vector<256x128xf32>
    %c240_i32_68 = arith.constant 240 : i32
    %150 = tpu.dynamic_rotate %1 by %c240_i32_68 dim 0 : vector<256x128xf32>, i32 -> vector<256x128xf32>
    %c240_i32_69 = arith.constant 240 : i32
    %151 = vector.broadcast %c240_i32_69 : i32 to vector<256x128xi32>
    %152 = arith.cmpi sge, %3, %151 : vector<256x128xi32>
    %cst_70 = arith.constant 0.000000e+00 : f32
    %153 = vector.broadcast %cst_70 : f32 to vector<256x128xf32>
    %154 = arith.select %152, %153, %150 : vector<256x128xi1>, vector<256x128xf32>
    %c7 = arith.constant 7 : index
    %c0_71 = arith.constant 0 : index
    %c0_72 = arith.constant 0 : index
    %155 = vector.load %arg2[%c7, %c0_71, %c0_72] : memref<9x128x128xf32, #tpu.memory_space<vmem>>, vector<1x128x128xf32>
    %156 = vector.shape_cast %155 : vector<1x128x128xf32> to vector<128x128xf32>
    %cst_73 = arith.constant dense<0.000000e+00> : vector<256x128xf32>
    %157 = tpu.matmul %154, %156, %cst_73 {dimension_numbers = #tpu.dot_dimension_numbers<[1], [0], [0], [1], [0, 0, 1, 1], [], []>} : vector<256x128xf32>, vector<128x128xf32>, vector<256x128xf32> -> vector<256x128xf32>
    %158 = arith.addf %149, %157 : vector<256x128xf32>
    %c239_i32 = arith.constant 239 : i32
    %159 = tpu.dynamic_rotate %1 by %c239_i32 dim 0 : vector<256x128xf32>, i32 -> vector<256x128xf32>
    %c240_i32_74 = arith.constant 240 : i32
    %160 = vector.broadcast %c240_i32_74 : i32 to vector<256x128xi32>
    %161 = arith.cmpi sge, %3, %160 : vector<256x128xi32>
    %c16_i32_75 = arith.constant 16 : i32
    %c0_i32_76 = arith.constant 0 : i32
    %162 = arith.cmpi eq, %c16_i32_75, %c0_i32_76 : i32
    %c1_i32_77 = arith.constant 1 : i32
    %163 = arith.select %162, %c1_i32_77, %c16_i32_75 : i32
    %164 = vector.broadcast %163 : i32 to vector<256x128xi32>
    %165 = arith.remsi %3, %164 : vector<256x128xi32>
    %c0_i32_78 = arith.constant 0 : i32
    %166 = vector.broadcast %c0_i32_78 : i32 to vector<256x128xi32>
    %167 = arith.cmpi ne, %165, %166 : vector<256x128xi32>
    %c0_i32_79 = arith.constant 0 : i32
    %168 = vector.broadcast %c0_i32_79 : i32 to vector<256x128xi32>
    %169 = arith.cmpi slt, %165, %168 : vector<256x128xi32>
    %c0_i32_80 = arith.constant 0 : i32
    %170 = arith.cmpi slt, %163, %c0_i32_80 : i32
    %171 = vector.broadcast %170 : i1 to vector<256x128xi1>
    %172 = vector.broadcast %171 : vector<256x128xi1> to vector<256x128xi1>
    %173 = arith.xori %169, %172 : vector<256x128xi1>
    %174 = arith.andi %173, %167 : vector<256x128xi1>
    %175 = vector.broadcast %163 : i32 to vector<256x128xi32>
    %176 = arith.addi %165, %175 : vector<256x128xi32>
    %177 = arith.select %174, %176, %165 : vector<256x128xi1>, vector<256x128xi32>
    %c15_i32_81 = arith.constant 15 : i32
    %178 = vector.broadcast %c15_i32_81 : i32 to vector<256x128xi32>
    %179 = arith.cmpi eq, %177, %178 : vector<256x128xi32>
    %180 = arith.ori %161, %179 : vector<256x128xi1>
    %cst_82 = arith.constant 0.000000e+00 : f32
    %181 = vector.broadcast %cst_82 : f32 to vector<256x128xf32>
    %182 = arith.select %180, %181, %159 : vector<256x128xi1>, vector<256x128xf32>
    %c8 = arith.constant 8 : index
    %c0_83 = arith.constant 0 : index
    %c0_84 = arith.constant 0 : index
    %183 = vector.load %arg2[%c8, %c0_83, %c0_84] : memref<9x128x128xf32, #tpu.memory_space<vmem>>, vector<1x128x128xf32>
    %184 = vector.shape_cast %183 : vector<1x128x128xf32> to vector<128x128xf32>
    %cst_85 = arith.constant dense<0.000000e+00> : vector<256x128xf32>
    %185 = tpu.matmul %182, %184, %cst_85 {dimension_numbers = #tpu.dot_dimension_numbers<[1], [0], [0], [1], [0, 0, 1, 1], [], []>} : vector<256x128xf32>, vector<128x128xf32>, vector<256x128xf32> -> vector<256x128xf32>
    %186 = arith.addf %158, %185 : vector<256x128xf32>
    %187 = vector.broadcast %2 : vector<1x128xf32> to vector<256x128xf32>
    %188 = arith.addf %186, %187 : vector<256x128xf32>
    %cst_86 = arith.constant 0.000000e+00 : f32
    %189 = vector.broadcast %cst_86 : f32 to vector<256x128xf32>
    %190 = arith.maximumf %188, %189 : vector<256x128xf32>
    %c0_87 = arith.constant 0 : index
    %c0_88 = arith.constant 0 : index
    %191 = vector.load %arg7[%c0_87, %c0_88] : memref<256x128xf32, #tpu.memory_space<vmem>>, vector<256x128xf32>
    tpu.vector_store %arg7[%c0_87, %c0_88], %190 {strides = array<i32>} : memref<256x128xf32, #tpu.memory_space<vmem>>, vector<256x128xf32>,
    %c0_89 = arith.constant 0 : index
    %c0_90 = arith.constant 0 : index
    %192 = vector.load %arg7[%c0_89, %c0_90] : memref<256x128xf32, #tpu.memory_space<vmem>>, vector<256x128xf32>
    %c0_91 = arith.constant 0 : index
    %c0_92 = arith.constant 0 : index
    %193 = vector.load %arg5[%c0_91, %c0_92] : memref<1x128xf32, #tpu.memory_space<vmem>>, vector<1x128xf32>
    %194 = tpu.iota {dimensions = array<i32: 0>} : vector<256x128xi32>
    %c17_i32_93 = arith.constant 17 : i32
    %195 = tpu.dynamic_rotate %192 by %c17_i32_93 dim 0 : vector<256x128xf32>, i32 -> vector<256x128xf32>
    %c16_i32_94 = arith.constant 16 : i32
    %196 = vector.broadcast %c16_i32_94 : i32 to vector<256x128xi32>
    %197 = arith.cmpi slt, %194, %196 : vector<256x128xi32>
    %c16_i32_95 = arith.constant 16 : i32
    %c0_i32_96 = arith.constant 0 : i32
    %198 = arith.cmpi eq, %c16_i32_95, %c0_i32_96 : i32
    %c1_i32_97 = arith.constant 1 : i32
    %199 = arith.select %198, %c1_i32_97, %c16_i32_95 : i32
    %200 = vector.broadcast %199 : i32 to vector<256x128xi32>
    %201 = arith.remsi %194, %200 : vector<256x128xi32>
    %c0_i32_98 = arith.constant 0 : i32
    %202 = vector.broadcast %c0_i32_98 : i32 to vector<256x128xi32>
    %203 = arith.cmpi ne, %201, %202 : vector<256x128xi32>
    %c0_i32_99 = arith.constant 0 : i32
    %204 = vector.broadcast %c0_i32_99 : i32 to vector<256x128xi32>
    %205 = arith.cmpi slt, %201, %204 : vector<256x128xi32>
    %c0_i32_100 = arith.constant 0 : i32
    %206 = arith.cmpi slt, %199, %c0_i32_100 : i32
    %207 = vector.broadcast %206 : i1 to vector<256x128xi1>
    %208 = vector.broadcast %207 : vector<256x128xi1> to vector<256x128xi1>
    %209 = arith.xori %205, %208 : vector<256x128xi1>
    %210 = arith.andi %209, %203 : vector<256x128xi1>
    %211 = vector.broadcast %199 : i32 to vector<256x128xi32>
    %212 = arith.addi %201, %211 : vector<256x128xi32>
    %213 = arith.select %210, %212, %201 : vector<256x128xi1>, vector<256x128xi32>
    %c0_i32_101 = arith.constant 0 : i32
    %214 = vector.broadcast %c0_i32_101 : i32 to vector<256x128xi32>
    %215 = arith.cmpi eq, %213, %214 : vector<256x128xi32>
    %216 = arith.ori %197, %215 : vector<256x128xi1>
    %cst_102 = arith.constant 0.000000e+00 : f32
    %217 = vector.broadcast %cst_102 : f32 to vector<256x128xf32>
    %218 = arith.select %216, %217, %195 : vector<256x128xi1>, vector<256x128xf32>
    %c0_103 = arith.constant 0 : index
    %c0_104 = arith.constant 0 : index
    %c0_105 = arith.constant 0 : index
    %219 = vector.load %arg4[%c0_103, %c0_104, %c0_105] : memref<9x128x128xf32, #tpu.memory_space<vmem>>, vector<1x128x128xf32>
    %220 = vector.shape_cast %219 : vector<1x128x128xf32> to vector<128x128xf32>
    %cst_106 = arith.constant dense<0.000000e+00> : vector<256x128xf32>
    %221 = tpu.matmul %218, %220, %cst_106 {dimension_numbers = #tpu.dot_dimension_numbers<[1], [0], [0], [1], [0, 0, 1, 1], [], []>} : vector<256x128xf32>, vector<128x128xf32>, vector<256x128xf32> -> vector<256x128xf32>
    %c16_i32_107 = arith.constant 16 : i32
    %222 = tpu.dynamic_rotate %192 by %c16_i32_107 dim 0 : vector<256x128xf32>, i32 -> vector<256x128xf32>
    %c16_i32_108 = arith.constant 16 : i32
    %223 = vector.broadcast %c16_i32_108 : i32 to vector<256x128xi32>
    %224 = arith.cmpi slt, %194, %223 : vector<256x128xi32>
    %cst_109 = arith.constant 0.000000e+00 : f32
    %225 = vector.broadcast %cst_109 : f32 to vector<256x128xf32>
    %226 = arith.select %224, %225, %222 : vector<256x128xi1>, vector<256x128xf32>
    %c1_110 = arith.constant 1 : index
    %c0_111 = arith.constant 0 : index
    %c0_112 = arith.constant 0 : index
    %227 = vector.load %arg4[%c1_110, %c0_111, %c0_112] : memref<9x128x128xf32, #tpu.memory_space<vmem>>, vector<1x128x128xf32>
    %228 = vector.shape_cast %227 : vector<1x128x128xf32> to vector<128x128xf32>
    %cst_113 = arith.constant dense<0.000000e+00> : vector<256x128xf32>
    %229 = tpu.matmul %226, %228, %cst_113 {dimension_numbers = #tpu.dot_dimension_numbers<[1], [0], [0], [1], [0, 0, 1, 1], [], []>} : vector<256x128xf32>, vector<128x128xf32>, vector<256x128xf32> -> vector<256x128xf32>
    %230 = arith.addf %221, %229 : vector<256x128xf32>
    %c15_i32_114 = arith.constant 15 : i32
    %231 = tpu.dynamic_rotate %192 by %c15_i32_114 dim 0 : vector<256x128xf32>, i32 -> vector<256x128xf32>
    %c16_i32_115 = arith.constant 16 : i32
    %232 = vector.broadcast %c16_i32_115 : i32 to vector<256x128xi32>
    %233 = arith.cmpi slt, %194, %232 : vector<256x128xi32>
    %c16_i32_116 = arith.constant 16 : i32
    %c0_i32_117 = arith.constant 0 : i32
    %234 = arith.cmpi eq, %c16_i32_116, %c0_i32_117 : i32
    %c1_i32_118 = arith.constant 1 : i32
    %235 = arith.select %234, %c1_i32_118, %c16_i32_116 : i32
    %236 = vector.broadcast %235 : i32 to vector<256x128xi32>
    %237 = arith.remsi %194, %236 : vector<256x128xi32>
    %c0_i32_119 = arith.constant 0 : i32
    %238 = vector.broadcast %c0_i32_119 : i32 to vector<256x128xi32>
    %239 = arith.cmpi ne, %237, %238 : vector<256x128xi32>
    %c0_i32_120 = arith.constant 0 : i32
    %240 = vector.broadcast %c0_i32_120 : i32 to vector<256x128xi32>
    %241 = arith.cmpi slt, %237, %240 : vector<256x128xi32>
    %c0_i32_121 = arith.constant 0 : i32
    %242 = arith.cmpi slt, %235, %c0_i32_121 : i32
    %243 = vector.broadcast %242 : i1 to vector<256x128xi1>
    %244 = vector.broadcast %243 : vector<256x128xi1> to vector<256x128xi1>
    %245 = arith.xori %241, %244 : vector<256x128xi1>
    %246 = arith.andi %245, %239 : vector<256x128xi1>
    %247 = vector.broadcast %235 : i32 to vector<256x128xi32>
    %248 = arith.addi %237, %247 : vector<256x128xi32>
    %249 = arith.select %246, %248, %237 : vector<256x128xi1>, vector<256x128xi32>
    %c15_i32_122 = arith.constant 15 : i32
    %250 = vector.broadcast %c15_i32_122 : i32 to vector<256x128xi32>
    %251 = arith.cmpi eq, %249, %250 : vector<256x128xi32>
    %252 = arith.ori %233, %251 : vector<256x128xi1>
    %cst_123 = arith.constant 0.000000e+00 : f32
    %253 = vector.broadcast %cst_123 : f32 to vector<256x128xf32>
    %254 = arith.select %252, %253, %231 : vector<256x128xi1>, vector<256x128xf32>
    %c2_124 = arith.constant 2 : index
    %c0_125 = arith.constant 0 : index
    %c0_126 = arith.constant 0 : index
    %255 = vector.load %arg4[%c2_124, %c0_125, %c0_126] : memref<9x128x128xf32, #tpu.memory_space<vmem>>, vector<1x128x128xf32>
    %256 = vector.shape_cast %255 : vector<1x128x128xf32> to vector<128x128xf32>
    %cst_127 = arith.constant dense<0.000000e+00> : vector<256x128xf32>
    %257 = tpu.matmul %254, %256, %cst_127 {dimension_numbers = #tpu.dot_dimension_numbers<[1], [0], [0], [1], [0, 0, 1, 1], [], []>} : vector<256x128xf32>, vector<128x128xf32>, vector<256x128xf32> -> vector<256x128xf32>
    %258 = arith.addf %230, %257 : vector<256x128xf32>
    %c1_i32_128 = arith.constant 1 : i32
    %259 = tpu.dynamic_rotate %192 by %c1_i32_128 dim 0 : vector<256x128xf32>, i32 -> vector<256x128xf32>
    %c16_i32_129 = arith.constant 16 : i32
    %c0_i32_130 = arith.constant 0 : i32
    %260 = arith.cmpi eq, %c16_i32_129, %c0_i32_130 : i32
    %c1_i32_131 = arith.constant 1 : i32
    %261 = arith.select %260, %c1_i32_131, %c16_i32_129 : i32
    %262 = vector.broadcast %261 : i32 to vector<256x128xi32>
    %263 = arith.remsi %194, %262 : vector<256x128xi32>
    %c0_i32_132 = arith.constant 0 : i32
    %264 = vector.broadcast %c0_i32_132 : i32 to vector<256x128xi32>
    %265 = arith.cmpi ne, %263, %264 : vector<256x128xi32>
    %c0_i32_133 = arith.constant 0 : i32
    %266 = vector.broadcast %c0_i32_133 : i32 to vector<256x128xi32>
    %267 = arith.cmpi slt, %263, %266 : vector<256x128xi32>
    %c0_i32_134 = arith.constant 0 : i32
    %268 = arith.cmpi slt, %261, %c0_i32_134 : i32
    %269 = vector.broadcast %268 : i1 to vector<256x128xi1>
    %270 = vector.broadcast %269 : vector<256x128xi1> to vector<256x128xi1>
    %271 = arith.xori %267, %270 : vector<256x128xi1>
    %272 = arith.andi %271, %265 : vector<256x128xi1>
    %273 = vector.broadcast %261 : i32 to vector<256x128xi32>
    %274 = arith.addi %263, %273 : vector<256x128xi32>
    %275 = arith.select %272, %274, %263 : vector<256x128xi1>, vector<256x128xi32>
    %c0_i32_135 = arith.constant 0 : i32
    %276 = vector.broadcast %c0_i32_135 : i32 to vector<256x128xi32>
    %277 = arith.cmpi eq, %275, %276 : vector<256x128xi32>
    %cst_136 = arith.constant 0.000000e+00 : f32
    %278 = vector.broadcast %cst_136 : f32 to vector<256x128xf32>
    %279 = arith.select %277, %278, %259 : vector<256x128xi1>, vector<256x128xf32>
    %c3_137 = arith.constant 3 : index
    %c0_138 = arith.constant 0 : index
    %c0_139 = arith.constant 0 : index
    %280 = vector.load %arg4[%c3_137, %c0_138, %c0_139] : memref<9x128x128xf32, #tpu.memory_space<vmem>>, vector<1x128x128xf32>
    %281 = vector.shape_cast %280 : vector<1x128x128xf32> to vector<128x128xf32>
    %cst_140 = arith.constant dense<0.000000e+00> : vector<256x128xf32>
    %282 = tpu.matmul %279, %281, %cst_140 {dimension_numbers = #tpu.dot_dimension_numbers<[1], [0], [0], [1], [0, 0, 1, 1], [], []>} : vector<256x128xf32>, vector<128x128xf32>, vector<256x128xf32> -> vector<256x128xf32>
    %283 = arith.addf %258, %282 : vector<256x128xf32>
    %c4_141 = arith.constant 4 : index
    %c0_142 = arith.constant 0 : index
    %c0_143 = arith.constant 0 : index
    %284 = vector.load %arg4[%c4_141, %c0_142, %c0_143] : memref<9x128x128xf32, #tpu.memory_space<vmem>>, vector<1x128x128xf32>
    %285 = vector.shape_cast %284 : vector<1x128x128xf32> to vector<128x128xf32>
    %cst_144 = arith.constant dense<0.000000e+00> : vector<256x128xf32>
    %286 = tpu.matmul %192, %285, %cst_144 {dimension_numbers = #tpu.dot_dimension_numbers<[1], [0], [0], [1], [0, 0, 1, 1], [], []>} : vector<256x128xf32>, vector<128x128xf32>, vector<256x128xf32> -> vector<256x128xf32>
    %287 = arith.addf %283, %286 : vector<256x128xf32>
    %c255_i32_145 = arith.constant 255 : i32
    %288 = tpu.dynamic_rotate %192 by %c255_i32_145 dim 0 : vector<256x128xf32>, i32 -> vector<256x128xf32>
    %c16_i32_146 = arith.constant 16 : i32
    %c0_i32_147 = arith.constant 0 : i32
    %289 = arith.cmpi eq, %c16_i32_146, %c0_i32_147 : i32
    %c1_i32_148 = arith.constant 1 : i32
    %290 = arith.select %289, %c1_i32_148, %c16_i32_146 : i32
    %291 = vector.broadcast %290 : i32 to vector<256x128xi32>
    %292 = arith.remsi %194, %291 : vector<256x128xi32>
    %c0_i32_149 = arith.constant 0 : i32
    %293 = vector.broadcast %c0_i32_149 : i32 to vector<256x128xi32>
    %294 = arith.cmpi ne, %292, %293 : vector<256x128xi32>
    %c0_i32_150 = arith.constant 0 : i32
    %295 = vector.broadcast %c0_i32_150 : i32 to vector<256x128xi32>
    %296 = arith.cmpi slt, %292, %295 : vector<256x128xi32>
    %c0_i32_151 = arith.constant 0 : i32
    %297 = arith.cmpi slt, %290, %c0_i32_151 : i32
    %298 = vector.broadcast %297 : i1 to vector<256x128xi1>
    %299 = vector.broadcast %298 : vector<256x128xi1> to vector<256x128xi1>
    %300 = arith.xori %296, %299 : vector<256x128xi1>
    %301 = arith.andi %300, %294 : vector<256x128xi1>
    %302 = vector.broadcast %290 : i32 to vector<256x128xi32>
    %303 = arith.addi %292, %302 : vector<256x128xi32>
    %304 = arith.select %301, %303, %292 : vector<256x128xi1>, vector<256x128xi32>
    %c15_i32_152 = arith.constant 15 : i32
    %305 = vector.broadcast %c15_i32_152 : i32 to vector<256x128xi32>
    %306 = arith.cmpi eq, %304, %305 : vector<256x128xi32>
    %cst_153 = arith.constant 0.000000e+00 : f32
    %307 = vector.broadcast %cst_153 : f32 to vector<256x128xf32>
    %308 = arith.select %306, %307, %288 : vector<256x128xi1>, vector<256x128xf32>
    %c5_154 = arith.constant 5 : index
    %c0_155 = arith.constant 0 : index
    %c0_156 = arith.constant 0 : index
    %309 = vector.load %arg4[%c5_154, %c0_155, %c0_156] : memref<9x128x128xf32, #tpu.memory_space<vmem>>, vector<1x128x128xf32>
    %310 = vector.shape_cast %309 : vector<1x128x128xf32> to vector<128x128xf32>
    %cst_157 = arith.constant dense<0.000000e+00> : vector<256x128xf32>
    %311 = tpu.matmul %308, %310, %cst_157 {dimension_numbers = #tpu.dot_dimension_numbers<[1], [0], [0], [1], [0, 0, 1, 1], [], []>} : vector<256x128xf32>, vector<128x128xf32>, vector<256x128xf32> -> vector<256x128xf32>
    %312 = arith.addf %287, %311 : vector<256x128xf32>
    %c241_i32_158 = arith.constant 241 : i32
    %313 = tpu.dynamic_rotate %192 by %c241_i32_158 dim 0 : vector<256x128xf32>, i32 -> vector<256x128xf32>
    %c240_i32_159 = arith.constant 240 : i32
    %314 = vector.broadcast %c240_i32_159 : i32 to vector<256x128xi32>
    %315 = arith.cmpi sge, %194, %314 : vector<256x128xi32>
    %c16_i32_160 = arith.constant 16 : i32
    %c0_i32_161 = arith.constant 0 : i32
    %316 = arith.cmpi eq, %c16_i32_160, %c0_i32_161 : i32
    %c1_i32_162 = arith.constant 1 : i32
    %317 = arith.select %316, %c1_i32_162, %c16_i32_160 : i32
    %318 = vector.broadcast %317 : i32 to vector<256x128xi32>
    %319 = arith.remsi %194, %318 : vector<256x128xi32>
    %c0_i32_163 = arith.constant 0 : i32
    %320 = vector.broadcast %c0_i32_163 : i32 to vector<256x128xi32>
    %321 = arith.cmpi ne, %319, %320 : vector<256x128xi32>
    %c0_i32_164 = arith.constant 0 : i32
    %322 = vector.broadcast %c0_i32_164 : i32 to vector<256x128xi32>
    %323 = arith.cmpi slt, %319, %322 : vector<256x128xi32>
    %c0_i32_165 = arith.constant 0 : i32
    %324 = arith.cmpi slt, %317, %c0_i32_165 : i32
    %325 = vector.broadcast %324 : i1 to vector<256x128xi1>
    %326 = vector.broadcast %325 : vector<256x128xi1> to vector<256x128xi1>
    %327 = arith.xori %323, %326 : vector<256x128xi1>
    %328 = arith.andi %327, %321 : vector<256x128xi1>
    %329 = vector.broadcast %317 : i32 to vector<256x128xi32>
    %330 = arith.addi %319, %329 : vector<256x128xi32>
    %331 = arith.select %328, %330, %319 : vector<256x128xi1>, vector<256x128xi32>
    %c0_i32_166 = arith.constant 0 : i32
    %332 = vector.broadcast %c0_i32_166 : i32 to vector<256x128xi32>
    %333 = arith.cmpi eq, %331, %332 : vector<256x128xi32>
    %334 = arith.ori %315, %333 : vector<256x128xi1>
    %cst_167 = arith.constant 0.000000e+00 : f32
    %335 = vector.broadcast %cst_167 : f32 to vector<256x128xf32>
    %336 = arith.select %334, %335, %313 : vector<256x128xi1>, vector<256x128xf32>
    %c6_168 = arith.constant 6 : index
    %c0_169 = arith.constant 0 : index
    %c0_170 = arith.constant 0 : index
    %337 = vector.load %arg4[%c6_168, %c0_169, %c0_170] : memref<9x128x128xf32, #tpu.memory_space<vmem>>, vector<1x128x128xf32>
    %338 = vector.shape_cast %337 : vector<1x128x128xf32> to vector<128x128xf32>
    %cst_171 = arith.constant dense<0.000000e+00> : vector<256x128xf32>
    %339 = tpu.matmul %336, %338, %cst_171 {dimension_numbers = #tpu.dot_dimension_numbers<[1], [0], [0], [1], [0, 0, 1, 1], [], []>} : vector<256x128xf32>, vector<128x128xf32>, vector<256x128xf32> -> vector<256x128xf32>
    %340 = arith.addf %312, %339 : vector<256x128xf32>
    %c240_i32_172 = arith.constant 240 : i32
    %341 = tpu.dynamic_rotate %192 by %c240_i32_172 dim 0 : vector<256x128xf32>, i32 -> vector<256x128xf32>
    %c240_i32_173 = arith.constant 240 : i32
    %342 = vector.broadcast %c240_i32_173 : i32 to vector<256x128xi32>
    %343 = arith.cmpi sge, %194, %342 : vector<256x128xi32>
    %cst_174 = arith.constant 0.000000e+00 : f32
    %344 = vector.broadcast %cst_174 : f32 to vector<256x128xf32>
    %345 = arith.select %343, %344, %341 : vector<256x128xi1>, vector<256x128xf32>
    %c7_175 = arith.constant 7 : index
    %c0_176 = arith.constant 0 : index
    %c0_177 = arith.constant 0 : index
    %346 = vector.load %arg4[%c7_175, %c0_176, %c0_177] : memref<9x128x128xf32, #tpu.memory_space<vmem>>, vector<1x128x128xf32>
    %347 = vector.shape_cast %346 : vector<1x128x128xf32> to vector<128x128xf32>
    %cst_178 = arith.constant dense<0.000000e+00> : vector<256x128xf32>
    %348 = tpu.matmul %345, %347, %cst_178 {dimension_numbers = #tpu.dot_dimension_numbers<[1], [0], [0], [1], [0, 0, 1, 1], [], []>} : vector<256x128xf32>, vector<128x128xf32>, vector<256x128xf32> -> vector<256x128xf32>
    %349 = arith.addf %340, %348 : vector<256x128xf32>
    %c239_i32_179 = arith.constant 239 : i32
    %350 = tpu.dynamic_rotate %192 by %c239_i32_179 dim 0 : vector<256x128xf32>, i32 -> vector<256x128xf32>
    %c240_i32_180 = arith.constant 240 : i32
    %351 = vector.broadcast %c240_i32_180 : i32 to vector<256x128xi32>
    %352 = arith.cmpi sge, %194, %351 : vector<256x128xi32>
    %c16_i32_181 = arith.constant 16 : i32
    %c0_i32_182 = arith.constant 0 : i32
    %353 = arith.cmpi eq, %c16_i32_181, %c0_i32_182 : i32
    %c1_i32_183 = arith.constant 1 : i32
    %354 = arith.select %353, %c1_i32_183, %c16_i32_181 : i32
    %355 = vector.broadcast %354 : i32 to vector<256x128xi32>
    %356 = arith.remsi %194, %355 : vector<256x128xi32>
    %c0_i32_184 = arith.constant 0 : i32
    %357 = vector.broadcast %c0_i32_184 : i32 to vector<256x128xi32>
    %358 = arith.cmpi ne, %356, %357 : vector<256x128xi32>
    %c0_i32_185 = arith.constant 0 : i32
    %359 = vector.broadcast %c0_i32_185 : i32 to vector<256x128xi32>
    %360 = arith.cmpi slt, %356, %359 : vector<256x128xi32>
    %c0_i32_186 = arith.constant 0 : i32
    %361 = arith.cmpi slt, %354, %c0_i32_186 : i32
    %362 = vector.broadcast %361 : i1 to vector<256x128xi1>
    %363 = vector.broadcast %362 : vector<256x128xi1> to vector<256x128xi1>
    %364 = arith.xori %360, %363 : vector<256x128xi1>
    %365 = arith.andi %364, %358 : vector<256x128xi1>
    %366 = vector.broadcast %354 : i32 to vector<256x128xi32>
    %367 = arith.addi %356, %366 : vector<256x128xi32>
    %368 = arith.select %365, %367, %356 : vector<256x128xi1>, vector<256x128xi32>
    %c15_i32_187 = arith.constant 15 : i32
    %369 = vector.broadcast %c15_i32_187 : i32 to vector<256x128xi32>
    %370 = arith.cmpi eq, %368, %369 : vector<256x128xi32>
    %371 = arith.ori %352, %370 : vector<256x128xi1>
    %cst_188 = arith.constant 0.000000e+00 : f32
    %372 = vector.broadcast %cst_188 : f32 to vector<256x128xf32>
    %373 = arith.select %371, %372, %350 : vector<256x128xi1>, vector<256x128xf32>
    %c8_189 = arith.constant 8 : index
    %c0_190 = arith.constant 0 : index
    %c0_191 = arith.constant 0 : index
    %374 = vector.load %arg4[%c8_189, %c0_190, %c0_191] : memref<9x128x128xf32, #tpu.memory_space<vmem>>, vector<1x128x128xf32>
    %375 = vector.shape_cast %374 : vector<1x128x128xf32> to vector<128x128xf32>
    %cst_192 = arith.constant dense<0.000000e+00> : vector<256x128xf32>
    %376 = tpu.matmul %373, %375, %cst_192 {dimension_numbers = #tpu.dot_dimension_numbers<[1], [0], [0], [1], [0, 0, 1, 1], [], []>} : vector<256x128xf32>, vector<128x128xf32>, vector<256x128xf32> -> vector<256x128xf32>
    %377 = arith.addf %349, %376 : vector<256x128xf32>
    %378 = vector.broadcast %193 : vector<1x128xf32> to vector<256x128xf32>
    %379 = arith.addf %377, %378 : vector<256x128xf32>
    %cst_193 = arith.constant 0.000000e+00 : f32
    %380 = vector.broadcast %cst_193 : f32 to vector<256x128xf32>
    %381 = arith.maximumf %379, %380 : vector<256x128xf32>
    %c0_194 = arith.constant 0 : index
    %c0_195 = arith.constant 0 : index
    %c0_196 = arith.constant 0 : index
    %382 = vector.load %arg6[%c0_194, %c0_195, %c0_196] : memref<1x256x128xf32, #tpu.memory_space<vmem>>, vector<1x256x128xf32>
    %383 = vector.shape_cast %382 : vector<1x256x128xf32> to vector<256x128xf32>
    %384 = vector.shape_cast %381 : vector<256x128xf32> to vector<1x256x128xf32>
    tpu.vector_store %arg6[%c0_194, %c0_195, %c0_196], %384 {strides = array<i32>} : memref<1x256x128xf32, #tpu.memory_space<vmem>>, vector<1x256x128xf32>,
    return
  }
  func.func @transform_0(%arg0: i32) -> (i32, i32, i32) {
    %c0_i32 = arith.constant 0 : i32
    %c0_i32_0 = arith.constant 0 : i32
    %c0_i32_1 = arith.constant 0 : i32
    return %arg0, %c0_i32, %c0_i32_0 : i32, i32, i32
  }
  func.func @transform_1(%arg0: i32) -> (i32, i32, i32) {
    %c0_i32 = arith.constant 0 : i32
    %c0_i32_0 = arith.constant 0 : i32
    %c0_i32_1 = arith.constant 0 : i32
    %c0_i32_2 = arith.constant 0 : i32
    return %c0_i32, %c0_i32_0, %c0_i32_1 : i32, i32, i32
  }
  func.func @transform_2(%arg0: i32) -> (i32, i32) {
    %c0_i32 = arith.constant 0 : i32
    %c0_i32_0 = arith.constant 0 : i32
    %c0_i32_1 = arith.constant 0 : i32
    return %c0_i32, %c0_i32_0 : i32, i32
  }
  func.func @transform_3(%arg0: i32) -> (i32, i32, i32) {
    %c0_i32 = arith.constant 0 : i32
    %c0_i32_0 = arith.constant 0 : i32
    %c0_i32_1 = arith.constant 0 : i32
    %c0_i32_2 = arith.constant 0 : i32
    return %c0_i32, %c0_i32_0, %c0_i32_1 : i32, i32, i32
  }
  func.func @transform_4(%arg0: i32) -> (i32, i32) {
    %c0_i32 = arith.constant 0 : i32
    %c0_i32_0 = arith.constant 0 : i32
    %c0_i32_1 = arith.constant 0 : i32
    return %c0_i32, %c0_i32_0 : i32, i32
  }
  func.func @transform_5(%arg0: i32) -> (i32, i32, i32) {
    %c0_i32 = arith.constant 0 : i32
    %c0_i32_0 = arith.constant 0 : i32
    %c0_i32_1 = arith.constant 0 : i32
    return %arg0, %c0_i32, %c0_i32_0 : i32, i32, i32
  }
}

</mosaic_0001>

<bundles_post_ra>
// kernel: double_conv_forward.1
= control target key start
LH: loop header
LB: loop body
LE: loop exit
PB: predicated region body
PF: predicated region fallthrough
CT: control target
= control target key end

     0   :  { %s9850_s18 = smov 0   ;;  %s13954_s0 = inlined_call_operand.vmem [shape: f32[2,256,128], index: 0, kind: input, shape index: {}]   ;;  %s13955_s1 = inlined_call_operand.vmem [shape: f32[9,128,128], index: 1, kind: input, shape index: {}]   ;;  %s13956_s2 = inlined_call_operand.vmem [shape: f32[1,128], index: 2, kind: input, shape index: {}]   ;;  %s13957_s3 = inlined_call_operand.vmem [shape: f32[9,128,128], index: 3, kind: input, shape index: {}]   ;;  %s13958_s4 = inlined_call_operand.vmem [shape: f32[1,128], index: 4, kind: input, shape index: {}]   ;;  %s13959_s5 = inlined_call_operand.vmem [shape: f32[2,256,128], index: 5, kind: output, shape index: {}]  }
   0x1 LB: > { %s6795_s19 = sadd.s32 4294967295, %s9817_s18   ;;  %p6799_p0 = scmp.ge.s32.totalorder %s9817_s18, 1  ;;  %s9817_s18 = sphi %s9850_s18, %s15_s18  }
   0x2   : > { %p187_p1 = scmp.lt.s32.totalorder %s9817_s18, 3 }
   0x4   : > { %p188_p2 = pnand %p6799_p0, %p187_p1 }
   0x6   : > { %191 = sbr.rel (%p188_p2) target bundleno = 1017 (0x3f9), region = 40 }
   0xb   : > { %v6819_v0 = vld [vmem:[%s13955_s1 + $0xf8] sm:$0xff]  ;;  %v6818_v2 = vld [vmem:[%s13955_s1 + $0xf0] sm:$0xff]  ;;  %v6817_v4 = vld [vmem:[%s13955_s1 + $0xe8] sm:$0xff]  ;;  %p215_p3 = scmp.lt.s32.totalorder %s6795_s19, 1  ;;  %v258_v20 = vlaneseq  ;;  %v13961_v44 = vmov 0.0   ;;  %v14273_v49 = vmov 0 }
   0xc   : > { %v883_v1 = vld [vmem:[%s13955_s1 + $0x78] sm:$0xff]  ;;  %8330 = vmatprep.subr.mxu0 %v6819_v0  ;;  %v882_v3 = vld [vmem:[%s13955_s1 + $0x70] sm:$0xff]  ;;  %v881_v5 = vld [vmem:[%s13955_s1 + $0x68] sm:$0xff]  ;;  %8362 = vmatprep.mubr.f32.mxu0 %v13961_v44  ;;  %v14277_v62 = vmov 0 }
   0xd   : > { %8410 = vmatprep.subr.mxu1 %v883_v1  ;;  %8331 = vmatpush3.msra.mxu0 %v6819_v0  ;;  %v6816_v6 = vld [vmem:[%s13955_s1 + $0xe0] sm:$0xff]  ;;  %v6815_v8 = vld [vmem:[%s13955_s1 + $0xd8] sm:$0xff]  ;;  %v6814_v10 = vld [vmem:[%s13955_s1 + $0xd0] sm:$0xff]  ;;  %s15123_s19 = smov (!%p215_p3, %s6795_s19), 1  ;;  %v9937_v25 = vshrl.u32 %v258_v20, 7 }
   0xe   : > { %8411 = vmatpush3.msra.mxu1 %v883_v1  ;;  %8332 = vmatprep.subr.mxu0 %v6818_v2  ;;  %v880_v7 = vld [vmem:[%s13955_s1 + $0x60] sm:$0xff]  ;;  %v879_v9 = vld [vmem:[%s13955_s1 + $0x58] sm:$0xff]  ;;  %v878_v11 = vld [vmem:[%s13955_s1 + $0x50] sm:$0xff]  ;;  %s7432_s22 = sshll.u32 %s15123_s19, 8 }
   0xf   : > { %8412 = vmatprep.subr.mxu1 %v882_v3  ;;  %8333 = vmatpush3.msra.mxu0 %v6818_v2  ;;  %v6813_v12 = vld [vmem:[%s13955_s1 + $0xc8] sm:$0xff]  ;;  %v6812_v14 = vld [vmem:[%s13955_s1 + $0xc0] sm:$0xff]  ;;  %v6811_v16 = vld [vmem:[%s13955_s1 + $0xb8] sm:$0xff]  ;;  %14270 = vst [vmem:[#allocation3_spill] sm:$0xff] %v9937_v25  ;;  %s9950_s29 = scalar_lea.vmem %s13954_s0, %s7432_s22  ;;  %v261_v31 = vadd.s32 16, %v9937_v25  ;;  %v263_v41 = vadd.s32 32, %v9937_v25  ;;  %s13809_s21 = scalar_lea.vmem %s13959_s5, %s7432_s22 }
  0x10   : > { %8413 = vmatpush3.msra.mxu1 %v882_v3  ;;  %8334 = vmatprep.subr.mxu0 %v6817_v4  ;;  %v877_v13 = vld [vmem:[%s13955_s1 + $0x48] sm:$0xff]  ;;  %v876_v15 = vld [vmem:[%s13955_s1 + $0x40] sm:$0xff]  ;;  %v875_v17 = vld [vmem:[%s13955_s1 + $0x38] sm:$0xff]  ;;  %vm14008_vm0 = vcmp.lt.s32.totalorder %v9937_v25, 1  ;;  %v265_v47 = vadd.s32 48, %v9937_v25  ;;  %v267_v60 = vadd.s32 64, %v9937_v25 }
  0x11   : > { %8414 = vmatprep.subr.mxu1 %v881_v5  ;;  %8335 = vmatpush3.msra.mxu0 %v6817_v4  ;;  %v6810_v18 = vld [vmem:[%s13955_s1 + $0xb0] sm:$0xff]  ;;  %v6809_v21 = vld [vmem:[%s13955_s1 + $0xa8] sm:$0xff]  ;;  %v6808_v23 = vld [vmem:[%s13955_s1 + $0xa0] sm:$0xff]  ;;  %v406_v40 = vand.u32 15, %v261_v31  ;;  %v420_v51 = vand.u32 15, %v263_v41  ;;  %v269_v3 = vadd.s32 80, %v9937_v25 }
  0x12   : > { %8415 = vmatpush3.msra.mxu1 %v881_v5  ;;  %8336 = vmatprep.subr.mxu0 %v6816_v6  ;;  %v874_v19 = vld [vmem:[%s13955_s1 + $0x30] sm:$0xff]  ;;  %v873_v22 = vld [vmem:[%s13955_s1 + $0x28] sm:$0xff]  ;;  %v872_v24 = vld [vmem:[%s13955_s1 + $0x20] sm:$0xff]  ;;  %v434_v58 = vand.u32 15, %v265_v47  ;;  %v14282_v5 = vmov 0  ;;  %v273_v31 = vadd.s32 112, %v9937_v25 }
  0x13   : > { %8416 = vmatprep.subr.mxu1 %v880_v7  ;;  %8337 = vmatpush3.msra.mxu0 %v6816_v6  ;;  %v6807_v26 = vld [vmem:[%s13955_s1 + $0x98] sm:$0xff]  ;;  %v6806_v28 = vld [vmem:[%s13955_s1 + $0x90] sm:$0xff]  ;;  %v6805_v30 = vld [vmem:[%s13955_s1 + $0x88] sm:$0xff]  ;;  %vm10003_vm1 = vcmp.ne.s32.totalorder %v406_v40, 0  ;;  %vm10037_vm2 = vcmp.ne.s32.totalorder %v420_v51, 0  ;;  %v14296_v40 = vmov 0 }
  0x14   : > { %8417 = vmatpush3.msra.mxu1 %v880_v7  ;;  %8338 = vmatprep.subr.mxu0 %v6815_v8  ;;  %v871_v27 = vld [vmem:[%s13955_s1 + $0x18] sm:$0xff]  ;;  %v870_v29 = vld [vmem:[%s13955_s1 + $0x10] sm:$0xff]  ;;  %v869_v32 = vld [vmem:[%s13955_s1 + $0x8] sm:$0xff]  ;;  %v14274_v49 = vsel %vm10003_vm1, 4294967295, %v14273_v49  ;;  %v14278_v62 = vsel %vm10037_vm2, 4294967295, %v14277_v62  ;;  %vm10063_vm3 = vcmp.ne.s32.totalorder %v434_v58, 0 }
  0x15   : > { %8418 = vmatprep.subr.mxu1 %v879_v9  ;;  %8339 = vmatpush3.msra.mxu0 %v6815_v8  ;;  %v9966_v33 = vld [vmem:[%s9950_s29] sm:$0xff]  ;;  %v9969_v34 = vld [vmem:[%s9950_s29 + $0xf8] sm:$0xff]  ;;  %v9978_v37 = vld [vmem:[%s9950_s29 + $0x8] sm:$0xff]  ;;  %14275 = vst [vmem:[#allocation6_spill] sm:$0xff] %v14274_v49  ;;  %v14283_v5 = vsel %vm10063_vm3, 4294967295, %v14282_v5  ;;  %v448_v7 = vand.u32 15, %v267_v60 }
  0x16   : > { %8419 = vmatpush3.msra.mxu1 %v879_v9  ;;  %8340 = vmatprep.subr.mxu0 %v6814_v10  ;;  %14271 = vst [vmem:[#allocation4_spill] sm:$0xff] %v9966_v33  ;;  %14272 = vst [vmem:[#allocation5_spill] sm:$0xff] %v9969_v34  ;;  %v6804_v35 = vld [vmem:[%s13955_s1 + $0x80] sm:$0xff]  ;;  %v291_v38 = vrot.slane %v9966_v33, 7  ;;  %v13960_v39 = vrot.slane %v9969_v34, 7  ;;  %v9985_v42 = vld [vmem:[%s9950_s29 + $0x10] sm:$0xff] }
  0x17   : > { %8420 = vmatprep.subr.mxu1 %v878_v11  ;;  %8341 = vmatpush3.msra.mxu0 %v6814_v10  ;;  %v868_v36 = vld [vmem:[%s13955_s1] sm:$0xff]  ;;  %v292_v43 = vrot.slane %v9978_v37, 7  ;;  %v6865_v45 = vld [vmem:[%s13955_s1 + $0x178] sm:$0xff]  ;;  %v293_v50 = vrot.slane %v9985_v42, 7  ;;  %v6864_v53 = vld [vmem:[%s13955_s1 + $0x170] sm:$0xff]  ;;  %14279 = vst [vmem:[#allocation8_spill] sm:$0xff] %v14278_v62 }
  0x18   : > { %8421 = vmatpush3.msra.mxu1 %v878_v11  ;;  %8342 = vmatprep.subr.mxu0 %v6813_v12  ;;  %v9993_v46 = vld [vmem:[%s9950_s29 + $0x18] sm:$0xff]  ;;  %v10001_v48 = vsel %vm14008_vm0, %v13960_v39, %v291_v38  ;;  %v10009_v52 = vld [vmem:[%s9950_s29 + $0x20] sm:$0xff]  ;;  %v10030_v59 = vld [vmem:[%s9950_s29 + $0x28] sm:$0xff]  ;;  %14284 = vst [vmem:[#allocation11_spill] sm:$0xff] %v14283_v5  ;;  %vm10096_vm4 = vcmp.ne.s32.totalorder %v448_v7, 0  ;;  %v490_v47 = vand.u32 15, %v273_v31 }
  0x19   : > { %8422 = vmatprep.subr.mxu1 %v877_v13  ;;  %8343 = vmatpush3.msra.mxu0 %v6813_v12  ;;  %v6911_v54 = vld [vmem:[%s13955_s1 + $0x1f8] sm:$0xff]  ;;  %v10022_v55 = vsel %vm14008_vm0, %v291_v38, %v292_v43  ;;  %v294_v56 = vrot.slane %v9993_v46, 7  ;;  %v295_v57 = vrot.slane %v10009_v52, 7  ;;  %v10035_v61 = vsel %vm14008_vm0, %v292_v43, %v293_v50  ;;  %v6863_v63 = vld [vmem:[%s13955_s1 + $0x168] sm:$0xff]  ;;  %v10045_v0 = vld [vmem:[%s9950_s29 + $0x30] sm:$0xff] }
  0x1a   : > { %8423 = vmatpush3.msra.mxu1 %v877_v13  ;;  %8344 = vmatprep.subr.mxu0 %v6812_v14  ;;  %14276 = vst [vmem:[#allocation7_spill] sm:$0xff] %v10035_v61  ;;  %v296_v2 = vrot.slane %v10030_v59, 7  ;;  %v297_v6 = vrot.slane %v10045_v0, 7  ;;  %v10069_v8 = vld [vmem:[%s9950_s29 + $0x38] sm:$0xff]  ;;  %v6862_v9 = vld [vmem:[%s13955_s1 + $0x160] sm:$0xff]  ;;  %v6910_v11 = vld [vmem:[%s13955_s1 + $0x1f0] sm:$0xff] }
  0x1b   : > { %8424 = vmatprep.subr.mxu1 %v876_v15  ;;  %8345 = vmatpush3.msra.mxu0 %v6812_v14  ;;  %v10052_v1 = vsel %vm14008_vm0, %v293_v50, %v294_v56  ;;  %v10061_v4 = vsel %vm14008_vm0, %v294_v56, %v295_v57  ;;  %v10075_v10 = vld [vmem:[%s9950_s29 + $0x40] sm:$0xff]  ;;  %v298_v13 = vrot.slane %v10069_v8, 7  ;;  %v271_v14 = vadd.s32 96, %v9937_v25  ;;  %v6861_v20 = vld [vmem:[%s13955_s1 + $0x158] sm:$0xff]  ;;  %v10167_v50 = vld [vmem:[%s9950_s29 + $0x68] sm:$0xff] }
  0x1c   : > { %8425 = vmatpush3.msra.mxu1 %v876_v15  ;;  %8346 = vmatprep.subr.mxu0 %v6811_v16  ;;  %14280 = vst [vmem:[#allocation9_spill] sm:$0xff] %v10052_v1  ;;  %14281 = vst [vmem:[#allocation10_spill] sm:$0xff] %v10061_v4  ;;  %v10088_v12 = vsel %vm14008_vm0, %v295_v57, %v296_v2  ;;  %v10094_v15 = vsel %vm14008_vm0, %v296_v2, %v297_v6  ;;  %v275_v51 = vadd.s32 128, %v9937_v25  ;;  %v6907_v56 = vld [vmem:[%s13955_s1 + $0x1d8] sm:$0xff]  ;;  %v14302_v2 = vmov 0  ;;  %v10237_v31 = vld [vmem:[%s9950_s29 + $0x90] sm:$0xff] }
  0x1d   : > { %8426 = vmatprep.subr.mxu1 %v875_v17  ;;  %8347 = vmatpush3.msra.mxu0 %v6811_v16  ;;  %14285 = vst [vmem:[#allocation12_spill] sm:$0xff] %v10088_v12  ;;  %14286 = vst [vmem:[#allocation13_spill] sm:$0xff] %v10094_v15  ;;  %v14287_v16 = vmov 0  ;;  %v304_v58 = vrot.slane %v10167_v50, 7  ;;  %v277_v60 = vadd.s32 144, %v9937_v25  ;;  %vm10195_vm7 = vcmp.ne.s32.totalorder %v490_v47, 0 }
  0x1e   : > { %8427 = vmatpush3.msra.mxu1 %v875_v17  ;;  %8348 = vmatprep.subr.mxu0 %v6810_v18  ;;  %v14288_v16 = vsel %vm10096_vm4, 4294967295, %v14287_v16  ;;  %v299_v17 = vrot.slane %v10075_v10, 7  ;;  %v14303_v2 = vsel %vm10195_vm7, 4294967295, %v14302_v2  ;;  %v10201_v7 = vld [vmem:[%s9950_s29 + $0x78] sm:$0xff]  ;;  %v309_v47 = vrot.slane %v10237_v31, 7  ;;  %v10299_v39 = vld [vmem:[%s9950_s29 + $0xa8] sm:$0xff] }
  0x1f   : > { %8428 = vmatprep.subr.mxu1 %v874_v19  ;;  %8349 = vmatpush3.msra.mxu0 %v6810_v18  ;;  %14289 = vst [vmem:[#allocation14_spill] sm:$0xff] %v14288_v16  ;;  %v462_v18 = vand.u32 15, %v269_v3  ;;  %14304 = vst [vmem:[#allocation23_spill] sm:$0xff] %v14303_v2  ;;  %v1396_v16 = vrot.slane %v10167_v50, 1  ;;  %v280_v2 = vadd.s32 168, %v9937_v25 }
  0x20   : > { %8429 = vmatpush3.msra.mxu1 %v874_v19  ;;  %8350 = vmatprep.subr.mxu0 %v6809_v21  ;;  %v10102_v19 = vld [vmem:[%s9950_s29 + $0x48] sm:$0xff]  ;;  %14321 = vst [vmem:[#allocation34_spill] sm:$0xff] %v10299_v39 }
  0x21   : > { %8430 = vmatprep.subr.mxu1 %v873_v22  ;;  %8351 = vmatpush3.msra.mxu0 %v6809_v21  ;;  %v10108_v21 = vld [vmem:[%s9950_s29 + $0x50] sm:$0xff]  ;;  %vm10128_vm5 = vcmp.ne.s32.totalorder %v462_v18, 0  ;;  %v279_v18 = vadd.s32 160, %v9937_v25  ;;  %v1392_v62 = vrot.slane %v10102_v19, 1 }
  0x22   : > { %8431 = vmatpush3.msra.mxu1 %v873_v22  ;;  %8352 = vmatprep.subr.mxu0 %v6808_v23  ;;  %v6909_v22 = vld [vmem:[%s13955_s1 + $0x1e8] sm:$0xff] }
  0x23   : > { %8432 = vmatprep.subr.mxu1 %v872_v24  ;;  %8353 = vmatpush3.msra.mxu0 %v6808_v23  ;;  %v10121_v23 = vsel %vm14008_vm0, %v297_v6, %v298_v13  ;;  %v504_v6 = vand.u32 15, %v275_v51 }
  0x24   : > { %8433 = vmatpush3.msra.mxu1 %v872_v24  ;;  %8354 = vmatprep.subr.mxu0 %v6807_v26  ;;  %14290 = vst [vmem:[#allocation15_spill] sm:$0xff] %v10121_v23  ;;  %v300_v24 = vrot.slane %v10102_v19, 7 }
  0x25   : > { %8434 = vmatprep.subr.mxu1 %v871_v27  ;;  %8355 = vmatpush3.msra.mxu0 %v6807_v26  ;;  %v476_v26 = vand.u32 15, %v271_v14  ;;  %vm10228_vm8 = vcmp.ne.s32.totalorder %v504_v6, 0  ;;  %v10273_v6 = vld [vmem:[%s9950_s29 + $0xa0] sm:$0xff] }
  0x26   : > { %8435 = vmatpush3.msra.mxu1 %v871_v27  ;;  %8356 = vmatprep.subr.mxu0 %v6806_v28  ;;  %v10126_v27 = vsel %vm14008_vm0, %v298_v13, %v299_v17  ;;  %v10154_v38 = vsel %vm14008_vm0, %v299_v17, %v300_v24  ;;  %v6906_v13 = vld [vmem:[%s13955_s1 + $0x1d0] sm:$0xff]  ;;  %v306_v17 = vrot.slane %v10201_v7, 7  ;;  %14315 = vst [vmem:[#allocation30_spill] sm:$0xff] %v10273_v6 }
  0x27   : > { %8436 = vmatprep.subr.mxu1 %v870_v29  ;;  %8357 = vmatpush3.msra.mxu0 %v6806_v28  ;;  %14291 = vst [vmem:[#allocation16_spill] sm:$0xff] %v10126_v27  ;;  %v14292_v28 = vmov 0  ;;  %14295 = vst [vmem:[#allocation18_spill] sm:$0xff] %v10154_v38  ;;  %vm10156_vm6 = vcmp.ne.s32.totalorder %v476_v26, 0  ;;  %v518_v26 = vand.u32 15, %v277_v60  ;;  %v281_v60 = vadd.s32 176, %v9937_v25 }
  0x28   : > { %8437 = vmatpush3.msra.mxu1 %v870_v29  ;;  %8358 = vmatprep.subr.mxu0 %v6805_v30  ;;  %v14293_v28 = vsel %vm10128_vm5, 4294967295, %v14292_v28  ;;  %v301_v29 = vrot.slane %v10108_v21, 7  ;;  %v14297_v40 = vsel %vm10156_vm6, 4294967295, %v14296_v40 }
  0x29   : > { %8438 = vmatprep.subr.mxu1 %v869_v32  ;;  %8359 = vmatpush3.msra.mxu0 %v6805_v30  ;;  %14294 = vst [vmem:[#allocation17_spill] sm:$0xff] %v14293_v28  ;;  %v10134_v30 = vld [vmem:[%s9950_s29 + $0x58] sm:$0xff]  ;;  %14298 = vst [vmem:[#allocation19_spill] sm:$0xff] %v14297_v40  ;;  %vm10261_vm9 = vcmp.ne.s32.totalorder %v518_v26, 0  ;;  %v14318_v26 = vmov 0  ;;  %v1398_v28 = vrot.slane %v10201_v7, 1 }
  0x2a   : > { %8439 = vmatpush3.msra.mxu1 %v869_v32  ;;  %8360 = vmatprep.subr.mxu0 %v6804_v35  ;;  %v6860_v32 = vld [vmem:[%s13955_s1 + $0x150] sm:$0xff]  ;;  %v302_v41 = vrot.slane %v10134_v30, 7  ;;  %v10163_v43 = vsel %vm14008_vm0, %v300_v24, %v301_v29  ;;  %v1394_v5 = vrot.slane %v10134_v30, 1 }
  0x2b   : > { %8440 = vmatprep.subr.mxu1 %v868_v36  ;;  %8361 = vmatpush3.msra.mxu0 %v6804_v35  ;;  %v10141_v35 = vld [vmem:[%s9950_s29 + $0x60] sm:$0xff]  ;;  %14299 = vst [vmem:[#allocation20_spill] sm:$0xff] %v10163_v43 }
  0x2c   : > { %8441 = vmatpush3.msra.mxu1 %v868_v36  ;;  %8442 = vmatprep.mubr.f32.mxu1 %v13961_v44  ;;  %v6908_v36 = vld [vmem:[%s13955_s1 + $0x1e0] sm:$0xff]  ;;  %v10187_v57 = vsel %vm14008_vm0, %v301_v29, %v302_v41  ;;  %v10234_v29 = vld [vmem:[%s9950_s29 + $0x88] sm:$0xff] }
  0x2d   : > { %8363 = vmatmul.mubr.f32.vlgmr.msra.gmra.mxu0 %v13961_v44  ;;  %8443 = vmatmul.mubr.f32.vlgmr.msra.gmra.mxu1 %v13961_v44  ;;  %14300 = vst [vmem:[#allocation21_spill] sm:$0xff] %v10187_v57  ;;  %v10302_v44 = vld [vmem:[%s9950_s29 + $0xb0] sm:$0xff]  ;;  %v1400_v40 = vrot.slane %v10234_v29, 1 }
  0x2e   : > { %8490 = vmatprep.subr.mxu0 %v6865_v45  ;;  %8365 = vmatprep.mubr.f32.mxu0 %v9966_v33  ;;  %14322 = vst [vmem:[#allocation35_spill] sm:$0xff] %v10302_v44 }
  0x2f   : > { %8491 = vmatpush3.msra.mxu0 %v6865_v45  ;;  %8445 = vmatprep.mubr.msk.f32.mxu1 %vm10003_vm1, %v10001_v48  ;;  %v303_v45 = vrot.slane %v10141_v35, 7 }
  0x30   : > { %8492 = vmatprep.subr.mxu0 %v6864_v53  ;;  %8570 = vmatprep.subr.mxu1 %v6911_v54 }
  0x31   : > { %8366 = vmatmul.mubr.f32.gmra.mxu0 %v9978_v37  ;;  %8446 = vmatmul.mubr.f32.gmra.mxu1 %v10022_v55  ;;  %v10220_v14 = vsel %vm14008_vm0, %v303_v45, %v304_v58 }
  0x32   : > { %8493 = vmatpush3.msra.mxu0 %v6864_v53  ;;  %8368 = vmatprep.mubr.f32.mxu0 %v9985_v42  ;;  %v6859_v53 = vld [vmem:[%s13955_s1 + $0x148] sm:$0xff]  ;;  %14305 = vst [vmem:[#allocation24_spill] sm:$0xff] %v10220_v14 }
  0x33   : > { %8448 = vmatprep.mubr.msk.f32.mxu1 %vm10037_vm2, %v10035_v61  ;;  %8494 = vmatprep.subr.mxu0 %v6863_v63 }
  0x34   : > { %8495 = vmatpush3.msra.mxu0 %v6863_v63  ;;  %8571 = vmatpush3.msra.mxu1 %v6911_v54  ;;  %v10174_v54 = vld [vmem:[%s9950_s29 + $0x70] sm:$0xff]  ;;  %v10193_v63 = vsel %vm14008_vm0, %v302_v41, %v303_v45  ;;  %v308_v45 = vrot.slane %v10234_v29, 7 }
  0x35   : > { %8369 = vmatmul.mubr.f32.gmra.mxu0 %v9993_v46  ;;  %8449 = vmatmul.mubr.f32.gmra.mxu1 %v10052_v1  ;;  %14301 = vst [vmem:[#allocation22_spill] sm:$0xff] %v10193_v63  ;;  %v305_v3 = vrot.slane %v10174_v54, 7 }
  0x36   : > { %8371 = vmatprep.mubr.f32.mxu0 %v10009_v52  ;;  %8451 = vmatprep.mubr.msk.f32.mxu1 %vm10063_vm3, %v10061_v4 }
  0x37   : > { %8496 = vmatprep.subr.mxu0 %v6862_v9  ;;  %8572 = vmatprep.subr.mxu1 %v6910_v11  ;;  %v10253_v41 = vsel %vm14008_vm0, %v305_v3, %v306_v17 }
  0x38   : > { %8497 = vmatpush3.msra.mxu0 %v6862_v9  ;;  %8573 = vmatpush3.msra.mxu1 %v6910_v11  ;;  %v6858_v9 = vld [vmem:[%s13955_s1 + $0x140] sm:$0xff]  ;;  %14310 = vst [vmem:[#allocation27_spill] sm:$0xff] %v10253_v41 }
  0x39   : > { %8372 = vmatmul.mubr.f32.gmra.mxu0 %v10030_v59  ;;  %8452 = vmatmul.mubr.f32.gmra.mxu1 %v10088_v12  ;;  %v10207_v11 = vld [vmem:[%s9950_s29 + $0x80] sm:$0xff] }
  0x3a   : > { %8374 = vmatprep.mubr.f32.mxu0 %v10045_v0  ;;  %8454 = vmatprep.mubr.msk.f32.mxu1 %vm10096_vm4, %v10094_v15  ;;  %v307_v24 = vrot.slane %v10207_v11, 7 }
  0x3b   : > { %8498 = vmatprep.subr.mxu0 %v6861_v20  ;;  %8574 = vmatprep.subr.mxu1 %v6909_v22 }
  0x3c   : > { %8499 = vmatpush3.msra.mxu0 %v6861_v20  ;;  %8575 = vmatpush3.msra.mxu1 %v6909_v22  ;;  %v10226_v20 = vsel %vm14008_vm0, %v304_v58, %v305_v3  ;;  %v14307_v22 = vmov 0  ;;  %v10259_v51 = vsel %vm14008_vm0, %v306_v17, %v307_v24  ;;  %v10266_v58 = vld [vmem:[%s9950_s29 + $0x98] sm:$0xff]  ;;  %v6856_v3 = vld [vmem:[%s13955_s1 + $0x130] sm:$0xff]  ;;  %v10290_v17 = vsel %vm14008_vm0, %v308_v45, %v309_v47 }
  0x3d   : > { %8375 = vmatmul.mubr.f32.gmra.mxu0 %v10069_v8  ;;  %8455 = vmatmul.mubr.f32.gmra.mxu1 %v10121_v23  ;;  %14306 = vst [vmem:[#allocation25_spill] sm:$0xff] %v10226_v20  ;;  %v14308_v22 = vsel %vm10228_vm8, 4294967295, %v14307_v22  ;;  %14311 = vst [vmem:[#allocation28_spill] sm:$0xff] %v10259_v51 }
  0x3e   : > { %8377 = vmatprep.mubr.f32.mxu0 %v10075_v10  ;;  %8457 = vmatprep.mubr.msk.f32.mxu1 %vm10128_vm5, %v10126_v27  ;;  %14309 = vst [vmem:[#allocation26_spill] sm:$0xff] %v14308_v22  ;;  %14317 = vst [vmem:[#allocation32_spill] sm:$0xff] %v10290_v17  ;;  %v6854_v22 = vld [vmem:[%s13955_s1 + $0x120] sm:$0xff] }
  0x3f   : > { %8500 = vmatprep.subr.mxu0 %v6860_v32  ;;  %8576 = vmatprep.subr.mxu1 %v6908_v36 }
  0x40   : > { %8501 = vmatpush3.msra.mxu0 %v6860_v32  ;;  %8577 = vmatpush3.msra.mxu1 %v6908_v36  ;;  %v6857_v32 = vld [vmem:[%s13955_s1 + $0x138] sm:$0xff]  ;;  %v6905_v36 = vld [vmem:[%s13955_s1 + $0x1c8] sm:$0xff] }
  0x41   : > { %8378 = vmatmul.mubr.f32.gmra.mxu0 %v10102_v19  ;;  %8458 = vmatmul.mubr.f32.gmra.mxu1 %v10154_v38 }
  0x42   : > { %8380 = vmatprep.mubr.f32.mxu0 %v10108_v21  ;;  %8460 = vmatprep.mubr.msk.f32.mxu1 %vm10156_vm6, %v10163_v43 }
  0x43   : > { %8502 = vmatprep.subr.mxu0 %v6859_v53  ;;  %8578 = vmatprep.subr.mxu1 %v6907_v56 }
  0x44   : > { %8503 = vmatpush3.msra.mxu0 %v6859_v53  ;;  %8579 = vmatpush3.msra.mxu1 %v6907_v56  ;;  %v14312_v53 = vmov 0  ;;  %v532_v56 = vand.u32 15, %v279_v18  ;;  %v310_v18 = vrot.slane %v10266_v58, 7 }
  0x45   : > { %8381 = vmatmul.mubr.f32.gmra.mxu0 %v10134_v30  ;;  %8461 = vmatmul.mubr.f32.gmra.mxu1 %v10187_v57  ;;  %v14313_v53 = vsel %vm10261_vm9, 4294967295, %v14312_v53 }
  0x46   : > { %8383 = vmatprep.mubr.f32.mxu0 %v10141_v35  ;;  %8463 = vmatprep.mubr.msk.f32.mxu1 %vm10195_vm7, %v10193_v63  ;;  %14314 = vst [vmem:[#allocation29_spill] sm:$0xff] %v14313_v53  ;;  %vm10293_vm10 = vcmp.ne.s32.totalorder %v532_v56, 0  ;;  %v6903_v56 = vld [vmem:[%s13955_s1 + $0x1b8] sm:$0xff]  ;;  %v14325_v53 = vmov 0 }
  0x47   : > { %8504 = vmatprep.subr.mxu0 %v6858_v9  ;;  %8580 = vmatprep.subr.mxu1 %v6906_v13  ;;  %v14319_v26 = vsel %vm10293_vm10, 4294967295, %v14318_v26 }
  0x48   : > { %8505 = vmatpush3.msra.mxu0 %v6858_v9  ;;  %8581 = vmatpush3.msra.mxu1 %v6906_v13  ;;  %v6904_v9 = vld [vmem:[%s13955_s1 + $0x1c0] sm:$0xff]  ;;  %v10286_v13 = vsel %vm14008_vm0, %v307_v24, %v308_v45  ;;  %14320 = vst [vmem:[#allocation33_spill] sm:$0xff] %v14319_v26  ;;  %v283_v24 = vadd.s32 192, %v9937_v25  ;;  %v6855_v45 = vld [vmem:[%s13955_s1 + $0x128] sm:$0xff]  ;;  %v10332_v26 = vld [vmem:[%s9950_s29 + $0xb8] sm:$0xff] }
  0x49   : > { %8384 = vmatmul.mubr.f32.gmra.mxu0 %v10167_v50  ;;  %8464 = vmatmul.mubr.f32.gmra.mxu1 %v10220_v14  ;;  %14316 = vst [vmem:[#allocation31_spill] sm:$0xff] %v10286_v13  ;;  %14328 = vst [vmem:[#allocation39_spill] sm:$0xff] %v10332_v26  ;;  %v14376_v50 = vmov 0 }
  0x4a   : > { %8386 = vmatprep.mubr.f32.mxu0 %v10174_v54  ;;  %8466 = vmatprep.mubr.msk.f32.mxu1 %vm10228_vm8, %v10226_v20 }
  0x4b   : > { %8506 = vmatprep.subr.mxu0 %v6857_v32  ;;  %8582 = vmatprep.subr.mxu1 %v6905_v36 }
  0x4c   : > { %8507 = vmatpush3.msra.mxu0 %v6857_v32  ;;  %8583 = vmatpush3.msra.mxu1 %v6905_v36  ;;  %v311_v32 = vrot.slane %v10273_v6, 7  ;;  %v546_v36 = vand.u32 15, %v281_v60  ;;  %v10319_v60 = vsel %vm14008_vm0, %v309_v47, %v310_v18  ;;  %v285_v47 = vadd.s32 208, %v9937_v25 }
  0x4d   : > { %8387 = vmatmul.mubr.f32.gmra.mxu0 %v10201_v7  ;;  %8467 = vmatmul.mubr.f32.gmra.mxu1 %v10253_v41  ;;  %14323 = vst [vmem:[#allocation36_spill] sm:$0xff] %v10319_v60 }
  0x4e   : > { %8389 = vmatprep.mubr.f32.mxu0 %v10207_v11  ;;  %8469 = vmatprep.mubr.msk.f32.mxu1 %vm10261_vm9, %v10259_v51  ;;  %v10325_v34 = vsel %vm14008_vm0, %v310_v18, %v311_v32  ;;  %vm10327_vm11 = vcmp.ne.s32.totalorder %v546_v36, 0  ;;  %v6902_v18 = vld [vmem:[%s13955_s1 + $0x1b0] sm:$0xff] }
  0x4f   : > { %8508 = vmatprep.subr.mxu0 %v6856_v3  ;;  %8584 = vmatprep.subr.mxu1 %v6904_v9  ;;  %14324 = vst [vmem:[#allocation37_spill] sm:$0xff] %v10325_v34  ;;  %v14326_v53 = vsel %vm10327_vm11, 4294967295, %v14325_v53 }
  0x50   : > { %8509 = vmatpush3.msra.mxu0 %v6856_v3  ;;  %8585 = vmatpush3.msra.mxu1 %v6904_v9  ;;  %v312_v3 = vrot.slane %v10299_v39, 7  ;;  %v313_v9 = vrot.slane %v10302_v44, 7  ;;  %14327 = vst [vmem:[#allocation38_spill] sm:$0xff] %v14326_v53  ;;  %v574_v53 = vand.u32 15, %v285_v47 }
  0x51   : > { %8390 = vmatmul.mubr.f32.gmra.mxu0 %v10234_v29  ;;  %8470 = vmatmul.mubr.f32.gmra.mxu1 %v10286_v13  ;;  %v560_v13 = vand.u32 15, %v283_v24  ;;  %v314_v24 = vrot.slane %v10332_v26, 7 }
  0x52   : > { %8392 = vmatprep.mubr.f32.mxu0 %v10237_v31  ;;  %8472 = vmatprep.mubr.msk.f32.mxu1 %vm10293_vm10, %v10290_v17  ;;  %v10335_v17 = vld [vmem:[%s9950_s29 + $0xc0] sm:$0xff]  ;;  %v10352_v36 = vsel %vm14008_vm0, %v311_v32, %v312_v3  ;;  %v287_v32 = vadd.s32 224, %v9937_v25  ;;  %vm10392_vm13 = vcmp.ne.s32.totalorder %v574_v53, 0 }
  0x53   : > { %8510 = vmatprep.subr.mxu0 %v6855_v45  ;;  %8586 = vmatprep.subr.mxu1 %v6903_v56  ;;  %14329 = vst [vmem:[#allocation40_spill] sm:$0xff] %v10352_v36  ;;  %vm10360_vm12 = vcmp.ne.s32.totalorder %v560_v13, 0  ;;  %v6901_v13 = vld [vmem:[%s13955_s1 + $0x1a8] sm:$0xff]  ;;  %v6900_v53 = vld [vmem:[%s13955_s1 + $0x1a0] sm:$0xff] }
  0x54   : > { %8511 = vmatpush3.msra.mxu0 %v6855_v45  ;;  %8587 = vmatpush3.msra.mxu1 %v6903_v56  ;;  %v315_v45 = vrot.slane %v10335_v17, 7  ;;  %v10358_v56 = vsel %vm14008_vm0, %v312_v3, %v313_v9  ;;  %v10375_v3 = vld [vmem:[%s9950_s29 + $0xd0] sm:$0xff] }
  0x55   : > { %8393 = vmatmul.mubr.f32.gmra.mxu0 %v10266_v58  ;;  %8473 = vmatmul.mubr.f32.gmra.mxu1 %v10319_v60  ;;  %14330 = vst [vmem:[#allocation41_spill] sm:$0xff] %v10358_v56  ;;  %v14331_v60 = vmov 0  ;;  %14334 = vst [vmem:[#allocation43_spill] sm:$0xff] %v10375_v3 }
  0x56   : > { %8395 = vmatprep.mubr.f32.mxu0 %v10273_v6  ;;  %8475 = vmatprep.mubr.msk.f32.mxu1 %vm10327_vm11, %v10325_v34  ;;  %v14332_v60 = vsel %vm10360_vm12, 4294967295, %v14331_v60  ;;  %v10365_v6 = vld [vmem:[%s9950_s29 + $0xc8] sm:$0xff]  ;;  %v6853_v34 = vld [vmem:[%s13955_s1 + $0x118] sm:$0xff]  ;;  %v10389_v47 = vsel %vm14008_vm0, %v314_v24, %v315_v45 }
  0x57   : > { %8512 = vmatprep.subr.mxu0 %v6854_v22  ;;  %14333 = vst [vmem:[#allocation42_spill] sm:$0xff] %v14332_v60  ;;  %8588 = vmatprep.subr.mxu1 %v6902_v18  ;;  %14336 = vst [vmem:[#allocation45_spill] sm:$0xff] %v10389_v47  ;;  %v317_v60 = vrot.slane %v10375_v3, 7 }
  0x58   : > { %8513 = vmatpush3.msra.mxu0 %v6854_v22  ;;  %8589 = vmatpush3.msra.mxu1 %v6902_v18  ;;  %v10385_v22 = vsel %vm14008_vm0, %v313_v9, %v314_v24  ;;  %v316_v18 = vrot.slane %v10365_v6, 7  ;;  %v289_v9 = vadd.s32 240, %v9937_v25  ;;  %v6852_v24 = vld [vmem:[%s13955_s1 + $0x110] sm:$0xff] }
  0x59   : > { %8396 = vmatmul.mubr.f32.gmra.mxu0 %v10299_v39  ;;  %8476 = vmatmul.mubr.f32.gmra.mxu1 %v10352_v36  ;;  %14335 = vst [vmem:[#allocation44_spill] sm:$0xff] %v10385_v22  ;;  %v14337_v36 = vmov 0  ;;  %v10408_v39 = vld [vmem:[%s9950_s29 + $0xe0] sm:$0xff] }
  0x5a   : > { %8398 = vmatprep.mubr.f32.mxu0 %v10302_v44  ;;  %8478 = vmatprep.mubr.msk.f32.mxu1 %vm10360_vm12, %v10358_v56  ;;  %v14338_v36 = vsel %vm10392_vm13, 4294967295, %v14337_v36  ;;  %v588_v44 = vand.u32 15, %v287_v32  ;;  %v10398_v56 = vld [vmem:[%s9950_s29 + $0xd8] sm:$0xff]  ;;  %14341 = vst [vmem:[#allocation48_spill] sm:$0xff] %v10408_v39 }
  0x5b   : > { %8514 = vmatprep.subr.mxu0 %v6853_v34  ;;  %14339 = vst [vmem:[#allocation46_spill] sm:$0xff] %v14338_v36  ;;  %8590 = vmatprep.subr.mxu1 %v6901_v13  ;;  %14340 = vst [vmem:[#allocation47_spill] sm:$0xff] %v10398_v56  ;;  %v318_v32 = vrot.slane %v10398_v56, 7  ;;  %v602_v36 = vand.u32 15, %v289_v9 }
  0x5c   : > { %8515 = vmatpush3.msra.mxu0 %v6853_v34  ;;  %8591 = vmatpush3.msra.mxu1 %v6901_v13  ;;  %v10418_v34 = vsel %vm14008_vm0, %v315_v45, %v316_v18  ;;  %v10423_v13 = vsel %vm14008_vm0, %v316_v18, %v317_v60  ;;  %vm10425_vm14 = vcmp.ne.s32.totalorder %v588_v44, 0  ;;  %v6851_v45 = vld [vmem:[%s13955_s1 + $0x108] sm:$0xff]  ;;  %v6899_v18 = vld [vmem:[%s13955_s1 + $0x198] sm:$0xff] }
  0x5d   : > { %8399 = vmatmul.mubr.f32.gmra.mxu0 %v10332_v26  ;;  %8479 = vmatmul.mubr.f32.gmra.mxu1 %v10385_v22  ;;  %14342 = vst [vmem:[#allocation49_spill] sm:$0xff] %v10418_v34  ;;  %14343 = vst [vmem:[#allocation50_spill] sm:$0xff] %v10423_v13  ;;  %v14344_v26 = vmov 0  ;;  %v319_v22 = vrot.slane %v10408_v39, 7  ;;  %v10447_v44 = vsel %vm14008_vm0, %v317_v60, %v318_v32  ;;  %vm10454_vm15 = vcmp.ne.s32.totalorder %v602_v36, 0  ;;  %v6898_v60 = vld [vmem:[%s13955_s1 + $0x190] sm:$0xff] }
  0x5e   : > { %8401 = vmatprep.mubr.f32.mxu0 %v10335_v17  ;;  %8481 = vmatprep.mubr.msk.f32.mxu1 %vm10392_vm13, %v10389_v47  ;;  %v14345_v26 = vsel %vm10425_vm14, 4294967295, %v14344_v26  ;;  %v10431_v47 = vld [vmem:[%s9950_s29 + $0xe8] sm:$0xff]  ;;  %14348 = vst [vmem:[#allocation53_spill] sm:$0xff] %v10447_v44 }
  0x5f   : > { %8516 = vmatprep.subr.mxu0 %v6852_v24  ;;  %14346 = vst [vmem:[#allocation51_spill] sm:$0xff] %v14345_v26  ;;  %8592 = vmatprep.subr.mxu1 %v6900_v53  ;;  %14347 = vst [vmem:[#allocation52_spill] sm:$0xff] %v10431_v47  ;;  %v14009_v9 = vrot.slane %v10431_v47, 7  ;;  %v6850_v26 = vld [vmem:[%s13955_s1 + $0x100] sm:$0xff] }
  0x60   : > { %8517 = vmatpush3.msra.mxu0 %v6852_v24  ;;  %8593 = vmatpush3.msra.mxu1 %v6900_v53  ;;  %v10452_v24 = vsel %vm14008_vm0, %v318_v32, %v319_v22  ;;  %v14350_v53 = vmov 0  ;;  %v392_v32 = vand.u32 15, %v9937_v25 }
  0x61   : > { %8402 = vmatmul.mubr.f32.gmra.mxu0 %v10365_v6  ;;  %8482 = vmatmul.mubr.f32.gmra.mxu1 %v10418_v34  ;;  %14349 = vst [vmem:[#allocation54_spill] sm:$0xff] %v10452_v24  ;;  %v14351_v53 = vsel %vm10454_vm15, 4294967295, %v14350_v53  ;;  %v10475_v36 = vsel %vm14008_vm0, %v319_v22, %v14009_v9  ;;  %v6896_v22 = vld [vmem:[%s13955_s1 + $0x180] sm:$0xff]  ;;  %v14354_v9 = vmov 0 }
  0x62   : > { %8404 = vmatprep.mubr.f32.mxu0 %v10375_v3  ;;  %8484 = vmatprep.mubr.msk.f32.mxu1 %vm10425_vm14, %v10423_v13  ;;  %14352 = vst [vmem:[#allocation55_spill] sm:$0xff] %v14351_v53  ;;  %14353 = vst [vmem:[#allocation56_spill] sm:$0xff] %v10475_v36  ;;  %v6959_v53 = vld [vmem:[%s13955_s1 + $0x278] sm:$0xff]  ;;  %vm10491_vm0 = vcmp.ne.s32.totalorder %v392_v32, 0  ;;  %v14358_v32 = vrot.slane %v9966_v33, 1  ;;  %v290_v33 = vadd.s32 248, %v9937_v25 }
  0x63   : > { %8518 = vmatprep.subr.mxu0 %v6851_v45  ;;  %8594 = vmatprep.subr.mxu1 %v6899_v18  ;;  %v14355_v9 = vsel %vm10491_vm0, 4294967295, %v14354_v9 }
  0x64   : > { %8519 = vmatpush3.msra.mxu0 %v6851_v45  ;;  %8595 = vmatpush3.msra.mxu1 %v6899_v18  ;;  %v262_v45 = vadd.s32 24, %v9937_v25  ;;  %v6897_v18 = vld [vmem:[%s13955_s1 + $0x188] sm:$0xff]  ;;  %14356 = vst [vmem:[#allocation57_spill] sm:$0xff] %v14355_v9 }
  0x65   : > { %8405 = vmatmul.mubr.f32.gmra.mxu0 %v10398_v56  ;;  %8485 = vmatmul.mubr.f32.gmra.mxu1 %v10447_v44  ;;  %v1384_v44 = vrot.slane %v9978_v37, 1  ;;  %v1385_v37 = vrot.slane %v9985_v42, 1  ;;  %v6958_v42 = vld [vmem:[%s13955_s1 + $0x270] sm:$0xff] }
  0x66   : > { %8407 = vmatprep.mubr.f32.mxu0 %v10408_v39  ;;  %8487 = vmatprep.mubr.msk.f32.mxu1 %vm10454_vm15, %v10452_v24  ;;  %vm14113_vm15 = vcmp.lt.s32.totalorder %v9937_v25, 7  ;;  %v264_v24 = vadd.s32 40, %v9937_v25 }
  0x67   : > { %8520 = vmatprep.subr.mxu0 %v6850_v26  ;;  %8596 = vmatprep.subr.mxu1 %v6898_v60 }
  0x68   : > { %8521 = vmatpush3.msra.mxu0 %v6850_v26  ;;  %8597 = vmatpush3.msra.mxu1 %v6898_v60  ;;  %v14357_v26 = vmov 0.0   ;;  %v413_v60 = vand.u32 15, %v262_v45  ;;  %v14359_v45 = vmov 0 }
  0x69   : > { %8408 = vmatmul.mubr.f32.gmra.mxu0 %v10431_v47  ;;  %8488 = vmatmul.mubr.f32.gmra.mxu1 %v10475_v36  ;;  %v1386_v36 = vrot.slane %v9993_v46, 1  ;;  %v10507_v47 = vsel %vm14113_vm15, %v14358_v32, %v1384_v44  ;;  %v1387_v46 = vrot.slane %v10009_v52, 1  ;;  %v6957_v32 = vld [vmem:[%s13955_s1 + $0x268] sm:$0xff] }
  0x6a   : > { %8598 = vmatprep.subr.mxu1 %v6897_v18  ;;  %8522 = vmatprep.mubr.f32.mxu0 %v14357_v26 }
  0x6b   : > { %8599 = vmatpush3.msra.mxu1 %v6897_v18  ;;  %8650 = vmatprep.subr.mxu0 %v6959_v53  ;;  %v427_v18 = vand.u32 15, %v264_v24  ;;  %v10530_v52 = vsel %vm14113_vm15, %v1385_v37, %v1386_v36  ;;  %v6956_v24 = vld [vmem:[%s13955_s1 + $0x260] sm:$0xff] }
  0x6c   : > { %8600 = vmatprep.subr.mxu1 %v6896_v22  ;;  %8602 = vmatprep.mubr.msk.f32.mxu1 %vm10491_vm0, %v10001_v48  ;;  %v10517_v48 = vsel %vm14113_vm15, %v1384_v44, %v1385_v37  ;;  %vm10519_vm0 = vcmp.ne.s32.totalorder %v413_v60, 15  ;;  %v1389_v44 = vrot.slane %v10045_v0, 1  ;;  %v14362_v60 = vmov 0 }
  0x6d   : > { %8523 = vmatmul.mubr.f32.vlgmr.msra.gmra.mxu0 %v14357_v26  ;;  %8601 = vmatpush3.msra.mxu1 %v6896_v22  ;;  %v14360_v45 = vsel %vm10519_vm0, 4294967295, %v14359_v45  ;;  %v266_v22 = vadd.s32 56, %v9937_v25  ;;  %v268_v37 = vadd.s32 72, %v9937_v25  ;;  %v1390_v26 = vrot.slane %v10069_v8, 1 }
  0x6e   : > { %8651 = vmatpush3.msra.mxu0 %v6959_v53  ;;  %8603 = vmatmul.mubr.f32.vlgmr.msra.gmra.mxu1 %v10022_v55  ;;  %14361 = vst [vmem:[#allocation58_spill] sm:$0xff] %v14360_v45  ;;  %v1388_v55 = vrot.slane %v10030_v59, 1  ;;  %v6975_v59 = vld [vmem:[%s13955_s1 + $0x2f8] sm:$0xff]  ;;  %v10550_v53 = vsel %vm14113_vm15, %v1386_v36, %v1387_v46  ;;  %v14365_v8 = vmov 0 }
  0x6f   : > { %8525 = vmatprep.mubr.f32.mxu0 %v10507_v47  ;;  %8652 = vmatprep.subr.mxu0 %v6958_v42  ;;  %v441_v0 = vand.u32 15, %v266_v22  ;;  %v1391_v22 = vrot.slane %v10075_v10, 1  ;;  %v1393_v10 = vrot.slane %v10108_v21, 1 }
  0x70   : > { %8605 = vmatprep.mubr.msk.f32.mxu1 %vm10003_vm1, %v10035_v61  ;;  %8653 = vmatpush3.msra.mxu0 %v6958_v42  ;;  %vm10552_vm1 = vcmp.ne.s32.totalorder %v427_v18, 15  ;;  %v10562_v42 = vsel %vm14113_vm15, %v1387_v46, %v1388_v55  ;;  %v10570_v36 = vsel %vm14113_vm15, %v1388_v55, %v1389_v44  ;;  %v6955_v18 = vld [vmem:[%s13955_s1 + $0x258] sm:$0xff]  ;;  %v6974_v46 = vld [vmem:[%s13955_s1 + $0x2f0] sm:$0xff]  ;;  %v270_v55 = vadd.s32 88, %v9937_v25 }
  0x71   : > { %8526 = vmatmul.mubr.msk.f32.gmra.mxu0 %vm10519_vm0, %v10517_v48  ;;  %8654 = vmatprep.subr.mxu0 %v6957_v32  ;;  %v14363_v60 = vsel %vm10552_vm1, 4294967295, %v14362_v60  ;;  %v10608_v19 = vsel %vm14113_vm15, %v1390_v26, %v1391_v22  ;;  %v10637_v30 = vsel %vm14113_vm15, %v1392_v62, %v1393_v10  ;;  %v14414_v61 = vld [vmem:[#allocation45_spill] sm:$0xff] }
  0x72   : > { %8606 = vmatmul.mubr.f32.gmra.mxu1 %v10052_v1  ;;  %8528 = vmatprep.mubr.f32.mxu0 %v10530_v52  ;;  %14364 = vst [vmem:[#allocation59_spill] sm:$0xff] %v14363_v60  ;;  %v469_v21 = vand.u32 15, %v270_v55  ;;  %v274_v55 = vadd.s32 120, %v9937_v25 }
  0x73   : > { %8608 = vmatprep.mubr.msk.f32.mxu1 %vm10037_vm2, %v10061_v4  ;;  %8655 = vmatpush3.msra.mxu0 %v6957_v32  ;;  %vm10580_vm2 = vcmp.ne.s32.totalorder %v441_v0, 15  ;;  %v455_v32 = vand.u32 15, %v268_v37  ;;  %v6954_v0 = vld [vmem:[%s13955_s1 + $0x250] sm:$0xff]  ;;  %v272_v37 = vadd.s32 104, %v9937_v25 }
  0x74   : > { %8656 = vmatprep.subr.mxu0 %v6956_v24  ;;  %8730 = vmatprep.subr.mxu1 %v6975_v59  ;;  %v14366_v8 = vsel %vm10580_vm2, 4294967295, %v14365_v8  ;;  %v14408_v4 = vld [vmem:[#allocation41_spill] sm:$0xff] }
  0x75   : > { %8529 = vmatmul.mubr.msk.f32.gmra.mxu0 %vm10552_vm1, %v10550_v53  ;;  %8731 = vmatpush3.msra.mxu1 %v6975_v59  ;;  %14367 = vst [vmem:[#allocation60_spill] sm:$0xff] %v14366_v8  ;;  %v10591_v59 = vsel %vm14113_vm15, %v1389_v44, %v1390_v26  ;;  %v6973_v44 = vld [vmem:[%s13955_s1 + $0x2e8] sm:$0xff]  ;;  %v1395_v26 = vrot.slane %v10141_v35, 1  ;;  %v483_v35 = vand.u32 15, %v272_v37  ;;  %v276_v37 = vadd.s32 136, %v9937_v25  ;;  %v7066_v8 = vld [vmem:[%s13955_s1 + $0x3e0] sm:$0xff] }
  0x76   : > { %8609 = vmatmul.mubr.f32.gmra.mxu1 %v10088_v12  ;;  %8531 = vmatprep.mubr.f32.mxu0 %v10562_v42  ;;  %v14403_v12 = vld [vmem:[#allocation39_spill] sm:$0xff] }
  0x77   : > { %8611 = vmatprep.mubr.msk.f32.mxu1 %vm10063_vm3, %v10094_v15  ;;  %8657 = vmatpush3.msra.mxu0 %v6956_v24  ;;  %vm10610_vm3 = vcmp.ne.s32.totalorder %v455_v32, 15  ;;  %v14368_v24 = vmov 0  ;;  %v6953_v32 = vld [vmem:[%s13955_s1 + $0x248] sm:$0xff]  ;;  %v1406_v49 = vrot.slane %v14403_v12, 1 }
  0x78   : > { %8658 = vmatprep.subr.mxu0 %v6955_v18  ;;  %8732 = vmatprep.subr.mxu1 %v6974_v46  ;;  %v14369_v24 = vsel %vm10610_vm3, 4294967295, %v14368_v24 }
  0x79   : > { %8532 = vmatmul.mubr.msk.f32.gmra.mxu0 %vm10580_vm2, %v10570_v36  ;;  %8733 = vmatpush3.msra.mxu1 %v6974_v46  ;;  %14370 = vst [vmem:[#allocation61_spill] sm:$0xff] %v14369_v24  ;;  %v10620_v46 = vsel %vm14113_vm15, %v1391_v22, %v1392_v62  ;;  %v14372_v22 = vmov 0  ;;  %v10657_v62 = vsel %vm14113_vm15, %v1394_v5, %v1395_v26  ;;  %v7065_v24 = vld [vmem:[%s13955_s1 + $0x3d8] sm:$0xff] }
  0x7a   : > { %8612 = vmatmul.mubr.f32.gmra.mxu1 %v10121_v23  ;;  %8534 = vmatprep.mubr.f32.mxu0 %v10591_v59  ;;  %14371 = vst [vmem:[#allocation62_spill] sm:$0xff] %v10620_v46  ;;  %v284_v23 = vadd.s32 200, %v9937_v25 }
  0x7b   : > { %8614 = vmatprep.mubr.msk.f32.mxu1 %vm10096_vm4, %v10126_v27  ;;  %8659 = vmatpush3.msra.mxu0 %v6955_v18  ;;  %v6972_v18 = vld [vmem:[%s13955_s1 + $0x2e0] sm:$0xff]  ;;  %vm10639_vm4 = vcmp.ne.s32.totalorder %v469_v21, 15  ;;  %v497_v21 = vand.u32 15, %v274_v55  ;;  %v278_v55 = vadd.s32 152, %v9937_v25 }
  0x7c   : > { %8660 = vmatprep.subr.mxu0 %v6954_v0  ;;  %8734 = vmatprep.subr.mxu1 %v6973_v44  ;;  %v14373_v22 = vsel %vm10639_vm4, 4294967295, %v14372_v22  ;;  %v567_v15 = vand.u32 15, %v284_v23  ;;  %v1409_v23 = vrot.slane %v10375_v3, 1  ;;  %v1410_v3 = vrot.slane %v10398_v56, 1 }
  0x7d   : > { %8535 = vmatmul.mubr.msk.f32.gmra.mxu0 %vm10610_vm3, %v10608_v19  ;;  %8735 = vmatpush3.msra.mxu1 %v6973_v44  ;;  %14374 = vst [vmem:[#allocation63_spill] sm:$0xff] %v14373_v22  ;;  %v10649_v44 = vsel %vm14113_vm15, %v1393_v10, %v1394_v5  ;;  %v6971_v10 = vld [vmem:[%s13955_s1 + $0x2d8] sm:$0xff]  ;;  %v1397_v5 = vrot.slane %v10174_v54, 1  ;;  %v1399_v54 = vrot.slane %v10207_v11, 1  ;;  %v511_v11 = vand.u32 15, %v276_v37  ;;  %v7064_v22 = vld [vmem:[%s13955_s1 + $0x3d0] sm:$0xff] }
  0x7e   : > { %8615 = vmatmul.mubr.f32.gmra.mxu1 %v10154_v38  ;;  %8537 = vmatprep.mubr.f32.mxu0 %v10620_v46  ;;  %14375 = vst [vmem:[#allocation64_spill] sm:$0xff] %v10649_v44  ;;  %v14384_v37 = vmov 0  ;;  %v14398_v38 = vmov 0  ;;  %v10884_v56 = vsel %vm14113_vm15, %v1409_v23, %v1410_v3 }
  0x7f   : > { %8617 = vmatprep.mubr.msk.f32.mxu1 %vm10128_vm5, %v10163_v43  ;;  %8661 = vmatpush3.msra.mxu0 %v6954_v0  ;;  %v6952_v0 = vld [vmem:[%s13955_s1 + $0x240] sm:$0xff]  ;;  %vm10667_vm5 = vcmp.ne.s32.totalorder %v483_v35, 15  ;;  %v6951_v35 = vld [vmem:[%s13955_s1 + $0x238] sm:$0xff]  ;;  %v10695_v7 = vsel %vm14113_vm15, %v1396_v16, %v1397_v5  ;;  %14421 = vst [vmem:[#allocation72_spill] sm:$0xff] %v10884_v56 }
  0x80   : > { %8662 = vmatprep.subr.mxu0 %v6953_v32  ;;  %8736 = vmatprep.subr.mxu1 %v6972_v18  ;;  %v14377_v50 = vsel %vm10667_vm5, 4294967295, %v14376_v50 }
  0x81   : > { %8538 = vmatmul.mubr.msk.f32.gmra.mxu0 %vm10639_vm4, %v10637_v30  ;;  %8737 = vmatpush3.msra.mxu1 %v6972_v18  ;;  %14378 = vst [vmem:[#allocation65_spill] sm:$0xff] %v14377_v50  ;;  %v10678_v18 = vsel %vm14113_vm15, %v1395_v26, %v1396_v16  ;;  %v6970_v26 = vld [vmem:[%s13955_s1 + $0x2d0] sm:$0xff]  ;;  %v1401_v16 = vrot.slane %v10237_v31, 1  ;;  %v525_v31 = vand.u32 15, %v278_v55  ;;  %v14389_v55 = vmov 0  ;;  %v7063_v50 = vld [vmem:[%s13955_s1 + $0x3c8] sm:$0xff] }
  0x82   : > { %8618 = vmatmul.mubr.f32.gmra.mxu1 %v10187_v57  ;;  %8540 = vmatprep.mubr.f32.mxu0 %v10649_v44  ;;  %14379 = vst [vmem:[#allocation66_spill] sm:$0xff] %v10678_v18  ;;  %v6948_v57 = vld [vmem:[%s13955_s1 + $0x220] sm:$0xff] }
  0x83   : > { %8620 = vmatprep.mubr.msk.f32.mxu1 %vm10156_vm6, %v10193_v63  ;;  %8663 = vmatpush3.msra.mxu0 %v6953_v32  ;;  %vm10697_vm6 = vcmp.ne.s32.totalorder %v497_v21, 15  ;;  %v14380_v32 = vmov 0  ;;  %v6950_v21 = vld [vmem:[%s13955_s1 + $0x230] sm:$0xff]  ;;  %v14393_v63 = vld [vmem:[#allocation32_spill] sm:$0xff] }
  0x84   : > { %8664 = vmatprep.subr.mxu0 %v6952_v0  ;;  %8738 = vmatprep.subr.mxu1 %v6971_v10  ;;  %v14381_v32 = vsel %vm10697_vm6, 4294967295, %v14380_v32 }
  0x85   : > { %8541 = vmatmul.mubr.msk.f32.gmra.mxu0 %vm10667_vm5, %v10657_v62  ;;  %8739 = vmatpush3.msra.mxu1 %v6971_v10  ;;  %14382 = vst [vmem:[#allocation67_spill] sm:$0xff] %v14381_v32  ;;  %v10707_v10 = vsel %vm14113_vm15, %v1397_v5, %v1398_v28  ;;  %v10724_v5 = vsel %vm14113_vm15, %v1398_v28, %v1399_v54  ;;  %v7062_v32 = vld [vmem:[%s13955_s1 + $0x3c0] sm:$0xff] }
  0x86   : > { %8621 = vmatmul.mubr.f32.gmra.mxu1 %v10220_v14  ;;  %8543 = vmatprep.mubr.f32.mxu0 %v10678_v18  ;;  %14383 = vst [vmem:[#allocation68_spill] sm:$0xff] %v10724_v5  ;;  %v10744_v28 = vsel %vm14113_vm15, %v1400_v40, %v1401_v16  ;;  %v282_v14 = vadd.s32 184, %v9937_v25 }
  0x87   : > { %8623 = vmatprep.mubr.msk.f32.mxu1 %vm10195_vm7, %v10226_v20  ;;  %8665 = vmatpush3.msra.mxu0 %v6952_v0  ;;  %v6969_v0 = vld [vmem:[%s13955_s1 + $0x2c8] sm:$0xff]  ;;  %vm10726_vm7 = vcmp.ne.s32.totalorder %v511_v11, 15  ;;  %v1402_v20 = vrot.slane %v10266_v58, 1  ;;  %v14388_v11 = vld [vmem:[#allocation31_spill] sm:$0xff] }
  0x88   : > { %8666 = vmatprep.subr.mxu0 %v6951_v35  ;;  %8740 = vmatprep.subr.mxu1 %v6970_v26  ;;  %v14385_v37 = vsel %vm10726_vm7, 4294967295, %v14384_v37  ;;  %v553_v27 = vand.u32 15, %v282_v14 }
  0x89   : > { %8544 = vmatmul.mubr.msk.f32.gmra.mxu0 %vm10697_vm6, %v10695_v7  ;;  %8741 = vmatpush3.msra.mxu1 %v6970_v26  ;;  %14386 = vst [vmem:[#allocation69_spill] sm:$0xff] %v14385_v37  ;;  %v539_v26 = vand.u32 15, %v280_v2  ;;  %v14396_v2 = vld [vmem:[#allocation35_spill] sm:$0xff] }
  0x8a   : > { %8624 = vmatmul.mubr.f32.gmra.mxu1 %v10253_v41  ;;  %8546 = vmatprep.mubr.f32.mxu0 %v10707_v10  ;;  %v10736_v41 = vsel %vm14113_vm15, %v1399_v54, %v1400_v40  ;;  %v6968_v54 = vld [vmem:[%s13955_s1 + $0x2c0] sm:$0xff]  ;;  %v14392_v40 = vld [vmem:[#allocation30_spill] sm:$0xff] }
  0x8b   : > { %8626 = vmatprep.mubr.msk.f32.mxu1 %vm10228_vm8, %v10259_v51  ;;  %8667 = vmatpush3.msra.mxu0 %v6951_v35  ;;  %v6949_v35 = vld [vmem:[%s13955_s1 + $0x228] sm:$0xff]  ;;  %vm10754_vm8 = vcmp.ne.s32.totalorder %v525_v31, 15  ;;  %v1403_v51 = vrot.slane %v14392_v40, 1  ;;  %v1405_v31 = vrot.slane %v14396_v2, 1 }
  0x8c   : > { %8668 = vmatprep.subr.mxu0 %v6950_v21  ;;  %8742 = vmatprep.subr.mxu1 %v6969_v0  ;;  %v14390_v55 = vsel %vm10754_vm8, 4294967295, %v14389_v55 }
  0x8d   : > { %8547 = vmatmul.mubr.msk.f32.gmra.mxu0 %vm10726_vm7, %v10724_v5  ;;  %8743 = vmatpush3.msra.mxu1 %v6969_v0  ;;  %14391 = vst [vmem:[#allocation70_spill] sm:$0xff] %v14390_v55  ;;  %v10765_v0 = vsel %vm14113_vm15, %v1401_v16, %v1402_v20  ;;  %v6967_v16 = vld [vmem:[%s13955_s1 + $0x2b8] sm:$0xff] }
  0x8e   : > { %8627 = vmatmul.mubr.f32.gmra.mxu1 %v14388_v11  ;;  %8549 = vmatprep.mubr.f32.mxu0 %v10736_v41  ;;  %v14395_v11 = vld [vmem:[#allocation34_spill] sm:$0xff] }
  0x8f   : > { %8629 = vmatprep.mubr.msk.f32.mxu1 %vm10261_vm9, %v14393_v63  ;;  %8669 = vmatpush3.msra.mxu0 %v6950_v21  ;;  %v1404_v43 = vrot.slane %v14395_v11, 1  ;;  %v14397_v21 = vld [vmem:[#allocation36_spill] sm:$0xff]  ;;  %v10782_v63 = vsel %vm14113_vm15, %v1402_v20, %v1403_v51  ;;  %vm10784_vm9 = vcmp.ne.s32.totalorder %v539_v26, 15  ;;  %v6947_v20 = vld [vmem:[%s13955_s1 + $0x218] sm:$0xff] }
  0x90   : > { %8670 = vmatprep.subr.mxu0 %v6949_v35  ;;  %8744 = vmatprep.subr.mxu1 %v6968_v54  ;;  %v14399_v38 = vsel %vm10784_vm9, 4294967295, %v14398_v38  ;;  %v14404_v26 = vld [vmem:[#allocation40_spill] sm:$0xff] }
  0x91   : > { %8550 = vmatmul.mubr.msk.f32.gmra.mxu0 %vm10754_vm8, %v10744_v28  ;;  %8745 = vmatpush3.msra.mxu1 %v6968_v54  ;;  %14400 = vst [vmem:[#allocation30_spill] sm:$0xff] %v14399_v38  ;;  %v14401_v54 = vld [vmem:[#allocation37_spill] sm:$0xff]  ;;  %v10802_v14 = vsel %vm14113_vm15, %v1404_v43, %v1405_v31 }
  0x92   : > { %8630 = vmatmul.mubr.f32.gmra.mxu1 %v14397_v21  ;;  %8552 = vmatprep.mubr.f32.mxu0 %v10765_v0  ;;  %v10794_v21 = vsel %vm14113_vm15, %v1403_v51, %v1404_v43  ;;  %v6966_v51 = vld [vmem:[%s13955_s1 + $0x2b0] sm:$0xff]  ;;  %v1407_v43 = vrot.slane %v10335_v17, 1 }
  0x93   : > { %8632 = vmatprep.mubr.msk.f32.mxu1 %vm10293_vm10, %v14401_v54  ;;  %8671 = vmatpush3.msra.mxu0 %v6949_v35  ;;  %vm10812_vm10 = vcmp.ne.s32.totalorder %v553_v27, 15  ;;  %v14405_v35 = vmov 0  ;;  %v286_v54 = vadd.s32 216, %v9937_v25  ;;  %v6946_v27 = vld [vmem:[%s13955_s1 + $0x210] sm:$0xff] }
  0x94   : > { %8672 = vmatprep.subr.mxu0 %v6948_v57  ;;  %8746 = vmatprep.subr.mxu1 %v6967_v16  ;;  %v14406_v35 = vsel %vm10812_vm10, 4294967295, %v14405_v35  ;;  %v10840_v1 = vsel %vm14113_vm15, %v1406_v49, %v1407_v43 }
  0x95   : > { %8553 = vmatmul.mubr.msk.f32.gmra.mxu0 %vm10784_vm9, %v10782_v63  ;;  %8747 = vmatpush3.msra.mxu1 %v6967_v16  ;;  %14407 = vst [vmem:[#allocation34_spill] sm:$0xff] %v14406_v35  ;;  %v10823_v16 = vsel %vm14113_vm15, %v1405_v31, %v1406_v49  ;;  %v14410_v31 = vld [vmem:[#allocation44_spill] sm:$0xff]  ;;  %v581_v9 = vand.u32 15, %v286_v54  ;;  %v6964_v54 = vld [vmem:[%s13955_s1 + $0x2a0] sm:$0xff]  ;;  %v14513_v35 = vld [vmem:[#allocation49_spill] sm:$0xff] }
  0x96   : > { %8633 = vmatmul.mubr.f32.gmra.mxu1 %v14404_v26  ;;  %8555 = vmatprep.mubr.f32.mxu0 %v10794_v21  ;;  %v1408_v26 = vrot.slane %v10365_v6, 1 }
  0x97   : > { %8635 = vmatprep.mubr.msk.f32.mxu1 %vm10327_vm11, %v14408_v4  ;;  %8673 = vmatpush3.msra.mxu0 %v6948_v57  ;;  %v6965_v57 = vld [vmem:[%s13955_s1 + $0x2a8] sm:$0xff]  ;;  %vm10842_vm11 = vcmp.ne.s32.totalorder %v567_v15, 15  ;;  %v14411_v4 = vmov 0 }
  0x98   : > { %8674 = vmatprep.subr.mxu0 %v6947_v20  ;;  %8748 = vmatprep.subr.mxu1 %v6966_v51  ;;  %v14412_v4 = vsel %vm10842_vm11, 4294967295, %v14411_v4  ;;  %v10860_v49 = vsel %vm14113_vm15, %v1408_v26, %v1409_v23  ;;  %v6945_v15 = vld [vmem:[%s13955_s1 + $0x208] sm:$0xff]  ;;  %v6944_v23 = vld [vmem:[%s13955_s1 + $0x200] sm:$0xff] }
  0x99   : > { %8556 = vmatmul.mubr.msk.f32.gmra.mxu0 %vm10812_vm10, %v10802_v14  ;;  %8749 = vmatpush3.msra.mxu1 %v6966_v51  ;;  %14413 = vst [vmem:[#allocation35_spill] sm:$0xff] %v14412_v4  ;;  %v288_v51 = vadd.s32 232, %v9937_v25  ;;  %14416 = vst [vmem:[#allocation39_spill] sm:$0xff] %v10860_v49 }
  0x9a   : > { %8636 = vmatmul.mubr.f32.gmra.mxu1 %v14410_v31  ;;  %8558 = vmatprep.mubr.f32.mxu0 %v10823_v16  ;;  %v10852_v31 = vsel %vm14113_vm15, %v1407_v43, %v1408_v26  ;;  %v14417_v43 = vmov 0 }
  0x9b   : > { %8638 = vmatprep.mubr.msk.f32.mxu1 %vm10360_vm12, %v14414_v61  ;;  %8675 = vmatpush3.msra.mxu0 %v6947_v20  ;;  %v10869_v20 = vld [vmem:[%s9950_s29 + $0xf0] sm:$0xff]  ;;  %vm10873_vm12 = vcmp.ne.s32.totalorder %v581_v9, 15  ;;  %v595_v26 = vand.u32 15, %v288_v51  ;;  %v6963_v51 = vld [vmem:[%s13955_s1 + $0x298] sm:$0xff] }
  0x9c   : > { %8676 = vmatprep.subr.mxu0 %v6946_v27  ;;  %8750 = vmatprep.subr.mxu1 %v6965_v57  ;;  %v14418_v43 = vsel %vm10873_vm12, 4294967295, %v14417_v43  ;;  %v321_v9 = vrot.slane %v10869_v20, 7 }
  0x9d   : > { %8559 = vmatmul.mubr.msk.f32.gmra.mxu0 %vm10842_vm11, %v10840_v1  ;;  %8751 = vmatpush3.msra.mxu1 %v6965_v57  ;;  %14419 = vst [vmem:[#allocation71_spill] sm:$0xff] %v14418_v43  ;;  %v1411_v57 = vrot.slane %v10408_v39, 1  ;;  %v14098_v39 = vrot.slane %v10869_v20, 1  ;;  %v14428_v43 = vld [vmem:[#allocation54_spill] sm:$0xff] }
  0x9e   : > { %8639 = vmatmul.mubr.f32.gmra.mxu1 %v10418_v34  ;;  %8561 = vmatprep.mubr.f32.mxu0 %v10852_v31  ;;  %v14422_v34 = vld [vmem:[#allocation52_spill] sm:$0xff] }
  0x9f   : > { %8641 = vmatprep.mubr.msk.f32.mxu1 %vm10392_vm13, %v10423_v13  ;;  %8677 = vmatpush3.msra.mxu0 %v6946_v27  ;;  %v1412_v4 = vrot.slane %v14422_v34, 1  ;;  %v14423_v27 = vld [vmem:[#allocation53_spill] sm:$0xff]  ;;  %v10901_v61 = vsel %vm14113_vm15, %v1410_v3, %v1411_v57  ;;  %vm10903_vm13 = vcmp.ne.s32.totalorder %v595_v26, 15  ;;  %v14425_v13 = vmov 0 }
  0xa0   : > { %8678 = vmatprep.subr.mxu0 %v6945_v15  ;;  %8752 = vmatprep.subr.mxu1 %v6964_v54  ;;  %14424 = vst [vmem:[#allocation52_spill] sm:$0xff] %v10901_v61  ;;  %v14426_v13 = vsel %vm10903_vm13, 4294967295, %v14425_v13  ;;  %v6962_v3 = vld [vmem:[%s13955_s1 + $0x290] sm:$0xff] }
  0xa1   : > { %8562 = vmatmul.mubr.msk.f32.gmra.mxu0 %vm10873_vm12, %v10860_v49  ;;  %8753 = vmatpush3.msra.mxu1 %v6964_v54  ;;  %14427 = vst [vmem:[#allocation73_spill] sm:$0xff] %v14426_v13  ;;  %v609_v54 = vand.u32 15, %v290_v33  ;;  %v14431_v33 = vrot.slane %v14422_v34, 7  ;;  %vm14432_vm12 = vcmp.lt.s32.totalorder %v9937_v25, 1  ;;  %v14435_v49 = vmov 0 }
  0xa2   : > { %8642 = vmatmul.mubr.f32.gmra.mxu1 %v14423_v27  ;;  %8564 = vmatprep.mubr.f32.mxu0 %v10884_v56  ;;  %v10913_v27 = vsel %vm14113_vm15, %v1411_v57, %v1412_v4  ;;  %v260_v56 = vadd.s32 8, %v9937_v25  ;;  %v10934_v57 = vsel %vm14113_vm15, %v1412_v4, %v14098_v39  ;;  %v7067_v39 = vld [vmem:[%s13955_s1 + $0x3e8] sm:$0xff] }
  0xa3   : > { %8644 = vmatprep.mubr.msk.f32.mxu1 %vm10425_vm14, %v14428_v43  ;;  %8679 = vmatpush3.msra.mxu0 %v6945_v15  ;;  %14430 = vst [vmem:[#allocation74_spill] sm:$0xff] %v10913_v27  ;;  %v10923_v26 = vsel %vm14432_vm12, %v14431_v33, %v321_v9  ;;  %v14433_v15 = vld [vmem:[#allocation56_spill] sm:$0xff]  ;;  %14434 = vst [vmem:[#allocation75_spill] sm:$0xff] %v10934_v57  ;;  %vm10936_vm14 = vcmp.ne.s32.totalorder %v609_v54, 15  ;;  %v7023_v54 = vld [vmem:[%s13955_s1 + $0x378] sm:$0xff] }
  0xa4   : > { %8754 = vmatprep.subr.mxu1 %v6963_v51  ;;  %8680 = vmatprep.subr.mxu0 %v6944_v23  ;;  %v14436_v49 = vsel %vm10936_vm14, 4294967295, %v14435_v49  ;;  %v6961_v33 = vld [vmem:[%s13955_s1 + $0x288] sm:$0xff]  ;;  %v399_v4 = vand.u32 15, %v260_v56  ;;  %v9779_v56 = vld [vmem:[%s9950_s29] sm:$0xff] }
  0xa5   : > { %8565 = vmatmul.mubr.msk.f32.gmra.mxu0 %vm10903_vm13, %v10901_v61  ;;  %8755 = vmatpush3.msra.mxu1 %v6963_v51  ;;  %14437 = vst [vmem:[#allocation76_spill] sm:$0xff] %v14436_v49  ;;  %v14438_v51 = vld [vmem:[#allocation55_spill] sm:$0xff]  ;;  %vm14442_vm13 = vcmp.lt.s32.totalorder %v9937_v25, 1 }
  0xa6   : > { %8645 = vmatmul.mubr.f32.gmra.mxu1 %v14433_v15  ;;  %8567 = vmatprep.mubr.f32.mxu0 %v10913_v27  ;;  %vm14439_vm12 = vnez %v14438_v51  ;;  %v14440_v15 = vld [vmem:[#allocation5_spill] sm:$0xff]  ;;  %v11038_v51 = vld [vmem:[%s9950_s29 + $0x48] sm:$0xff] }
  0xa7   : > { %8756 = vmatprep.subr.mxu1 %v6962_v3  ;;  %8647 = vmatprep.mubr.msk.f32.mxu1 %vm14439_vm12, %v10923_v26  ;;  %v14441_v43 = vrot.slane %v14440_v15, 7  ;;  %v6960_v15 = vld [vmem:[%s13955_s1 + $0x280] sm:$0xff]  ;;  %vm14455_vm12 = vcmp.lt.s32.totalorder %v9937_v25, 7  ;;  %v14465_v25 = vld [vmem:[#allocation9_spill] sm:$0xff] }
  0xa8   : > { %8681 = vmatpush3.msra.mxu0 %v6944_v23  ;;  %8757 = vmatpush3.msra.mxu1 %v6962_v3  ;;  %v9780_v23 = vld [vmem:[%s9950_s29 + $0x8] sm:$0xff] }
  0xa9   : > { %v10950_v13 = vsel %vm14442_vm13, %v321_v9, %v14441_v43  ;;  %8568 = vmatmul.mubr.msk.f32.gmra.mxu0 %vm10936_vm14, %v10934_v57  ;;  %8758 = vmatprep.subr.mxu1 %v6961_v33  ;;  %vm10963_vm13 = vcmp.ne.s32.totalorder %v399_v4, 15  ;;  %v14443_v43 = vmov 0  ;;  %v7022_v9 = vld [vmem:[%s13955_s1 + $0x370] sm:$0xff]  ;;  %v7021_v3 = vld [vmem:[%s13955_s1 + $0x368] sm:$0xff]  ;;  %v7069_v4 = vld [vmem:[%s13955_s1 + $0x3f8] sm:$0xff] }
  0xaa   : > { %8648 = vmatmul.mubr.f32.gmra.mxu1 %v10950_v13  ;;  %8682 = vmatprep.mubr.f32.mxu0 %v9779_v56  ;;  %v14444_v43 = vsel %vm10963_vm13, 4294967295, %v14443_v43  ;;  %v7019_v56 = vld [vmem:[%s13955_s1 + $0x358] sm:$0xff] }
  0xab   : > { %8759 = vmatpush3.msra.mxu1 %v6961_v33  ;;  %8810 = vmatprep.subr.mxu0 %v7023_v54  ;;  %14445 = vst [vmem:[#allocation5_spill] sm:$0xff] %v14444_v43  ;;  %v10979_v33 = vld [vmem:[%s9950_s29 + $0x10] sm:$0xff] }
  0xac   : > { %8760 = vmatprep.subr.mxu1 %v6960_v15  ;;  %8762 = vmatprep.mubr.f32.mxu1 %v10507_v47  ;;  %v10984_v47 = vld [vmem:[%s9950_s29 + $0x18] sm:$0xff] }
  0xad   : > { %8683 = vmatmul.mubr.f32.vlgmr.msra.gmra.mxu0 %v9780_v23  ;;  %8761 = vmatpush3.msra.mxu1 %v6960_v15  ;;  %v11002_v15 = vld [vmem:[%s9950_s29 + $0x28] sm:$0xff]  ;;  %v11015_v23 = vld [vmem:[%s9950_s29 + $0x30] sm:$0xff] }
  0xae   : > { %8811 = vmatpush3.msra.mxu0 %v7023_v54  ;;  %8763 = vmatmul.mubr.msk.f32.vlgmr.msra.gmra.mxu1 %vm10963_vm13, %v10517_v48  ;;  %v7020_v48 = vld [vmem:[%s13955_s1 + $0x360] sm:$0xff] }
  0xaf   : > { %8685 = vmatprep.mubr.f32.mxu0 %v10979_v33  ;;  %8812 = vmatprep.subr.mxu0 %v7022_v9  ;;  %v10997_v54 = vld [vmem:[%s9950_s29 + $0x20] sm:$0xff] }
  0xb0   : > { %8765 = vmatprep.mubr.f32.mxu1 %v10530_v52  ;;  %8813 = vmatpush3.msra.mxu0 %v7022_v9  ;;  %v7068_v9 = vld [vmem:[%s13955_s1 + $0x3f0] sm:$0xff] }
  0xb1   : > { %8686 = vmatmul.mubr.f32.gmra.mxu0 %v10984_v47  ;;  %8814 = vmatprep.subr.mxu0 %v7021_v3 }
  0xb2   : > { %8766 = vmatmul.mubr.msk.f32.gmra.mxu1 %vm10519_vm0, %v10550_v53  ;;  %8688 = vmatprep.mubr.f32.mxu0 %v10997_v54 }
  0xb3   : > { %8768 = vmatprep.mubr.f32.mxu1 %v10562_v42  ;;  %8815 = vmatpush3.msra.mxu0 %v7021_v3  ;;  %v11020_v3 = vld [vmem:[%s9950_s29 + $0x38] sm:$0xff] }
  0xb4   : > { %8816 = vmatprep.subr.mxu0 %v7020_v48  ;;  %8890 = vmatprep.subr.mxu1 %v7069_v4 }
  0xb5   : > { %8689 = vmatmul.mubr.f32.gmra.mxu0 %v11002_v15  ;;  %8891 = vmatpush3.msra.mxu1 %v7069_v4  ;;  %v7018_v4 = vld [vmem:[%s13955_s1 + $0x350] sm:$0xff] }
  0xb6   : > { %8769 = vmatmul.mubr.msk.f32.gmra.mxu1 %vm10552_vm1, %v10570_v36  ;;  %8691 = vmatprep.mubr.f32.mxu0 %v11015_v23 }
  0xb7   : > { %8771 = vmatprep.mubr.f32.mxu1 %v10591_v59  ;;  %8817 = vmatpush3.msra.mxu0 %v7020_v48  ;;  %v11033_v48 = vld [vmem:[%s9950_s29 + $0x40] sm:$0xff] }
  0xb8   : > { %8818 = vmatprep.subr.mxu0 %v7019_v56  ;;  %8892 = vmatprep.subr.mxu1 %v7068_v9 }
  0xb9   : > { %8692 = vmatmul.mubr.f32.gmra.mxu0 %v11020_v3  ;;  %8893 = vmatpush3.msra.mxu1 %v7068_v9  ;;  %v7017_v9 = vld [vmem:[%s13955_s1 + $0x348] sm:$0xff] }
  0xba   : > { %8772 = vmatmul.mubr.msk.f32.gmra.mxu1 %vm10580_vm2, %v10608_v19  ;;  %8694 = vmatprep.mubr.f32.mxu0 %v11033_v48 }
  0xbb   : > { %8774 = vmatprep.mubr.f32.mxu1 %v10620_v46  ;;  %8819 = vmatpush3.msra.mxu0 %v7019_v56  ;;  %v11051_v56 = vld [vmem:[%s9950_s29 + $0x50] sm:$0xff]  ;;  %v11056_v46 = vld [vmem:[%s9950_s29 + $0x58] sm:$0xff] }
  0xbc   : > { %8820 = vmatprep.subr.mxu0 %v7018_v4  ;;  %8894 = vmatprep.subr.mxu1 %v7067_v39 }
  0xbd   : > { %8695 = vmatmul.mubr.f32.gmra.mxu0 %v11038_v51  ;;  %8895 = vmatpush3.msra.mxu1 %v7067_v39  ;;  %v7016_v39 = vld [vmem:[%s13955_s1 + $0x340] sm:$0xff] }
  0xbe   : > { %8775 = vmatmul.mubr.msk.f32.gmra.mxu1 %vm10610_vm3, %v10637_v30  ;;  %8697 = vmatprep.mubr.f32.mxu0 %v11051_v56 }
  0xbf   : > { %8777 = vmatprep.mubr.f32.mxu1 %v10649_v44  ;;  %8821 = vmatpush3.msra.mxu0 %v7018_v4  ;;  %v11069_v4 = vld [vmem:[%s9950_s29 + $0x60] sm:$0xff]  ;;  %v11074_v44 = vld [vmem:[%s9950_s29 + $0x68] sm:$0xff] }
  0xc0   : > { %8822 = vmatprep.subr.mxu0 %v7017_v9  ;;  %8896 = vmatprep.subr.mxu1 %v7066_v8 }
  0xc1   : > { %8698 = vmatmul.mubr.f32.gmra.mxu0 %v11056_v46  ;;  %8897 = vmatpush3.msra.mxu1 %v7066_v8  ;;  %v7015_v8 = vld [vmem:[%s13955_s1 + $0x338] sm:$0xff] }
  0xc2   : > { %8778 = vmatmul.mubr.msk.f32.gmra.mxu1 %vm10639_vm4, %v10657_v62  ;;  %8700 = vmatprep.mubr.f32.mxu0 %v11069_v4 }
  0xc3   : > { %8780 = vmatprep.mubr.f32.mxu1 %v10678_v18  ;;  %8823 = vmatpush3.msra.mxu0 %v7017_v9  ;;  %v11087_v9 = vld [vmem:[%s9950_s29 + $0x70] sm:$0xff]  ;;  %v11092_v18 = vld [vmem:[%s9950_s29 + $0x78] sm:$0xff] }
  0xc4   : > { %8824 = vmatprep.subr.mxu0 %v7016_v39  ;;  %8898 = vmatprep.subr.mxu1 %v7065_v24 }
  0xc5   : > { %8701 = vmatmul.mubr.f32.gmra.mxu0 %v11074_v44  ;;  %8899 = vmatpush3.msra.mxu1 %v7065_v24  ;;  %v7014_v24 = vld [vmem:[%s13955_s1 + $0x330] sm:$0xff] }
  0xc6   : > { %8781 = vmatmul.mubr.msk.f32.gmra.mxu1 %vm10667_vm5, %v10695_v7  ;;  %8703 = vmatprep.mubr.f32.mxu0 %v11087_v9 }
  0xc7   : > { %8783 = vmatprep.mubr.f32.mxu1 %v10707_v10  ;;  %8825 = vmatpush3.msra.mxu0 %v7016_v39  ;;  %v11105_v39 = vld [vmem:[%s9950_s29 + $0x80] sm:$0xff] }
  0xc8   : > { %8826 = vmatprep.subr.mxu0 %v7015_v8  ;;  %8900 = vmatprep.subr.mxu1 %v7064_v22 }
  0xc9   : > { %8704 = vmatmul.mubr.f32.gmra.mxu0 %v11092_v18  ;;  %8901 = vmatpush3.msra.mxu1 %v7064_v22  ;;  %v7013_v22 = vld [vmem:[%s13955_s1 + $0x328] sm:$0xff] }
  0xca   : > { %8784 = vmatmul.mubr.msk.f32.gmra.mxu1 %vm10697_vm6, %v10724_v5  ;;  %8706 = vmatprep.mubr.f32.mxu0 %v11105_v39  ;;  %v11120_v5 = vld [vmem:[%s9950_s29 + $0x90] sm:$0xff] }
  0xcb   : > { %8786 = vmatprep.mubr.f32.mxu1 %v10736_v41  ;;  %8827 = vmatpush3.msra.mxu0 %v7015_v8  ;;  %v14446_v8 = vld [vmem:[#allocation39_spill] sm:$0xff] }
  0xcc   : > { %8828 = vmatprep.subr.mxu0 %v7014_v24  ;;  %8902 = vmatprep.subr.mxu1 %v7063_v50 }
  0xcd   : > { %8707 = vmatmul.mubr.f32.gmra.mxu0 %v10234_v29  ;;  %8903 = vmatpush3.msra.mxu1 %v7063_v50  ;;  %v7012_v29 = vld [vmem:[%s13955_s1 + $0x320] sm:$0xff]  ;;  %v7061_v50 = vld [vmem:[%s13955_s1 + $0x3b8] sm:$0xff] }
  0xce   : > { %8787 = vmatmul.mubr.msk.f32.gmra.mxu1 %vm10726_vm7, %v10744_v28  ;;  %8709 = vmatprep.mubr.f32.mxu0 %v11120_v5 }
  0xcf   : > { %8789 = vmatprep.mubr.f32.mxu1 %v10765_v0  ;;  %8829 = vmatpush3.msra.mxu0 %v7014_v24  ;;  %v9802_v24 = vld [vmem:[%s9950_s29 + $0xb0] sm:$0xff] }
  0xd0   : > { %8830 = vmatprep.subr.mxu0 %v7013_v22  ;;  %8904 = vmatprep.subr.mxu1 %v7062_v32 }
  0xd1   : > { %8710 = vmatmul.mubr.f32.gmra.mxu0 %v10266_v58  ;;  %8905 = vmatpush3.msra.mxu1 %v7062_v32  ;;  %v7011_v58 = vld [vmem:[%s13955_s1 + $0x318] sm:$0xff]  ;;  %v7060_v32 = vld [vmem:[%s13955_s1 + $0x3b0] sm:$0xff] }
  0xd2   : > { %8790 = vmatmul.mubr.msk.f32.gmra.mxu1 %vm10754_vm8, %v10782_v63  ;;  %8712 = vmatprep.mubr.f32.mxu0 %v14392_v40  ;;  %v7059_v40 = vld [vmem:[%s13955_s1 + $0x3a8] sm:$0xff] }
  0xd3   : > { %8792 = vmatprep.mubr.f32.mxu1 %v10794_v21  ;;  %8831 = vmatpush3.msra.mxu0 %v7013_v22  ;;  %v14449_v22 = vld [vmem:[#allocation72_spill] sm:$0xff] }
  0xd4   : > { %8832 = vmatprep.subr.mxu0 %v7012_v29  ;;  %8906 = vmatprep.subr.mxu1 %v7061_v50 }
  0xd5   : > { %8713 = vmatmul.mubr.f32.gmra.mxu0 %v14395_v11  ;;  %8907 = vmatpush3.msra.mxu1 %v7061_v50  ;;  %v7010_v11 = vld [vmem:[%s13955_s1 + $0x310] sm:$0xff]  ;;  %v14450_v50 = vld [vmem:[#allocation47_spill] sm:$0xff] }
  0xd6   : > { %8793 = vmatmul.mubr.msk.f32.gmra.mxu1 %vm10784_vm9, %v10802_v14  ;;  %8715 = vmatprep.mubr.f32.mxu0 %v14396_v2  ;;  %v7058_v2 = vld [vmem:[%s13955_s1 + $0x3a0] sm:$0xff] }
  0xd7   : > { %8795 = vmatprep.mubr.f32.mxu1 %v10823_v16  ;;  %8833 = vmatpush3.msra.mxu0 %v7012_v29 }
  0xd8   : > { %8834 = vmatprep.subr.mxu0 %v7011_v58  ;;  %8908 = vmatprep.subr.mxu1 %v7060_v32 }
  0xd9   : > { %8716 = vmatmul.mubr.f32.gmra.mxu0 %v14403_v12  ;;  %8909 = vmatpush3.msra.mxu1 %v7060_v32  ;;  %v7009_v12 = vld [vmem:[%s13955_s1 + $0x308] sm:$0xff]  ;;  %v7008_v32 = vld [vmem:[%s13955_s1 + $0x300] sm:$0xff] }
  0xda   : > { %8796 = vmatmul.mubr.msk.f32.gmra.mxu1 %vm10812_vm10, %v10840_v1  ;;  %8718 = vmatprep.mubr.f32.mxu0 %v10335_v17  ;;  %v14448_v17 = vld [vmem:[#allocation43_spill] sm:$0xff] }
  0xdb   : > { %8798 = vmatprep.mubr.f32.mxu1 %v10852_v31  ;;  %8835 = vmatpush3.msra.mxu0 %v7011_v58  ;;  %v7057_v58 = vld [vmem:[%s13955_s1 + $0x398] sm:$0xff] }
  0xdc   : > { %8836 = vmatprep.subr.mxu0 %v7010_v11  ;;  %8910 = vmatprep.subr.mxu1 %v7059_v40 }
  0xdd   : > { %8719 = vmatmul.mubr.f32.gmra.mxu0 %v10365_v6  ;;  %8911 = vmatpush3.msra.mxu1 %v7059_v40  ;;  %v11173_v6 = vld [vmem:[%s9950_s29 + $0xf8] sm:$0xff]  ;;  %v14451_v40 = vld [vmem:[#allocation71_spill] sm:$0xff] }
  0xde   : > { %8799 = vmatmul.mubr.msk.f32.gmra.mxu1 %vm10842_vm11, %v14446_v8  ;;  %8721 = vmatprep.mubr.f32.mxu0 %v14448_v17  ;;  %v1414_v29 = vrot.slane %v11173_v6, 1  ;;  %vm14452_vm15 = vnez %v14451_v40  ;;  %v14454_v17 = vrot.slane %v10869_v20, 1  ;;  %v14459_v40 = vld [vmem:[#allocation4_spill] sm:$0xff]  ;;  %v14520_v8 = vld [vmem:[#allocation53_spill] sm:$0xff] }
  0xdf   : > { %8801 = vmatprep.mubr.f32.mxu1 %v14449_v22  ;;  %8837 = vmatpush3.msra.mxu0 %v7010_v11  ;;  %v14453_v11 = vld [vmem:[#allocation48_spill] sm:$0xff] }
  0xe0   : > { %8838 = vmatprep.subr.mxu0 %v7009_v12  ;;  %8912 = vmatprep.subr.mxu1 %v7058_v2  ;;  %v14507_v22 = vld [vmem:[#allocation44_spill] sm:$0xff] }
  0xe1   : > { %8722 = vmatmul.mubr.f32.gmra.mxu0 %v14450_v50  ;;  %8913 = vmatpush3.msra.mxu1 %v7058_v2  ;;  %v7056_v2 = vld [vmem:[%s13955_s1 + $0x390] sm:$0xff]  ;;  %v11195_v50 = vsel %vm14455_vm12, %v14454_v17, %v1414_v29 }
  0xe2   : > { %8802 = vmatmul.mubr.msk.f32.gmra.mxu1 %vm14452_vm15, %v10901_v61  ;;  %8724 = vmatprep.mubr.f32.mxu0 %v14453_v11  ;;  %14456 = vst [vmem:[#allocation43_spill] sm:$0xff] %v11195_v50  ;;  %v14457_v11 = vld [vmem:[#allocation73_spill] sm:$0xff] }
  0xe3   : > { %8804 = vmatprep.mubr.f32.mxu1 %v10913_v27  ;;  %8839 = vmatpush3.msra.mxu0 %v7009_v12  ;;  %vm14458_vm15 = vnez %v14457_v11  ;;  %v7055_v12 = vld [vmem:[%s13955_s1 + $0x388] sm:$0xff]  ;;  %v14460_v27 = vrot.slane %v14459_v40, 1  ;;  %v14462_v40 = vld [vmem:[#allocation7_spill] sm:$0xff]  ;;  %v14467_v11 = vld [vmem:[#allocation6_spill] sm:$0xff] }
  0xe4   : > { %8914 = vmatprep.subr.mxu1 %v7057_v58  ;;  %8840 = vmatprep.subr.mxu0 %v7008_v32 }
  0xe5   : > { %8725 = vmatmul.mubr.f32.gmra.mxu0 %v14422_v34  ;;  %8915 = vmatpush3.msra.mxu1 %v7057_v58  ;;  %v11210_v17 = vsel %vm14455_vm12, %v1414_v29, %v14460_v27  ;;  %v7085_v34 = vld [vmem:[%s13955_s1 + $0x478] sm:$0xff]  ;;  %v7054_v58 = vld [vmem:[%s13955_s1 + $0x380] sm:$0xff]  ;;  %v14463_v27 = vld [vmem:[#allocation57_spill] sm:$0xff] }
  0xe6   : > { %8805 = vmatmul.mubr.msk.f32.gmra.mxu1 %vm14458_vm15, %v10934_v57  ;;  %8727 = vmatprep.mubr.f32.mxu0 %v10869_v20  ;;  %14461 = vst [vmem:[#allocation47_spill] sm:$0xff] %v11210_v17  ;;  %vm14464_vm12 = vnez %v14463_v27  ;;  %v7084_v29 = vld [vmem:[%s13955_s1 + $0x470] sm:$0xff]  ;;  %v14466_v27 = vld [vmem:[#allocation10_spill] sm:$0xff]  ;;  %v14501_v57 = vld [vmem:[#allocation40_spill] sm:$0xff] }
  0xe7   : > { %8916 = vmatprep.subr.mxu1 %v7056_v2  ;;  %8807 = vmatprep.mubr.f32.mxu1 %v11195_v50  ;;  %v14497_v50 = vld [vmem:[#allocation36_spill] sm:$0xff] }
  0xe8   : > { %8841 = vmatpush3.msra.mxu0 %v7008_v32  ;;  %8917 = vmatpush3.msra.mxu1 %v7056_v2 }
  0xe9   : > { %8728 = vmatmul.mubr.f32.gmra.mxu0 %v11173_v6  ;;  %8918 = vmatprep.subr.mxu1 %v7055_v12 }
  0xea   : > { %8808 = vmatmul.mubr.msk.f32.gmra.mxu1 %vm10936_vm14, %v11210_v17  ;;  %8842 = vmatprep.mubr.msk.f32.mxu0 %vm14464_vm12, %v14462_v40  ;;  %vm14468_vm14 = vnez %v14467_v11  ;;  %v14473_v11 = vld [vmem:[#allocation15_spill] sm:$0xff] }
  0xeb   : > { %8919 = vmatpush3.msra.mxu1 %v7055_v12  ;;  %8970 = vmatprep.subr.mxu0 %v7085_v34  ;;  %v7083_v12 = vld [vmem:[%s13955_s1 + $0x468] sm:$0xff] }
  0xec   : > { %8920 = vmatprep.subr.mxu1 %v7054_v58  ;;  %8922 = vmatprep.mubr.f32.mxu1 %v10979_v33 }
  0xed   : > { %v8364_v32 = vpop.f32.mrf.mxu0  ;;  %v8444_v2 = vpop.f32.mrf.mxu1  ;;  %8843 = vmatmul.mubr.f32.vlgmr.msra.gmra.mxu0 %v14465_v25  ;;  %8921 = vmatpush3.msra.mxu1 %v7054_v58  ;;  %v14469_v58 = vld [vmem:[#allocation12_spill] sm:$0xff] }
  0xee   : > { %v11230_v49 = vadd.f32 %v8444_v2, %v8364_v32  ;;  %8971 = vmatpush3.msra.mxu0 %v7085_v34  ;;  %8923 = vmatmul.mubr.f32.vlgmr.msra.gmra.mxu1 %v10984_v47  ;;  %v7082_v47 = vld [vmem:[%s13955_s1 + $0x460] sm:$0xff]  ;;  %v14471_v2 = vld [vmem:[#allocation8_spill] sm:$0xff] }
  0xef   : > { %v999_v40 = vpop.f32.mrf.mxu0  ;;  %v1224_v33 = vpop.f32.mrf.mxu1  ;;  %8845 = vmatprep.mubr.msk.f32.mxu0 %vm14468_vm14, %v14466_v27  ;;  %8972 = vmatprep.subr.mxu0 %v7084_v29  ;;  %v14470_v27 = vld [vmem:[#allocation13_spill] sm:$0xff]  ;;  %vm14472_vm12 = vnez %v14471_v2  ;;  %v14477_v2 = vld [vmem:[#allocation18_spill] sm:$0xff] }
  0xf0   : > { %v11239_v17 = vadd.f32 %v1224_v33, %v999_v40  ;;  %8925 = vmatprep.mubr.f32.mxu1 %v10997_v54  ;;  %8973 = vmatpush3.msra.mxu0 %v7084_v29 }
  0xf1   : > { %v8367_v25 = vpop.f32.mrf.mxu0  ;;  %v8447_v34 = vpop.f32.mrf.mxu1  ;;  %8846 = vmatmul.mubr.f32.gmra.mxu0 %v14469_v58  ;;  %8974 = vmatprep.subr.mxu0 %v7083_v12 }
  0xf2   : > { %v11246_v32 = vadd.f32 %v8447_v34, %v8367_v25  ;;  %8926 = vmatmul.mubr.f32.gmra.mxu1 %v11002_v15  ;;  %8848 = vmatprep.mubr.msk.f32.mxu0 %vm14472_vm12, %v14470_v27  ;;  %v7081_v15 = vld [vmem:[%s13955_s1 + $0x458] sm:$0xff]  ;;  %v14474_v34 = vld [vmem:[#allocation16_spill] sm:$0xff]  ;;  %v14475_v27 = vld [vmem:[#allocation11_spill] sm:$0xff] }
  0xf3   : > { %v1009_v40 = vpop.f32.mrf.mxu0  ;;  %v1234_v54 = vpop.f32.mrf.mxu1  ;;  %8928 = vmatprep.mubr.f32.mxu1 %v11015_v23  ;;  %8975 = vmatpush3.msra.mxu0 %v7083_v12  ;;  %vm14476_vm12 = vnez %v14475_v27  ;;  %v14481_v27 = vld [vmem:[#allocation21_spill] sm:$0xff] }
  0xf4   : > { %v11253_v29 = vadd.f32 %v1234_v54, %v1009_v40  ;;  %8976 = vmatprep.subr.mxu0 %v7082_v47 }
  0xf5   : > { %v8370_v33 = vpop.f32.mrf.mxu0  ;;  %v8450_v58 = vpop.f32.mrf.mxu1  ;;  %8849 = vmatmul.mubr.f32.gmra.mxu0 %v14473_v11 }
  0xf6   : > { %v11259_v25 = vadd.f32 %v8450_v58, %v8370_v33  ;;  %8929 = vmatmul.mubr.f32.gmra.mxu1 %v11020_v3  ;;  %8851 = vmatprep.mubr.msk.f32.mxu0 %vm14476_vm12, %v14474_v34  ;;  %v7080_v3 = vld [vmem:[%s13955_s1 + $0x450] sm:$0xff]  ;;  %v14478_v58 = vld [vmem:[#allocation20_spill] sm:$0xff]  ;;  %v14479_v34 = vld [vmem:[#allocation14_spill] sm:$0xff] }
  0xf7   : > { %v1019_v23 = vpop.f32.mrf.mxu0  ;;  %v1244_v12 = vpop.f32.mrf.mxu1  ;;  %8931 = vmatprep.mubr.f32.mxu1 %v11033_v48  ;;  %8977 = vmatpush3.msra.mxu0 %v7082_v47  ;;  %vm14480_vm12 = vnez %v14479_v34  ;;  %v14485_v34 = vld [vmem:[#allocation24_spill] sm:$0xff] }
  0xf8   : > { %v11266_v40 = vadd.f32 %v1244_v12, %v1019_v23  ;;  %8978 = vmatprep.subr.mxu0 %v7081_v15 }
  0xf9   : > { %v8373_v11 = vpop.f32.mrf.mxu0  ;;  %v8453_v54 = vpop.f32.mrf.mxu1  ;;  %8852 = vmatmul.mubr.f32.gmra.mxu0 %v14477_v2 }
  0xfa   : > { %v11272_v33 = vadd.f32 %v8453_v54, %v8373_v11  ;;  %8932 = vmatmul.mubr.f32.gmra.mxu1 %v11038_v51  ;;  %8854 = vmatprep.mubr.msk.f32.mxu0 %vm14480_vm12, %v14478_v58  ;;  %v7079_v51 = vld [vmem:[%s13955_s1 + $0x448] sm:$0xff]  ;;  %v14482_v54 = vld [vmem:[#allocation22_spill] sm:$0xff]  ;;  %v14483_v58 = vld [vmem:[#allocation17_spill] sm:$0xff] }
  0xfb   : > { %v1029_v48 = vpop.f32.mrf.mxu0  ;;  %v1254_v47 = vpop.f32.mrf.mxu1  ;;  %8934 = vmatprep.mubr.f32.mxu1 %v11051_v56  ;;  %8979 = vmatpush3.msra.mxu0 %v7081_v15  ;;  %vm14484_vm12 = vnez %v14483_v58  ;;  %v14489_v58 = vld [vmem:[#allocation27_spill] sm:$0xff] }
  0xfc   : > { %v11279_v23 = vadd.f32 %v1254_v47, %v1029_v48  ;;  %8980 = vmatprep.subr.mxu0 %v7080_v3 }
  0xfd   : > { %v8376_v2 = vpop.f32.mrf.mxu0  ;;  %v8456_v12 = vpop.f32.mrf.mxu1  ;;  %8855 = vmatmul.mubr.f32.gmra.mxu0 %v14481_v27 }
  0xfe   : > { %v11285_v11 = vadd.f32 %v8456_v12, %v8376_v2  ;;  %8935 = vmatmul.mubr.f32.gmra.mxu1 %v11056_v46  ;;  %8857 = vmatprep.mubr.msk.f32.mxu0 %vm14484_vm12, %v14482_v54  ;;  %v7078_v46 = vld [vmem:[%s13955_s1 + $0x440] sm:$0xff]  ;;  %v14486_v12 = vld [vmem:[#allocation25_spill] sm:$0xff] }
  0xff   : > { %v1039_v56 = vpop.f32.mrf.mxu0  ;;  %v1264_v15 = vpop.f32.mrf.mxu1  ;;  %8937 = vmatprep.mubr.f32.mxu1 %v11069_v4  ;;  %8981 = vmatpush3.msra.mxu0 %v7080_v3  ;;  %v14487_v54 = vld [vmem:[#allocation19_spill] sm:$0xff] }
 0x100   : > { %v11292_v48 = vadd.f32 %v1264_v15, %v1039_v56  ;;  %8982 = vmatprep.subr.mxu0 %v7079_v51  ;;  %vm14488_vm12 = vnez %v14487_v54  ;;  %v14493_v54 = vld [vmem:[#allocation31_spill] sm:$0xff] }
 0x101   : > { %v8379_v27 = vpop.f32.mrf.mxu0  ;;  %v8459_v47 = vpop.f32.mrf.mxu1  ;;  %8858 = vmatmul.mubr.f32.gmra.mxu0 %v14485_v34 }
 0x102   : > { %v11298_v2 = vadd.f32 %v8459_v47, %v8379_v27  ;;  %8938 = vmatmul.mubr.f32.gmra.mxu1 %v11074_v44  ;;  %8860 = vmatprep.mubr.msk.f32.mxu0 %vm14488_vm12, %v14486_v12  ;;  %v7077_v44 = vld [vmem:[%s13955_s1 + $0x438] sm:$0xff]  ;;  %v14490_v47 = vld [vmem:[#allocation28_spill] sm:$0xff]  ;;  %v14491_v12 = vld [vmem:[#allocation23_spill] sm:$0xff] }
 0x103   : > { %v1049_v4 = vpop.f32.mrf.mxu0  ;;  %v1274_v3 = vpop.f32.mrf.mxu1  ;;  %8940 = vmatprep.mubr.f32.mxu1 %v11087_v9  ;;  %8983 = vmatpush3.msra.mxu0 %v7079_v51  ;;  %vm14492_vm12 = vnez %v14491_v12  ;;  %v14495_v12 = vld [vmem:[#allocation26_spill] sm:$0xff] }
 0x104   : > { %v11305_v56 = vadd.f32 %v1274_v3, %v1049_v4  ;;  %8984 = vmatprep.subr.mxu0 %v7078_v46 }
 0x105   : > { %v8382_v34 = vpop.f32.mrf.mxu0  ;;  %v8462_v15 = vpop.f32.mrf.mxu1  ;;  %8861 = vmatmul.mubr.f32.gmra.mxu0 %v14489_v58 }
 0x106   : > { %v11311_v27 = vadd.f32 %v8462_v15, %v8382_v34  ;;  %8941 = vmatmul.mubr.f32.gmra.mxu1 %v11092_v18  ;;  %8863 = vmatprep.mubr.msk.f32.mxu0 %vm14492_vm12, %v14490_v47  ;;  %v7076_v18 = vld [vmem:[%s13955_s1 + $0x430] sm:$0xff]  ;;  %v9798_v15 = vld [vmem:[%s9950_s29 + $0x88] sm:$0xff]  ;;  %vm14496_vm12 = vnez %v14495_v12 }
 0x107   : > { %v1059_v9 = vpop.f32.mrf.mxu0  ;;  %v1284_v51 = vpop.f32.mrf.mxu1  ;;  %8943 = vmatprep.mubr.f32.mxu1 %v11105_v39  ;;  %8985 = vmatpush3.msra.mxu0 %v7078_v46  ;;  %v14494_v47 = vld [vmem:[#allocation32_spill] sm:$0xff]  ;;  %v14499_v12 = vld [vmem:[#allocation29_spill] sm:$0xff] }
 0x108   : > { %v11318_v4 = vadd.f32 %v1284_v51, %v1059_v9  ;;  %8986 = vmatprep.subr.mxu0 %v7077_v44 }
 0x109   : > { %v8385_v58 = vpop.f32.mrf.mxu0  ;;  %v8465_v3 = vpop.f32.mrf.mxu1  ;;  %8864 = vmatmul.mubr.f32.gmra.mxu0 %v14493_v54 }
 0x10a   : > { %v11324_v34 = vadd.f32 %v8465_v3, %v8385_v58  ;;  %8944 = vmatmul.mubr.f32.gmra.mxu1 %v9798_v15  ;;  %8866 = vmatprep.mubr.msk.f32.mxu0 %vm14496_vm12, %v14494_v47  ;;  %v7075_v58 = vld [vmem:[%s13955_s1 + $0x428] sm:$0xff]  ;;  %v9799_v15 = vld [vmem:[%s9950_s29 + $0x98] sm:$0xff]  ;;  %v14498_v47 = vld [vmem:[#allocation37_spill] sm:$0xff]  ;;  %vm14500_vm12 = vnez %v14499_v12 }
 0x10b   : > { %v1069_v39 = vpop.f32.mrf.mxu0  ;;  %v1294_v46 = vpop.f32.mrf.mxu1  ;;  %8946 = vmatprep.mubr.f32.mxu1 %v11120_v5  ;;  %8987 = vmatpush3.msra.mxu0 %v7077_v44  ;;  %v14503_v12 = vld [vmem:[#allocation33_spill] sm:$0xff] }
 0x10c   : > { %v11331_v54 = vadd.f32 %v1294_v46, %v1069_v39  ;;  %8988 = vmatprep.subr.mxu0 %v7076_v18  ;;  %v9800_v39 = vld [vmem:[%s9950_s29 + $0xa0] sm:$0xff] }
 0x10d   : > { %v8388_v9 = vpop.f32.mrf.mxu0  ;;  %v8468_v51 = vpop.f32.mrf.mxu1  ;;  %8867 = vmatmul.mubr.f32.gmra.mxu0 %v14497_v50 }
 0x10e   : > { %v11337_v3 = vadd.f32 %v8468_v51, %v8388_v9  ;;  %8947 = vmatmul.mubr.f32.gmra.mxu1 %v9799_v15  ;;  %8869 = vmatprep.mubr.msk.f32.mxu0 %vm14500_vm12, %v14498_v47  ;;  %v7074_v9 = vld [vmem:[%s13955_s1 + $0x420] sm:$0xff]  ;;  %v9801_v15 = vld [vmem:[%s9950_s29 + $0xa8] sm:$0xff]  ;;  %v14502_v47 = vld [vmem:[#allocation41_spill] sm:$0xff]  ;;  %vm14504_vm12 = vnez %v14503_v12 }
 0x10f   : > { %v11343_v5 = vpop.f32.mrf.mxu0  ;;  %v11345_v44 = vpop.f32.mrf.mxu1  ;;  %8949 = vmatprep.mubr.f32.mxu1 %v9800_v39  ;;  %8989 = vmatpush3.msra.mxu0 %v7076_v18  ;;  %v14509_v12 = vld [vmem:[#allocation38_spill] sm:$0xff] }
 0x110   : > { %8990 = vmatprep.subr.mxu0 %v7075_v58 }
 0x111   : > { %v8391_v50 = vpop.f32.mrf.mxu0  ;;  %v8471_v46 = vpop.f32.mrf.mxu1  ;;  %8870 = vmatmul.mubr.f32.gmra.mxu0 %v14501_v57 }
 0x112   : > { %v11352_v51 = vadd.f32 %v8471_v46, %v8391_v50  ;;  %8950 = vmatmul.mubr.f32.gmra.mxu1 %v9801_v15  ;;  %8872 = vmatprep.mubr.msk.f32.mxu0 %vm14504_vm12, %v14502_v47  ;;  %v7073_v50 = vld [vmem:[%s13955_s1 + $0x418] sm:$0xff]  ;;  %v14508_v47 = vld [vmem:[#allocation45_spill] sm:$0xff]  ;;  %vm14510_vm12 = vnez %v14509_v12 }
 0x113   : > { %v11358_v39 = vpop.f32.mrf.mxu0  ;;  %v11360_v18 = vpop.f32.mrf.mxu1  ;;  %8952 = vmatprep.mubr.f32.mxu1 %v9802_v24  ;;  %8991 = vmatpush3.msra.mxu0 %v7075_v58  ;;  %v9803_v15 = vld [vmem:[%s9950_s29 + $0xb8] sm:$0xff] }
 0x114   : > { %14505 = vst [vmem:[#allocation48_spill] sm:$0xff] %v11358_v39  ;;  %14506 = vst [vmem:[#allocation4_spill] sm:$0xff] %v11360_v18  ;;  %8992 = vmatprep.subr.mxu0 %v7074_v9  ;;  %v9804_v18 = vld [vmem:[%s9950_s29 + $0xc0] sm:$0xff]  ;;  %v14516_v12 = vld [vmem:[#allocation42_spill] sm:$0xff] }
 0x115   : > { %v8394_v57 = vpop.f32.mrf.mxu0  ;;  %v8474_v61 = vpop.f32.mrf.mxu1  ;;  %8873 = vmatmul.mubr.f32.gmra.mxu0 %v14507_v22 }
 0x116   : > { %v11367_v46 = vadd.f32 %v8474_v61, %v8394_v57  ;;  %8953 = vmatmul.mubr.f32.gmra.mxu1 %v9803_v15  ;;  %8875 = vmatprep.mubr.msk.f32.mxu0 %vm14510_vm12, %v14508_v47  ;;  %v7072_v61 = vld [vmem:[%s13955_s1 + $0x410] sm:$0xff]  ;;  %v9805_v15 = vld [vmem:[%s9950_s29 + $0xc8] sm:$0xff]  ;;  %v14515_v47 = vld [vmem:[#allocation50_spill] sm:$0xff]  ;;  %vm14517_vm12 = vnez %v14516_v12 }
 0x117   : > { %v11373_v24 = vpop.f32.mrf.mxu0  ;;  %v11375_v58 = vpop.f32.mrf.mxu1  ;;  %8955 = vmatprep.mubr.f32.mxu1 %v9804_v18  ;;  %8993 = vmatpush3.msra.mxu0 %v7074_v9  ;;  %v14522_v12 = vld [vmem:[#allocation46_spill] sm:$0xff] }
 0x118   : > { %14511 = vst [vmem:[#allocation7_spill] sm:$0xff] %v11373_v24  ;;  %14512 = vst [vmem:[#allocation9_spill] sm:$0xff] %v11375_v58  ;;  %8994 = vmatprep.subr.mxu0 %v7073_v50  ;;  %v9806_v58 = vld [vmem:[%s9950_s29 + $0xd0] sm:$0xff] }
 0x119   : > { %v8397_v22 = vpop.f32.mrf.mxu0  ;;  %v8477_v39 = vpop.f32.mrf.mxu1  ;;  %8876 = vmatmul.mubr.f32.gmra.mxu0 %v14513_v35 }
 0x11a   : > { %v11382_v57 = vadd.f32 %v8477_v39, %v8397_v22  ;;  %8956 = vmatmul.mubr.f32.gmra.mxu1 %v9805_v15  ;;  %8878 = vmatprep.mubr.msk.f32.mxu0 %vm14517_vm12, %v14515_v47  ;;  %v7071_v39 = vld [vmem:[%s13955_s1 + $0x408] sm:$0xff]  ;;  %v9807_v15 = vld [vmem:[%s9950_s29 + $0xd8] sm:$0xff]  ;;  %vm14523_vm12 = vnez %v14522_v12 }
 0x11b   : > { %v11388_v18 = vpop.f32.mrf.mxu0  ;;  %v11390_v9 = vpop.f32.mrf.mxu1  ;;  %8958 = vmatprep.mubr.f32.mxu1 %v9806_v58  ;;  %8995 = vmatpush3.msra.mxu0 %v7073_v50  ;;  %v14521_v47 = vld [vmem:[#allocation54_spill] sm:$0xff] }
 0x11c   : > { %14514 = vst [vmem:[#allocation10_spill] sm:$0xff] %v11382_v57  ;;  %14518 = vst [vmem:[#allocation12_spill] sm:$0xff] %v11388_v18  ;;  %8996 = vmatprep.subr.mxu0 %v7072_v61  ;;  %v14526_v57 = vld [vmem:[#allocation56_spill] sm:$0xff] }
 0x11d   : > { %14519 = vst [vmem:[#allocation13_spill] sm:$0xff] %v11390_v9  ;;  %v8400_v35 = vpop.f32.mrf.mxu0  ;;  %v8480_v24 = vpop.f32.mrf.mxu1  ;;  %8879 = vmatmul.mubr.f32.gmra.mxu0 %v14520_v8  ;;  %v9808_v9 = vld [vmem:[%s9950_s29 + $0xe0] sm:$0xff] }
 0x11e   : > { %v11397_v22 = vadd.f32 %v8480_v24, %v8400_v35  ;;  %8959 = vmatmul.mubr.f32.gmra.mxu1 %v9807_v15  ;;  %8881 = vmatprep.mubr.msk.f32.mxu0 %vm14523_vm12, %v14521_v47  ;;  %v7070_v24 = vld [vmem:[%s13955_s1 + $0x400] sm:$0xff]  ;;  %v9809_v15 = vld [vmem:[%s9950_s29 + $0xe8] sm:$0xff] }
 0x11f   : > { %v11403_v58 = vpop.f32.mrf.mxu0  ;;  %v11405_v50 = vpop.f32.mrf.mxu1  ;;  %8961 = vmatprep.mubr.f32.mxu1 %v9808_v9  ;;  %8997 = vmatpush3.msra.mxu0 %v7072_v61  ;;  %v14527_v47 = vld [vmem:[#allocation51_spill] sm:$0xff] }
 0x120   : > { %14524 = vst [vmem:[#allocation15_spill] sm:$0xff] %v11403_v58  ;;  %14525 = vst [vmem:[#allocation16_spill] sm:$0xff] %v11405_v50  ;;  %8998 = vmatprep.subr.mxu0 %v7071_v39  ;;  %vm14528_vm12 = vnez %v14527_v47 }
 0x121   : > { %v8403_v8 = vpop.f32.mrf.mxu0  ;;  %v8483_v18 = vpop.f32.mrf.mxu1  ;;  %8882 = vmatmul.mubr.f32.gmra.mxu0 %v14526_v57 }
 0x122   : > { %v11412_v35 = vadd.f32 %v8483_v18, %v8403_v8  ;;  %8962 = vmatmul.mubr.f32.gmra.mxu1 %v9809_v15  ;;  %8884 = vmatprep.mubr.msk.f32.mxu0 %vm14528_vm12, %v10923_v26  ;;  %v14531_v8 = vmov 0.0  }
 0x123   : > { %v11418_v12 = vpop.f32.mrf.mxu0  ;;  %v11420_v61 = vpop.f32.mrf.mxu1  ;;  %8964 = vmatprep.mubr.f32.mxu1 %v10869_v20  ;;  %8999 = vmatpush3.msra.mxu0 %v7071_v39 }
 0x124   : > { %14529 = vst [vmem:[#allocation18_spill] sm:$0xff] %v11418_v12  ;;  %14530 = vst [vmem:[#allocation20_spill] sm:$0xff] %v11420_v61  ;;  %9000 = vmatprep.subr.mxu0 %v7070_v24 }
 0x125   : > { %v8406_v57 = vpop.f32.mrf.mxu0  ;;  %v8486_v9 = vpop.f32.mrf.mxu1  ;;  %8885 = vmatmul.mubr.f32.gmra.mxu0 %v10950_v13 }
 0x126   : > { %v11424_v18 = vadd.f32 %v8486_v9, %v8406_v57  ;;  %8965 = vmatmul.mubr.f32.gmra.mxu1 %v11173_v6  ;;  %8887 = vmatprep.mubr.f32.mxu0 %v14531_v8 }
 0x127   : > { %v11428_v15 = vpop.f32.mrf.mxu0  ;;  %v11430_v26 = vpop.f32.mrf.mxu1  ;;  %8967 = vmatprep.mubr.f32.mxu1 %v14531_v8  ;;  %9001 = vmatpush3.msra.mxu0 %v7070_v24 }
 0x128   : > { %14532 = vst [vmem:[#allocation21_spill] sm:$0xff] %v11428_v15  ;;  %14533 = vst [vmem:[#allocation22_spill] sm:$0xff] %v11430_v26 }
 0x129   : > { %v8409_v20 = vpop.f32.mrf.mxu0  ;;  %v8489_v39 = vpop.f32.mrf.mxu1  ;;  %8888 = vmatmul.mubr.f32.gmra.mxu0 %v14531_v8 }
 0x12a   : > { %v11434_v47 = vadd.f32 %v8489_v39, %v8409_v20  ;;  %8968 = vmatmul.mubr.f32.gmra.mxu1 %v14531_v8  ;;  %9002 = vmatprep.mubr.f32.mxu0 %v10530_v52 }
 0x12b   : > { %v11438_v13 = vpop.f32.mrf.mxu0  ;;  %9082 = vmatprep.mubr.f32.mxu1 %v14531_v8  ;;  %v11441_v6 = vpop.f32.mrf.mxu1 }
 0x12c   : > { %14534 = vst [vmem:[#allocation24_spill] sm:$0xff] %v11438_v13  ;;  %14535 = vst [vmem:[#allocation25_spill] sm:$0xff] %v11441_v6 }
 0x12d   : > { %v8524_v57 = vpop.f32.mrf.mxu0  ;;  %9003 = vmatmul.mubr.msk.f32.vlgmr.msra.gmra.mxu0 %vm10963_vm13, %v10550_v53 }
 0x12e   : > { %v1787_v24 = vadd.f32 %v8524_v57, %v11230_v49  ;;  %v8604_v9 = vpop.f32.mrf.mxu1  ;;  %9005 = vmatprep.mubr.f32.mxu0 %v10562_v42 }
 0x12f   : > { %v1627_v20 = vpop.f32.mrf.mxu0 }
 0x130   : > { %v11449_v39 = vadd.f32 %v1627_v20, %v11239_v17  ;;  %v11451_v52 = vadd.f32 %v8604_v9, %v1787_v24  ;;  %v11453_v13 = vpop.f32.mrf.mxu1  ;;  %v7132_v24 = vld [vmem:[%s13957_s3 + $0xf8] sm:$0xff] }
 0x131   : > { %v8527_v26 = vpop.f32.mrf.mxu0  ;;  %9006 = vmatmul.mubr.msk.f32.gmra.mxu0 %vm10519_vm0, %v10570_v36  ;;  %9050 = vmatprep.subr.mxu1 %v7132_v24 }
 0x132   : > { %v1789_v53 = vadd.f32 %v8527_v26, %v11246_v32  ;;  %v8607_v43 = vpop.f32.mrf.mxu1  ;;  %9008 = vmatprep.mubr.f32.mxu0 %v10591_v59  ;;  %v14536_v32 = vld [vmem:[#allocation62_spill] sm:$0xff]  ;;  %9051 = vmatpush3.msra.mxu1 %v7132_v24 }
 0x133   : > { %v1637_v49 = vpop.f32.mrf.mxu0 }
 0x134   : > { %v11461_v42 = vadd.f32 %v1637_v49, %v11253_v29  ;;  %v11463_v17 = vadd.f32 %v8607_v43, %v1789_v53  ;;  %v11465_v57 = vpop.f32.mrf.mxu1  ;;  %v7131_v53 = vld [vmem:[%s13957_s3 + $0xf0] sm:$0xff] }
 0x135   : > { %v8530_v9 = vpop.f32.mrf.mxu0  ;;  %9009 = vmatmul.mubr.msk.f32.gmra.mxu0 %vm10552_vm1, %v10608_v19  ;;  %9052 = vmatprep.subr.mxu1 %v7131_v53 }
 0x136   : > { %v1791_v36 = vadd.f32 %v8530_v9, %v11259_v25  ;;  %v8610_v59 = vpop.f32.mrf.mxu1  ;;  %9011 = vmatprep.mubr.f32.mxu0 %v14536_v32  ;;  %v14538_v9 = vld [vmem:[#allocation64_spill] sm:$0xff]  ;;  %9053 = vmatpush3.msra.mxu1 %v7131_v53 }
 0x137   : > { %v1647_v43 = vpop.f32.mrf.mxu0 }
 0x138   : > { %v11476_v29 = vadd.f32 %v1647_v43, %v11266_v40  ;;  %v11478_v26 = vadd.f32 %v8610_v59, %v1791_v36  ;;  %v11480_v20 = vpop.f32.mrf.mxu1  ;;  %v7130_v43 = vld [vmem:[%s13957_s3 + $0xe8] sm:$0xff] }
 0x139   : > { %v8533_v19 = vpop.f32.mrf.mxu0  ;;  %9012 = vmatmul.mubr.msk.f32.gmra.mxu0 %vm10580_vm2, %v10637_v30  ;;  %9054 = vmatprep.subr.mxu1 %v7130_v43 }
 0x13a   : > { %v1793_v25 = vadd.f32 %v8533_v19, %v11272_v33  ;;  %v8613_v24 = vpop.f32.mrf.mxu1  ;;  %9014 = vmatprep.mubr.f32.mxu0 %v14538_v9  ;;  %v14540_v19 = vld [vmem:[#allocation66_spill] sm:$0xff]  ;;  %9055 = vmatpush3.msra.mxu1 %v7130_v43 }
 0x13b   : > { %v1657_v40 = vpop.f32.mrf.mxu0 }
 0x13c   : > { %v11491_v36 = vadd.f32 %v1657_v40, %v11279_v23  ;;  %v11493_v59 = vadd.f32 %v8613_v24, %v1793_v25  ;;  %v11495_v32 = vpop.f32.mrf.mxu1  ;;  %v7129_v40 = vld [vmem:[%s13957_s3 + $0xe0] sm:$0xff] }
 0x13d   : > { %v8536_v30 = vpop.f32.mrf.mxu0  ;;  %9015 = vmatmul.mubr.msk.f32.gmra.mxu0 %vm10610_vm3, %v10657_v62  ;;  %9056 = vmatprep.subr.mxu1 %v7129_v40 }
 0x13e   : > { %v1795_v33 = vadd.f32 %v8536_v30, %v11285_v11  ;;  %v8616_v53 = vpop.f32.mrf.mxu1  ;;  %9017 = vmatprep.mubr.f32.mxu0 %v14540_v19  ;;  %9057 = vmatpush3.msra.mxu1 %v7129_v40  ;;  %v7128_v19 = vld [vmem:[%s13957_s3 + $0xd8] sm:$0xff] }
 0x13f   : > { %v1667_v23 = vpop.f32.mrf.mxu0  ;;  %9058 = vmatprep.subr.mxu1 %v7128_v19 }
 0x140   : > { %v11506_v25 = vadd.f32 %v1667_v23, %v11292_v48  ;;  %v11508_v24 = vadd.f32 %v8616_v53, %v1795_v33  ;;  %v11510_v9 = vpop.f32.mrf.mxu1  ;;  %v14542_v23 = vld [vmem:[#allocation68_spill] sm:$0xff]  ;;  %9059 = vmatpush3.msra.mxu1 %v7128_v19 }
 0x141   : > { %v8539_v62 = vpop.f32.mrf.mxu0  ;;  %9018 = vmatmul.mubr.msk.f32.gmra.mxu0 %vm10639_vm4, %v10695_v7 }
 0x142   : > { %v1797_v11 = vadd.f32 %v8539_v62, %v11298_v2  ;;  %v8619_v43 = vpop.f32.mrf.mxu1  ;;  %9020 = vmatprep.mubr.f32.mxu0 %v10707_v10 }
 0x143   : > { %v1677_v48 = vpop.f32.mrf.mxu0 }
 0x144   : > { %v11521_v30 = vadd.f32 %v1677_v48, %v11305_v56  ;;  %v11523_v33 = vadd.f32 %v8619_v43, %v1797_v11  ;;  %v11525_v53 = vpop.f32.mrf.mxu1  ;;  %v7127_v43 = vld [vmem:[%s13957_s3 + $0xd0] sm:$0xff] }
 0x145   : > { %v8542_v7 = vpop.f32.mrf.mxu0  ;;  %9021 = vmatmul.mubr.msk.f32.gmra.mxu0 %vm10667_vm5, %v14542_v23  ;;  %9060 = vmatprep.subr.mxu1 %v7127_v43 }
 0x146   : > { %v1799_v10 = vadd.f32 %v8542_v7, %v11311_v27  ;;  %v8622_v2 = vpop.f32.mrf.mxu1  ;;  %9023 = vmatprep.mubr.f32.mxu0 %v10736_v41  ;;  %9061 = vmatpush3.msra.mxu1 %v7127_v43 }
 0x147   : > { %v1687_v56 = vpop.f32.mrf.mxu0 }
 0x148   : > { %v11536_v40 = vadd.f32 %v1687_v56, %v11318_v4  ;;  %v11538_v62 = vadd.f32 %v8622_v2, %v1799_v10  ;;  %v11540_v11 = vpop.f32.mrf.mxu1  ;;  %v7126_v2 = vld [vmem:[%s13957_s3 + $0xc8] sm:$0xff] }
 0x149   : > { %v8545_v48 = vpop.f32.mrf.mxu0  ;;  %9024 = vmatmul.mubr.msk.f32.gmra.mxu0 %vm10697_vm6, %v10744_v28  ;;  %9062 = vmatprep.subr.mxu1 %v7126_v2 }
 0x14a   : > { %v1801_v41 = vadd.f32 %v8545_v48, %v11324_v34  ;;  %v8625_v27 = vpop.f32.mrf.mxu1  ;;  %9026 = vmatprep.mubr.f32.mxu0 %v10765_v0  ;;  %v1305_v0 = vadd.f32 %v11345_v44, %v11343_v5  ;;  %9063 = vmatpush3.msra.mxu1 %v7126_v2  ;;  %v3964_v5 = vld [vmem:[%s13957_s3 + $0x78] sm:$0xff] }
 0x14b   : > { %v1697_v4 = vpop.f32.mrf.mxu0  ;;  %9130 = vmatprep.subr.mxu0 %v3964_v5 }
 0x14c   : > { %v11551_v19 = vadd.f32 %v1697_v4, %v11331_v54  ;;  %v11553_v7 = vadd.f32 %v8625_v27, %v1801_v41  ;;  %v11555_v10 = vpop.f32.mrf.mxu1  ;;  %9131 = vmatpush3.msra.mxu0 %v3964_v5  ;;  %v14553_v5 = vld [vmem:[#allocation39_spill] sm:$0xff] }
 0x14d   : > { %14546 = vst [vmem:[#allocation28_spill] sm:$0xff] %v11555_v10  ;;  %v8548_v28 = vpop.f32.mrf.mxu0  ;;  %9027 = vmatmul.mubr.msk.f32.gmra.mxu0 %vm10726_vm7, %v10782_v63  ;;  %v7125_v63 = vld [vmem:[%s13957_s3 + $0xc0] sm:$0xff] }
 0x14e   : > { %14545 = vst [vmem:[#allocation27_spill] sm:$0xff] %v11551_v19  ;;  %v1803_v34 = vadd.f32 %v8548_v28, %v11337_v3  ;;  %v8628_v54 = vpop.f32.mrf.mxu1  ;;  %9029 = vmatprep.mubr.f32.mxu0 %v10794_v21  ;;  %9064 = vmatprep.subr.mxu1 %v7125_v63  ;;  %v7124_v28 = vld [vmem:[%s13957_s3 + $0xb8] sm:$0xff] }
 0x14f   : > { %v1707_v56 = vpop.f32.mrf.mxu0  ;;  %9065 = vmatpush3.msra.mxu1 %v7125_v63 }
 0x150   : > { %v11567_v43 = vadd.f32 %v1707_v56, %v1305_v0  ;;  %v11569_v48 = vadd.f32 %v8628_v54, %v1803_v34  ;;  %v11571_v41 = vpop.f32.mrf.mxu1  ;;  %9066 = vmatprep.subr.mxu1 %v7124_v28  ;;  %v3962_v34 = vld [vmem:[%s13957_s3 + $0x68] sm:$0xff] }
 0x151   : > { %14548 = vst [vmem:[#allocation32_spill] sm:$0xff] %v11571_v41  ;;  %v8551_v3 = vpop.f32.mrf.mxu0  ;;  %9030 = vmatmul.mubr.msk.f32.gmra.mxu0 %vm10754_vm8, %v10802_v14  ;;  %v3963_v14 = vld [vmem:[%s13957_s3 + $0x70] sm:$0xff]  ;;  %9067 = vmatpush3.msra.mxu1 %v7124_v28  ;;  %v7220_v41 = vld [vmem:[%s13957_s3 + $0x1d8] sm:$0xff] }
 0x152   : > { %14547 = vst [vmem:[#allocation31_spill] sm:$0xff] %v11567_v43  ;;  %v1805_v21 = vadd.f32 %v8551_v3, %v11352_v51  ;;  %v8631_v44 = vpop.f32.mrf.mxu1  ;;  %9032 = vmatprep.mubr.f32.mxu0 %v10823_v16  ;;  %9132 = vmatprep.subr.mxu0 %v3963_v14  ;;  %v3961_v3 = vld [vmem:[%s13957_s3 + $0x60] sm:$0xff] }
 0x153   : > { %v11584_v27 = vpop.f32.mrf.mxu0  ;;  %9133 = vmatpush3.msra.mxu0 %v3963_v14 }
 0x154   : > { %14549 = vst [vmem:[#allocation36_spill] sm:$0xff] %v11584_v27  ;;  %v11586_v4 = vadd.f32 %v8631_v44, %v1805_v21  ;;  %v11588_v2 = vpop.f32.mrf.mxu1  ;;  %9134 = vmatprep.subr.mxu0 %v3962_v34  ;;  %v14555_v21 = vld [vmem:[#allocation10_spill] sm:$0xff] }
 0x155   : > { %14550 = vst [vmem:[#allocation37_spill] sm:$0xff] %v11588_v2  ;;  %v8554_v51 = vpop.f32.mrf.mxu0  ;;  %9033 = vmatmul.mubr.msk.f32.gmra.mxu0 %vm10784_vm9, %v10840_v1  ;;  %v7123_v1 = vld [vmem:[%s13957_s3 + $0xb0] sm:$0xff] }
 0x156   : > { %v1807_v16 = vadd.f32 %v8554_v51, %v11367_v46  ;;  %v8634_v0 = vpop.f32.mrf.mxu1  ;;  %9035 = vmatprep.mubr.f32.mxu0 %v10852_v31  ;;  %v14556_v51 = vld [vmem:[#allocation72_spill] sm:$0xff]  ;;  %9068 = vmatprep.subr.mxu1 %v7123_v1 }
 0x157   : > { %v11604_v54 = vpop.f32.mrf.mxu0  ;;  %9135 = vmatpush3.msra.mxu0 %v3962_v34  ;;  %9069 = vmatpush3.msra.mxu1 %v7123_v1 }
 0x158   : > { %14551 = vst [vmem:[#allocation40_spill] sm:$0xff] %v11604_v54  ;;  %v11606_v56 = vadd.f32 %v8634_v0, %v1807_v16  ;;  %v11608_v63 = vpop.f32.mrf.mxu1  ;;  %9136 = vmatprep.subr.mxu0 %v3961_v3 }
 0x159   : > { %14552 = vst [vmem:[#allocation41_spill] sm:$0xff] %v11608_v63  ;;  %v8557_v46 = vpop.f32.mrf.mxu0  ;;  %9036 = vmatmul.mubr.msk.f32.gmra.mxu0 %vm10812_vm10, %v14553_v5  ;;  %v3960_v5 = vld [vmem:[%s13957_s3 + $0x58] sm:$0xff] }
 0x15a   : > { %v1809_v44 = vadd.f32 %v8557_v46, %v14555_v21  ;;  %v8637_v28 = vpop.f32.mrf.mxu1  ;;  %9038 = vmatprep.mubr.f32.mxu0 %v14556_v51  ;;  %v7122_v46 = vld [vmem:[%s13957_s3 + $0xa8] sm:$0xff]  ;;  %9137 = vmatpush3.msra.mxu0 %v3961_v3  ;;  %v7121_v3 = vld [vmem:[%s13957_s3 + $0xa0] sm:$0xff] }
 0x15b   : > { %v11621_v14 = vpop.f32.mrf.mxu0  ;;  %v14559_v51 = vld [vmem:[#allocation52_spill] sm:$0xff]  ;;  %9070 = vmatprep.subr.mxu1 %v7122_v46  ;;  %9138 = vmatprep.subr.mxu0 %v3960_v5 }
 0x15c   : > { %14557 = vst [vmem:[#allocation44_spill] sm:$0xff] %v11621_v14  ;;  %v11623_v16 = vadd.f32 %v8637_v28, %v1809_v44  ;;  %v11625_v0 = vpop.f32.mrf.mxu1  ;;  %v14561_v44 = vld [vmem:[#allocation74_spill] sm:$0xff]  ;;  %v3959_v28 = vld [vmem:[%s13957_s3 + $0x50] sm:$0xff]  ;;  %9071 = vmatpush3.msra.mxu1 %v7122_v46  ;;  %9139 = vmatpush3.msra.mxu0 %v3960_v5  ;;  %v3957_v5 = vld [vmem:[%s13957_s3 + $0x40] sm:$0xff] }
 0x15d   : > { %14558 = vst [vmem:[#allocation45_spill] sm:$0xff] %v11625_v0  ;;  %v8560_v21 = vpop.f32.mrf.mxu0  ;;  %9039 = vmatmul.mubr.msk.f32.gmra.mxu0 %vm10842_vm11, %v14559_v51  ;;  %v14564_v51 = vld [vmem:[#allocation75_spill] sm:$0xff]  ;;  %9140 = vmatprep.subr.mxu0 %v3959_v28 }
 0x15e   : > { %v1811_v34 = vadd.f32 %v8560_v21, %v11397_v22  ;;  %v8640_v1 = vpop.f32.mrf.mxu1  ;;  %9041 = vmatprep.mubr.f32.mxu0 %v14561_v44  ;;  %v3958_v22 = vld [vmem:[%s13957_s3 + $0x48] sm:$0xff]  ;;  %v14565_v44 = vld [vmem:[#allocation71_spill] sm:$0xff]  ;;  %9141 = vmatpush3.msra.mxu0 %v3959_v28  ;;  %v7120_v28 = vld [vmem:[%s13957_s3 + $0x98] sm:$0xff] }
 0x15f   : > { %v11641_v38 = vpop.f32.mrf.mxu0  ;;  %vm14566_vm13 = vnez %v14565_v44  ;;  %9142 = vmatprep.subr.mxu0 %v3958_v22  ;;  %9072 = vmatprep.subr.mxu1 %v7121_v3 }
 0x160   : > { %14562 = vst [vmem:[#allocation49_spill] sm:$0xff] %v11641_v38  ;;  %v11643_v55 = vadd.f32 %v8640_v1, %v1811_v34  ;;  %v11645_v37 = vpop.f32.mrf.mxu1  ;;  %v14567_v1 = vld [vmem:[#allocation43_spill] sm:$0xff]  ;;  %9143 = vmatpush3.msra.mxu0 %v3958_v22  ;;  %9073 = vmatpush3.msra.mxu1 %v7121_v3  ;;  %v3955_v22 = vld [vmem:[%s13957_s3 + $0x30] sm:$0xff] }
 0x161   : > { %14563 = vst [vmem:[#allocation50_spill] sm:$0xff] %v11645_v37  ;;  %v8563_v21 = vpop.f32.mrf.mxu0  ;;  %9042 = vmatmul.mubr.msk.f32.gmra.mxu0 %vm14566_vm13, %v14564_v51  ;;  %v14570_v51 = vld [vmem:[#allocation47_spill] sm:$0xff]  ;;  %9144 = vmatprep.subr.mxu0 %v3957_v5 }
 0x162   : > { %v1813_v46 = vadd.f32 %v8563_v21, %v11412_v35  ;;  %v8643_v34 = vpop.f32.mrf.mxu1  ;;  %9044 = vmatprep.mubr.f32.mxu0 %v14567_v1  ;;  %v3956_v35 = vld [vmem:[%s13957_s3 + $0x38] sm:$0xff]  ;;  %9145 = vmatpush3.msra.mxu0 %v3957_v5  ;;  %v7119_v5 = vld [vmem:[%s13957_s3 + $0x90] sm:$0xff] }
 0x163   : > { %v11661_v31 = vpop.f32.mrf.mxu0  ;;  %9146 = vmatprep.subr.mxu0 %v3956_v35  ;;  %9074 = vmatprep.subr.mxu1 %v7120_v28 }
 0x164   : > { %14568 = vst [vmem:[#allocation53_spill] sm:$0xff] %v11661_v31  ;;  %v11663_v23 = vadd.f32 %v8643_v34, %v1813_v46  ;;  %v11665_v49 = vpop.f32.mrf.mxu1  ;;  %9147 = vmatpush3.msra.mxu0 %v3956_v35  ;;  %9075 = vmatpush3.msra.mxu1 %v7120_v28  ;;  %v3953_v35 = vld [vmem:[%s13957_s3 + $0x20] sm:$0xff] }
 0x165   : > { %14569 = vst [vmem:[#allocation54_spill] sm:$0xff] %v11665_v49  ;;  %v8566_v21 = vpop.f32.mrf.mxu0  ;;  %9045 = vmatmul.mubr.msk.f32.gmra.mxu0 %vm14458_vm15, %v14570_v51  ;;  %9148 = vmatprep.subr.mxu0 %v3955_v22  ;;  %v7178_v49 = vld [vmem:[%s13957_s3 + $0x178] sm:$0xff] }
 0x166   : > { %v1815_v46 = vadd.f32 %v8566_v21, %v11424_v18  ;;  %v8646_v34 = vpop.f32.mrf.mxu1  ;;  %9047 = vmatprep.mubr.f32.mxu0 %v14531_v8  ;;  %v3954_v18 = vld [vmem:[%s13957_s3 + $0x28] sm:$0xff]  ;;  %9149 = vmatpush3.msra.mxu0 %v3955_v22 }
 0x167   : > { %v11681_v3 = vpop.f32.mrf.mxu0  ;;  %9076 = vmatprep.subr.mxu1 %v7119_v5  ;;  %9150 = vmatprep.subr.mxu0 %v3954_v18  ;;  %v7118_v22 = vld [vmem:[%s13957_s3 + $0x88] sm:$0xff] }
 0x168   : > { %14572 = vst [vmem:[#allocation56_spill] sm:$0xff] %v11681_v3  ;;  %v11683_v44 = vadd.f32 %v8646_v34, %v1815_v46  ;;  %v11685_v60 = vpop.f32.mrf.mxu1  ;;  %9077 = vmatpush3.msra.mxu1 %v7119_v5  ;;  %9151 = vmatpush3.msra.mxu0 %v3954_v18  ;;  %v3951_v18 = vld [vmem:[%s13957_s3 + $0x10] sm:$0xff] }
 0x169   : > { %14573 = vst [vmem:[#allocation62_spill] sm:$0xff] %v11685_v60  ;;  %v8569_v21 = vpop.f32.mrf.mxu0  ;;  %9048 = vmatmul.mubr.f32.gmra.mxu0 %v14531_v8  ;;  %9152 = vmatprep.subr.mxu0 %v3953_v35 }
 0x16a   : > { %v1817_v51 = vadd.f32 %v8569_v21, %v11434_v47  ;;  %v8649_v46 = vpop.f32.mrf.mxu1  ;;  %v3952_v47 = vld [vmem:[%s13957_s3 + $0x18] sm:$0xff]  ;;  %9162 = vmatprep.mubr.f32.mxu0 %v14531_v8  ;;  %9078 = vmatprep.subr.mxu1 %v7118_v22 }
 0x16b   : > { %v11698_v28 = vpop.f32.mrf.mxu0  ;;  %9153 = vmatpush3.msra.mxu0 %v3953_v35  ;;  %9079 = vmatpush3.msra.mxu1 %v7118_v22 }
 0x16c   : > { %14574 = vst [vmem:[#allocation64_spill] sm:$0xff] %v11698_v28  ;;  %v11700_v34 = vadd.f32 %v8649_v46, %v1817_v51  ;;  %v11702_v1 = vpop.f32.mrf.mxu1  ;;  %v7117_v46 = vld [vmem:[%s13957_s3 + $0x80] sm:$0xff]  ;;  %9154 = vmatprep.subr.mxu0 %v3952_v47 }
 0x16d   : > { %14575 = vst [vmem:[#allocation66_spill] sm:$0xff] %v11702_v1  ;;  %v8684_v21 = vpop.f32.mrf.mxu0  ;;  %9080 = vmatprep.subr.mxu1 %v7117_v46  ;;  %9155 = vmatpush3.msra.mxu0 %v3952_v47  ;;  %v3949_v28 = vld [vmem:[%s13957_s3] sm:$0xff] }
 0x16e   : > { %v11712_v5 = vadd.f32 %v8684_v21, %v11451_v52  ;;  %v11714_v51 = vpop.f32.mrf.mxu1  ;;  %v3950_v52 = vld [vmem:[%s13957_s3 + $0x8] sm:$0xff]  ;;  %9081 = vmatpush3.msra.mxu1 %v7117_v46  ;;  %9156 = vmatprep.subr.mxu0 %v3951_v18 }
 0x16f   : > { %v11722_v45 = vpop.f32.mrf.mxu0  ;;  %9083 = vmatmul.mubr.f32.vlgmr.msra.gmra.mxu1 %v14531_v8  ;;  %9157 = vmatpush3.msra.mxu0 %v3951_v18 }
 0x170   : > { %v11724_v1 = vpop.f32.mrf.mxu1  ;;  %9158 = vmatprep.subr.mxu0 %v3950_v52  ;;  %9210 = vmatprep.subr.mxu1 %v7178_v49 }
 0x171   : > { %v8687_v35 = vpop.f32.mrf.mxu0  ;;  %9159 = vmatpush3.msra.mxu0 %v3950_v52  ;;  %9211 = vmatpush3.msra.mxu1 %v7178_v49  ;;  %v7176_v49 = vld [vmem:[%s13957_s3 + $0x168] sm:$0xff] }
 0x172   : > { %v11731_v22 = vadd.f32 %v8687_v35, %v11463_v17  ;;  %v11733_v21 = vpop.f32.mrf.mxu1  ;;  %9160 = vmatprep.subr.mxu0 %v3949_v28 }
 0x173   : > { %v11738_v47 = vpop.f32.mrf.mxu0  ;;  %9161 = vmatpush3.msra.mxu0 %v3949_v28 }
 0x174   : > { %v11740_v60 = vpop.f32.mrf.mxu1  ;;  %9163 = vmatmul.mubr.f32.vlgmr.msra.gmra.mxu0 %v14531_v8  ;;  %v7177_v8 = vld [vmem:[%s13957_s3 + $0x170] sm:$0xff] }
 0x175   : > { %v8690_v46 = vpop.f32.mrf.mxu0  ;;  %9212 = vmatprep.subr.mxu1 %v7177_v8 }
 0x176   : > { %v11743_v6 = vadd.f32 %v8690_v46, %v11478_v26  ;;  %v11745_v17 = vpop.f32.mrf.mxu1  ;;  %9213 = vmatpush3.msra.mxu1 %v7177_v8  ;;  %v7175_v8 = vld [vmem:[%s13957_s3 + $0x160] sm:$0xff] }
 0x177   : > { %v11747_v35 = vpop.f32.mrf.mxu0  ;;  %9214 = vmatprep.subr.mxu1 %v7176_v49 }
 0x178   : > { %v11750_v18 = vpop.f32.mrf.mxu1  ;;  %9215 = vmatpush3.msra.mxu1 %v7176_v49  ;;  %v7174_v49 = vld [vmem:[%s13957_s3 + $0x158] sm:$0xff] }
 0x179   : > { %v8693_v3 = vpop.f32.mrf.mxu0  ;;  %9216 = vmatprep.subr.mxu1 %v7175_v8 }
 0x17a   : > { %v11756_v52 = vadd.f32 %v8693_v3, %v11493_v59  ;;  %v11758_v26 = vpop.f32.mrf.mxu1  ;;  %9217 = vmatpush3.msra.mxu1 %v7175_v8  ;;  %v7173_v8 = vld [vmem:[%s13957_s3 + $0x150] sm:$0xff] }
 0x17b   : > { %v11760_v46 = vpop.f32.mrf.mxu0  ;;  %9218 = vmatprep.subr.mxu1 %v7174_v49 }
 0x17c   : > { %v11762_v28 = vpop.f32.mrf.mxu1  ;;  %9219 = vmatpush3.msra.mxu1 %v7174_v49  ;;  %v7172_v49 = vld [vmem:[%s13957_s3 + $0x148] sm:$0xff] }
 0x17d   : > { %v8696_v31 = vpop.f32.mrf.mxu0  ;;  %9220 = vmatprep.subr.mxu1 %v7173_v8 }
 0x17e   : > { %v11768_v37 = vadd.f32 %v8696_v31, %v11508_v24  ;;  %v11770_v15 = vpop.f32.mrf.mxu1  ;;  %9221 = vmatpush3.msra.mxu1 %v7173_v8  ;;  %v7171_v8 = vld [vmem:[%s13957_s3 + $0x140] sm:$0xff] }
 0x17f   : > { %v11772_v59 = vpop.f32.mrf.mxu0  ;;  %9222 = vmatprep.subr.mxu1 %v7172_v49 }
 0x180   : > { %v11774_v3 = vpop.f32.mrf.mxu1  ;;  %9223 = vmatpush3.msra.mxu1 %v7172_v49  ;;  %v7170_v49 = vld [vmem:[%s13957_s3 + $0x138] sm:$0xff] }
 0x181   : > { %v8699_v0 = vpop.f32.mrf.mxu0  ;;  %9224 = vmatprep.subr.mxu1 %v7171_v8 }
 0x182   : > { %v11780_v38 = vadd.f32 %v8699_v0, %v11523_v33  ;;  %v11782_v61 = vpop.f32.mrf.mxu1  ;;  %9225 = vmatpush3.msra.mxu1 %v7171_v8  ;;  %v7169_v8 = vld [vmem:[%s13957_s3 + $0x130] sm:$0xff] }
 0x183   : > { %v11784_v24 = vpop.f32.mrf.mxu0  ;;  %9226 = vmatprep.subr.mxu1 %v7170_v49 }
 0x184   : > { %v11786_v31 = vpop.f32.mrf.mxu1  ;;  %9227 = vmatpush3.msra.mxu1 %v7170_v49  ;;  %v7168_v49 = vld [vmem:[%s13957_s3 + $0x128] sm:$0xff] }
 0x185   : > { %14576 = vst [vmem:[#allocation68_spill] sm:$0xff] %v11786_v31  ;;  %v8702_v12 = vpop.f32.mrf.mxu0  ;;  %9228 = vmatprep.subr.mxu1 %v7169_v8 }
 0x186   : > { %v11792_v14 = vadd.f32 %v8702_v12, %v11538_v62  ;;  %v11794_v63 = vpop.f32.mrf.mxu1  ;;  %9229 = vmatpush3.msra.mxu1 %v7169_v8  ;;  %v7167_v8 = vld [vmem:[%s13957_s3 + $0x120] sm:$0xff] }
 0x187   : > { %14578 = vst [vmem:[#allocation10_spill] sm:$0xff] %v11794_v63  ;;  %v11796_v33 = vpop.f32.mrf.mxu0  ;;  %9230 = vmatprep.subr.mxu1 %v7168_v49 }
 0x188   : > { %14577 = vst [vmem:[#allocation39_spill] sm:$0xff] %v11792_v14  ;;  %14579 = vst [vmem:[#allocation72_spill] sm:$0xff] %v11796_v33  ;;  %v11798_v0 = vpop.f32.mrf.mxu1  ;;  %9231 = vmatpush3.msra.mxu1 %v7168_v49  ;;  %v7166_v49 = vld [vmem:[%s13957_s3 + $0x118] sm:$0xff]  ;;  %v7219_v14 = vld [vmem:[%s13957_s3 + $0x1d0] sm:$0xff] }
 0x189   : > { %14580 = vst [vmem:[#allocation52_spill] sm:$0xff] %v11798_v0  ;;  %v8705_v50 = vpop.f32.mrf.mxu0  ;;  %9232 = vmatprep.subr.mxu1 %v7167_v8  ;;  %v7217_v33 = vld [vmem:[%s13957_s3 + $0x1c0] sm:$0xff] }
 0x18a   : > { %v11804_v58 = vadd.f32 %v8705_v50, %v11553_v7  ;;  %v11806_v2 = vpop.f32.mrf.mxu1  ;;  %9233 = vmatpush3.msra.mxu1 %v7167_v8  ;;  %v7165_v8 = vld [vmem:[%s13957_s3 + $0x110] sm:$0xff] }
 0x18b   : > { %14582 = vst [vmem:[#allocation75_spill] sm:$0xff] %v11806_v2  ;;  %v11808_v12 = vpop.f32.mrf.mxu0  ;;  %9234 = vmatprep.subr.mxu1 %v7166_v49 }
 0x18c   : > { %14581 = vst [vmem:[#allocation74_spill] sm:$0xff] %v11804_v58  ;;  %14583 = vst [vmem:[#allocation43_spill] sm:$0xff] %v11808_v12  ;;  %v11810_v62 = vpop.f32.mrf.mxu1  ;;  %9235 = vmatpush3.msra.mxu1 %v7166_v49 }
 0x18d   : > { %14584 = vst [vmem:[#allocation47_spill] sm:$0xff] %v11810_v62  ;;  %v8708_v54 = vpop.f32.mrf.mxu0  ;;  %9236 = vmatprep.subr.mxu1 %v7165_v8 }
 0x18e   : > { %v11816_v27 = vadd.f32 %v8708_v54, %v11569_v48  ;;  %v11818_v0 = vpop.f32.mrf.mxu1  ;;  %9237 = vmatpush3.msra.mxu1 %v7165_v8 }
 0x18f   : > { %14586 = vst [vmem:[#allocation78_spill] sm:$0xff] %v11818_v0  ;;  %v11820_v50 = vpop.f32.mrf.mxu0 }
 0x190   : > { %14585 = vst [vmem:[#allocation77_spill] sm:$0xff] %v11816_v27  ;;  %14587 = vst [vmem:[#allocation79_spill] sm:$0xff] %v11820_v50  ;;  %v11822_v7 = vpop.f32.mrf.mxu1 }
 0x191   : > { %14588 = vst [vmem:[#allocation80_spill] sm:$0xff] %v11822_v7  ;;  %v8711_v62 = vpop.f32.mrf.mxu0 }
 0x192   : > { %v11828_v2 = vadd.f32 %v8711_v62, %v11586_v4  ;;  %v11830_v58 = vpop.f32.mrf.mxu1 }
 0x193   : > { %14590 = vst [vmem:[#allocation82_spill] sm:$0xff] %v11830_v58  ;;  %v11832_v48 = vpop.f32.mrf.mxu0 }
 0x194   : > { %14589 = vst [vmem:[#allocation81_spill] sm:$0xff] %v11828_v2  ;;  %14591 = vst [vmem:[#allocation83_spill] sm:$0xff] %v11832_v48  ;;  %v11834_v54 = vpop.f32.mrf.mxu1  ;;  %v7221_v48 = vld [vmem:[%s13957_s3 + $0x1e0] sm:$0xff] }
 0x195   : > { %14592 = vst [vmem:[#allocation84_spill] sm:$0xff] %v11834_v54  ;;  %v8714_v7 = vpop.f32.mrf.mxu0 }
 0x196   : > { %v11840_v0 = vadd.f32 %v8714_v7, %v11606_v56  ;;  %v11842_v27 = vpop.f32.mrf.mxu1 }
 0x197   : > { %14594 = vst [vmem:[#allocation86_spill] sm:$0xff] %v11842_v27  ;;  %v11844_v4 = vpop.f32.mrf.mxu0 }
 0x198   : > { %14593 = vst [vmem:[#allocation85_spill] sm:$0xff] %v11840_v0  ;;  %14595 = vst [vmem:[#allocation87_spill] sm:$0xff] %v11844_v4  ;;  %v11846_v62 = vpop.f32.mrf.mxu1 }
 0x199   : > { %14596 = vst [vmem:[#allocation88_spill] sm:$0xff] %v11846_v62  ;;  %v8717_v54 = vpop.f32.mrf.mxu0 }
 0x19a   : > { %v11852_v58 = vadd.f32 %v8717_v54, %v11623_v16  ;;  %v11854_v2 = vpop.f32.mrf.mxu1 }
 0x19b   : > { %14598 = vst [vmem:[#allocation90_spill] sm:$0xff] %v11854_v2  ;;  %v11856_v56 = vpop.f32.mrf.mxu0 }
 0x19c   : > { %14597 = vst [vmem:[#allocation89_spill] sm:$0xff] %v11852_v58  ;;  %14599 = vst [vmem:[#allocation91_spill] sm:$0xff] %v11856_v56  ;;  %v11858_v7 = vpop.f32.mrf.mxu1 }
 0x19d   : > { %14600 = vst [vmem:[#allocation92_spill] sm:$0xff] %v11858_v7  ;;  %v8720_v62 = vpop.f32.mrf.mxu0 }
 0x19e   : > { %v11864_v27 = vadd.f32 %v8720_v62, %v11643_v55  ;;  %v11866_v0 = vpop.f32.mrf.mxu1 }
 0x19f   : > { %14602 = vst [vmem:[#allocation94_spill] sm:$0xff] %v11866_v0  ;;  %v11868_v16 = vpop.f32.mrf.mxu0 }
 0x1a0   : > { %14601 = vst [vmem:[#allocation93_spill] sm:$0xff] %v11864_v27  ;;  %14603 = vst [vmem:[#allocation95_spill] sm:$0xff] %v11868_v16  ;;  %v11870_v54 = vpop.f32.mrf.mxu1  ;;  %v7222_v16 = vld [vmem:[%s13957_s3 + $0x1e8] sm:$0xff] }
 0x1a1   : > { %14604 = vst [vmem:[#allocation96_spill] sm:$0xff] %v11870_v54  ;;  %v8723_v7 = vpop.f32.mrf.mxu0 }
 0x1a2   : > { %v11876_v2 = vadd.f32 %v8723_v7, %v11663_v23  ;;  %v11878_v58 = vpop.f32.mrf.mxu1 }
 0x1a3   : > { %14606 = vst [vmem:[#allocation98_spill] sm:$0xff] %v11878_v58  ;;  %v11880_v55 = vpop.f32.mrf.mxu0 }
 0x1a4   : > { %14605 = vst [vmem:[#allocation97_spill] sm:$0xff] %v11876_v2  ;;  %14607 = vst [vmem:[#allocation99_spill] sm:$0xff] %v11880_v55  ;;  %v11882_v62 = vpop.f32.mrf.mxu1 }
 0x1a5   : > { %14608 = vst [vmem:[#allocation100_spill] sm:$0xff] %v11882_v62  ;;  %v8726_v54 = vpop.f32.mrf.mxu0 }
 0x1a6   : > { %v11888_v0 = vadd.f32 %v8726_v54, %v11683_v44  ;;  %v11890_v27 = vpop.f32.mrf.mxu1 }
 0x1a7   : > { %14610 = vst [vmem:[#allocation102_spill] sm:$0xff] %v11890_v27  ;;  %v11892_v23 = vpop.f32.mrf.mxu0 }
 0x1a8   : > { %14609 = vst [vmem:[#allocation101_spill] sm:$0xff] %v11888_v0  ;;  %14611 = vst [vmem:[#allocation103_spill] sm:$0xff] %v11892_v23  ;;  %v11894_v7 = vpop.f32.mrf.mxu1  ;;  %v7223_v23 = vld [vmem:[%s13957_s3 + $0x1f0] sm:$0xff] }
 0x1a9   : > { %14612 = vst [vmem:[#allocation104_spill] sm:$0xff] %v11894_v7  ;;  %v8729_v62 = vpop.f32.mrf.mxu0 }
 0x1aa   : > { %v11900_v58 = vadd.f32 %v8729_v62, %v11700_v34  ;;  %v11902_v2 = vpop.f32.mrf.mxu1  ;;  %v7164_v34 = vld [vmem:[%s13957_s3 + $0x108] sm:$0xff] }
 0x1ab   : > { %14614 = vst [vmem:[#allocation106_spill] sm:$0xff] %v11902_v2  ;;  %v11904_v44 = vpop.f32.mrf.mxu0  ;;  %9238 = vmatprep.subr.mxu1 %v7164_v34  ;;  %v7224_v2 = vld [vmem:[%s13957_s3 + $0x1f8] sm:$0xff] }
 0x1ac   : > { %14613 = vst [vmem:[#allocation105_spill] sm:$0xff] %v11900_v58  ;;  %14615 = vst [vmem:[#allocation107_spill] sm:$0xff] %v11904_v44  ;;  %v11906_v54 = vpop.f32.mrf.mxu1  ;;  %9239 = vmatpush3.msra.mxu1 %v7164_v34  ;;  %9290 = vmatprep.subr.mxu0 %v7224_v2  ;;  %v11937_v34 = vld [vmem:[%s13957_s3 + $0x278] sm:$0xff] }
 0x1ad   : > { %14616 = vst [vmem:[#allocation108_spill] sm:$0xff] %v11906_v54  ;;  %v11911_v7 = vpop.f32.mrf.mxu0  ;;  %v7163_v54 = vld [vmem:[%s13957_s3 + $0x100] sm:$0xff]  ;;  %9291 = vmatpush3.msra.mxu0 %v7224_v2  ;;  %14617 = vst [vmem:[#allocation109_spill] sm:$0xff] %v11937_v34 }
 0x1ae   : > { %v11913_v27 = vpop.f32.mrf.mxu1  ;;  %9240 = vmatprep.subr.mxu1 %v7163_v54  ;;  %9292 = vmatprep.subr.mxu0 %v7223_v23 }
 0x1af   : > { %v11918_v62 = vpop.f32.mrf.mxu0  ;;  %9241 = vmatpush3.msra.mxu1 %v7163_v54  ;;  %9293 = vmatpush3.msra.mxu0 %v7223_v23 }
 0x1b0   : > { %v11920_v49 = vpop.f32.mrf.mxu1  ;;  %9370 = vmatprep.subr.mxu1 %v11937_v34  ;;  %9294 = vmatprep.subr.mxu0 %v7222_v16 }
 0x1b1   : > { %v11928_v58 = vpop.f32.mrf.mxu0  ;;  %9295 = vmatpush3.msra.mxu0 %v7222_v16 }
 0x1b2   : > { %v11932_v44 = vpop.f32.mrf.mxu1  ;;  %9296 = vmatprep.subr.mxu0 %v7221_v48 }
 0x1b3   : > { %v11930_v8 = vpop.f32.mrf.mxu0  ;;  %9297 = vmatpush3.msra.mxu0 %v7221_v48 }
 0x1b4   : > { %v11945_v54 = vpop.f32.mrf.mxu1  ;;  %9298 = vmatprep.subr.mxu0 %v7220_v41 }
 0x1b5   : > { %v11940_v0 = vpop.f32.mrf.mxu0  ;;  %9299 = vmatpush3.msra.mxu0 %v7220_v41 }
 0x1b6   : > { %v11954_v34 = vpop.f32.mrf.mxu1  ;;  %9300 = vmatprep.subr.mxu0 %v7219_v14 }
 0x1b7   : > { %v11947_v2 = vpop.f32.mrf.mxu0  ;;  %9301 = vmatpush3.msra.mxu0 %v7219_v14 }
 0x1b8   : > { %v11963_v23 = vpop.f32.mrf.mxu1 }
 0x1b9   : > { %v11949_v55 = vpop.f32.mrf.mxu0 }
 0x1ba   : > { %v11972_v16 = vpop.f32.mrf.mxu1 }
 0x1bb   : > { %v11956_v56 = vpop.f32.mrf.mxu0 }
 0x1bc   : > { %v11981_v48 = vpop.f32.mrf.mxu1 }
 0x1bd   : > { %v11958_v4 = vpop.f32.mrf.mxu0 }
 0x1be   : > { %v11990_v41 = vpop.f32.mrf.mxu1 }
 0x1bf   : > { %v11965_v50 = vpop.f32.mrf.mxu0  ;;  %14623 = vst [vmem:[#allocation115_spill] sm:$0xff] %v11990_v41  ;;  %v7216_v41 = vld [vmem:[%s13957_s3 + $0x1b8] sm:$0xff] }
 0x1c0   : > { %v11999_v14 = vpop.f32.mrf.mxu1 }
 0x1c1   : > { %v11967_v12 = vpop.f32.mrf.mxu0  ;;  %14626 = vst [vmem:[#allocation118_spill] sm:$0xff] %v11999_v14  ;;  %v7215_v14 = vld [vmem:[%s13957_s3 + $0x1b0] sm:$0xff] }
 0x1c2   : > { %14618 = vst [vmem:[#allocation110_spill] sm:$0xff] %v11967_v12  ;;  %v7218_v12 = vld [vmem:[%s13957_s3 + $0x1c8] sm:$0xff] }
 0x1c3   : > { %v11974_v43 = vpop.f32.mrf.mxu0  ;;  %9302 = vmatprep.subr.mxu0 %v7218_v12 }
 0x1c4   : > { %14619 = vst [vmem:[#allocation111_spill] sm:$0xff] %v11974_v43  ;;  %9303 = vmatpush3.msra.mxu0 %v7218_v12  ;;  %v12008_v12 = vpop.f32.mrf.mxu1 }
 0x1c5   : > { %v11976_v63 = vpop.f32.mrf.mxu0  ;;  %9304 = vmatprep.subr.mxu0 %v7217_v33  ;;  %14629 = vst [vmem:[#allocation121_spill] sm:$0xff] %v12008_v12  ;;  %v7214_v12 = vld [vmem:[%s13957_s3 + $0x1a8] sm:$0xff] }
 0x1c6   : > { %14620 = vst [vmem:[#allocation112_spill] sm:$0xff] %v11976_v63  ;;  %9305 = vmatpush3.msra.mxu0 %v7217_v33  ;;  %v12017_v33 = vpop.f32.mrf.mxu1 }
 0x1c7   : > { %v11983_v10 = vpop.f32.mrf.mxu0  ;;  %9306 = vmatprep.subr.mxu0 %v7216_v41  ;;  %14632 = vst [vmem:[#allocation124_spill] sm:$0xff] %v12017_v33  ;;  %v7213_v33 = vld [vmem:[%s13957_s3 + $0x1a0] sm:$0xff] }
 0x1c8   : > { %14621 = vst [vmem:[#allocation113_spill] sm:$0xff] %v11983_v10  ;;  %9307 = vmatpush3.msra.mxu0 %v7216_v41  ;;  %v12026_v41 = vpop.f32.mrf.mxu1 }
 0x1c9   : > { %v11985_v19 = vpop.f32.mrf.mxu0  ;;  %9308 = vmatprep.subr.mxu0 %v7215_v14  ;;  %14635 = vst [vmem:[#allocation127_spill] sm:$0xff] %v12026_v41  ;;  %v7212_v41 = vld [vmem:[%s13957_s3 + $0x198] sm:$0xff] }
 0x1ca   : > { %14622 = vst [vmem:[#allocation114_spill] sm:$0xff] %v11985_v19  ;;  %9309 = vmatpush3.msra.mxu0 %v7215_v14  ;;  %v12035_v14 = vpop.f32.mrf.mxu1 }
 0x1cb   : > { %v11992_v63 = vpop.f32.mrf.mxu0  ;;  %9310 = vmatprep.subr.mxu0 %v7214_v12  ;;  %14638 = vst [vmem:[#allocation130_spill] sm:$0xff] %v12035_v14 }
 0x1cc   : > { %14624 = vst [vmem:[#allocation116_spill] sm:$0xff] %v11992_v63  ;;  %9311 = vmatpush3.msra.mxu0 %v7214_v12  ;;  %v2092_v12 = vadd.f32 %v11453_v13, %v11449_v39  ;;  %v2673_v13 = vadd.f32 %v11714_v51, %v11712_v5  ;;  %v2675_v5 = vadd.f32 %v11733_v21, %v11731_v22  ;;  %v7209_v22 = vld [vmem:[%s13957_s3 + $0x180] sm:$0xff] }
 0x1cd   : > { %v11994_v43 = vpop.f32.mrf.mxu0  ;;  %9312 = vmatprep.subr.mxu0 %v7213_v33  ;;  %v2677_v21 = vadd.f32 %v11745_v17, %v11743_v6 }
 0x1ce   : > { %14625 = vst [vmem:[#allocation117_spill] sm:$0xff] %v11994_v43  ;;  %9313 = vmatpush3.msra.mxu0 %v7213_v33  ;;  %v2366_v14 = vadd.f32 %v11722_v45, %v2092_v12  ;;  %v7211_v33 = vld [vmem:[%s13957_s3 + $0x190] sm:$0xff]  ;;  %v3043_v12 = vadd.f32 %v11911_v7, %v2673_v13 }
 0x1cf   : > { %v12001_v19 = vpop.f32.mrf.mxu0  ;;  %9314 = vmatprep.subr.mxu0 %v7212_v41  ;;  %v3047_v17 = vadd.f32 %v11940_v0, %v2677_v21 }
 0x1d0   : > { %14627 = vst [vmem:[#allocation119_spill] sm:$0xff] %v12001_v19  ;;  %9315 = vmatpush3.msra.mxu0 %v7212_v41  ;;  %v2672_v45 = vadd.f32 %v11724_v1, %v2366_v14  ;;  %v3349_v14 = vadd.f32 %v11913_v27, %v3043_v12  ;;  %v12097_v27 = vld [vmem:[%s13956_s2] ss:$0 sm:$0xff]  ;;  %v7288_v12 = vld [vmem:[%s13957_s3 + $0x2f8] sm:$0xff] }
 0x1d1   : > { %v12003_v10 = vpop.f32.mrf.mxu0  ;;  %9316 = vmatprep.subr.mxu0 %v7211_v33 }
 0x1d2   : > { %14628 = vst [vmem:[#allocation120_spill] sm:$0xff] %v12003_v10  ;;  %9317 = vmatpush3.msra.mxu0 %v7211_v33  ;;  %v3042_v51 = vadd.f32 %v11918_v62, %v2672_v45  ;;  %v3045_v33 = vadd.f32 %v11928_v58, %v2675_v5  ;;  %v2679_v45 = vadd.f32 %v11758_v26, %v11756_v52 }
 0x1d3   : > { %v12010_v43 = vpop.f32.mrf.mxu0 }
 0x1d4   : > { %14630 = vst [vmem:[#allocation122_spill] sm:$0xff] %v12010_v43  ;;  %v3348_v62 = vadd.f32 %v11920_v49, %v3042_v51  ;;  %v3351_v6 = vadd.f32 %v11932_v44, %v3045_v33  ;;  %v3049_v5 = vadd.f32 %v11949_v55, %v2679_v45 }
 0x1d5   : > { %v12012_v63 = vpop.f32.mrf.mxu0 }
 0x1d6   : > { %14631 = vst [vmem:[#allocation123_spill] sm:$0xff] %v12012_v63 }
 0x1d7   : > { %v12019_v10 = vpop.f32.mrf.mxu0 }
 0x1d8   : > { %14633 = vst [vmem:[#allocation125_spill] sm:$0xff] %v12019_v10 }
 0x1d9   : > { %v12021_v19 = vpop.f32.mrf.mxu0 }
 0x1da   : > { %14634 = vst [vmem:[#allocation126_spill] sm:$0xff] %v12021_v19 }
 0x1db   : > { %v12028_v63 = vpop.f32.mrf.mxu0 }
 0x1dc   : > { %14636 = vst [vmem:[#allocation128_spill] sm:$0xff] %v12028_v63 }
 0x1dd   : > { %v12030_v43 = vpop.f32.mrf.mxu0 }
 0x1de   : > { %14637 = vst [vmem:[#allocation129_spill] sm:$0xff] %v12030_v43  ;;  %v12046_v43 = vpop.f32.mrf.mxu1 }
 0x1df   : > { %v12037_v19 = vpop.f32.mrf.mxu0 }
 0x1e0   : > { %14639 = vst [vmem:[#allocation131_spill] sm:$0xff] %v12037_v19  ;;  %v12060_v39 = vpop.f32.mrf.mxu1 }
 0x1e1   : > { %v12039_v10 = vpop.f32.mrf.mxu0 }
 0x1e2   : > { %14640 = vst [vmem:[#allocation132_spill] sm:$0xff] %v12039_v10  ;;  %v2094_v10 = vadd.f32 %v11465_v57, %v11461_v42  ;;  %v7210_v42 = vld [vmem:[%s13957_s3 + $0x188] sm:$0xff]  ;;  %v2096_v57 = vadd.f32 %v11480_v20, %v11476_v29  ;;  %v12077_v1 = vpop.f32.mrf.mxu1  ;;  %v2098_v29 = vadd.f32 %v11495_v32, %v11491_v36 }
 0x1e3   : > { %v12048_v63 = vpop.f32.mrf.mxu0  ;;  %9318 = vmatprep.subr.mxu0 %v7210_v42 }
 0x1e4   : > { %v2368_v41 = vadd.f32 %v11738_v47, %v2094_v10  ;;  %9319 = vmatpush3.msra.mxu0 %v7210_v42  ;;  %v2370_v7 = vadd.f32 %v11747_v35, %v2096_v57  ;;  %v2372_v36 = vadd.f32 %v11760_v46, %v2098_v29  ;;  %v12100_v32 = vpop.f32.mrf.mxu1  ;;  %v3353_v57 = vadd.f32 %v11954_v34, %v3047_v17 }
 0x1e5   : > { %v12051_v31 = vpop.f32.mrf.mxu0  ;;  %9320 = vmatprep.subr.mxu0 %v7209_v22 }
 0x1e6   : > { %14641 = vst [vmem:[#allocation133_spill] sm:$0xff] %v12051_v31  ;;  %v2674_v47 = vadd.f32 %v11740_v60, %v2368_v41  ;;  %9321 = vmatpush3.msra.mxu0 %v7209_v22  ;;  %v2676_v13 = vadd.f32 %v11750_v18, %v2370_v7  ;;  %v12118_v52 = vpop.f32.mrf.mxu1  ;;  %v2104_v22 = vadd.f32 %v11540_v11, %v11536_v40  ;;  %v14644_v11 = vld [vmem:[#allocation68_spill] sm:$0xff] }
 0x1e7   : > { %v12062_v19 = vpop.f32.mrf.mxu0  ;;  %9450 = vmatprep.subr.mxu0 %v7288_v12  ;;  %v14650_v12 = vld [vmem:[#allocation28_spill] sm:$0xff] }
 0x1e8   : > { %v3044_v60 = vadd.f32 %v11930_v8, %v2674_v47  ;;  %v2100_v8 = vadd.f32 %v11510_v9, %v11506_v25  ;;  %v3046_v44 = vadd.f32 %v11947_v2, %v2676_v13  ;;  %v2678_v25 = vadd.f32 %v11762_v28, %v2372_v36  ;;  %v14642_v36 = vld [vmem:[#allocation48_spill] sm:$0xff] }
 0x1e9   : > { %v12067_v31 = vpop.f32.mrf.mxu0  ;;  %v2102_v2 = vadd.f32 %v11525_v53, %v11521_v30  ;;  %v2681_v47 = vadd.f32 %v11770_v15, %v11768_v37  ;;  %v12137_v53 = vpop.f32.mrf.mxu1  ;;  %v3355_v15 = vadd.f32 %v11972_v16, %v3049_v5 }
 0x1ea   : > { %v3350_v18 = vadd.f32 %v11945_v54, %v3044_v60  ;;  %v2374_v9 = vadd.f32 %v11772_v59, %v2100_v8  ;;  %v3048_v34 = vadd.f32 %v11956_v56, %v2678_v25 }
 0x1eb   : > { %v12079_v10 = vpop.f32.mrf.mxu0  ;;  %v2376_v30 = vadd.f32 %v11784_v24, %v2102_v2 }
 0x1ec   : > { %v2680_v29 = vadd.f32 %v11774_v3, %v2374_v9  ;;  %v2683_v3 = vadd.f32 %v11782_v61, %v11780_v38  ;;  %v3354_v60 = vadd.f32 %v11981_v48, %v3048_v34  ;;  %v14645_v38 = vld [vmem:[#allocation72_spill] sm:$0xff]  ;;  %v14646_v48 = vld [vmem:[#allocation115_spill] sm:$0xff] }
 0x1ed   : > { %v9004_v20 = vpop.f32.mrf.mxu0  ;;  %v2682_v13 = vadd.f32 %v14644_v11, %v2376_v30  ;;  %v2378_v61 = vadd.f32 %v14645_v38, %v2104_v22  ;;  %v14660_v30 = vld [vmem:[#allocation52_spill] sm:$0xff]  ;;  %v14667_v11 = vld [vmem:[#allocation75_spill] sm:$0xff] }
 0x1ee   : > { %v3687_v58 = vadd.f32 %v9004_v20, %v3349_v14  ;;  %v3352_v14 = vadd.f32 %v11963_v23, %v3046_v44  ;;  %v3051_v23 = vadd.f32 %v11958_v4, %v2681_v47  ;;  %v3050_v16 = vadd.f32 %v11965_v50, %v2680_v29  ;;  %v14647_v50 = vld [vmem:[#allocation110_spill] sm:$0xff]  ;;  %v14651_v44 = vld [vmem:[#allocation39_spill] sm:$0xff] }
 0x1ef   : > { %v3527_v35 = vpop.f32.mrf.mxu0  ;;  %v3053_v8 = vadd.f32 %v14647_v50, %v2683_v3  ;;  %v14662_v3 = vld [vmem:[#allocation121_spill] sm:$0xff] }
 0x1f0   : > { %v3686_v49 = vadd.f32 %v3527_v35, %v3348_v62  ;;  %v3725_v41 = vadd.f32 %v12097_v27, %v3687_v58  ;;  %v14643_v35 = vld [vmem:[#allocation4_spill] sm:$0xff]  ;;  %v14670_v50 = vld [vmem:[#allocation113_spill] sm:$0xff] }
 0x1f1   : > { %v9007_v46 = vpop.f32.mrf.mxu0  ;;  %v1315_v40 = vadd.f32 %v14643_v35, %v14642_v36  ;;  %v14666_v35 = vld [vmem:[#allocation74_spill] sm:$0xff] }
 0x1f2   : > { %v3724_v0 = vadd.f32 %v12097_v27, %v3686_v49  ;;  %v3689_v42 = vadd.f32 %v9007_v46, %v3351_v6  ;;  %v12128_v7 = vmax.f32 %v3725_v41, 0.0  ;;  %v12159_v6 = vpop.f32.mrf.mxu1  ;;  %v3357_v49 = vadd.f32 %v14646_v48, %v3051_v23  ;;  %v14649_v46 = vld [vmem:[#allocation27_spill] sm:$0xff]  ;;  %v14669_v48 = vld [vmem:[#allocation124_spill] sm:$0xff] }
 0x1f3   : > { %v3537_v26 = vpop.f32.mrf.mxu0 }
 0x1f4   : > { %v12122_v51 = vmax.f32 %v3724_v0, 0.0  ;;  %v3688_v54 = vadd.f32 %v3537_v26, %v3350_v18  ;;  %v3727_v28 = vadd.f32 %v12097_v27, %v3689_v42  ;;  %v2106_v18 = vadd.f32 %v14650_v12, %v14649_v46  ;;  %v14652_v0 = vld [vmem:[#allocation10_spill] sm:$0xff]  ;;  %v14671_v12 = vld [vmem:[#allocation12_spill] sm:$0xff] }
 0x1f5   : > { %v9010_v59 = vpop.f32.mrf.mxu0  ;;  %v2685_v42 = vadd.f32 %v14652_v0, %v14651_v44  ;;  %v14673_v44 = vld [vmem:[#allocation40_spill] sm:$0xff] }
 0x1f6   : > { %v3726_v55 = vadd.f32 %v12097_v27, %v3688_v54  ;;  %v3691_v33 = vadd.f32 %v9010_v59, %v3353_v57  ;;  %9085 = vmatprep.mubr.f32.mxu1 %v12122_v51  ;;  %v12148_v21 = vmax.f32 %v3727_v28, 0.0  ;;  %v14654_v57 = vld [vmem:[#allocation118_spill] sm:$0xff]  ;;  %v14655_v54 = vld [vmem:[#allocation111_spill] sm:$0xff] }
 0x1f7   : > { %v3547_v37 = vpop.f32.mrf.mxu0  ;;  %9086 = vmatmul.mubr.f32.gmra.mxu1 %v12128_v7  ;;  %v3356_v5 = vadd.f32 %v14654_v57, %v3050_v16  ;;  %v3052_v2 = vadd.f32 %v14655_v54, %v2682_v13  ;;  %v14656_v59 = vld [vmem:[#allocation7_spill] sm:$0xff]  ;;  %v2687_v13 = vadd.f32 %v14667_v11, %v14666_v35  ;;  %v14686_v11 = vld [vmem:[#allocation16_spill] sm:$0xff] }
 0x1f8   : > { %v12142_v20 = vmax.f32 %v3726_v55, 0.0  ;;  %v3690_v56 = vadd.f32 %v3547_v37, %v3352_v14  ;;  %v3729_v24 = vadd.f32 %v12097_v27, %v3691_v33  ;;  %v14657_v14 = vld [vmem:[#allocation9_spill] sm:$0xff]  ;;  %v14658_v55 = vld [vmem:[#allocation31_spill] sm:$0xff]  ;;  %v14659_v33 = vld [vmem:[#allocation32_spill] sm:$0xff]  ;;  %v2684_v37 = vadd.f32 %v14660_v30, %v2378_v61 }
 0x1f9   : > { %v9013_v62 = vpop.f32.mrf.mxu0  ;;  %v1325_v34 = vadd.f32 %v14657_v14, %v14656_v59  ;;  %v2108_v29 = vadd.f32 %v14659_v33, %v14658_v55  ;;  %v14679_v33 = vld [vmem:[#allocation37_spill] sm:$0xff]  ;;  %v14685_v35 = vld [vmem:[#allocation15_spill] sm:$0xff] }
 0x1fa   : > { %v3728_v4 = vadd.f32 %v12097_v27, %v3690_v56  ;;  %v3693_v58 = vadd.f32 %v9013_v62, %v3355_v15  ;;  %9088 = vmatprep.mubr.f32.mxu1 %v12142_v20  ;;  %v12170_v25 = vmax.f32 %v3729_v24, 0.0  ;;  %v14661_v15 = vld [vmem:[#allocation43_spill] sm:$0xff]  ;;  %v12183_v56 = vpop.f32.mrf.mxu1  ;;  %v3359_v24 = vadd.f32 %v14662_v3, %v3053_v8  ;;  %v14663_v62 = vld [vmem:[#allocation112_spill] sm:$0xff]  ;;  %v14683_v3 = vld [vmem:[#allocation130_spill] sm:$0xff] }
 0x1fb   : > { %v3557_v17 = vpop.f32.mrf.mxu0  ;;  %9089 = vmatmul.mubr.f32.gmra.mxu1 %v12148_v21  ;;  %v2380_v23 = vadd.f32 %v14661_v15, %v2106_v18  ;;  %v14672_v18 = vld [vmem:[#allocation13_spill] sm:$0xff]  ;;  %v1806_v0 = vadd.f32 %v14673_v44, %v1325_v34  ;;  %v14681_v34 = vld [vmem:[#allocation78_spill] sm:$0xff] }
 0x1fc   : > { %v12164_v45 = vmax.f32 %v3728_v4, 0.0  ;;  %v3692_v41 = vadd.f32 %v3557_v17, %v3354_v60  ;;  %14653 = vst [vmem:[#allocation4_spill] sm:$0xff] %v12170_v25  ;;  %v3731_v9 = vadd.f32 %v12097_v27, %v3693_v58  ;;  %v3055_v60 = vadd.f32 %v14663_v62, %v2685_v42  ;;  %v14665_v58 = vld [vmem:[#allocation36_spill] sm:$0xff]  ;;  %v14674_v42 = vld [vmem:[#allocation47_spill] sm:$0xff] }
 0x1fd   : > { %v9016_v26 = vpop.f32.mrf.mxu0  ;;  %v1804_v36 = vadd.f32 %v14665_v58, %v1315_v40  ;;  %v1335_v40 = vadd.f32 %v14672_v18, %v14671_v12  ;;  %v14684_v62 = vld [vmem:[#allocation116_spill] sm:$0xff]  ;;  %v14690_v12 = vld [vmem:[#allocation117_spill] sm:$0xff] }
 0x1fe   : > { %14648 = vst [vmem:[#allocation48_spill] sm:$0xff] %v12164_v45  ;;  %v3730_v47 = vadd.f32 %v12097_v27, %v3692_v41  ;;  %v3695_v28 = vadd.f32 %v9016_v26, %v3357_v49  ;;  %9091 = vmatprep.mubr.f32.mxu1 %v12164_v45  ;;  %v12193_v38 = vmax.f32 %v3731_v9, 0.0  ;;  %v3358_v49 = vadd.f32 %v14669_v48, %v3052_v2  ;;  %v14675_v26 = vld [vmem:[#allocation79_spill] sm:$0xff]  ;;  %v14688_v48 = vld [vmem:[#allocation80_spill] sm:$0xff] }
 0x1ff   : > { %v3567_v22 = vpop.f32.mrf.mxu0  ;;  %9092 = vmatmul.mubr.f32.gmra.mxu1 %v12170_v25  ;;  %v3054_v41 = vadd.f32 %v14670_v50, %v2684_v37  ;;  %v2686_v9 = vadd.f32 %v14674_v42, %v2380_v23  ;;  %v2382_v57 = vadd.f32 %v14675_v26, %v2108_v29  ;;  %v14676_v2 = vld [vmem:[#allocation127_spill] sm:$0xff]  ;;  %v2110_v30 = vadd.f32 %v14679_v33, %v1804_v36  ;;  %v14680_v37 = vld [vmem:[#allocation77_spill] sm:$0xff] }
 0x200   : > { %v12188_v16 = vmax.f32 %v3730_v47, 0.0  ;;  %v3694_v4 = vadd.f32 %v3567_v22, %v3356_v5  ;;  %14668 = vst [vmem:[#allocation72_spill] sm:$0xff] %v12193_v38  ;;  %v3733_v61 = vadd.f32 %v12097_v27, %v3695_v28  ;;  %v12205_v5 = vpop.f32.mrf.mxu1  ;;  %v3361_v47 = vadd.f32 %v14676_v2, %v3055_v60  ;;  %v14677_v28 = vld [vmem:[#allocation114_spill] sm:$0xff]  ;;  %v14696_v33 = vld [vmem:[#allocation119_spill] sm:$0xff] }
 0x201   : > { %v9019_v17 = vpop.f32.mrf.mxu0  ;;  %v3057_v59 = vadd.f32 %v14677_v28, %v2687_v13  ;;  %v2689_v15 = vadd.f32 %v14681_v34, %v14680_v37  ;;  %v1345_v36 = vadd.f32 %v14686_v11, %v14685_v35  ;;  %v14687_v13 = vld [vmem:[#allocation41_spill] sm:$0xff]  ;;  %v14697_v37 = vld [vmem:[#allocation18_spill] sm:$0xff]  ;;  %v14698_v34 = vld [vmem:[#allocation20_spill] sm:$0xff] }
 0x202   : > { %14664 = vst [vmem:[#allocation68_spill] sm:$0xff] %v12188_v16  ;;  %v3732_v8 = vadd.f32 %v12097_v27, %v3694_v4  ;;  %v3697_v46 = vadd.f32 %v9019_v17, %v3359_v24  ;;  %9094 = vmatprep.mubr.f32.mxu1 %v12188_v16  ;;  %v12215_v23 = vmax.f32 %v3733_v61, 0.0  ;;  %v3360_v24 = vadd.f32 %v14683_v3, %v3054_v41  ;;  %v14700_v3 = vld [vmem:[#allocation84_spill] sm:$0xff] }
 0x203   : > { %v3577_v54 = vpop.f32.mrf.mxu0  ;;  %9095 = vmatmul.mubr.f32.gmra.mxu1 %v12193_v38  ;;  %v3056_v4 = vadd.f32 %v14684_v62, %v2686_v9  ;;  %v2112_v17 = vadd.f32 %v14687_v13, %v1806_v0  ;;  %v2688_v61 = vadd.f32 %v14688_v48, %v2382_v57  ;;  %v3363_v41 = vadd.f32 %v12046_v43, %v3057_v59  ;;  %v14692_v9 = vld [vmem:[#allocation44_spill] sm:$0xff]  ;;  %v14694_v0 = vld [vmem:[#allocation82_spill] sm:$0xff]  ;;  %v14704_v48 = vld [vmem:[#allocation45_spill] sm:$0xff] }
 0x204   : > { %v12210_v14 = vmax.f32 %v3732_v8, 0.0  ;;  %v3696_v55 = vadd.f32 %v3577_v54, %v3358_v49  ;;  %14682 = vst [vmem:[#allocation110_spill] sm:$0xff] %v12215_v23  ;;  %v3735_v29 = vadd.f32 %v12097_v27, %v3697_v46  ;;  %v14689_v49 = vld [vmem:[#allocation83_spill] sm:$0xff]  ;;  %v12227_v8 = vpop.f32.mrf.mxu1  ;;  %v3059_v18 = vadd.f32 %v14690_v12, %v2689_v15  ;;  %v14693_v54 = vld [vmem:[#allocation81_spill] sm:$0xff] }
 0x205   : > { %v9022_v22 = vpop.f32.mrf.mxu0  ;;  %v2384_v50 = vadd.f32 %v14689_v49, %v2110_v30  ;;  %v1808_v26 = vadd.f32 %v14692_v9, %v1335_v40  ;;  %v2691_v2 = vadd.f32 %v14694_v0, %v14693_v54  ;;  %v3058_v30 = vadd.f32 %v14696_v33, %v2688_v61  ;;  %v14699_v15 = vld [vmem:[#allocation49_spill] sm:$0xff]  ;;  %v14710_v0 = vld [vmem:[#allocation22_spill] sm:$0xff]  ;;  %v14713_v33 = vld [vmem:[#allocation91_spill] sm:$0xff] }
 0x206   : > { %14678 = vst [vmem:[#allocation115_spill] sm:$0xff] %v12210_v14  ;;  %v3734_v60 = vadd.f32 %v12097_v27, %v3696_v55  ;;  %v3699_v58 = vadd.f32 %v9022_v22, %v3361_v47  ;;  %9097 = vmatprep.mubr.f32.mxu1 %v12210_v14  ;;  %v12237_v57 = vmax.f32 %v3735_v29, 0.0  ;;  %v3362_v55 = vadd.f32 %v12060_v39, %v3056_v4  ;;  %v14702_v4 = vld [vmem:[#allocation120_spill] sm:$0xff]  ;;  %v14705_v49 = vld [vmem:[#allocation85_spill] sm:$0xff] }
 0x207   : > { %v3587_v46 = vpop.f32.mrf.mxu0  ;;  %9098 = vmatmul.mubr.f32.gmra.mxu1 %v12215_v23  ;;  %v1355_v40 = vadd.f32 %v14698_v34, %v14697_v37  ;;  %v1810_v22 = vadd.f32 %v14699_v15, %v1345_v36  ;;  %v2690_v29 = vadd.f32 %v14700_v3, %v2384_v50  ;;  %v3365_v39 = vadd.f32 %v12077_v1, %v3059_v18  ;;  %v14706_v36 = vld [vmem:[#allocation86_spill] sm:$0xff]  ;;  %v14709_v54 = vld [vmem:[#allocation21_spill] sm:$0xff] }
 0x208   : > { %v12232_v44 = vmax.f32 %v3734_v60, 0.0  ;;  %v3698_v42 = vadd.f32 %v3587_v46, %v3360_v24  ;;  %14695 = vst [vmem:[#allocation28_spill] sm:$0xff] %v12237_v57  ;;  %v3737_v47 = vadd.f32 %v12097_v27, %v3699_v58  ;;  %v14701_v24 = vld [vmem:[#allocation87_spill] sm:$0xff]  ;;  %v12249_v60 = vpop.f32.mrf.mxu1  ;;  %v3061_v35 = vadd.f32 %v14702_v4, %v2691_v2  ;;  %v14711_v2 = vld [vmem:[#allocation50_spill] sm:$0xff] }
 0x209   : > { %v9025_v28 = vpop.f32.mrf.mxu0  ;;  %v2386_v62 = vadd.f32 %v14701_v24, %v2112_v17  ;;  %v2114_v61 = vadd.f32 %v14704_v48, %v1808_v26  ;;  %v2693_v46 = vadd.f32 %v14706_v36, %v14705_v49  ;;  %v3364_v12 = vadd.f32 %v12100_v32, %v3058_v30  ;;  %v14714_v30 = vld [vmem:[#allocation123_spill] sm:$0xff]  ;;  %v14721_v36 = vld [vmem:[#allocation56_spill] sm:$0xff] }
 0x20a   : > { %14691 = vst [vmem:[#allocation27_spill] sm:$0xff] %v12232_v44  ;;  %v3736_v43 = vadd.f32 %v12097_v27, %v3698_v42  ;;  %v3701_v59 = vadd.f32 %v9025_v28, %v3363_v41  ;;  %9100 = vmatprep.mubr.f32.mxu1 %v12232_v44  ;;  %v12259_v50 = vmax.f32 %v3737_v47, 0.0  ;;  %v14708_v42 = vld [vmem:[#allocation122_spill] sm:$0xff]  ;;  %v1365_v26 = vadd.f32 %v14710_v0, %v14709_v54 }
 0x20b   : > { %v3597_v58 = vpop.f32.mrf.mxu0  ;;  %9101 = vmatmul.mubr.f32.gmra.mxu1 %v12237_v57  ;;  %v3060_v9 = vadd.f32 %v14708_v42, %v2690_v29  ;;  %v2116_v28 = vadd.f32 %v14711_v2, %v1810_v22  ;;  %v3367_v32 = vadd.f32 %v12118_v52, %v3061_v35  ;;  %v3063_v34 = vadd.f32 %v14714_v30, %v2693_v46  ;;  %v14716_v29 = vld [vmem:[#allocation53_spill] sm:$0xff]  ;;  %v14718_v22 = vld [vmem:[#allocation90_spill] sm:$0xff]  ;;  %v14730_v30 = vld [vmem:[#allocation128_spill] sm:$0xff] }
 0x20c   : > { %v12254_v11 = vmax.f32 %v3736_v43, 0.0  ;;  %v3700_v13 = vadd.f32 %v3597_v58, %v3362_v55  ;;  %14707 = vst [vmem:[#allocation10_spill] sm:$0xff] %v12259_v50  ;;  %v3739_v17 = vadd.f32 %v12097_v27, %v3701_v59  ;;  %v14712_v55 = vld [vmem:[#allocation88_spill] sm:$0xff]  ;;  %v2388_v43 = vadd.f32 %v14713_v33, %v2114_v61  ;;  %v12271_v59 = vpop.f32.mrf.mxu1  ;;  %v14717_v58 = vld [vmem:[#allocation89_spill] sm:$0xff]  ;;  %v14726_v2 = vld [vmem:[#allocation54_spill] sm:$0xff] }
 0x20d   : > { %v9028_v41 = vpop.f32.mrf.mxu0  ;;  %v2692_v47 = vadd.f32 %v14712_v55, %v2386_v62  ;;  %v1812_v24 = vadd.f32 %v14716_v29, %v1355_v40  ;;  %v3366_v48 = vadd.f32 %v12137_v53, %v3060_v9  ;;  %v14720_v61 = vld [vmem:[#allocation125_spill] sm:$0xff]  ;;  %v1814_v46 = vadd.f32 %v14721_v36, %v1365_v26  ;;  %v14722_v40 = vld [vmem:[#allocation92_spill] sm:$0xff]  ;;  %v14724_v53 = vld [vmem:[#allocation126_spill] sm:$0xff] }
 0x20e   : > { %14703 = vst [vmem:[#allocation39_spill] sm:$0xff] %v12254_v11  ;;  %v3738_v1 = vadd.f32 %v12097_v27, %v3700_v13  ;;  %v3703_v18 = vadd.f32 %v9028_v41, %v3365_v39  ;;  %9103 = vmatprep.mubr.f32.mxu1 %v12254_v11  ;;  %v2695_v39 = vadd.f32 %v14718_v22, %v14717_v58  ;;  %v12281_v62 = vmax.f32 %v3739_v17, 0.0  ;;  %v8963_v17 = vpop.f32.mrf.mxu1  ;;  %v14728_v33 = vld [vmem:[#allocation94_spill] sm:$0xff]  ;;  %v14731_v29 = vld [vmem:[#allocation24_spill] sm:$0xff]  ;;  %v14732_v58 = vld [vmem:[#allocation25_spill] sm:$0xff] }
 0x20f   : > { %v3607_v37 = vpop.f32.mrf.mxu0  ;;  %9104 = vmatmul.mubr.f32.gmra.mxu1 %v12259_v50  ;;  %v3062_v49 = vadd.f32 %v14720_v61, %v2692_v47  ;;  %v2694_v41 = vadd.f32 %v14722_v40, %v2388_v43  ;;  %v2118_v55 = vadd.f32 %v14726_v2, %v1812_v24  ;;  %v14727_v47 = vld [vmem:[#allocation93_spill] sm:$0xff]  ;;  %v1375_v24 = vadd.f32 %v14732_v58, %v14731_v29  ;;  %v14733_v22 = vld [vmem:[#allocation62_spill] sm:$0xff] }
 0x210   : > { %v12276_v15 = vmax.f32 %v3738_v1, 0.0  ;;  %v3702_v3 = vadd.f32 %v3607_v37, %v3364_v12  ;;  %14719 = vst [vmem:[#allocation111_spill] sm:$0xff] %v12281_v62  ;;  %v3741_v4 = vadd.f32 %v12097_v27, %v3703_v18  ;;  %v14723_v12 = vld [vmem:[#allocation95_spill] sm:$0xff]  ;;  %v3369_v18 = vadd.f32 %v12159_v6, %v3063_v34 }
 0x211   : > { %v9031_v13 = vpop.f32.mrf.mxu0  ;;  %v2390_v42 = vadd.f32 %v14723_v12, %v2116_v28  ;;  %v3065_v9 = vadd.f32 %v14724_v53, %v2695_v39  ;;  %v2697_v26 = vadd.f32 %v14728_v33, %v14727_v47  ;;  %v2120_v39 = vadd.f32 %v14733_v22, %v1814_v46  ;;  %v14738_v12 = vld [vmem:[#allocation64_spill] sm:$0xff]  ;;  %v14740_v53 = vld [vmem:[#allocation98_spill] sm:$0xff]  ;;  %v14742_v47 = vld [vmem:[#allocation131_spill] sm:$0xff] }
 0x212   : > { %14715 = vst [vmem:[#allocation118_spill] sm:$0xff] %v12276_v15  ;;  %v3740_v52 = vadd.f32 %v12097_v27, %v3702_v3  ;;  %v3705_v35 = vadd.f32 %v9031_v13, %v3367_v32  ;;  %9106 = vmatprep.mubr.f32.mxu1 %v12276_v15  ;;  %v12299_v37 = vmax.f32 %v3741_v4, 0.0  ;;  %v3368_v32 = vadd.f32 %v12183_v56, %v3062_v49  ;;  %v14734_v13 = vld [vmem:[#allocation96_spill] sm:$0xff]  ;;  %v14736_v49 = vld [vmem:[#allocation129_spill] sm:$0xff] }
 0x213   : > { %v3617_v1 = vpop.f32.mrf.mxu0  ;;  %9107 = vmatmul.mubr.f32.gmra.mxu1 %v12281_v62  ;;  %v3064_v3 = vadd.f32 %v14730_v30, %v2694_v41  ;;  %v2696_v4 = vadd.f32 %v14734_v13, %v2390_v42  ;;  %v3371_v56 = vadd.f32 %v12205_v5, %v3065_v9  ;;  %v3067_v36 = vadd.f32 %v14736_v49, %v2697_v26  ;;  %v14743_v26 = vld [vmem:[#allocation100_spill] sm:$0xff]  ;;  %v14748_v13 = vld [vmem:[#allocation101_spill] sm:$0xff] }
 0x214   : > { %v12294_v54 = vmax.f32 %v3740_v52, 0.0  ;;  %v3704_v0 = vadd.f32 %v3617_v1, %v3366_v48  ;;  %14729 = vst [vmem:[#allocation9_spill] sm:$0xff] %v12299_v37  ;;  %v3743_v28 = vadd.f32 %v12097_v27, %v3705_v35  ;;  %v14735_v48 = vld [vmem:[#allocation99_spill] sm:$0xff]  ;;  %v3319_v52 = vpop.f32.mrf.mxu1  ;;  %v1816_v1 = vadd.f32 %v14738_v12, %v1375_v24  ;;  %v14747_v24 = vld [vmem:[#allocation66_spill] sm:$0xff] }
 0x215   : > { %v9034_v43 = vpop.f32.mrf.mxu0  ;;  %v2392_v61 = vadd.f32 %v14735_v48, %v2118_v55  ;;  %v3370_v55 = vadd.f32 %v12227_v8, %v3064_v3  ;;  %v3066_v33 = vadd.f32 %v14742_v47, %v2696_v4  ;;  %v14749_v4 = vld [vmem:[#allocation102_spill] sm:$0xff] }
 0x216   : > { %14725 = vst [vmem:[#allocation7_spill] sm:$0xff] %v12294_v54  ;;  %v3742_v6 = vadd.f32 %v12097_v27, %v3704_v0  ;;  %v3707_v34 = vadd.f32 %v9034_v43, %v3369_v18  ;;  %9109 = vmatprep.mubr.f32.mxu1 %v12294_v54  ;;  %v14739_v18 = vld [vmem:[#allocation97_spill] sm:$0xff]  ;;  %v12319_v0 = vmax.f32 %v3743_v28, 0.0  ;;  %v3373_v28 = vadd.f32 %v12249_v60, %v3067_v36 }
 0x217   : > { %v3627_v35 = vpop.f32.mrf.mxu0  ;;  %9110 = vmatmul.mubr.f32.gmra.mxu1 %v12299_v37  ;;  %v2699_v46 = vadd.f32 %v14740_v53, %v14739_v18  ;;  %v2698_v43 = vadd.f32 %v14743_v26, %v2392_v61  ;;  %v2122_v22 = vadd.f32 %v14747_v24, %v1816_v1  ;;  %v2701_v48 = vadd.f32 %v14749_v4, %v14748_v13  ;;  %v14752_v1 = vld [vmem:[#allocation107_spill] sm:$0xff] }
 0x218   : > { %v12314_v40 = vmax.f32 %v3742_v6, 0.0  ;;  %v3706_v41 = vadd.f32 %v3627_v35, %v3368_v32  ;;  %14741 = vst [vmem:[#allocation32_spill] sm:$0xff] %v12319_v0  ;;  %v3745_v42 = vadd.f32 %v12097_v27, %v3707_v34  ;;  %v14744_v32 = vld [vmem:[#allocation103_spill] sm:$0xff]  ;;  %v8966_v6 = vpop.f32.mrf.mxu1  ;;  %v14745_v34 = vld [vmem:[#allocation132_spill] sm:$0xff] }
 0x219   : > { %v9037_v2 = vpop.f32.mrf.mxu0  ;;  %v2394_v30 = vadd.f32 %v14744_v32, %v2120_v39  ;;  %v3069_v58 = vadd.f32 %v14745_v34, %v2699_v46  ;;  %v3068_v49 = vadd.f32 %v12048_v63, %v2698_v43  ;;  %v2396_v18 = vadd.f32 %v14752_v1, %v2122_v22  ;;  %v14755_v63 = vld [vmem:[#allocation105_spill] sm:$0xff] }
 0x21a   : > { %14737 = vst [vmem:[#allocation31_spill] sm:$0xff] %v12314_v40  ;;  %v3744_v5 = vadd.f32 %v12097_v27, %v3706_v41  ;;  %v3709_v9 = vadd.f32 %v9037_v2, %v3371_v56  ;;  %9112 = vmatprep.mubr.f32.mxu1 %v12314_v40  ;;  %v12336_v35 = vmax.f32 %v3745_v42, 0.0  ;;  %v3372_v56 = vadd.f32 %v12271_v59, %v3066_v33  ;;  %v14751_v41 = vld [vmem:[#allocation104_spill] sm:$0xff]  ;;  %v3329_v53 = vpop.f32.mrf.mxu1  ;;  %v14753_v2 = vld [vmem:[#allocation133_spill] sm:$0xff]  ;;  %v14756_v33 = vld [vmem:[#allocation106_spill] sm:$0xff] }
 0x21b   : > { %v3637_v29 = vpop.f32.mrf.mxu0  ;;  %9113 = vmatmul.mubr.f32.gmra.mxu1 %v12319_v0  ;;  %v2700_v12 = vadd.f32 %v14751_v41, %v2394_v30  ;;  %v3375_v42 = vadd.f32 %v8963_v17, %v3069_v58  ;;  %v3374_v32 = vadd.f32 %v3319_v52, %v3068_v49  ;;  %v14758_v17 = vld [vmem:[#allocation108_spill] sm:$0xff] }
 0x21c   : > { %v12331_v8 = vmax.f32 %v3744_v5, 0.0  ;;  %v3708_v3 = vadd.f32 %v3637_v29, %v3370_v55  ;;  %14750 = vst [vmem:[#allocation43_spill] sm:$0xff] %v12336_v35  ;;  %v3747_v39 = vadd.f32 %v12097_v27, %v3709_v9  ;;  %v3071_v55 = vadd.f32 %v14753_v2, %v2701_v48  ;;  %v8969_v58 = vpop.f32.mrf.mxu1 }
 0x21d   : > { %v9040_v61 = vpop.f32.mrf.mxu0  ;;  %v2703_v5 = vadd.f32 %v14756_v33, %v14755_v63  ;;  %v3070_v30 = vadd.f32 %v12062_v19, %v2700_v12  ;;  %v2702_v34 = vadd.f32 %v14758_v17, %v2396_v18  ;;  %v4465_v17 = vrot.slane %v12128_v7, 1 }
 0x21e   : > { %14746 = vst [vmem:[#allocation52_spill] sm:$0xff] %v12331_v8  ;;  %v3746_v60 = vadd.f32 %v12097_v27, %v3708_v3  ;;  %v3711_v36 = vadd.f32 %v9040_v61, %v3373_v28  ;;  %9115 = vmatprep.mubr.f32.mxu1 %v12331_v8  ;;  %v12351_v9 = vmax.f32 %v3747_v39, 0.0  ;;  %v3377_v24 = vadd.f32 %v8966_v6, %v3071_v55 }
 0x21f   : > { %v3647_v46 = vpop.f32.mrf.mxu0  ;;  %9116 = vmatmul.mubr.f32.gmra.mxu1 %v12336_v35  ;;  %v3073_v22 = vadd.f32 %v12067_v31, %v2703_v5  ;;  %v3376_v39 = vadd.f32 %v3329_v53, %v3070_v30  ;;  %v3072_v61 = vadd.f32 %v12079_v10, %v2702_v34 }
 0x220   : > { %v12347_v47 = vmax.f32 %v3746_v60, 0.0  ;;  %v3710_v59 = vadd.f32 %v3647_v46, %v3372_v56  ;;  %14757 = vst [vmem:[#allocation112_spill] sm:$0xff] %v12351_v9  ;;  %v3749_v26 = vadd.f32 %v12097_v27, %v3711_v36  ;;  %v3339_v60 = vpop.f32.mrf.mxu1 }
 0x221   : > { %v9043_v43 = vpop.f32.mrf.mxu0  ;;  %v3379_v31 = vadd.f32 %v8969_v58, %v3073_v22  ;;  %v3378_v53 = vadd.f32 %v3339_v60, %v3072_v61  ;;  %v4466_v58 = vrot.slane %v12142_v20, 1  ;;  %v14775_v61 = vld [vmem:[#allocation8_spill] sm:$0xff] }
 0x222   : > { %14754 = vst [vmem:[#allocation121_spill] sm:$0xff] %v12347_v47  ;;  %v3748_v29 = vadd.f32 %v12097_v27, %v3710_v59  ;;  %v3713_v28 = vadd.f32 %v9043_v43, %v3375_v42  ;;  %9118 = vmatprep.mubr.f32.mxu1 %v12347_v47  ;;  %v12362_v52 = vmax.f32 %v3749_v26, 0.0  ;;  %v3853_v26 = vrot.slane %v12122_v51, 7 }
 0x223   : > { %v3657_v3 = vpop.f32.mrf.mxu0  ;;  %9119 = vmatmul.mubr.f32.gmra.mxu1 %v12351_v9  ;;  %v14146_v43 = vrot.slane %v12122_v51, 1 }
 0x224   : > { %v12360_v13 = vmax.f32 %v3748_v29, 0.0  ;;  %v3712_v4 = vadd.f32 %v3657_v3, %v3374_v32  ;;  %14760 = vst [vmem:[#allocation74_spill] sm:$0xff] %v12362_v52  ;;  %v3751_v19 = vadd.f32 %v12097_v27, %v3713_v28  ;;  %v14766_v32 = vmov 0.0   ;;  %v7396_v3 = vld [vmem:[%s13957_s3 + $0x468] sm:$0xff] }
 0x225   : > { %v9046_v48 = vpop.f32.mrf.mxu0  ;;  %v3855_v29 = vrot.slane %v12142_v20, 7  ;;  %v3854_v28 = vrot.slane %v12128_v7, 7 }
 0x226   : > { %14759 = vst [vmem:[#allocation36_spill] sm:$0xff] %v12360_v13  ;;  %v3750_v56 = vadd.f32 %v12097_v27, %v3712_v4  ;;  %v3715_v49 = vadd.f32 %v9046_v48, %v3377_v24  ;;  %9121 = vmatprep.mubr.f32.mxu1 %v12360_v13  ;;  %v12371_v12 = vmax.f32 %v3751_v19, 0.0  ;;  %v7271_v4 = vld [vmem:[%s13957_s3 + $0x270] sm:$0xff]  ;;  %v3857_v48 = vrot.slane %v12164_v45, 7 }
 0x227   : > { %v3667_v6 = vpop.f32.mrf.mxu0  ;;  %9122 = vmatmul.mubr.f32.gmra.mxu1 %v12362_v52 }
 0x228   : > { %v12369_v36 = vmax.f32 %v3750_v56, 0.0  ;;  %v3714_v41 = vadd.f32 %v3667_v6, %v3376_v39  ;;  %14762 = vst [vmem:[#allocation124_spill] sm:$0xff] %v12371_v12  ;;  %v3753_v1 = vadd.f32 %v12097_v27, %v3715_v49  ;;  %v14774_v39 = vld [vmem:[#allocation109_spill] sm:$0xff]  ;;  %v3856_v56 = vrot.slane %v12148_v21, 7 }
 0x229   : > { %v9049_v18 = vpop.f32.mrf.mxu0  ;;  %v4467_v49 = vrot.slane %v12148_v21, 1  ;;  %v4468_v6 = vrot.slane %v12164_v45, 1 }
 0x22a   : > { %14761 = vst [vmem:[#allocation75_spill] sm:$0xff] %v12369_v36  ;;  %v3752_v10 = vadd.f32 %v12097_v27, %v3714_v41  ;;  %v3717_v46 = vadd.f32 %v9049_v18, %v3379_v31  ;;  %9124 = vmatprep.mubr.f32.mxu1 %v12369_v36  ;;  %v12380_v63 = vmax.f32 %v3753_v1, 0.0  ;;  %v7270_v18 = vld [vmem:[%s13957_s3 + $0x268] sm:$0xff]  ;;  %v4475_v31 = vrot.slane %v12237_v57, 1 }
 0x22b   : > { %v3677_v42 = vpop.f32.mrf.mxu0  ;;  %9125 = vmatmul.mubr.f32.gmra.mxu1 %v12371_v12 }
 0x22c   : > { %v12377_v2 = vmax.f32 %v3752_v10, 0.0  ;;  %v3755_v55 = vadd.f32 %v12097_v27, %v3717_v46  ;;  %v3716_v59 = vadd.f32 %v3677_v42, %v3378_v53  ;;  %14764 = vst [vmem:[#allocation12_spill] sm:$0xff] %v12380_v63  ;;  %v3859_v42 = vrot.slane %v12188_v16, 7 }
 0x22e   : > { %14763 = vst [vmem:[#allocation113_spill] sm:$0xff] %v12377_v2  ;;  %v12382_v33 = vmax.f32 %v3755_v55, 0.0  ;;  %v12385_v5 = vadd.f32 %v12097_v27, %v3716_v59  ;;  %9127 = vmatprep.mubr.f32.mxu1 %v12377_v2  ;;  %v14767_v27 = vld [vmem:[#allocation3_spill] sm:$0xff] }
 0x22f   : > { %9128 = vmatmul.mubr.f32.gmra.mxu1 %v12380_v63  ;;  %vm14768_vm15 = vcmp.lt.s32.totalorder %v14767_v27, 1  ;;  %vm14771_vm12 = vcmp.lt.s32.totalorder %v14767_v27, 7  ;;  %v9084_v53 = vpop.f32.mrf.mxu1  ;;  %v14783_v59 = vld [vmem:[#allocation11_spill] sm:$0xff] }
 0x230   : > { %14765 = vst [vmem:[#allocation13_spill] sm:$0xff] %v12382_v33  ;;  %9242 = vmatprep.mubr.f32.mxu1 %v14766_v32  ;;  %v14147_v30 = vrot.slane %v12382_v33, 7  ;;  %vm14770_vm13 = vmmov %vm14768_vm15  ;;  %v12415_v22 = vsel %vm14771_vm12, %v14146_v43, %v4465_v17  ;;  %v12435_v60 = vsel %vm14771_vm12, %v4465_v17, %v4466_v58  ;;  %v4470_v17 = vrot.slane %v12188_v16, 1 }
 0x231   : > { %v12409_v24 = vsel %vm14770_vm13, %v3853_v26, %v3854_v28  ;;  %14772 = vst [vmem:[#allocation40_spill] sm:$0xff] %v12415_v22  ;;  %14777 = vst [vmem:[#allocation47_spill] sm:$0xff] %v12435_v60 }
 0x232   : > { %v12400_v34 = vsel %vm14768_vm15, %v14147_v30, %v3853_v26  ;;  %vm14773_vm15 = vmmov %vm14770_vm13  ;;  %vm14776_vm13 = vnez %v14775_v61  ;;  %v3858_v26 = vrot.slane %v12170_v25, 7  ;;  %v4472_v30 = vrot.slane %v12210_v14, 1 }
 0x233   : > { %9165 = vmatprep.mubr.msk.f32.mxu0 %vm14468_vm14, %v12400_v34  ;;  %9243 = vmatmul.mubr.f32.vlgmr.msra.gmra.mxu1 %v14766_v32  ;;  %v12424_v19 = vsel %vm14773_vm15, %v3854_v28, %v3855_v29  ;;  %v12443_v41 = vsel %vm14773_vm15, %v3855_v29, %v3856_v56  ;;  %v4469_v29 = vrot.slane %v12170_v25, 1 }
 0x234   : > { %9166 = vmatmul.mubr.f32.gmra.mxu0 %v12409_v24  ;;  %9245 = vmatprep.mubr.f32.mxu1 %v12415_v22  ;;  %v9164_v10 = vpop.f32.mrf.mxu0 }
 0x235   : > { %9371 = vmatpush3.msra.mxu1 %v14774_v39  ;;  %9168 = vmatprep.mubr.msk.f32.mxu0 %vm14776_vm13, %v12424_v19  ;;  %vm14779_vm13 = vmmov %vm14771_vm12  ;;  %v12459_v55 = vadd.f32 %v9164_v10, %v9084_v53  ;;  %v3861_v53 = vrot.slane %v12210_v14, 7  ;;  %v4471_v10 = vrot.slane %v12193_v38, 1 }
 0x236   : > { %9372 = vmatprep.subr.mxu1 %v7271_v4  ;;  %v12447_v1 = vsel %vm14779_vm13, %v4466_v58, %v4467_v49  ;;  %vm14781_vm12 = vmmov %vm14773_vm15  ;;  %vm14784_vm13 = vnez %v14783_v59  ;;  %vm14785_vm15 = vcmp.lt.s32.totalorder %v14767_v27, 7  ;;  %v4473_v58 = vrot.slane %v12215_v23, 1 }
 0x237   : > { %9246 = vmatmul.mubr.msk.f32.gmra.mxu1 %vm10519_vm0, %v12435_v60  ;;  %14780 = vst [vmem:[#allocation79_spill] sm:$0xff] %v12447_v1  ;;  %v12456_v46 = vsel %vm14781_vm12, %v3856_v56, %v3857_v48  ;;  %14782 = vst [vmem:[#allocation127_spill] sm:$0xff] %v12459_v55  ;;  %v12468_v28 = vsel %vm14785_vm15, %v4467_v49, %v4468_v6  ;;  %v7269_v56 = vld [vmem:[%s13957_s3 + $0x260] sm:$0xff]  ;;  %v4477_v60 = vrot.slane %v12259_v50, 1 }
 0x238   : > { %9169 = vmatmul.mubr.f32.gmra.mxu0 %v12443_v41  ;;  %9248 = vmatprep.mubr.f32.mxu1 %v12447_v1  ;;  %14786 = vst [vmem:[#allocation114_spill] sm:$0xff] %v12468_v28  ;;  %vm14788_vm0 = vmmov %vm14785_vm15 }
 0x239   : > { %9373 = vmatpush3.msra.mxu1 %v7271_v4  ;;  %9171 = vmatprep.mubr.msk.f32.mxu0 %vm14784_vm13, %v12456_v46  ;;  %v12476_v4 = vsel %vm14781_vm12, %v3857_v48, %v3858_v26  ;;  %v12480_v39 = vsel %vm14788_vm0, %v4468_v6, %v4469_v29  ;;  %vm14790_vm15 = vmmov %vm14781_vm12  ;;  %v14791_v48 = vld [vmem:[#allocation14_spill] sm:$0xff]  ;;  %v3860_v6 = vrot.slane %v12193_v38, 7  ;;  %v12499_v43 = vsel %vm14788_vm0, %v4469_v29, %v4470_v17 }
 0x23a   : > { %9374 = vmatprep.subr.mxu1 %v7270_v18  ;;  %14789 = vst [vmem:[#allocation37_spill] sm:$0xff] %v12480_v39  ;;  %v12489_v49 = vsel %vm14790_vm15, %v3858_v26, %v3859_v42  ;;  %vm14792_vm12 = vnez %v14791_v48  ;;  %14793 = vst [vmem:[#allocation77_spill] sm:$0xff] %v12499_v43  ;;  %v7268_v29 = vld [vmem:[%s13957_s3 + $0x258] sm:$0xff]  ;;  %v3863_v26 = vrot.slane %v12232_v44, 7  ;;  %v7393_v48 = vld [vmem:[%s13957_s3 + $0x450] sm:$0xff] }
 0x23b   : > { %9249 = vmatmul.mubr.msk.f32.gmra.mxu1 %vm10552_vm1, %v12468_v28  ;;  %vm14795_vm1 = vmmov %vm14788_vm0 }
 0x23c   : > { %9172 = vmatmul.mubr.f32.gmra.mxu0 %v12476_v4  ;;  %9251 = vmatprep.mubr.f32.mxu1 %v12480_v39  ;;  %v12511_v55 = vsel %vm14795_vm1, %v4470_v17, %v4471_v10  ;;  %vm14797_vm0 = vmmov %vm14790_vm15  ;;  %v3862_v17 = vrot.slane %v12215_v23, 7 }
 0x23d   : > { %9375 = vmatpush3.msra.mxu1 %v7270_v18  ;;  %9174 = vmatprep.mubr.msk.f32.mxu0 %vm14792_vm12, %v12489_v49  ;;  %v12507_v18 = vsel %vm14790_vm15, %v3859_v42, %v3860_v6  ;;  %14796 = vst [vmem:[#allocation78_spill] sm:$0xff] %v12511_v55  ;;  %v12520_v32 = vsel %vm14797_vm0, %v3860_v6, %v3861_v53  ;;  %v14798_v42 = vld [vmem:[#allocation17_spill] sm:$0xff] }
 0x23e   : > { %9376 = vmatprep.subr.mxu1 %v7269_v56  ;;  %vm14799_vm15 = vnez %v14798_v42  ;;  %v7392_v42 = vld [vmem:[%s13957_s3 + $0x448] sm:$0xff] }
 0x23f   : > { %9252 = vmatmul.mubr.msk.f32.gmra.mxu1 %vm10580_vm2, %v12499_v43  ;;  %v12530_v43 = vsel %vm14795_vm1, %v4471_v10, %v4472_v30  ;;  %vm14802_vm2 = vmmov %vm14795_vm1  ;;  %v7267_v10 = vld [vmem:[%s13957_s3 + $0x250] sm:$0xff] }
 0x240   : > { %9175 = vmatmul.mubr.f32.gmra.mxu0 %v12507_v18  ;;  %9254 = vmatprep.mubr.f32.mxu1 %v12511_v55  ;;  %14800 = vst [vmem:[#allocation130_spill] sm:$0xff] %v12530_v43  ;;  %v4474_v55 = vrot.slane %v12232_v44, 1  ;;  %v12542_v39 = vsel %vm14802_vm2, %v4472_v30, %v4473_v58  ;;  %vm14804_vm1 = vmmov %vm14797_vm0  ;;  %v3864_v30 = vrot.slane %v12237_v57, 7 }
 0x241   : > { %9377 = vmatpush3.msra.mxu1 %v7269_v56  ;;  %9177 = vmatprep.mubr.msk.f32.mxu0 %vm14799_vm15, %v12520_v32  ;;  %v12538_v56 = vsel %vm14797_vm0, %v3861_v53, %v3862_v17  ;;  %14803 = vst [vmem:[#allocation116_spill] sm:$0xff] %v12542_v39  ;;  %v12551_v6 = vsel %vm14804_vm1, %v3862_v17, %v3863_v26  ;;  %v14805_v53 = vld [vmem:[#allocation19_spill] sm:$0xff] }
 0x242   : > { %9378 = vmatprep.subr.mxu1 %v7268_v29  ;;  %vm14806_vm0 = vnez %v14805_v53  ;;  %v12561_v28 = vsel %vm14802_vm2, %v4473_v58, %v4474_v55  ;;  %v7266_v58 = vld [vmem:[%s13957_s3 + $0x248] sm:$0xff]  ;;  %v7391_v53 = vld [vmem:[%s13957_s3 + $0x440] sm:$0xff] }
 0x243   : > { %9255 = vmatmul.mubr.msk.f32.gmra.mxu1 %vm10610_vm3, %v12530_v43  ;;  %v3865_v43 = vrot.slane %v12254_v11, 7  ;;  %14807 = vst [vmem:[#allocation15_spill] sm:$0xff] %v12561_v28  ;;  %vm14809_vm3 = vmmov %vm14802_vm2 }
 0x244   : > { %9178 = vmatmul.mubr.f32.gmra.mxu0 %v12538_v56  ;;  %9257 = vmatprep.mubr.f32.mxu1 %v12542_v39  ;;  %v4476_v39 = vrot.slane %v12254_v11, 1  ;;  %v12573_v1 = vsel %vm14809_vm3, %v4474_v55, %v4475_v31  ;;  %vm14811_vm2 = vmmov %vm14804_vm1  ;;  %v3866_v55 = vrot.slane %v12259_v50, 7 }
 0x245   : > { %9379 = vmatpush3.msra.mxu1 %v7268_v29  ;;  %9180 = vmatprep.mubr.msk.f32.mxu0 %vm14806_vm0, %v12551_v6  ;;  %v12569_v29 = vsel %vm14804_vm1, %v3863_v26, %v3864_v30  ;;  %14810 = vst [vmem:[#allocation16_spill] sm:$0xff] %v12573_v1  ;;  %v12582_v17 = vsel %vm14811_vm2, %v3864_v30, %v3865_v43  ;;  %v14812_v26 = vld [vmem:[#allocation23_spill] sm:$0xff] }
 0x246   : > { %9380 = vmatprep.subr.mxu1 %v7267_v10  ;;  %vm14813_vm1 = vnez %v14812_v26  ;;  %v12592_v22 = vsel %vm14809_vm3, %v4475_v31, %v4476_v39  ;;  %v7265_v31 = vld [vmem:[%s13957_s3 + $0x240] sm:$0xff]  ;;  %v7390_v26 = vld [vmem:[%s13957_s3 + $0x438] sm:$0xff] }
 0x247   : > { %9258 = vmatmul.mubr.msk.f32.gmra.mxu1 %vm10639_vm4, %v12561_v28  ;;  %v3867_v28 = vrot.slane %v12276_v15, 7  ;;  %14814 = vst [vmem:[#allocation41_spill] sm:$0xff] %v12592_v22  ;;  %vm14816_vm4 = vmmov %vm14809_vm3 }
 0x248   : > { %9181 = vmatmul.mubr.f32.gmra.mxu0 %v12569_v29  ;;  %9260 = vmatprep.mubr.f32.mxu1 %v12573_v1  ;;  %v4478_v1 = vrot.slane %v12276_v15, 1  ;;  %v12604_v33 = vsel %vm14816_vm4, %v4476_v39, %v4477_v60  ;;  %vm14818_vm3 = vmmov %vm14811_vm2  ;;  %v3868_v39 = vrot.slane %v12281_v62, 7  ;;  %v4479_v15 = vrot.slane %v12281_v62, 1 }
 0x249   : > { %9381 = vmatpush3.msra.mxu1 %v7267_v10  ;;  %9183 = vmatprep.mubr.msk.f32.mxu0 %vm14813_vm1, %v12582_v17  ;;  %v12600_v10 = vsel %vm14811_vm2, %v3865_v43, %v3866_v55  ;;  %14817 = vst [vmem:[#allocation80_spill] sm:$0xff] %v12604_v33  ;;  %v12613_v30 = vsel %vm14818_vm3, %v3866_v55, %v3867_v28  ;;  %v14819_v43 = vld [vmem:[#allocation26_spill] sm:$0xff] }
 0x24a   : > { %9382 = vmatprep.subr.mxu1 %v7266_v58  ;;  %vm14820_vm2 = vnez %v14819_v43  ;;  %v12623_v50 = vsel %vm14816_vm4, %v4477_v60, %v4478_v1  ;;  %v7264_v60 = vld [vmem:[%s13957_s3 + $0x238] sm:$0xff]  ;;  %v14933_v59 = vld [vmem:[#allocation15_spill] sm:$0xff] }
 0x24b   : > { %9261 = vmatmul.mubr.msk.f32.gmra.mxu1 %vm10667_vm5, %v12592_v22  ;;  %v3869_v22 = vrot.slane %v12294_v54, 7  ;;  %14821 = vst [vmem:[#allocation83_spill] sm:$0xff] %v12623_v50  ;;  %vm14823_vm5 = vmmov %vm14816_vm4 }
 0x24c   : > { %9184 = vmatmul.mubr.f32.gmra.mxu0 %v12600_v10  ;;  %9263 = vmatprep.mubr.f32.mxu1 %v12604_v33  ;;  %v4480_v33 = vrot.slane %v12294_v54, 1  ;;  %v12635_v43 = vsel %vm14823_vm5, %v4478_v1, %v4479_v15  ;;  %vm14825_vm4 = vmmov %vm14818_vm3  ;;  %v3870_v1 = vrot.slane %v12299_v37, 7  ;;  %v4481_v54 = vrot.slane %v12299_v37, 1 }
 0x24d   : > { %9383 = vmatpush3.msra.mxu1 %v7266_v58  ;;  %9186 = vmatprep.mubr.msk.f32.mxu0 %vm14820_vm2, %v12613_v30  ;;  %v12631_v58 = vsel %vm14818_vm3, %v3867_v28, %v3868_v39  ;;  %14824 = vst [vmem:[#allocation117_spill] sm:$0xff] %v12635_v43  ;;  %v12644_v55 = vsel %vm14825_vm4, %v3868_v39, %v3869_v22  ;;  %v14826_v28 = vld [vmem:[#allocation29_spill] sm:$0xff] }
 0x24e   : > { %9384 = vmatprep.subr.mxu1 %v7265_v31  ;;  %vm14827_vm3 = vnez %v14826_v28  ;;  %v12654_v62 = vsel %vm14823_vm5, %v4479_v15, %v4480_v33  ;;  %v7263_v15 = vld [vmem:[%s13957_s3 + $0x230] sm:$0xff] }
 0x24f   : > { %9264 = vmatmul.mubr.msk.f32.gmra.mxu1 %vm10697_vm6, %v12623_v50  ;;  %v3871_v50 = vrot.slane %v12314_v40, 7  ;;  %14828 = vst [vmem:[#allocation44_spill] sm:$0xff] %v12654_v62  ;;  %vm14830_vm6 = vmmov %vm14823_vm5 }
 0x250   : > { %9187 = vmatmul.mubr.f32.gmra.mxu0 %v12631_v58  ;;  %9266 = vmatprep.mubr.f32.mxu1 %v12635_v43  ;;  %v4482_v43 = vrot.slane %v12314_v40, 1  ;;  %v12666_v28 = vsel %vm14830_vm6, %v4480_v33, %v4481_v54  ;;  %vm14832_vm5 = vmmov %vm14825_vm4  ;;  %v3872_v33 = vrot.slane %v12319_v0, 7  ;;  %v4483_v40 = vrot.slane %v12319_v0, 1 }
 0x251   : > { %9385 = vmatpush3.msra.mxu1 %v7265_v31  ;;  %9189 = vmatprep.mubr.msk.f32.mxu0 %vm14827_vm3, %v12644_v55  ;;  %v12662_v31 = vsel %vm14825_vm4, %v3869_v22, %v3870_v1  ;;  %14831 = vst [vmem:[#allocation81_spill] sm:$0xff] %v12666_v28  ;;  %v12675_v39 = vsel %vm14832_vm5, %v3870_v1, %v3871_v50  ;;  %v14833_v22 = vld [vmem:[#allocation33_spill] sm:$0xff] }
 0x252   : > { %9386 = vmatprep.subr.mxu1 %v7264_v60  ;;  %vm14834_vm4 = vnez %v14833_v22  ;;  %v12685_v37 = vsel %vm14830_vm6, %v4481_v54, %v4482_v43  ;;  %v7262_v54 = vld [vmem:[%s13957_s3 + $0x228] sm:$0xff] }
 0x253   : > { %9267 = vmatmul.mubr.msk.f32.gmra.mxu1 %vm10726_vm7, %v12654_v62  ;;  %v3873_v62 = vrot.slane %v12331_v8, 7  ;;  %14835 = vst [vmem:[#allocation82_spill] sm:$0xff] %v12685_v37  ;;  %vm14837_vm7 = vmmov %vm14830_vm6 }
 0x254   : > { %9190 = vmatmul.mubr.f32.gmra.mxu0 %v12662_v31  ;;  %9269 = vmatprep.mubr.f32.mxu1 %v12666_v28  ;;  %v4484_v28 = vrot.slane %v12331_v8, 1  ;;  %v12697_v22 = vsel %vm14837_vm7, %v4482_v43, %v4483_v40  ;;  %vm14839_vm6 = vmmov %vm14832_vm5  ;;  %v3874_v43 = vrot.slane %v12336_v35, 7  ;;  %v4485_v8 = vrot.slane %v12336_v35, 1 }
 0x255   : > { %9387 = vmatpush3.msra.mxu1 %v7264_v60  ;;  %9192 = vmatprep.mubr.msk.f32.mxu0 %vm14834_vm4, %v12675_v39  ;;  %v12693_v60 = vsel %vm14832_vm5, %v3871_v50, %v3872_v33  ;;  %14838 = vst [vmem:[#allocation119_spill] sm:$0xff] %v12697_v22  ;;  %v12706_v1 = vsel %vm14839_vm6, %v3872_v33, %v3873_v62  ;;  %v14840_v50 = vld [vmem:[#allocation38_spill] sm:$0xff] }
 0x256   : > { %9388 = vmatprep.subr.mxu1 %v7263_v15  ;;  %vm14841_vm5 = vnez %v14840_v50  ;;  %v12716_v0 = vsel %vm14837_vm7, %v4483_v40, %v4484_v28  ;;  %v7261_v40 = vld [vmem:[%s13957_s3 + $0x220] sm:$0xff] }
 0x257   : > { %9270 = vmatmul.mubr.msk.f32.gmra.mxu1 %vm10754_vm8, %v12685_v37  ;;  %v3875_v37 = vrot.slane %v12347_v47, 7  ;;  %14842 = vst [vmem:[#allocation18_spill] sm:$0xff] %v12716_v0  ;;  %vm14844_vm8 = vmmov %vm14837_vm7 }
 0x258   : > { %9193 = vmatmul.mubr.f32.gmra.mxu0 %v12693_v60  ;;  %9272 = vmatprep.mubr.f32.mxu1 %v12697_v22  ;;  %v4486_v22 = vrot.slane %v12347_v47, 1  ;;  %v12728_v50 = vsel %vm14844_vm8, %v4484_v28, %v4485_v8  ;;  %vm14846_vm7 = vmmov %vm14839_vm6  ;;  %v3876_v28 = vrot.slane %v12351_v9, 7  ;;  %v4487_v47 = vrot.slane %v12351_v9, 1 }
 0x259   : > { %9389 = vmatpush3.msra.mxu1 %v7263_v15  ;;  %9195 = vmatprep.mubr.msk.f32.mxu0 %vm14841_vm5, %v12706_v1  ;;  %v12724_v15 = vsel %vm14839_vm6, %v3873_v62, %v3874_v43  ;;  %14845 = vst [vmem:[#allocation20_spill] sm:$0xff] %v12728_v50  ;;  %v12737_v33 = vsel %vm14846_vm7, %v3874_v43, %v3875_v37  ;;  %v14847_v62 = vld [vmem:[#allocation42_spill] sm:$0xff] }
 0x25a   : > { %9390 = vmatprep.subr.mxu1 %v7262_v54  ;;  %vm14848_vm6 = vnez %v14847_v62  ;;  %v12747_v35 = vsel %vm14844_vm8, %v4485_v8, %v4486_v22  ;;  %v7260_v8 = vld [vmem:[%s13957_s3 + $0x218] sm:$0xff] }
 0x25b   : > { %9273 = vmatmul.mubr.msk.f32.gmra.mxu1 %vm10784_vm9, %v12716_v0  ;;  %v3877_v0 = vrot.slane %v12360_v13, 7  ;;  %14849 = vst [vmem:[#allocation49_spill] sm:$0xff] %v12747_v35  ;;  %vm14851_vm9 = vmmov %vm14844_vm8 }
 0x25c   : > { %9196 = vmatmul.mubr.f32.gmra.mxu0 %v12724_v15  ;;  %9275 = vmatprep.mubr.f32.mxu1 %v12728_v50  ;;  %v4488_v50 = vrot.slane %v12360_v13, 1  ;;  %v12759_v62 = vsel %vm14851_vm9, %v4486_v22, %v4487_v47  ;;  %vm14853_vm8 = vmmov %vm14846_vm7  ;;  %v3878_v22 = vrot.slane %v12362_v52, 7  ;;  %v4489_v13 = vrot.slane %v12362_v52, 1 }
 0x25d   : > { %9391 = vmatpush3.msra.mxu1 %v7262_v54  ;;  %9198 = vmatprep.mubr.msk.f32.mxu0 %vm14848_vm6, %v12737_v33  ;;  %v12755_v54 = vsel %vm14846_vm7, %v3875_v37, %v3876_v28  ;;  %14852 = vst [vmem:[#allocation84_spill] sm:$0xff] %v12759_v62  ;;  %v12768_v43 = vsel %vm14853_vm8, %v3876_v28, %v3877_v0  ;;  %v14854_v37 = vld [vmem:[#allocation46_spill] sm:$0xff]  ;;  %v12808_v52 = vmax.f32 %v12385_v5, 0.0 }
 0x25e   : > { %9392 = vmatprep.subr.mxu1 %v7261_v40  ;;  %vm14855_vm7 = vnez %v14854_v37  ;;  %v12778_v9 = vsel %vm14851_vm9, %v4487_v47, %v4488_v50  ;;  %v7259_v47 = vld [vmem:[%s13957_s3 + $0x210] sm:$0xff] }
 0x25f   : > { %9276 = vmatmul.mubr.msk.f32.gmra.mxu1 %vm10812_vm10, %v12747_v35  ;;  %v3879_v35 = vrot.slane %v12369_v36, 7  ;;  %14856 = vst [vmem:[#allocation87_spill] sm:$0xff] %v12778_v9  ;;  %vm14858_vm10 = vmmov %vm14851_vm9 }
 0x260   : > { %9199 = vmatmul.mubr.f32.gmra.mxu0 %v12755_v54  ;;  %9278 = vmatprep.mubr.f32.mxu1 %v12759_v62  ;;  %v4490_v62 = vrot.slane %v12369_v36, 1  ;;  %v12790_v37 = vsel %vm14858_vm10, %v4488_v50, %v4489_v13  ;;  %vm14860_vm9 = vmmov %vm14853_vm8  ;;  %v3880_v50 = vrot.slane %v12371_v12, 7  ;;  %v4491_v36 = vrot.slane %v12371_v12, 1 }
 0x261   : > { %9393 = vmatpush3.msra.mxu1 %v7261_v40  ;;  %9201 = vmatprep.mubr.msk.f32.mxu0 %vm14855_vm7, %v12768_v43  ;;  %v12786_v40 = vsel %vm14853_vm8, %v3877_v0, %v3878_v22  ;;  %14859 = vst [vmem:[#allocation120_spill] sm:$0xff] %v12790_v37  ;;  %v12799_v28 = vsel %vm14860_vm9, %v3878_v22, %v3879_v35  ;;  %v14861_v0 = vld [vmem:[#allocation51_spill] sm:$0xff]  ;;  %v4492_v22 = vrot.slane %v12377_v2, 1 }
 0x262   : > { %9394 = vmatprep.subr.mxu1 %v7260_v8  ;;  %vm14862_vm8 = vnez %v14861_v0 }
 0x263   : > { %9279 = vmatmul.mubr.msk.f32.gmra.mxu1 %vm10842_vm11, %v12778_v9  ;;  %v3881_v9 = vrot.slane %v12377_v2, 7  ;;  %vm14866_vm11 = vcmp.lt.s32.totalorder %v14767_v27, 1  ;;  %v14872_v2 = vld [vmem:[#allocation73_spill] sm:$0xff] }
 0x264   : > { %9202 = vmatmul.mubr.f32.gmra.mxu0 %v12786_v40  ;;  %9281 = vmatprep.mubr.f32.mxu1 %v12790_v37  ;;  %v12812_v37 = vsel %vm14858_vm10, %v4489_v13, %v4490_v62  ;;  %v12820_v0 = vsel %vm14866_vm11, %v3879_v35, %v3880_v50  ;;  %v7258_v13 = vld [vmem:[%s13957_s3 + $0x208] sm:$0xff]  ;;  %v14870_v35 = vld [vmem:[#allocation55_spill] sm:$0xff] }
 0x265   : > { %9395 = vmatpush3.msra.mxu1 %v7260_v8  ;;  %9204 = vmatprep.mubr.msk.f32.mxu0 %vm14862_vm8, %v12799_v28  ;;  %14863 = vst [vmem:[#allocation45_spill] sm:$0xff] %v12812_v37  ;;  %v14864_v8 = vld [vmem:[#allocation71_spill] sm:$0xff]  ;;  %vm14867_vm8 = vmmov %vm14858_vm10 }
 0x266   : > { %9396 = vmatprep.subr.mxu1 %v7259_v47  ;;  %vm14865_vm9 = vnez %v14864_v8  ;;  %v12824_v12 = vsel %vm14867_vm8, %v4490_v62, %v4491_v36  ;;  %vm14869_vm10 = vmmov %vm14866_vm11  ;;  %vm14871_vm11 = vnez %v14870_v35  ;;  %v14257_v62 = vrot.slane %v12380_v63, 7 }
 0x267   : > { %9282 = vmatmul.mubr.msk.f32.gmra.mxu1 %vm14865_vm9, %v12812_v37  ;;  %14868 = vst [vmem:[#allocation85_spill] sm:$0xff] %v12824_v12  ;;  %v12833_v5 = vsel %vm14869_vm10, %v3880_v50, %v3881_v9  ;;  %v4493_v8 = vrot.slane %v12380_v63, 1  ;;  %v12842_v37 = vsel %vm14867_vm8, %v4491_v36, %v4492_v22  ;;  %vm14873_vm10 = vnez %v14872_v2  ;;  %v7257_v36 = vld [vmem:[%s13957_s3 + $0x200] sm:$0xff]  ;;  %v7336_v2 = vld [vmem:[%s13957_s3 + $0x378] sm:$0xff] }
 0x268   : > { %9205 = vmatmul.mubr.f32.gmra.mxu0 %v12820_v0  ;;  %9284 = vmatprep.mubr.f32.mxu1 %v12824_v12  ;;  %vm14874_vm9 = vcmp.lt.s32.totalorder %v14767_v27, 1  ;;  %v14876_v12 = vld [vmem:[#allocation57_spill] sm:$0xff] }
 0x269   : > { %9397 = vmatpush3.msra.mxu1 %v7259_v47  ;;  %9207 = vmatprep.mubr.msk.f32.mxu0 %vm14871_vm11, %v12833_v5  ;;  %v12852_v47 = vsel %vm14874_vm9, %v3881_v9, %v14257_v62  ;;  %vm14875_vm11 = vmmov %vm14867_vm8  ;;  %vm14877_vm8 = vnez %v14876_v12  ;;  %v14878_v9 = vrot.slane %v12808_v52, 1  ;;  %v7380_v12 = vld [vmem:[%s13957_s3 + $0x3e8] sm:$0xff] }
 0x26a   : > { %9398 = vmatprep.subr.mxu1 %v7258_v13  ;;  %v12856_v50 = vsel %vm14875_vm11, %v4492_v22, %v4493_v8  ;;  %vm14879_vm9 = vmmov %vm14875_vm11  ;;  %v14880_v22 = vld [vmem:[#allocation76_spill] sm:$0xff] }
 0x26b   : > { %9285 = vmatmul.mubr.msk.f32.gmra.mxu1 %vm14873_vm10, %v12842_v37  ;;  %v12870_v62 = vsel %vm14879_vm9, %v4493_v8, %v14878_v9  ;;  %vm14881_vm11 = vnez %v14880_v22  ;;  %v9810_v8 = vld [vmem:[%s13957_s3 + $0x2f8] sm:$0xff]  ;;  %vm14882_vm9 = vnez %v14775_v61  ;;  %vm14908_vm10 = vcmp.lt.s32.totalorder %v14767_v27, 1  ;;  %v7395_v61 = vld [vmem:[%s13957_s3 + $0x460] sm:$0xff] }
 0x26c   : > { %9208 = vmatmul.mubr.f32.gmra.mxu0 %v12852_v47  ;;  %9287 = vmatprep.mubr.f32.mxu1 %v12856_v50  ;;  %v7284_v9 = vld [vmem:[%s13957_s3 + $0x2d8] sm:$0xff] }
 0x26d   : > { %9399 = vmatpush3.msra.mxu1 %v7258_v13  ;;  %9322 = vmatprep.mubr.msk.f32.mxu0 %vm14877_vm8, %v12400_v34  ;;  %v7287_v34 = vld [vmem:[%s13957_s3 + $0x2f0] sm:$0xff]  ;;  %v7286_v13 = vld [vmem:[%s13957_s3 + $0x2e8] sm:$0xff] }
 0x26e   : > { %9400 = vmatprep.subr.mxu1 %v7257_v36 }
 0x26f   : > { %9288 = vmatmul.mubr.msk.f32.gmra.mxu1 %vm14881_vm11, %v12870_v62 }
 0x270   : > { %9323 = vmatmul.mubr.f32.vlgmr.msra.gmra.mxu0 %v12409_v24  ;;  %9401 = vmatpush3.msra.mxu1 %v7257_v36  ;;  %v7335_v24 = vld [vmem:[%s13957_s3 + $0x370] sm:$0xff]  ;;  %v7333_v36 = vld [vmem:[%s13957_s3 + $0x360] sm:$0xff] }
 0x271   : > { %9402 = vmatprep.mubr.f32.mxu1 %v12122_v51  ;;  %9325 = vmatprep.mubr.msk.f32.mxu0 %vm14468_vm14, %v12424_v19 }
 0x272   : > { %9451 = vmatpush3.msra.mxu0 %v9810_v8  ;;  %9530 = vmatprep.subr.mxu1 %v7336_v2  ;;  %v7283_v8 = vld [vmem:[%s13957_s3 + $0x2d0] sm:$0xff] }
 0x273   : > { %9403 = vmatmul.mubr.f32.vlgmr.msra.gmra.mxu1 %v12128_v7  ;;  %9452 = vmatprep.subr.mxu0 %v7287_v34  ;;  %v7334_v7 = vld [vmem:[%s13957_s3 + $0x368] sm:$0xff] }
 0x274   : > { %9326 = vmatmul.mubr.f32.gmra.mxu0 %v12443_v41  ;;  %9405 = vmatprep.mubr.f32.mxu1 %v12142_v20 }
 0x275   : > { %9531 = vmatpush3.msra.mxu1 %v7336_v2  ;;  %9328 = vmatprep.mubr.msk.f32.mxu0 %vm14882_vm9, %v12456_v46  ;;  %v7285_v2 = vld [vmem:[%s13957_s3 + $0x2e0] sm:$0xff] }
 0x276   : > { %9453 = vmatpush3.msra.mxu0 %v7287_v34  ;;  %9532 = vmatprep.subr.mxu1 %v7335_v24  ;;  %v7332_v34 = vld [vmem:[%s13957_s3 + $0x358] sm:$0xff] }
 0x277   : > { %9406 = vmatmul.mubr.f32.gmra.mxu1 %v12148_v21  ;;  %9454 = vmatprep.subr.mxu0 %v7286_v13 }
 0x278   : > { %9329 = vmatmul.mubr.f32.gmra.mxu0 %v12476_v4  ;;  %9408 = vmatprep.mubr.f32.mxu1 %v12164_v45 }
 0x279   : > { %9533 = vmatpush3.msra.mxu1 %v7335_v24  ;;  %9331 = vmatprep.mubr.msk.f32.mxu0 %vm14784_vm13, %v12489_v49  ;;  %v7331_v24 = vld [vmem:[%s13957_s3 + $0x350] sm:$0xff] }
 0x27a   : > { %9455 = vmatpush3.msra.mxu0 %v7286_v13  ;;  %9534 = vmatprep.subr.mxu1 %v7334_v7  ;;  %v7282_v13 = vld [vmem:[%s13957_s3 + $0x2c8] sm:$0xff] }
 0x27b   : > { %9409 = vmatmul.mubr.f32.gmra.mxu1 %v12170_v25  ;;  %9456 = vmatprep.subr.mxu0 %v7285_v2  ;;  %v14907_v25 = vrot.slane %v12380_v63, 7 }
 0x27c   : > { %9332 = vmatmul.mubr.f32.gmra.mxu0 %v12507_v18  ;;  %9411 = vmatprep.mubr.f32.mxu1 %v12188_v16  ;;  %v14906_v16 = vld [vmem:[#allocation113_spill] sm:$0xff] }
 0x27d   : > { %9535 = vmatpush3.msra.mxu1 %v7334_v7  ;;  %9334 = vmatprep.mubr.msk.f32.mxu0 %vm14792_vm12, %v12520_v32  ;;  %v7330_v7 = vld [vmem:[%s13957_s3 + $0x348] sm:$0xff] }
 0x27e   : > { %9457 = vmatpush3.msra.mxu0 %v7285_v2  ;;  %9536 = vmatprep.subr.mxu1 %v7333_v36  ;;  %v7281_v2 = vld [vmem:[%s13957_s3 + $0x2c0] sm:$0xff] }
 0x27f   : > { %9412 = vmatmul.mubr.f32.gmra.mxu1 %v12193_v38  ;;  %9458 = vmatprep.subr.mxu0 %v7284_v9  ;;  %v3883_v38 = vrot.slane %v12808_v52, 7 }
 0x280   : > { %9335 = vmatmul.mubr.f32.gmra.mxu0 %v12538_v56  ;;  %9414 = vmatprep.mubr.f32.mxu1 %v12210_v14  ;;  %v14900_v14 = vld [vmem:[#allocation46_spill] sm:$0xff] }
 0x281   : > { %9537 = vmatpush3.msra.mxu1 %v7333_v36  ;;  %9337 = vmatprep.mubr.msk.f32.mxu0 %vm14799_vm15, %v12551_v6  ;;  %v14883_v36 = vld [vmem:[#allocation10_spill] sm:$0xff] }
 0x282   : > { %9459 = vmatpush3.msra.mxu0 %v7284_v9  ;;  %9538 = vmatprep.subr.mxu1 %v7332_v34  ;;  %v7329_v9 = vld [vmem:[%s13957_s3 + $0x340] sm:$0xff] }
 0x283   : > { %9415 = vmatmul.mubr.f32.gmra.mxu1 %v12215_v23  ;;  %9460 = vmatprep.subr.mxu0 %v7283_v8  ;;  %v7385_v23 = vld [vmem:[%s13957_s3 + $0x410] sm:$0xff] }
 0x284   : > { %9338 = vmatmul.mubr.f32.gmra.mxu0 %v12569_v29  ;;  %9417 = vmatprep.mubr.f32.mxu1 %v12232_v44  ;;  %v7386_v44 = vld [vmem:[%s13957_s3 + $0x418] sm:$0xff] }
 0x285   : > { %9539 = vmatpush3.msra.mxu1 %v7332_v34  ;;  %9340 = vmatprep.mubr.msk.f32.mxu0 %vm14806_vm0, %v12582_v17  ;;  %v14884_v34 = vld [vmem:[#allocation118_spill] sm:$0xff] }
 0x286   : > { %9461 = vmatpush3.msra.mxu0 %v7283_v8  ;;  %9540 = vmatprep.subr.mxu1 %v7331_v24  ;;  %v7280_v8 = vld [vmem:[%s13957_s3 + $0x2b8] sm:$0xff] }
 0x287   : > { %9418 = vmatmul.mubr.f32.gmra.mxu1 %v12237_v57  ;;  %9462 = vmatprep.subr.mxu0 %v7282_v13  ;;  %v7387_v57 = vld [vmem:[%s13957_s3 + $0x420] sm:$0xff] }
 0x288   : > { %9341 = vmatmul.mubr.f32.gmra.mxu0 %v12600_v10  ;;  %9420 = vmatprep.mubr.f32.mxu1 %v12254_v11  ;;  %v7388_v11 = vld [vmem:[%s13957_s3 + $0x428] sm:$0xff] }
 0x289   : > { %9541 = vmatpush3.msra.mxu1 %v7331_v24  ;;  %9343 = vmatprep.mubr.msk.f32.mxu0 %vm14813_vm1, %v12613_v30  ;;  %v14958_v24 = vld [vmem:[#allocation18_spill] sm:$0xff] }
 0x28a   : > { %9463 = vmatpush3.msra.mxu0 %v7282_v13  ;;  %9542 = vmatprep.subr.mxu1 %v7330_v7  ;;  %v14886_v13 = vld [vmem:[#allocation111_spill] sm:$0xff] }
 0x28b   : > { %9421 = vmatmul.mubr.f32.gmra.mxu1 %v14883_v36  ;;  %9464 = vmatprep.subr.mxu0 %v7281_v2  ;;  %v7328_v36 = vld [vmem:[%s13957_s3 + $0x338] sm:$0xff] }
 0x28c   : > { %9344 = vmatmul.mubr.f32.gmra.mxu0 %v12631_v58  ;;  %9423 = vmatprep.mubr.f32.mxu1 %v14884_v34  ;;  %v14887_v34 = vld [vmem:[#allocation7_spill] sm:$0xff] }
 0x28d   : > { %9543 = vmatpush3.msra.mxu1 %v7330_v7  ;;  %9346 = vmatprep.mubr.msk.f32.mxu0 %vm14820_vm2, %v12644_v55  ;;  %v7279_v7 = vld [vmem:[%s13957_s3 + $0x2b0] sm:$0xff] }
 0x28e   : > { %9465 = vmatpush3.msra.mxu0 %v7281_v2  ;;  %9544 = vmatprep.subr.mxu1 %v7329_v9  ;;  %v14889_v2 = vld [vmem:[#allocation9_spill] sm:$0xff] }
 0x28f   : > { %9424 = vmatmul.mubr.f32.gmra.mxu1 %v14886_v13  ;;  %9466 = vmatprep.subr.mxu0 %v7280_v8  ;;  %v7327_v13 = vld [vmem:[%s13957_s3 + $0x330] sm:$0xff] }
 0x290   : > { %9347 = vmatmul.mubr.f32.gmra.mxu0 %v12662_v31  ;;  %9426 = vmatprep.mubr.f32.mxu1 %v14887_v34  ;;  %v14890_v34 = vld [vmem:[#allocation31_spill] sm:$0xff] }
 0x291   : > { %9545 = vmatpush3.msra.mxu1 %v7329_v9  ;;  %9349 = vmatprep.mubr.msk.f32.mxu0 %vm14827_vm3, %v12675_v39  ;;  %v7278_v9 = vld [vmem:[%s13957_s3 + $0x2a8] sm:$0xff] }
 0x292   : > { %9467 = vmatpush3.msra.mxu0 %v7280_v8  ;;  %9546 = vmatprep.subr.mxu1 %v7328_v36  ;;  %v14892_v8 = vld [vmem:[#allocation32_spill] sm:$0xff] }
 0x293   : > { %9427 = vmatmul.mubr.f32.gmra.mxu1 %v14889_v2  ;;  %9468 = vmatprep.subr.mxu0 %v7279_v7  ;;  %v7326_v2 = vld [vmem:[%s13957_s3 + $0x328] sm:$0xff] }
 0x294   : > { %9350 = vmatmul.mubr.f32.gmra.mxu0 %v12693_v60  ;;  %9429 = vmatprep.mubr.f32.mxu1 %v14890_v34  ;;  %v14893_v34 = vld [vmem:[#allocation52_spill] sm:$0xff] }
 0x295   : > { %9547 = vmatpush3.msra.mxu1 %v7328_v36  ;;  %9352 = vmatprep.mubr.msk.f32.mxu0 %vm14834_vm4, %v12706_v1  ;;  %v7277_v36 = vld [vmem:[%s13957_s3 + $0x2a0] sm:$0xff] }
 0x296   : > { %9469 = vmatpush3.msra.mxu0 %v7279_v7  ;;  %9548 = vmatprep.subr.mxu1 %v7327_v13  ;;  %v14895_v7 = vld [vmem:[#allocation43_spill] sm:$0xff] }
 0x297   : > { %9430 = vmatmul.mubr.f32.gmra.mxu1 %v14892_v8  ;;  %9470 = vmatprep.subr.mxu0 %v7278_v9  ;;  %v7325_v8 = vld [vmem:[%s13957_s3 + $0x320] sm:$0xff] }
 0x298   : > { %9353 = vmatmul.mubr.f32.gmra.mxu0 %v12724_v15  ;;  %9432 = vmatprep.mubr.f32.mxu1 %v14893_v34  ;;  %v14896_v34 = vld [vmem:[#allocation121_spill] sm:$0xff] }
 0x299   : > { %9549 = vmatpush3.msra.mxu1 %v7327_v13  ;;  %9355 = vmatprep.mubr.msk.f32.mxu0 %vm14841_vm5, %v12737_v33  ;;  %v7276_v13 = vld [vmem:[%s13957_s3 + $0x298] sm:$0xff] }
 0x29a   : > { %9471 = vmatpush3.msra.mxu0 %v7278_v9  ;;  %9550 = vmatprep.subr.mxu1 %v7326_v2  ;;  %v14898_v9 = vld [vmem:[#allocation112_spill] sm:$0xff] }
 0x29b   : > { %9433 = vmatmul.mubr.f32.gmra.mxu1 %v14895_v7  ;;  %9472 = vmatprep.subr.mxu0 %v7277_v36  ;;  %v7324_v7 = vld [vmem:[%s13957_s3 + $0x318] sm:$0xff] }
 0x29c   : > { %9356 = vmatmul.mubr.f32.gmra.mxu0 %v12755_v54  ;;  %9435 = vmatprep.mubr.f32.mxu1 %v14896_v34  ;;  %v14899_v34 = vld [vmem:[#allocation36_spill] sm:$0xff] }
 0x29d   : > { %9551 = vmatpush3.msra.mxu1 %v7326_v2  ;;  %9358 = vmatprep.mubr.msk.f32.mxu0 %vm14848_vm6, %v12768_v43  ;;  %v7275_v2 = vld [vmem:[%s13957_s3 + $0x290] sm:$0xff] }
 0x29e   : > { %9473 = vmatpush3.msra.mxu0 %v7277_v36  ;;  %9552 = vmatprep.subr.mxu1 %v7325_v8  ;;  %v14901_v36 = vld [vmem:[#allocation74_spill] sm:$0xff] }
 0x29f   : > { %9436 = vmatmul.mubr.f32.gmra.mxu1 %v14898_v9  ;;  %9474 = vmatprep.subr.mxu0 %v7276_v13  ;;  %v7323_v9 = vld [vmem:[%s13957_s3 + $0x310] sm:$0xff] }
 0x2a0   : > { %9359 = vmatmul.mubr.f32.gmra.mxu0 %v12786_v40  ;;  %9438 = vmatprep.mubr.f32.mxu1 %v14899_v34  ;;  %v14902_v34 = vld [vmem:[#allocation75_spill] sm:$0xff] }
 0x2a1   : > { %9553 = vmatpush3.msra.mxu1 %v7325_v8  ;;  %9361 = vmatprep.mubr.msk.f32.mxu0 %vm14855_vm7, %v12799_v28  ;;  %v7274_v8 = vld [vmem:[%s13957_s3 + $0x288] sm:$0xff]  ;;  %vm14912_vm7 = vmmov %vm14908_vm10 }
 0x2a2   : > { %9475 = vmatpush3.msra.mxu0 %v7276_v13  ;;  %9554 = vmatprep.subr.mxu1 %v7324_v7  ;;  %v14903_v13 = vld [vmem:[#allocation51_spill] sm:$0xff] }
 0x2a3   : > { %9439 = vmatmul.mubr.f32.gmra.mxu1 %v14901_v36  ;;  %9476 = vmatprep.subr.mxu0 %v7275_v2  ;;  %vm14904_vm11 = vnez %v14903_v13  ;;  %v14905_v36 = vld [vmem:[#allocation124_spill] sm:$0xff] }
 0x2a4   : > { %9362 = vmatmul.mubr.f32.gmra.mxu0 %v12820_v0  ;;  %9441 = vmatprep.mubr.f32.mxu1 %v14902_v34  ;;  %v7322_v34 = vld [vmem:[%s13957_s3 + $0x308] sm:$0xff] }
 0x2a5   : > { %9555 = vmatpush3.msra.mxu1 %v7324_v7  ;;  %9364 = vmatprep.mubr.msk.f32.mxu0 %vm14904_vm11, %v12833_v5  ;;  %v13056_v7 = vsel %vm14908_vm10, %v14907_v25, %v3883_v38  ;;  %vm14909_vm11 = vnez %v14870_v35  ;;  %v7321_v25 = vld [vmem:[%s13957_s3 + $0x300] sm:$0xff]  ;;  %v7382_v35 = vld [vmem:[%s13957_s3 + $0x3f8] sm:$0xff] }
 0x2a6   : > { %9477 = vmatpush3.msra.mxu0 %v7275_v2  ;;  %9556 = vmatprep.subr.mxu1 %v7323_v9  ;;  %v7273_v2 = vld [vmem:[%s13957_s3 + $0x280] sm:$0xff] }
 0x2a7   : > { %9442 = vmatmul.mubr.f32.gmra.mxu1 %v14905_v36  ;;  %9478 = vmatprep.subr.mxu0 %v7274_v8 }
 0x2a8   : > { %9365 = vmatmul.mubr.f32.gmra.mxu0 %v12852_v47  ;;  %9444 = vmatprep.mubr.f32.mxu1 %v14906_v16  ;;  %v14910_v16 = vld [vmem:[#allocation13_spill] sm:$0xff] }
 0x2a9   : > { %9557 = vmatpush3.msra.mxu1 %v7323_v9  ;;  %9367 = vmatprep.mubr.msk.f32.mxu0 %vm14909_vm11, %v13056_v7  ;;  %v14911_v36 = vrot.slane %v14910_v16, 7  ;;  %v14913_v9 = vld [vmem:[#allocation40_spill] sm:$0xff]  ;;  %vm14979_vm11 = vnez %v14900_v14 }
 0x2aa   : > { %9479 = vmatpush3.msra.mxu0 %v7274_v8  ;;  %9558 = vmatprep.subr.mxu1 %v7322_v34  ;;  %v14915_v8 = vld [vmem:[#allocation5_spill] sm:$0xff]  ;;  %v7384_v14 = vld [vmem:[%s13957_s3 + $0x408] sm:$0xff] }
 0x2ab   : > { %9445 = vmatmul.mubr.f32.gmra.mxu1 %v12380_v63  ;;  %v13069_v45 = vsel %vm14912_vm7, %v3883_v38, %v14911_v36  ;;  %9480 = vmatprep.subr.mxu0 %v7273_v2  ;;  %v7398_v38 = vld [vmem:[%s13957_s3 + $0x478] sm:$0xff]  ;;  %v14914_v36 = vld [vmem:[#allocation47_spill] sm:$0xff]  ;;  %vm14916_vm7 = vnez %v14915_v8 }
 0x2ac   : > { %9368 = vmatmul.mubr.f32.gmra.mxu0 %v13069_v45  ;;  %9447 = vmatprep.mubr.f32.mxu1 %v12808_v52  ;;  %v14924_v63 = vld [vmem:[#allocation59_spill] sm:$0xff] }
 0x2ad   : > { %9559 = vmatpush3.msra.mxu1 %v7322_v34  ;;  %9482 = vmatprep.mubr.f32.mxu0 %v14913_v9  ;;  %v7381_v34 = vld [vmem:[%s13957_s3 + $0x3f0] sm:$0xff] }
 0x2ae   : > { %9481 = vmatpush3.msra.mxu0 %v7273_v2  ;;  %9560 = vmatprep.subr.mxu1 %v7321_v25  ;;  %v14917_v2 = vld [vmem:[#allocation79_spill] sm:$0xff]  ;;  %v7397_v9 = vld [vmem:[%s13957_s3 + $0x470] sm:$0xff] }
 0x2af   : > { %9448 = vmatmul.mubr.f32.gmra.mxu1 %v14910_v16  ;;  %9610 = vmatprep.subr.mxu0 %v7382_v35 }
 0x2b0   : > { %9483 = vmatmul.mubr.msk.f32.vlgmr.msra.gmra.mxu0 %vm14916_vm7, %v14914_v36  ;;  %9561 = vmatpush3.msra.mxu1 %v7321_v25  ;;  %v14918_v25 = vld [vmem:[#allocation114_spill] sm:$0xff] }
 0x2b1   : > { %9562 = vmatprep.mubr.msk.f32.mxu1 %vm14877_vm8, %v12424_v19  ;;  %9485 = vmatprep.mubr.f32.mxu0 %v14917_v2  ;;  %v14919_v36 = vld [vmem:[#allocation58_spill] sm:$0xff]  ;;  %v13107_v19 = vpop.f32.mrf.mxu1 }
 0x2b2   : > { %9611 = vmatpush3.msra.mxu0 %v7382_v35  ;;  %9690 = vmatprep.subr.mxu1 %v7398_v38  ;;  %vm14920_vm10 = vnez %v14919_v36  ;;  %14921 = vst [vmem:[#allocation86_spill] sm:$0xff] %v13107_v19 }
 0x2b3   : > { %9563 = vmatmul.mubr.f32.vlgmr.msra.gmra.mxu1 %v12443_v41  ;;  %9612 = vmatprep.subr.mxu0 %v7381_v34  ;;  %v14922_v41 = vld [vmem:[#allocation37_spill] sm:$0xff] }
 0x2b4   : > { %9486 = vmatmul.mubr.msk.f32.gmra.mxu0 %vm14920_vm10, %v14918_v25  ;;  %9565 = vmatprep.mubr.msk.f32.mxu1 %vm14468_vm14, %v12456_v46  ;;  %v14923_v46 = vld [vmem:[#allocation77_spill] sm:$0xff]  ;;  %vm14925_vm14 = vnez %v14924_v63  ;;  %v14929_v63 = vld [vmem:[#allocation60_spill] sm:$0xff] }
 0x2b5   : > { %9691 = vmatpush3.msra.mxu1 %v7398_v38  ;;  %9488 = vmatprep.mubr.f32.mxu0 %v14922_v41  ;;  %v7379_v38 = vld [vmem:[%s13957_s3 + $0x3e0] sm:$0xff]  ;;  %vm14930_vm8 = vnez %v14929_v63  ;;  %v14934_v63 = vld [vmem:[#allocation61_spill] sm:$0xff] }
 0x2b6   : > { %9613 = vmatpush3.msra.mxu0 %v7381_v34  ;;  %9692 = vmatprep.subr.mxu1 %v7397_v9 }
 0x2b7   : > { %v13110_v35 = vpop.f32.mrf.mxu1  ;;  %9566 = vmatmul.mubr.f32.gmra.mxu1 %v12476_v4  ;;  %9614 = vmatprep.subr.mxu0 %v7380_v12  ;;  %v14926_v4 = vld [vmem:[#allocation78_spill] sm:$0xff] }
 0x2b8   : > { %9489 = vmatmul.mubr.msk.f32.gmra.mxu0 %vm14925_vm14, %v14923_v46  ;;  %9568 = vmatprep.mubr.msk.f32.mxu1 %vm14882_vm9, %v12489_v49  ;;  %v14928_v49 = vld [vmem:[#allocation130_spill] sm:$0xff] }
 0x2b9   : > { %9693 = vmatpush3.msra.mxu1 %v7397_v9  ;;  %v13125_v34 = vpop.f32.mrf.mxu1  ;;  %9491 = vmatprep.mubr.f32.mxu0 %v14926_v4  ;;  %v7378_v9 = vld [vmem:[%s13957_s3 + $0x3d8] sm:$0xff] }
 0x2ba   : > { %9615 = vmatpush3.msra.mxu0 %v7380_v12  ;;  %9694 = vmatprep.subr.mxu1 %v7396_v3 }
 0x2bb   : > { %v13128_v19 = vpop.f32.mrf.mxu1  ;;  %9569 = vmatmul.mubr.f32.gmra.mxu1 %v12507_v18  ;;  %9616 = vmatprep.subr.mxu0 %v7379_v38  ;;  %v14931_v18 = vld [vmem:[#allocation116_spill] sm:$0xff] }
 0x2bc   : > { %14927 = vst [vmem:[#allocation122_spill] sm:$0xff] %v13128_v19  ;;  %9492 = vmatmul.mubr.msk.f32.gmra.mxu0 %vm14930_vm8, %v14928_v49  ;;  %9571 = vmatprep.mubr.msk.f32.mxu1 %vm14784_vm13, %v12520_v32  ;;  %v7394_v32 = vld [vmem:[%s13957_s3 + $0x458] sm:$0xff]  ;;  %vm14935_vm13 = vnez %v14934_v63  ;;  %v14939_v63 = vld [vmem:[#allocation63_spill] sm:$0xff] }
 0x2bd   : > { %9695 = vmatpush3.msra.mxu1 %v7396_v3  ;;  %v13143_v12 = vpop.f32.mrf.mxu1  ;;  %9494 = vmatprep.mubr.f32.mxu0 %v14931_v18  ;;  %v7377_v3 = vld [vmem:[%s13957_s3 + $0x3d0] sm:$0xff] }
 0x2be   : > { %9617 = vmatpush3.msra.mxu0 %v7379_v38  ;;  %9696 = vmatprep.subr.mxu1 %v7395_v61 }
 0x2bf   : > { %v13146_v19 = vpop.f32.mrf.mxu1  ;;  %9572 = vmatmul.mubr.f32.gmra.mxu1 %v12538_v56  ;;  %9618 = vmatprep.subr.mxu0 %v7378_v9  ;;  %v14936_v56 = vld [vmem:[#allocation16_spill] sm:$0xff] }
 0x2c0   : > { %14932 = vst [vmem:[#allocation21_spill] sm:$0xff] %v13146_v19  ;;  %9495 = vmatmul.mubr.msk.f32.gmra.mxu0 %vm14935_vm13, %v14933_v59  ;;  %9574 = vmatprep.mubr.msk.f32.mxu1 %vm14792_vm12, %v12551_v6  ;;  %v14938_v6 = vld [vmem:[#allocation41_spill] sm:$0xff]  ;;  %vm14940_vm12 = vnez %v14939_v63 }
 0x2c1   : > { %9697 = vmatpush3.msra.mxu1 %v7395_v61  ;;  %v13161_v38 = vpop.f32.mrf.mxu1  ;;  %9497 = vmatprep.mubr.f32.mxu0 %v14936_v56  ;;  %v7376_v61 = vld [vmem:[%s13957_s3 + $0x3c8] sm:$0xff]  ;;  %v14944_v63 = vld [vmem:[#allocation65_spill] sm:$0xff] }
 0x2c2   : > { %9619 = vmatpush3.msra.mxu0 %v7378_v9  ;;  %9698 = vmatprep.subr.mxu1 %v7394_v32 }
 0x2c3   : > { %v13164_v19 = vpop.f32.mrf.mxu1  ;;  %9575 = vmatmul.mubr.f32.gmra.mxu1 %v12569_v29  ;;  %9620 = vmatprep.subr.mxu0 %v7377_v3  ;;  %v14941_v29 = vld [vmem:[#allocation80_spill] sm:$0xff] }
 0x2c4   : > { %14937 = vst [vmem:[#allocation22_spill] sm:$0xff] %v13164_v19  ;;  %9498 = vmatmul.mubr.msk.f32.gmra.mxu0 %vm14940_vm12, %v14938_v6  ;;  %9577 = vmatprep.mubr.msk.f32.mxu1 %vm14799_vm15, %v12582_v17  ;;  %v14943_v17 = vld [vmem:[#allocation83_spill] sm:$0xff]  ;;  %vm14945_vm15 = vnez %v14944_v63 }
 0x2c5   : > { %9699 = vmatpush3.msra.mxu1 %v7394_v32  ;;  %v13179_v9 = vpop.f32.mrf.mxu1  ;;  %9500 = vmatprep.mubr.f32.mxu0 %v14941_v29  ;;  %v7375_v32 = vld [vmem:[%s13957_s3 + $0x3c0] sm:$0xff] }
 0x2c6   : > { %9621 = vmatpush3.msra.mxu0 %v7377_v3  ;;  %9700 = vmatprep.subr.mxu1 %v7393_v48  ;;  %v14949_v63 = vld [vmem:[#allocation67_spill] sm:$0xff] }
 0x2c7   : > { %v13182_v19 = vpop.f32.mrf.mxu1  ;;  %9578 = vmatmul.mubr.f32.gmra.mxu1 %v12600_v10  ;;  %9622 = vmatprep.subr.mxu0 %v7376_v61  ;;  %v14946_v10 = vld [vmem:[#allocation117_spill] sm:$0xff] }
 0x2c8   : > { %14942 = vst [vmem:[#allocation50_spill] sm:$0xff] %v13182_v19  ;;  %9501 = vmatmul.mubr.msk.f32.gmra.mxu0 %vm14945_vm15, %v14943_v17  ;;  %9580 = vmatprep.mubr.msk.f32.mxu1 %vm14806_vm0, %v12613_v30  ;;  %v14948_v30 = vld [vmem:[#allocation44_spill] sm:$0xff]  ;;  %vm14950_vm0 = vnez %v14949_v63  ;;  %v14954_v63 = vld [vmem:[#allocation69_spill] sm:$0xff] }
 0x2c9   : > { %9701 = vmatpush3.msra.mxu1 %v7393_v48  ;;  %v13197_v3 = vpop.f32.mrf.mxu1  ;;  %9503 = vmatprep.mubr.f32.mxu0 %v14946_v10  ;;  %v7374_v48 = vld [vmem:[%s13957_s3 + $0x3b8] sm:$0xff] }
 0x2ca   : > { %9623 = vmatpush3.msra.mxu0 %v7376_v61  ;;  %9702 = vmatprep.subr.mxu1 %v7392_v42 }
 0x2cb   : > { %v13200_v19 = vpop.f32.mrf.mxu1  ;;  %9581 = vmatmul.mubr.f32.gmra.mxu1 %v12631_v58  ;;  %9624 = vmatprep.subr.mxu0 %v7375_v32  ;;  %v14951_v58 = vld [vmem:[#allocation81_spill] sm:$0xff] }
 0x2cc   : > { %14947 = vst [vmem:[#allocation88_spill] sm:$0xff] %v13200_v19  ;;  %9504 = vmatmul.mubr.msk.f32.gmra.mxu0 %vm14950_vm0, %v14948_v30  ;;  %9583 = vmatprep.mubr.msk.f32.mxu1 %vm14813_vm1, %v12644_v55  ;;  %v14953_v55 = vld [vmem:[#allocation82_spill] sm:$0xff]  ;;  %vm14955_vm1 = vnez %v14954_v63 }
 0x2cd   : > { %9703 = vmatpush3.msra.mxu1 %v7392_v42  ;;  %v13215_v61 = vpop.f32.mrf.mxu1  ;;  %9506 = vmatprep.mubr.f32.mxu0 %v14951_v58  ;;  %v7373_v42 = vld [vmem:[%s13957_s3 + $0x3b0] sm:$0xff]  ;;  %v14959_v63 = vld [vmem:[#allocation70_spill] sm:$0xff] }
 0x2ce   : > { %9625 = vmatpush3.msra.mxu0 %v7375_v32  ;;  %9704 = vmatprep.subr.mxu1 %v7391_v53 }
 0x2cf   : > { %v13218_v19 = vpop.f32.mrf.mxu1  ;;  %9584 = vmatmul.mubr.f32.gmra.mxu1 %v12662_v31  ;;  %9626 = vmatprep.subr.mxu0 %v7374_v48  ;;  %v14956_v31 = vld [vmem:[#allocation119_spill] sm:$0xff] }
 0x2d0   : > { %14952 = vst [vmem:[#allocation91_spill] sm:$0xff] %v13218_v19  ;;  %9507 = vmatmul.mubr.msk.f32.gmra.mxu0 %vm14955_vm1, %v14953_v55  ;;  %9586 = vmatprep.mubr.msk.f32.mxu1 %vm14820_vm2, %v12675_v39  ;;  %v7389_v39 = vld [vmem:[%s13957_s3 + $0x430] sm:$0xff]  ;;  %vm14960_vm2 = vnez %v14959_v63  ;;  %v14964_v63 = vld [vmem:[#allocation30_spill] sm:$0xff] }
 0x2d1   : > { %9705 = vmatpush3.msra.mxu1 %v7391_v53  ;;  %v13233_v32 = vpop.f32.mrf.mxu1  ;;  %9509 = vmatprep.mubr.f32.mxu0 %v14956_v31  ;;  %v7372_v53 = vld [vmem:[%s13957_s3 + $0x3a8] sm:$0xff] }
 0x2d2   : > { %9627 = vmatpush3.msra.mxu0 %v7374_v48  ;;  %9706 = vmatprep.subr.mxu1 %v7390_v26 }
 0x2d3   : > { %v13236_v19 = vpop.f32.mrf.mxu1  ;;  %9587 = vmatmul.mubr.f32.gmra.mxu1 %v12693_v60  ;;  %9628 = vmatprep.subr.mxu0 %v7373_v42  ;;  %v14961_v60 = vld [vmem:[#allocation20_spill] sm:$0xff] }
 0x2d4   : > { %14957 = vst [vmem:[#allocation123_spill] sm:$0xff] %v13236_v19  ;;  %9510 = vmatmul.mubr.msk.f32.gmra.mxu0 %vm14960_vm2, %v14958_v24  ;;  %9589 = vmatprep.mubr.msk.f32.mxu1 %vm14827_vm3, %v12706_v1  ;;  %v14963_v1 = vld [vmem:[#allocation49_spill] sm:$0xff]  ;;  %vm14965_vm3 = vnez %v14964_v63  ;;  %v14969_v63 = vld [vmem:[#allocation34_spill] sm:$0xff] }
 0x2d5   : > { %9707 = vmatpush3.msra.mxu1 %v7390_v26  ;;  %v13251_v48 = vpop.f32.mrf.mxu1  ;;  %9512 = vmatprep.mubr.f32.mxu0 %v14961_v60  ;;  %v7371_v26 = vld [vmem:[%s13957_s3 + $0x3a0] sm:$0xff] }
 0x2d6   : > { %9629 = vmatpush3.msra.mxu0 %v7373_v42  ;;  %9708 = vmatprep.subr.mxu1 %v7389_v39 }
 0x2d7   : > { %v13254_v19 = vpop.f32.mrf.mxu1  ;;  %9590 = vmatmul.mubr.f32.gmra.mxu1 %v12724_v15  ;;  %9630 = vmatprep.subr.mxu0 %v7372_v53  ;;  %v14966_v15 = vld [vmem:[#allocation84_spill] sm:$0xff] }
 0x2d8   : > { %14962 = vst [vmem:[#allocation53_spill] sm:$0xff] %v13254_v19  ;;  %9513 = vmatmul.mubr.msk.f32.gmra.mxu0 %vm14965_vm3, %v14963_v1  ;;  %9592 = vmatprep.mubr.msk.f32.mxu1 %vm14834_vm4, %v12737_v33  ;;  %v14968_v33 = vld [vmem:[#allocation87_spill] sm:$0xff]  ;;  %vm14970_vm4 = vnez %v14969_v63 }
 0x2d9   : > { %9709 = vmatpush3.msra.mxu1 %v7389_v39  ;;  %v13269_v42 = vpop.f32.mrf.mxu1  ;;  %9515 = vmatprep.mubr.f32.mxu0 %v14966_v15  ;;  %v7370_v39 = vld [vmem:[%s13957_s3 + $0x398] sm:$0xff]  ;;  %v14974_v63 = vld [vmem:[#allocation35_spill] sm:$0xff] }
 0x2da   : > { %9631 = vmatpush3.msra.mxu0 %v7372_v53  ;;  %9710 = vmatprep.subr.mxu1 %v7388_v11 }
 0x2db   : > { %v13272_v19 = vpop.f32.mrf.mxu1  ;;  %9593 = vmatmul.mubr.f32.gmra.mxu1 %v12755_v54  ;;  %9632 = vmatprep.subr.mxu0 %v7371_v26  ;;  %v14971_v54 = vld [vmem:[#allocation120_spill] sm:$0xff] }
 0x2dc   : > { %14967 = vst [vmem:[#allocation89_spill] sm:$0xff] %v13272_v19  ;;  %9516 = vmatmul.mubr.msk.f32.gmra.mxu0 %vm14970_vm4, %v14968_v33  ;;  %9595 = vmatprep.mubr.msk.f32.mxu1 %vm14841_vm5, %v12768_v43  ;;  %v14973_v43 = vld [vmem:[#allocation45_spill] sm:$0xff]  ;;  %vm14975_vm5 = vnez %v14974_v63 }
 0x2dd   : > { %9711 = vmatpush3.msra.mxu1 %v7388_v11  ;;  %v13287_v53 = vpop.f32.mrf.mxu1  ;;  %9518 = vmatprep.mubr.f32.mxu0 %v14971_v54  ;;  %v7369_v11 = vld [vmem:[%s13957_s3 + $0x390] sm:$0xff] }
 0x2de   : > { %9633 = vmatpush3.msra.mxu0 %v7371_v26  ;;  %9712 = vmatprep.subr.mxu1 %v7387_v57 }
 0x2df   : > { %v13290_v19 = vpop.f32.mrf.mxu1  ;;  %9596 = vmatmul.mubr.f32.gmra.mxu1 %v12786_v40  ;;  %9634 = vmatprep.subr.mxu0 %v7370_v39  ;;  %v14976_v40 = vld [vmem:[#allocation85_spill] sm:$0xff] }
 0x2e0   : > { %14972 = vst [vmem:[#allocation90_spill] sm:$0xff] %v13290_v19  ;;  %9519 = vmatmul.mubr.msk.f32.gmra.mxu0 %vm14975_vm5, %v14973_v43  ;;  %9598 = vmatprep.mubr.msk.f32.mxu1 %vm14848_vm6, %v12799_v28  ;;  %v14977_v28 = vld [vmem:[#allocation71_spill] sm:$0xff] }
 0x2e1   : > { %9713 = vmatpush3.msra.mxu1 %v7387_v57  ;;  %v13305_v26 = vpop.f32.mrf.mxu1  ;;  %9521 = vmatprep.mubr.f32.mxu0 %v14976_v40  ;;  %vm14978_vm6 = vnez %v14977_v28  ;;  %v7368_v57 = vld [vmem:[%s13957_s3 + $0x388] sm:$0xff] }
 0x2e2   : > { %9635 = vmatpush3.msra.mxu0 %v7370_v39  ;;  %9714 = vmatprep.subr.mxu1 %v7386_v44 }
 0x2e3   : > { %v13308_v19 = vpop.f32.mrf.mxu1  ;;  %9599 = vmatmul.mubr.f32.gmra.mxu1 %v12820_v0  ;;  %9636 = vmatprep.subr.mxu0 %v7369_v11  ;;  %v4495_v0 = vrot.slane %v14910_v16, 1 }
 0x2e4   : > { %9522 = vmatmul.mubr.msk.f32.gmra.mxu0 %vm14978_vm6, %v12842_v37  ;;  %9601 = vmatprep.mubr.msk.f32.mxu1 %vm14979_vm11, %v12833_v5  ;;  %v14980_v5 = vld [vmem:[#allocation73_spill] sm:$0xff]  ;;  %vm14982_vm11 = vnez %v14903_v13  ;;  %vm14984_vm6 = vcmp.lt.s32.totalorder %v14767_v27, 7  ;;  %v14985_v13 = vrot.slane %v12122_v51, 1 }
 0x2e5   : > { %9715 = vmatpush3.msra.mxu1 %v7386_v44  ;;  %v13323_v39 = vpop.f32.mrf.mxu1  ;;  %9524 = vmatprep.mubr.f32.mxu0 %v12856_v50  ;;  %vm14981_vm9 = vnez %v14980_v5  ;;  %v14983_v44 = vrot.slane %v12808_v52, 1 }
 0x2e6   : > { %9637 = vmatpush3.msra.mxu0 %v7369_v11  ;;  %9716 = vmatprep.subr.mxu1 %v7385_v23 }
 0x2e7   : > { %v13327_v63 = vpop.f32.mrf.mxu1  ;;  %9602 = vmatmul.mubr.f32.gmra.mxu1 %v12852_v47  ;;  %9638 = vmatprep.subr.mxu0 %v7368_v57  ;;  %v13343_v11 = vsel %vm14984_vm6, %v14983_v44, %v4495_v0  ;;  %v7367_v47 = vld [vmem:[%s13957_s3 + $0x380] sm:$0xff] }
 0x2e8   : > { %9525 = vmatmul.mubr.msk.f32.gmra.mxu0 %vm14981_vm9, %v12870_v62  ;;  %9604 = vmatprep.mubr.msk.f32.mxu1 %vm14982_vm11, %v13056_v7  ;;  %v13358_v7 = vsel %vm14984_vm6, %v4495_v0, %v14985_v13  ;;  %vm14986_vm11 = vnez %v14880_v22  ;;  %v14989_v22 = vld [vmem:[#allocation48_spill] sm:$0xff]  ;;  %v13378_v0 = vpop.f32.mrf.mxu0 }
 0x2e9   : > { %9717 = vmatpush3.msra.mxu1 %v7385_v23  ;;  %v13348_v16 = vpop.f32.mrf.mxu1  ;;  %9527 = vmatprep.mubr.f32.mxu0 %v13343_v11  ;;  %v7383_v23 = vld [vmem:[%s13957_s3 + $0x400] sm:$0xff]  ;;  %14990 = vst [vmem:[#allocation56_spill] sm:$0xff] %v13378_v0  ;;  %v14992_v13 = vld [vmem:[#allocation4_spill] sm:$0xff] }
 0x2ea   : > { %9639 = vmatpush3.msra.mxu0 %v7368_v57  ;;  %9718 = vmatprep.subr.mxu1 %v7384_v14 }
 0x2eb   : > { %v13351_v5 = vpop.f32.mrf.mxu1  ;;  %9605 = vmatmul.mubr.f32.gmra.mxu1 %v13069_v45  ;;  %9640 = vmatprep.subr.mxu0 %v7367_v47  ;;  %v14987_v45 = vmov 0.0  }
 0x2ec   : > { %9528 = vmatmul.mubr.msk.f32.gmra.mxu0 %vm14986_vm11, %v13358_v7  ;;  %9719 = vmatpush3.msra.mxu1 %v7384_v14  ;;  %v14991_v14 = vld [vmem:[#allocation127_spill] sm:$0xff] }
 0x2ed   : > { %v13366_v57 = vpop.f32.mrf.mxu1  ;;  %9642 = vmatprep.mubr.f32.mxu0 %v12142_v20  ;;  %9607 = vmatprep.mubr.f32.mxu1 %v14987_v45 }
 0x2ee   : > { %9641 = vmatpush3.msra.mxu0 %v7367_v47  ;;  %9720 = vmatprep.subr.mxu1 %v7383_v23 }
 0x2ef   : > { %v13370_v51 = vpop.f32.mrf.mxu1  ;;  %9608 = vmatmul.mubr.f32.gmra.mxu1 %v14987_v45 }
 0x2f0   : > { %9643 = vmatmul.mubr.f32.vlgmr.msra.gmra.mxu0 %v12148_v21  ;;  %9721 = vmatpush3.msra.mxu1 %v7383_v23  ;;  %v14993_v23 = vld [vmem:[#allocation68_spill] sm:$0xff] }
 0x2f1   : > { %9722 = vmatprep.mubr.f32.mxu1 %v14917_v2  ;;  %v13375_v27 = vpop.f32.mrf.mxu1  ;;  %9645 = vmatprep.mubr.f32.mxu0 %v14989_v22 }
 0x2f2   : > { %14988 = vst [vmem:[#allocation125_spill] sm:$0xff] %v13375_v27 }
 0x2f3   : > { %v9244_v20 = vpop.f32.mrf.mxu1  ;;  %9723 = vmatmul.mubr.msk.f32.vlgmr.msra.gmra.mxu1 %vm14916_vm7, %v14918_v25  ;;  %vm15038_vm7 = vnez %v14977_v28 }
 0x2f4   : > { %v13384_v44 = vadd.f32 %v9244_v20, %v14991_v14  ;;  %v9167_v47 = vpop.f32.mrf.mxu0  ;;  %9646 = vmatmul.mubr.f32.gmra.mxu0 %v14992_v13  ;;  %9725 = vmatprep.mubr.f32.mxu1 %v14922_v41  ;;  %v14994_v20 = vld [vmem:[#allocation72_spill] sm:$0xff]  ;;  %v14995_v41 = vld [vmem:[#allocation122_spill] sm:$0xff] }
 0x2f5   : > { %v4321_v21 = vadd.f32 %v9167_v47, %v13110_v35  ;;  %v13389_v2 = vpop.f32.mrf.mxu1  ;;  %9648 = vmatprep.mubr.f32.mxu0 %v14993_v23  ;;  %v14996_v47 = vld [vmem:[#allocation115_spill] sm:$0xff] }
 0x2f6   : > { %v4315_v22 = vpop.f32.mrf.mxu0 }
 0x2f7   : > { %v4316_v27 = vadd.f32 %v4315_v22, %v13125_v34  ;;  %v9247_v0 = vpop.f32.mrf.mxu1  ;;  %9726 = vmatmul.mubr.msk.f32.gmra.mxu1 %vm14920_vm10, %v14923_v46 }
 0x2f8   : > { %v13396_v8 = vadd.f32 %v9247_v0, %v4321_v21  ;;  %v9170_v25 = vpop.f32.mrf.mxu0  ;;  %9649 = vmatmul.mubr.f32.gmra.mxu0 %v14994_v20  ;;  %9728 = vmatprep.mubr.f32.mxu1 %v14926_v4  ;;  %v14998_v21 = vld [vmem:[#allocation110_spill] sm:$0xff]  ;;  %v14999_v4 = vld [vmem:[#allocation21_spill] sm:$0xff] }
 0x2f9   : > { %v4331_v35 = vadd.f32 %v9170_v25, %v14995_v41  ;;  %v4653_v14 = vpop.f32.mrf.mxu1  ;;  %9651 = vmatprep.mubr.f32.mxu0 %v14996_v47 }
 0x2fa   : > { %v13402_v13 = vadd.f32 %v4653_v14, %v4316_v27  ;;  %v4325_v34 = vpop.f32.mrf.mxu0  ;;  %v15000_v27 = vld [vmem:[#allocation27_spill] sm:$0xff] }
 0x2fb   : > { %v4326_v23 = vadd.f32 %v4325_v34, %v13143_v12  ;;  %v9250_v22 = vpop.f32.mrf.mxu1  ;;  %9729 = vmatmul.mubr.msk.f32.gmra.mxu1 %vm14925_vm14, %v14928_v49 }
 0x2fc   : > { %v13408_v46 = vadd.f32 %v9250_v22, %v4331_v35  ;;  %v9173_v0 = vpop.f32.mrf.mxu0  ;;  %9652 = vmatmul.mubr.f32.gmra.mxu0 %v14998_v21  ;;  %9731 = vmatprep.mubr.f32.mxu1 %v14931_v18  ;;  %v15002_v22 = vld [vmem:[#allocation28_spill] sm:$0xff]  ;;  %v15003_v18 = vld [vmem:[#allocation22_spill] sm:$0xff] }
 0x2fd   : > { %v4341_v25 = vadd.f32 %v9173_v0, %v14999_v4  ;;  %v4663_v20 = vpop.f32.mrf.mxu1  ;;  %9654 = vmatprep.mubr.f32.mxu0 %v15000_v27 }
 0x2fe   : > { %v13414_v41 = vadd.f32 %v4663_v20, %v4326_v23  ;;  %v4335_v12 = vpop.f32.mrf.mxu0  ;;  %v15004_v23 = vld [vmem:[#allocation39_spill] sm:$0xff] }
 0x2ff   : > { %v4336_v14 = vadd.f32 %v4335_v12, %v13161_v38  ;;  %v9253_v47 = vpop.f32.mrf.mxu1  ;;  %9732 = vmatmul.mubr.msk.f32.gmra.mxu1 %vm14930_vm8, %v14933_v59  ;;  %v15006_v12 = vld [vmem:[#allocation10_spill] sm:$0xff] }
 0x300   : > { %v13420_v35 = vadd.f32 %v9253_v47, %v4341_v25  ;;  %v9176_v34 = vpop.f32.mrf.mxu0  ;;  %9655 = vmatmul.mubr.f32.gmra.mxu0 %v15002_v22  ;;  %9734 = vmatprep.mubr.f32.mxu1 %v14936_v56  ;;  %v15007_v56 = vld [vmem:[#allocation50_spill] sm:$0xff] }
 0x301   : > { %v4351_v36 = vadd.f32 %v9176_v34, %v15003_v18  ;;  %v4673_v0 = vpop.f32.mrf.mxu1  ;;  %9657 = vmatprep.mubr.f32.mxu0 %v15004_v23  ;;  %v15010_v23 = vld [vmem:[#allocation111_spill] sm:$0xff] }
 0x302   : > { %v13426_v21 = vadd.f32 %v4673_v0, %v4336_v14  ;;  %v4345_v38 = vpop.f32.mrf.mxu0  ;;  %v15008_v14 = vld [vmem:[#allocation118_spill] sm:$0xff] }
 0x303   : > { %v4346_v4 = vadd.f32 %v4345_v38, %v13179_v9  ;;  %v9256_v20 = vpop.f32.mrf.mxu1  ;;  %9735 = vmatmul.mubr.msk.f32.gmra.mxu1 %vm14935_vm13, %v14938_v6 }
 0x304   : > { %v13432_v25 = vadd.f32 %v9256_v20, %v4351_v36  ;;  %v9179_v27 = vpop.f32.mrf.mxu0  ;;  %9658 = vmatmul.mubr.f32.gmra.mxu0 %v15006_v12  ;;  %9737 = vmatprep.mubr.f32.mxu1 %v14941_v29  ;;  %v15011_v29 = vld [vmem:[#allocation88_spill] sm:$0xff] }
 0x305   : > { %v4361_v47 = vadd.f32 %v9179_v27, %v15007_v56  ;;  %v4683_v49 = vpop.f32.mrf.mxu1  ;;  %9660 = vmatprep.mubr.f32.mxu0 %v15008_v14 }
 0x306   : > { %v13438_v34 = vadd.f32 %v4683_v49, %v4346_v4  ;;  %v4355_v9 = vpop.f32.mrf.mxu0  ;;  %v15012_v4 = vld [vmem:[#allocation7_spill] sm:$0xff]  ;;  %v15014_v49 = vld [vmem:[#allocation9_spill] sm:$0xff] }
 0x307   : > { %v4356_v22 = vadd.f32 %v4355_v9, %v13197_v3  ;;  %v9259_v18 = vpop.f32.mrf.mxu1  ;;  %9738 = vmatmul.mubr.msk.f32.gmra.mxu1 %vm14940_vm12, %v14943_v17 }
 0x308   : > { %v13444_v36 = vadd.f32 %v9259_v18, %v4361_v47  ;;  %v9182_v0 = vpop.f32.mrf.mxu0  ;;  %9661 = vmatmul.mubr.f32.gmra.mxu0 %v15010_v23  ;;  %9740 = vmatprep.mubr.f32.mxu1 %v14946_v10  ;;  %v15015_v10 = vld [vmem:[#allocation91_spill] sm:$0xff] }
 0x309   : > { %v4371_v38 = vadd.f32 %v9182_v0, %v15011_v29  ;;  %v4693_v20 = vpop.f32.mrf.mxu1  ;;  %9663 = vmatprep.mubr.f32.mxu0 %v15012_v4 }
 0x30a   : > { %v13450_v59 = vadd.f32 %v4693_v20, %v4356_v22  ;;  %v4365_v3 = vpop.f32.mrf.mxu0  ;;  %v15016_v22 = vld [vmem:[#allocation31_spill] sm:$0xff] }
 0x30b   : > { %v4366_v27 = vadd.f32 %v4365_v3, %v13215_v61  ;;  %v9262_v12 = vpop.f32.mrf.mxu1  ;;  %9741 = vmatmul.mubr.msk.f32.gmra.mxu1 %vm14945_vm15, %v14948_v30  ;;  %v15020_v3 = vld [vmem:[#allocation52_spill] sm:$0xff] }
 0x30c   : > { %v13456_v56 = vadd.f32 %v9262_v12, %v4371_v38  ;;  %v9185_v47 = vpop.f32.mrf.mxu0  ;;  %9664 = vmatmul.mubr.f32.gmra.mxu0 %v15014_v49  ;;  %9743 = vmatprep.mubr.f32.mxu1 %v14951_v58  ;;  %v15018_v38 = vld [vmem:[#allocation32_spill] sm:$0xff]  ;;  %v15019_v58 = vld [vmem:[#allocation123_spill] sm:$0xff] }
 0x30d   : > { %v4381_v14 = vadd.f32 %v9185_v47, %v15015_v10  ;;  %v4703_v9 = vpop.f32.mrf.mxu1  ;;  %9666 = vmatprep.mubr.f32.mxu0 %v15016_v22  ;;  %v15022_v10 = vld [vmem:[#allocation43_spill] sm:$0xff]  ;;  %v15024_v22 = vld [vmem:[#allocation121_spill] sm:$0xff] }
 0x30e   : > { %v13462_v18 = vadd.f32 %v4703_v9, %v4366_v27  ;;  %v4375_v61 = vpop.f32.mrf.mxu0 }
 0x30f   : > { %v4376_v6 = vadd.f32 %v4375_v61, %v13233_v32  ;;  %v9265_v0 = vpop.f32.mrf.mxu1  ;;  %9744 = vmatmul.mubr.msk.f32.gmra.mxu1 %vm14950_vm0, %v14953_v55 }
 0x310   : > { %v13468_v23 = vadd.f32 %v9265_v0, %v4381_v14  ;;  %v9188_v29 = vpop.f32.mrf.mxu0  ;;  %9667 = vmatmul.mubr.f32.gmra.mxu0 %v15018_v38  ;;  %9746 = vmatprep.mubr.f32.mxu1 %v14956_v31  ;;  %v15023_v31 = vld [vmem:[#allocation53_spill] sm:$0xff]  ;;  %v15026_v38 = vld [vmem:[#allocation112_spill] sm:$0xff] }
 0x311   : > { %v4391_v20 = vadd.f32 %v9188_v29, %v15019_v58  ;;  %v4713_v4 = vpop.f32.mrf.mxu1  ;;  %9669 = vmatprep.mubr.f32.mxu0 %v15020_v3 }
 0x312   : > { %v13474_v27 = vadd.f32 %v4713_v4, %v4376_v6  ;;  %v4385_v32 = vpop.f32.mrf.mxu0  ;;  %v15028_v4 = vld [vmem:[#allocation36_spill] sm:$0xff] }
 0x313   : > { %v4386_v12 = vadd.f32 %v4385_v32, %v13251_v48  ;;  %v9268_v17 = vpop.f32.mrf.mxu1  ;;  %9747 = vmatmul.mubr.msk.f32.gmra.mxu1 %vm14955_vm1, %v14958_v24  ;;  %v15034_v24 = vld [vmem:[#allocation124_spill] sm:$0xff] }
 0x314   : > { %v13480_v47 = vadd.f32 %v9268_v17, %v4391_v20  ;;  %v9191_v49 = vpop.f32.mrf.mxu0  ;;  %9670 = vmatmul.mubr.f32.gmra.mxu0 %v15022_v10  ;;  %9749 = vmatprep.mubr.f32.mxu1 %v14961_v60  ;;  %v15027_v60 = vld [vmem:[#allocation89_spill] sm:$0xff] }
 0x315   : > { %v4401_v14 = vadd.f32 %v9191_v49, %v15023_v31  ;;  %v4723_v9 = vpop.f32.mrf.mxu1  ;;  %9672 = vmatprep.mubr.f32.mxu0 %v15024_v22  ;;  %v15030_v49 = vld [vmem:[#allocation74_spill] sm:$0xff] }
 0x316   : > { %v13486_v61 = vadd.f32 %v4723_v9, %v4386_v12  ;;  %v4395_v48 = vpop.f32.mrf.mxu0 }
 0x317   : > { %v4396_v6 = vadd.f32 %v4395_v48, %v13269_v42  ;;  %v9271_v0 = vpop.f32.mrf.mxu1  ;;  %9750 = vmatmul.mubr.msk.f32.gmra.mxu1 %vm14960_vm2, %v14963_v1 }
 0x318   : > { %v13492_v30 = vadd.f32 %v9271_v0, %v4401_v14  ;;  %v9194_v29 = vpop.f32.mrf.mxu0  ;;  %9673 = vmatmul.mubr.f32.gmra.mxu0 %v15026_v38  ;;  %9752 = vmatprep.mubr.f32.mxu1 %v14966_v15  ;;  %v15031_v15 = vld [vmem:[#allocation90_spill] sm:$0xff]  ;;  %v15032_v14 = vld [vmem:[#allocation75_spill] sm:$0xff]  ;;  %v15035_v38 = vld [vmem:[#allocation113_spill] sm:$0xff] }
 0x319   : > { %v4411_v58 = vadd.f32 %v9194_v29, %v15027_v60  ;;  %v4733_v20 = vpop.f32.mrf.mxu1  ;;  %9675 = vmatprep.mubr.f32.mxu0 %v15028_v4 }
 0x31a   : > { %v13498_v3 = vadd.f32 %v4733_v20, %v4396_v6  ;;  %v4405_v42 = vpop.f32.mrf.mxu0 }
 0x31b   : > { %v4406_v32 = vadd.f32 %v4405_v42, %v13287_v53  ;;  %v9274_v12 = vpop.f32.mrf.mxu1  ;;  %9753 = vmatmul.mubr.msk.f32.gmra.mxu1 %vm14965_vm3, %v14968_v33 }
 0x31c   : > { %v13504_v17 = vadd.f32 %v9274_v12, %v4411_v58  ;;  %v9197_v55 = vpop.f32.mrf.mxu0  ;;  %9676 = vmatmul.mubr.f32.gmra.mxu0 %v15030_v49  ;;  %9755 = vmatprep.mubr.f32.mxu1 %v14971_v54 }
 0x31d   : > { %v4421_v10 = vadd.f32 %v9197_v55, %v15031_v15  ;;  %v4743_v31 = vpop.f32.mrf.mxu1  ;;  %9678 = vmatprep.mubr.f32.mxu0 %v15032_v14  ;;  %v15039_v15 = vld [vmem:[#allocation13_spill] sm:$0xff] }
 0x31e   : > { %v13510_v9 = vadd.f32 %v4743_v31, %v4406_v32  ;;  %v4415_v53 = vpop.f32.mrf.mxu0  ;;  %v15037_v32 = vld [vmem:[#allocation12_spill] sm:$0xff] }
 0x31f   : > { %v4416_v22 = vadd.f32 %v4415_v53, %v13305_v26  ;;  %v9277_v48 = vpop.f32.mrf.mxu1  ;;  %9756 = vmatmul.mubr.msk.f32.gmra.mxu1 %vm14970_vm4, %v14973_v43 }
 0x320   : > { %v13516_v6 = vadd.f32 %v9277_v48, %v4421_v10  ;;  %v9200_v0 = vpop.f32.mrf.mxu0  ;;  %9679 = vmatmul.mubr.f32.gmra.mxu0 %v15034_v24  ;;  %9758 = vmatprep.mubr.f32.mxu1 %v14976_v40  ;;  %v15041_v48 = vld [vmem:[#allocation86_spill] sm:$0xff] }
 0x321   : > { %v4431_v54 = vadd.f32 %v9200_v0, %v13308_v19  ;;  %v4753_v29 = vpop.f32.mrf.mxu1  ;;  %9681 = vmatprep.mubr.f32.mxu0 %v15035_v38  ;;  %v15043_v0 = vld [vmem:[#allocation125_spill] sm:$0xff] }
 0x322   : > { %v13522_v60 = vadd.f32 %v4753_v29, %v4416_v22  ;;  %v4425_v26 = vpop.f32.mrf.mxu0 }
 0x323   : > { %v4426_v58 = vadd.f32 %v4425_v26, %v13323_v39  ;;  %v9280_v20 = vpop.f32.mrf.mxu1  ;;  %9759 = vmatmul.mubr.msk.f32.gmra.mxu1 %vm14975_vm5, %v12842_v37 }
 0x324   : > { %v13528_v4 = vadd.f32 %v9280_v20, %v4431_v54  ;;  %v9203_v42 = vpop.f32.mrf.mxu0  ;;  %9682 = vmatmul.mubr.f32.gmra.mxu0 %v15037_v32  ;;  %9761 = vmatprep.mubr.f32.mxu1 %v12856_v50 }
 0x325   : > { %v4441_v19 = vadd.f32 %v9203_v42, %v13327_v63  ;;  %v4763_v40 = vpop.f32.mrf.mxu1  ;;  %9684 = vmatprep.mubr.f32.mxu0 %v12808_v52 }
 0x326   : > { %v13534_v12 = vadd.f32 %v4763_v40, %v4426_v58  ;;  %v4435_v39 = vpop.f32.mrf.mxu0 }
 0x327   : > { %v4436_v1 = vadd.f32 %v4435_v39, %v13348_v16  ;;  %v9283_v55 = vpop.f32.mrf.mxu1  ;;  %9762 = vmatmul.mubr.msk.f32.gmra.mxu1 %vm15038_vm7, %v12870_v62 }
 0x328   : > { %v13540_v37 = vadd.f32 %v9283_v55, %v4441_v19  ;;  %v9206_v49 = vpop.f32.mrf.mxu0  ;;  %9685 = vmatmul.mubr.f32.gmra.mxu0 %v15039_v15  ;;  %9764 = vmatprep.mubr.f32.mxu1 %v13343_v11 }
 0x329   : > { %v4451_v63 = vadd.f32 %v9206_v49, %v13351_v5  ;;  %v4773_v52 = vpop.f32.mrf.mxu1  ;;  %9687 = vmatprep.mubr.f32.mxu0 %v14987_v45 }
 0x32a   : > { %v13546_v50 = vadd.f32 %v4773_v52, %v4436_v1  ;;  %v4445_v16 = vpop.f32.mrf.mxu0 }
 0x32b   : > { %v4446_v10 = vadd.f32 %v4445_v16, %v13366_v57  ;;  %v9286_v31 = vpop.f32.mrf.mxu1  ;;  %9765 = vmatmul.mubr.msk.f32.gmra.mxu1 %vm14981_vm9, %v13358_v7  ;;  %v15042_v57 = vld [vmem:[#allocation56_spill] sm:$0xff] }
 0x32c   : > { %v13552_v28 = vadd.f32 %v9286_v31, %v4451_v63  ;;  %v9209_v14 = vpop.f32.mrf.mxu0  ;;  %9688 = vmatmul.mubr.f32.gmra.mxu0 %v14987_v45  ;;  %9767 = vmatprep.mubr.f32.mxu1 %v14987_v45  ;;  %v4306_v33 = vadd.f32 %v15042_v57, %v15041_v48 }
 0x32d   : > { %v4461_v5 = vadd.f32 %v9209_v14, %v13370_v51  ;;  %v4783_v11 = vpop.f32.mrf.mxu1 }
 0x32e   : > { %v13557_v53 = vadd.f32 %v4783_v11, %v4446_v10  ;;  %v4455_v22 = vpop.f32.mrf.mxu0  ;;  %v4802_v38 = vadd.f32 %v13389_v2, %v4306_v33 }
 0x32f   : > { %v4456_v24 = vadd.f32 %v4455_v22, %v15043_v0  ;;  %v9289_v54 = vpop.f32.mrf.mxu1  ;;  %9768 = vmatmul.mubr.f32.gmra.mxu1 %v14987_v45 }
 0x330   : > { %v13563_v7 = vadd.f32 %v9289_v54, %v4461_v5  ;;  %v9324_v29 = vpop.f32.mrf.mxu0 }
 0x331   : > { %v5109_v26 = vadd.f32 %v9324_v29, %v13384_v44  ;;  %v4793_v51 = vpop.f32.mrf.mxu1 }
 0x332   : > { %v13567_v58 = vadd.f32 %v4793_v51, %v4456_v24  ;;  %v4949_v20 = vpop.f32.mrf.mxu0 }
 0x333   : > { %v5108_v43 = vadd.f32 %v4949_v20, %v4802_v38  ;;  %v9404_v42 = vpop.f32.mrf.mxu1 }
 0x334   : > { %v13569_v32 = vadd.f32 %v9404_v42, %v5109_v26  ;;  %v9327_v19 = vpop.f32.mrf.mxu0 }
 0x335   : > { %v5111_v40 = vadd.f32 %v9327_v19, %v13396_v8  ;;  %v5223_v39 = vpop.f32.mrf.mxu1 }
 0x336   : > { %v13572_v45 = vadd.f32 %v5223_v39, %v5108_v43  ;;  %v4959_v1 = vpop.f32.mrf.mxu0 }
 0x337   : > { %v5110_v55 = vadd.f32 %v4959_v1, %v13402_v13  ;;  %v9407_v2 = vpop.f32.mrf.mxu1 }
 0x338   : > { %v13575_v49 = vadd.f32 %v9407_v2, %v5111_v40  ;;  %v9330_v44 = vpop.f32.mrf.mxu0 }
 0x339   : > { %v5113_v15 = vadd.f32 %v9330_v44, %v13408_v46  ;;  %v5233_v63 = vpop.f32.mrf.mxu1 }
 0x33a   : > { %v13578_v52 = vadd.f32 %v5233_v63, %v5110_v55  ;;  %v4969_v16 = vpop.f32.mrf.mxu0 }
 0x33b   : > { %v5112_v10 = vadd.f32 %v4969_v16, %v13414_v41  ;;  %v9410_v31 = vpop.f32.mrf.mxu1 }
 0x33c   : > { %v13581_v8 = vadd.f32 %v9410_v31, %v5113_v15  ;;  %v9333_v62 = vpop.f32.mrf.mxu0 }
 0x33d   : > { %v5115_v14 = vadd.f32 %v9333_v62, %v13420_v35  ;;  %v5243_v5 = vpop.f32.mrf.mxu1 }
 0x33e   : > { %v13584_v13 = vadd.f32 %v5243_v5, %v5112_v10  ;;  %v4979_v11 = vpop.f32.mrf.mxu0 }
 0x33f   : > { %v5114_v22 = vadd.f32 %v4979_v11, %v13426_v21  ;;  %v9413_v48 = vpop.f32.mrf.mxu1 }
 0x340   : > { %v13587_v46 = vadd.f32 %v9413_v48, %v5115_v14  ;;  %v9336_v57 = vpop.f32.mrf.mxu0 }
 0x341   : > { %v5117_v33 = vadd.f32 %v9336_v57, %v13432_v25  ;;  %v5253_v0 = vpop.f32.mrf.mxu1 }
 0x342   : > { %v13590_v41 = vadd.f32 %v5253_v0, %v5114_v22  ;;  %v4989_v24 = vpop.f32.mrf.mxu0 }
 0x343   : > { %v5116_v54 = vadd.f32 %v4989_v24, %v13438_v34  ;;  %v9416_v29 = vpop.f32.mrf.mxu1 }
 0x344   : > { %v13593_v35 = vadd.f32 %v9416_v29, %v5117_v33  ;;  %v9339_v38 = vpop.f32.mrf.mxu0 }
 0x345   : > { %v5119_v26 = vadd.f32 %v9339_v38, %v13444_v36  ;;  %v5263_v51 = vpop.f32.mrf.mxu1 }
 0x346   : > { %v13596_v21 = vadd.f32 %v5263_v51, %v5116_v54  ;;  %v4999_v20 = vpop.f32.mrf.mxu0 }
 0x347   : > { %v5118_v43 = vadd.f32 %v4999_v20, %v13450_v59  ;;  %v9419_v42 = vpop.f32.mrf.mxu1 }
 0x348   : > { %v13599_v25 = vadd.f32 %v9419_v42, %v5119_v26  ;;  %v9342_v19 = vpop.f32.mrf.mxu0 }
 0x349   : > { %v5121_v40 = vadd.f32 %v9342_v19, %v13456_v56  ;;  %v5273_v39 = vpop.f32.mrf.mxu1 }
 0x34a   : > { %v13602_v34 = vadd.f32 %v5273_v39, %v5118_v43  ;;  %v5009_v1 = vpop.f32.mrf.mxu0 }
 0x34b   : > { %v5120_v55 = vadd.f32 %v5009_v1, %v13462_v18  ;;  %v9422_v2 = vpop.f32.mrf.mxu1 }
 0x34c   : > { %v13605_v36 = vadd.f32 %v9422_v2, %v5121_v40  ;;  %v9345_v44 = vpop.f32.mrf.mxu0 }
 0x34d   : > { %v5123_v15 = vadd.f32 %v9345_v44, %v13468_v23  ;;  %v5283_v63 = vpop.f32.mrf.mxu1 }
 0x34e   : > { %v13608_v59 = vadd.f32 %v5283_v63, %v5120_v55  ;;  %v5019_v16 = vpop.f32.mrf.mxu0 }
 0x34f   : > { %v5122_v10 = vadd.f32 %v5019_v16, %v13474_v27  ;;  %v9425_v31 = vpop.f32.mrf.mxu1 }
 0x350   : > { %v13611_v56 = vadd.f32 %v9425_v31, %v5123_v15  ;;  %v9348_v62 = vpop.f32.mrf.mxu0 }
 0x351   : > { %v5125_v14 = vadd.f32 %v9348_v62, %v13480_v47  ;;  %v5293_v5 = vpop.f32.mrf.mxu1 }
 0x352   : > { %v13614_v18 = vadd.f32 %v5293_v5, %v5122_v10  ;;  %v5029_v11 = vpop.f32.mrf.mxu0 }
 0x353   : > { %v5124_v22 = vadd.f32 %v5029_v11, %v13486_v61  ;;  %v9428_v48 = vpop.f32.mrf.mxu1 }
 0x354   : > { %v13617_v23 = vadd.f32 %v9428_v48, %v5125_v14  ;;  %v9351_v57 = vpop.f32.mrf.mxu0 }
 0x355   : > { %v5127_v33 = vadd.f32 %v9351_v57, %v13492_v30  ;;  %v5303_v0 = vpop.f32.mrf.mxu1 }
 0x356   : > { %v13620_v27 = vadd.f32 %v5303_v0, %v5124_v22  ;;  %v5039_v24 = vpop.f32.mrf.mxu0 }
 0x357   : > { %v5126_v54 = vadd.f32 %v5039_v24, %v13498_v3  ;;  %v9431_v29 = vpop.f32.mrf.mxu1 }
 0x358   : > { %v13623_v47 = vadd.f32 %v9431_v29, %v5127_v33  ;;  %v9354_v38 = vpop.f32.mrf.mxu0 }
 0x359   : > { %v5129_v26 = vadd.f32 %v9354_v38, %v13504_v17  ;;  %v5313_v51 = vpop.f32.mrf.mxu1 }
 0x35a   : > { %15044 = vst [vmem:[#allocation92_spill] sm:$0xff] %v13623_v47  ;;  %v13626_v61 = vadd.f32 %v5313_v51, %v5126_v54  ;;  %v5049_v20 = vpop.f32.mrf.mxu0 }
 0x35b   : > { %v5128_v43 = vadd.f32 %v5049_v20, %v13510_v9  ;;  %v9434_v42 = vpop.f32.mrf.mxu1 }
 0x35c   : > { %15045 = vst [vmem:[#allocation95_spill] sm:$0xff] %v13626_v61  ;;  %v13629_v30 = vadd.f32 %v9434_v42, %v5129_v26  ;;  %v9357_v19 = vpop.f32.mrf.mxu0 }
 0x35d   : > { %v5131_v40 = vadd.f32 %v9357_v19, %v13516_v6  ;;  %v5323_v39 = vpop.f32.mrf.mxu1 }
 0x35e   : > { %15046 = vst [vmem:[#allocation126_spill] sm:$0xff] %v13629_v30  ;;  %v13632_v3 = vadd.f32 %v5323_v39, %v5128_v43  ;;  %v5059_v1 = vpop.f32.mrf.mxu0 }
 0x35f   : > { %v5130_v55 = vadd.f32 %v5059_v1, %v13522_v60  ;;  %v9437_v2 = vpop.f32.mrf.mxu1 }
 0x360   : > { %15047 = vst [vmem:[#allocation54_spill] sm:$0xff] %v13632_v3  ;;  %v13635_v17 = vadd.f32 %v9437_v2, %v5131_v40  ;;  %v9360_v44 = vpop.f32.mrf.mxu0 }
 0x361   : > { %v5133_v15 = vadd.f32 %v9360_v44, %v13528_v4  ;;  %v5333_v63 = vpop.f32.mrf.mxu1 }
 0x362   : > { %15048 = vst [vmem:[#allocation93_spill] sm:$0xff] %v13635_v17  ;;  %v13638_v9 = vadd.f32 %v5333_v63, %v5130_v55  ;;  %v5069_v16 = vpop.f32.mrf.mxu0 }
 0x363   : > { %v5132_v10 = vadd.f32 %v5069_v16, %v13534_v12  ;;  %v9440_v31 = vpop.f32.mrf.mxu1 }
 0x364   : > { %15049 = vst [vmem:[#allocation94_spill] sm:$0xff] %v13638_v9  ;;  %v13641_v6 = vadd.f32 %v9440_v31, %v5133_v15  ;;  %v9363_v62 = vpop.f32.mrf.mxu0 }
 0x365   : > { %v5135_v14 = vadd.f32 %v9363_v62, %v13540_v37  ;;  %v5343_v5 = vpop.f32.mrf.mxu1 }
 0x366   : > { %15050 = vst [vmem:[#allocation128_spill] sm:$0xff] %v13641_v6  ;;  %v13644_v60 = vadd.f32 %v5343_v5, %v5132_v10  ;;  %v5079_v11 = vpop.f32.mrf.mxu0 }
 0x367   : > { %v5134_v22 = vadd.f32 %v5079_v11, %v13546_v50  ;;  %v9443_v48 = vpop.f32.mrf.mxu1 }
 0x368   : > { %15051 = vst [vmem:[#allocation24_spill] sm:$0xff] %v13644_v60  ;;  %v13647_v4 = vadd.f32 %v9443_v48, %v5135_v14  ;;  %v9366_v57 = vpop.f32.mrf.mxu0 }
 0x369   : > { %v5137_v33 = vadd.f32 %v9366_v57, %v13552_v28  ;;  %v5353_v0 = vpop.f32.mrf.mxu1 }
 0x36a   : > { %15052 = vst [vmem:[#allocation25_spill] sm:$0xff] %v13647_v4  ;;  %v13650_v12 = vadd.f32 %v5353_v0, %v5134_v22  ;;  %v5089_v24 = vpop.f32.mrf.mxu0 }
 0x36b   : > { %v5136_v54 = vadd.f32 %v5089_v24, %v13557_v53  ;;  %v9446_v29 = vpop.f32.mrf.mxu1 }
 0x36c   : > { %15053 = vst [vmem:[#allocation62_spill] sm:$0xff] %v13650_v12  ;;  %v13653_v37 = vadd.f32 %v9446_v29, %v5137_v33  ;;  %v9369_v38 = vpop.f32.mrf.mxu0 }
 0x36d   : > { %v5139_v26 = vadd.f32 %v9369_v38, %v13563_v7  ;;  %v5363_v51 = vpop.f32.mrf.mxu1 }
 0x36e   : > { %15054 = vst [vmem:[#allocation96_spill] sm:$0xff] %v13653_v37  ;;  %v13656_v50 = vadd.f32 %v5363_v51, %v5136_v54  ;;  %v5099_v20 = vpop.f32.mrf.mxu0 }
 0x36f   : > { %v5138_v43 = vadd.f32 %v5099_v20, %v13567_v58  ;;  %v9449_v42 = vpop.f32.mrf.mxu1 }
 0x370   : > { %15055 = vst [vmem:[#allocation99_spill] sm:$0xff] %v13656_v50  ;;  %v13659_v28 = vadd.f32 %v9449_v42, %v5139_v26  ;;  %v9484_v19 = vpop.f32.mrf.mxu0 }
 0x371   : > { %v5373_v40 = vpop.f32.mrf.mxu1 }
 0x372   : > { %15056 = vst [vmem:[#allocation129_spill] sm:$0xff] %v13659_v28  ;;  %v13661_v39 = vadd.f32 %v5373_v40, %v5138_v43  ;;  %v5529_v53 = vpop.f32.mrf.mxu0 }
 0x373   : > { %v9564_v1 = vpop.f32.mrf.mxu1 }
 0x374   : > { %15057 = vst [vmem:[#allocation64_spill] sm:$0xff] %v13661_v39  ;;  %v9487_v55 = vpop.f32.mrf.mxu0 }
 0x375   : > { %v13663_v2 = vpop.f32.mrf.mxu1 }
 0x376   : > { %v13665_v44 = vpop.f32.mrf.mxu0 }
 0x377   : > { %v13667_v7 = vpop.f32.mrf.mxu1 }
 0x378   : > { %v13669_v15 = vpop.f32.mrf.mxu0 }
 0x379   : > { %v13671_v63 = vpop.f32.mrf.mxu1 }
 0x37a   : > { %v13673_v58 = vpop.f32.mrf.mxu0 }
 0x37b   : > { %v13675_v16 = vpop.f32.mrf.mxu1 }
 0x37c   : > { %v13677_v10 = vpop.f32.mrf.mxu0 }
 0x37d   : > { %v13679_v31 = vpop.f32.mrf.mxu1 }
 0x37e   : > { %v13681_v62 = vpop.f32.mrf.mxu0 }
 0x37f   : > { %v13683_v14 = vpop.f32.mrf.mxu1 }
 0x380   : > { %v13685_v5 = vpop.f32.mrf.mxu0 }
 0x381   : > { %v13687_v11 = vpop.f32.mrf.mxu1 }
 0x382   : > { %v13689_v22 = vpop.f32.mrf.mxu0 }
 0x383   : > { %v13691_v48 = vpop.f32.mrf.mxu1 }
 0x384   : > { %v13693_v57 = vpop.f32.mrf.mxu0 }
 0x385   : > { %v13695_v33 = vpop.f32.mrf.mxu1 }
 0x386   : > { %v13697_v0 = vpop.f32.mrf.mxu0 }
 0x387   : > { %v13699_v24 = vpop.f32.mrf.mxu1 }
 0x388   : > { %v13701_v54 = vpop.f32.mrf.mxu0 }
 0x389   : > { %v13703_v29 = vpop.f32.mrf.mxu1 }
 0x38a   : > { %v13705_v38 = vpop.f32.mrf.mxu0 }
 0x38b   : > { %v13707_v26 = vpop.f32.mrf.mxu1 }
 0x38c   : > { %v13709_v51 = vpop.f32.mrf.mxu0 }
 0x38d   : > { %v13711_v20 = vpop.f32.mrf.mxu1 }
 0x38e   : > { %v13713_v43 = vpop.f32.mrf.mxu0 }
 0x38f   : > { %v13715_v42 = vpop.f32.mrf.mxu1 }
 0x390   : > { %v13717_v40 = vpop.f32.mrf.mxu0 }
 0x391   : > { %v13719_v39 = vpop.f32.mrf.mxu1 }
 0x392   : > { %v13721_v28 = vpop.f32.mrf.mxu0 }
 0x393   : > { %v13723_v50 = vpop.f32.mrf.mxu1 }
 0x394   : > { %v13725_v37 = vpop.f32.mrf.mxu0 }
 0x395   : > { %15058 = vst [vmem:[#allocation97_spill] sm:$0xff] %v13725_v37  ;;  %v13727_v12 = vpop.f32.mrf.mxu1 }
 0x396   : > { %15059 = vst [vmem:[#allocation98_spill] sm:$0xff] %v13727_v12  ;;  %v13729_v4 = vpop.f32.mrf.mxu0 }
 0x397   : > { %15060 = vst [vmem:[#allocation131_spill] sm:$0xff] %v13729_v4  ;;  %v13731_v60 = vpop.f32.mrf.mxu1 }
 0x398   : > { %15061 = vst [vmem:[#allocation100_spill] sm:$0xff] %v13731_v60  ;;  %v13733_v6 = vpop.f32.mrf.mxu0 }
 0x399   : > { %15062 = vst [vmem:[#allocation103_spill] sm:$0xff] %v13733_v6  ;;  %v13735_v9 = vpop.f32.mrf.mxu1 }
 0x39a   : > { %15063 = vst [vmem:[#allocation132_spill] sm:$0xff] %v13735_v9  ;;  %v13737_v17 = vpop.f32.mrf.mxu0 }
 0x39b   : > { %15064 = vst [vmem:[#allocation66_spill] sm:$0xff] %v13737_v17  ;;  %v13739_v3 = vpop.f32.mrf.mxu1 }
 0x39c   : > { %15065 = vst [vmem:[#allocation101_spill] sm:$0xff] %v13739_v3  ;;  %v13741_v30 = vpop.f32.mrf.mxu0 }
 0x39d   : > { %15066 = vst [vmem:[#allocation102_spill] sm:$0xff] %v13741_v30  ;;  %v13743_v61 = vpop.f32.mrf.mxu1 }
 0x39e   : > { %15067 = vst [vmem:[#allocation104_spill] sm:$0xff] %v13743_v61  ;;  %v13745_v47 = vpop.f32.mrf.mxu0 }
 0x39f   : > { %15068 = vst [vmem:[#allocation107_spill] sm:$0xff] %v13745_v47  ;;  %v13747_v37 = vpop.f32.mrf.mxu1 }
 0x3a0   : > { %15069 = vst [vmem:[#allocation133_spill] sm:$0xff] %v13747_v37  ;;  %v13749_v12 = vpop.f32.mrf.mxu0 }
 0x3a1   : > { %15070 = vst [vmem:[#allocation105_spill] sm:$0xff] %v13749_v12  ;;  %v13751_v4 = vpop.f32.mrf.mxu1 }
 0x3a2   : > { %15071 = vst [vmem:[#allocation106_spill] sm:$0xff] %v13751_v4  ;;  %v13753_v60 = vpop.f32.mrf.mxu0  ;;  %v5689_v4 = vadd.f32 %v9484_v19, %v13569_v32  ;;  %v5690_v32 = vadd.f32 %v13665_v44, %v13578_v52 }
 0x3a3   : > { %15072 = vst [vmem:[#allocation108_spill] sm:$0xff] %v13753_v60  ;;  %v13755_v6 = vpop.f32.mrf.mxu1 }
 0x3a4   : > { %15073 = vst [vmem:[#allocation3_spill] sm:$0xff] %v13755_v6  ;;  %v13757_v9 = vpop.f32.mrf.mxu0  ;;  %v5996_v52 = vadd.f32 %v13671_v63, %v5690_v32 }
 0x3a5   : > { %15074 = vst [vmem:[#allocation6_spill] sm:$0xff] %v13757_v9  ;;  %v13759_v17 = vpop.f32.mrf.mxu1  ;;  %v5688_v9 = vadd.f32 %v5529_v53, %v13572_v45 }
 0x3a6   : > { %15075 = vst [vmem:[#allocation109_spill] sm:$0xff] %v13759_v17  ;;  %v13761_v3 = vpop.f32.mrf.mxu0 }
 0x3a7   : > { %15076 = vst [vmem:[#allocation8_spill] sm:$0xff] %v13761_v3  ;;  %v13763_v30 = vpop.f32.mrf.mxu1  ;;  %v5995_v3 = vadd.f32 %v9564_v1, %v5689_v4  ;;  %v5693_v4 = vadd.f32 %v13669_v15, %v13581_v8 }
 0x3a8   : > { %15077 = vst [vmem:[#allocation11_spill] sm:$0xff] %v13763_v30  ;;  %v13765_v61 = vpop.f32.mrf.mxu0  ;;  %v5691_v30 = vadd.f32 %v9487_v55, %v13575_v49  ;;  %v13795_v49 = vld [vmem:[%s13958_s4] ss:$0 sm:$0xff] }
 0x3a9   : > { %15078 = vst [vmem:[#allocation14_spill] sm:$0xff] %v13765_v61  ;;  %v13767_v47 = vpop.f32.mrf.mxu1 }
 0x3aa   : > { %15079 = vst [vmem:[#allocation17_spill] sm:$0xff] %v13767_v47  ;;  %v13769_v37 = vpop.f32.mrf.mxu0  ;;  %v5997_v45 = vadd.f32 %v13667_v7, %v5691_v30 }
 0x3ab   : > { %15080 = vst [vmem:[#allocation19_spill] sm:$0xff] %v13769_v37  ;;  %v13772_v12 = vpop.f32.mrf.mxu1  ;;  %v5994_v37 = vadd.f32 %v13663_v2, %v5688_v9 }
 0x3ac   : > { %15081 = vst [vmem:[#allocation23_spill] sm:$0xff] %v13772_v12  ;;  %v13774_v60 = vpop.f32.mrf.mxu0 }
 0x3ad   : > { %15082 = vst [vmem:[#allocation55_spill] sm:$0xff] %v13774_v60  ;;  %v13777_v6 = vpop.f32.mrf.mxu1 }
 0x3ae   : > { %v13779_v17 = vpop.f32.mrf.mxu0 }
 0x3af   : > { %v13782_v61 = vpop.f32.mrf.mxu1 }
 0x3b0   : > { %v9644_v47 = vpop.f32.mrf.mxu0 }
 0x3b1   : > { %v6301_v19 = vadd.f32 %v9644_v47, %v5995_v3  ;;  %v13787_v12 = vpop.f32.mrf.mxu1  ;;  %v5692_v47 = vadd.f32 %v13673_v58, %v13584_v13 }
 0x3b2   : > { %v6141_v60 = vpop.f32.mrf.mxu0 }
 0x3b3   : > { %v6300_v53 = vadd.f32 %v6141_v60, %v5994_v37  ;;  %v9724_v9 = vpop.f32.mrf.mxu1  ;;  %v5999_v60 = vadd.f32 %v13675_v16, %v5693_v4  ;;  %v5695_v37 = vadd.f32 %v13677_v10, %v13587_v46  ;;  %v5998_v16 = vadd.f32 %v13679_v31, %v5692_v47 }
 0x3b4   : > { %v6607_v1 = vadd.f32 %v9724_v9, %v6301_v19  ;;  %v9647_v55 = vpop.f32.mrf.mxu0  ;;  %v5694_v46 = vadd.f32 %v13681_v62, %v13590_v41 }
 0x3b5   : > { %v6303_v3 = vadd.f32 %v9647_v55, %v5997_v45  ;;  %v6447_v30 = vpop.f32.mrf.mxu1  ;;  %v5697_v55 = vadd.f32 %v13685_v5, %v13593_v35 }
 0x3b6   : > { %v6645_v2 = vadd.f32 %v13795_v49, %v6607_v1  ;;  %v6606_v44 = vadd.f32 %v6447_v30, %v6300_v53  ;;  %v6151_v8 = vpop.f32.mrf.mxu0  ;;  %v6001_v1 = vadd.f32 %v13683_v14, %v5695_v37  ;;  %v6000_v30 = vadd.f32 %v13687_v11, %v5694_v46 }
 0x3b7   : > { %v6302_v7 = vadd.f32 %v6151_v8, %v5996_v52  ;;  %v9727_v13 = vpop.f32.mrf.mxu1  ;;  %v6003_v37 = vadd.f32 %v13691_v48, %v5697_v55  ;;  %v5700_v55 = vadd.f32 %v13705_v38, %v13608_v59 }
 0x3b8   : > { %v6677_v15 = vmax.f32 %v6645_v2, 0.0  ;;  %v6644_v63 = vadd.f32 %v13795_v49, %v6606_v44  ;;  %v6609_v58 = vadd.f32 %v9727_v13, %v6303_v3  ;;  %v9650_v32 = vpop.f32.mrf.mxu0  ;;  %v5696_v2 = vadd.f32 %v13689_v22, %v13596_v21 }
 0x3b9   : > { %v6305_v10 = vadd.f32 %v9650_v32, %v5999_v60  ;;  %v6457_v19 = vpop.f32.mrf.mxu1  ;;  %v5698_v32 = vadd.f32 %v13697_v0, %v13602_v34 }
 0x3ba   : > { %6709 = vst [vmem:[%s13809_s21 + $0x8] sm:$0xff] %v6677_v15  ;;  %v6676_v45 = vmax.f32 %v6644_v63, 0.0  ;;  %v6647_v4 = vadd.f32 %v13795_v49, %v6609_v58  ;;  %v6608_v53 = vadd.f32 %v6457_v19, %v6302_v7  ;;  %v6161_v9 = vpop.f32.mrf.mxu0  ;;  %v5699_v7 = vadd.f32 %v13693_v57, %v13599_v25 }
 0x3bb   : > { %v6304_v52 = vadd.f32 %v6161_v9, %v5998_v16  ;;  %v9730_v3 = vpop.f32.mrf.mxu1  ;;  %v6002_v58 = vadd.f32 %v13695_v33, %v5696_v2 }
 0x3bc   : > { %6708 = vst [vmem:[%s13809_s21] sm:$0xff] %v6676_v45  ;;  %v6679_v31 = vmax.f32 %v6647_v4, 0.0  ;;  %v6646_v41 = vadd.f32 %v13795_v49, %v6608_v53  ;;  %v6611_v62 = vadd.f32 %v9730_v3, %v6305_v10  ;;  %v9653_v47 = vpop.f32.mrf.mxu0  ;;  %v6005_v19 = vadd.f32 %v13699_v24, %v5699_v7 }
 0x3bd   : > { %v6307_v44 = vadd.f32 %v9653_v47, %v6001_v1  ;;  %v6467_v8 = vpop.f32.mrf.mxu1  ;;  %v5701_v45 = vadd.f32 %v13701_v54, %v13605_v36  ;;  %v6004_v1 = vadd.f32 %v13703_v29, %v5698_v32 }
 0x3be   : > { %6711 = vst [vmem:[%s13809_s21 + $0x18] sm:$0xff] %v6679_v31  ;;  %v6678_v14 = vmax.f32 %v6646_v41, 0.0  ;;  %v6649_v35 = vadd.f32 %v13795_v49, %v6611_v62  ;;  %v6610_v5 = vadd.f32 %v6467_v8, %v6304_v52  ;;  %v6171_v60 = vpop.f32.mrf.mxu0  ;;  %v5703_v62 = vadd.f32 %v13709_v51, %v13611_v56 }
 0x3bf   : > { %v6306_v13 = vadd.f32 %v6171_v60, %v6000_v30  ;;  %v9733_v15 = vpop.f32.mrf.mxu1  ;;  %v6007_v41 = vadd.f32 %v13707_v26, %v5701_v45  ;;  %v5702_v8 = vadd.f32 %v13713_v43, %v13614_v18 }
 0x3c0   : > { %6710 = vst [vmem:[%s13809_s21 + $0x10] sm:$0xff] %v6678_v14  ;;  %v6681_v11 = vmax.f32 %v6649_v35, 0.0  ;;  %v6648_v21 = vadd.f32 %v13795_v49, %v6610_v5  ;;  %v6613_v22 = vadd.f32 %v9733_v15, %v6307_v44  ;;  %v9656_v63 = vpop.f32.mrf.mxu0  ;;  %v6006_v44 = vadd.f32 %v13711_v20, %v5700_v55 }
 0x3c1   : > { %v6309_v16 = vadd.f32 %v9656_v63, %v6003_v37  ;;  %v6477_v46 = vpop.f32.mrf.mxu1  ;;  %v6009_v60 = vadd.f32 %v13715_v42, %v5703_v62  ;;  %v5705_v37 = vadd.f32 %v13717_v40, %v13617_v23 }
 0x3c2   : > { %6713 = vst [vmem:[%s13809_s21 + $0x28] sm:$0xff] %v6681_v11  ;;  %v6680_v48 = vmax.f32 %v6648_v21, 0.0  ;;  %v6651_v25 = vadd.f32 %v13795_v49, %v6613_v22  ;;  %v6612_v57 = vadd.f32 %v6477_v46, %v6306_v13  ;;  %v6181_v10 = vpop.f32.mrf.mxu0  ;;  %v6008_v11 = vadd.f32 %v13719_v39, %v5702_v8  ;;  %v15084_v46 = vld [vmem:[#allocation97_spill] sm:$0xff] }
 0x3c3   : > { %v6308_v4 = vadd.f32 %v6181_v10, %v6002_v58  ;;  %v9736_v53 = vpop.f32.mrf.mxu1  ;;  %v5704_v21 = vadd.f32 %v13721_v28, %v13620_v27  ;;  %v6011_v32 = vadd.f32 %v13723_v50, %v5705_v37 }
 0x3c4   : > { %6712 = vst [vmem:[%s13809_s21 + $0x20] sm:$0xff] %v6680_v48  ;;  %v6683_v33 = vmax.f32 %v6651_v25, 0.0  ;;  %v6650_v34 = vadd.f32 %v13795_v49, %v6612_v57  ;;  %v6615_v0 = vadd.f32 %v9736_v53, %v6309_v16  ;;  %v9659_v9 = vpop.f32.mrf.mxu0  ;;  %v15083_v16 = vld [vmem:[#allocation92_spill] sm:$0xff]  ;;  %v15087_v53 = vld [vmem:[#allocation131_spill] sm:$0xff] }
 0x3c5   : > { %v6311_v52 = vadd.f32 %v9659_v9, %v6005_v19  ;;  %v6487_v3 = vpop.f32.mrf.mxu1  ;;  %v5707_v48 = vadd.f32 %v15084_v46, %v15083_v16  ;;  %v15085_v19 = vld [vmem:[#allocation98_spill] sm:$0xff] }
 0x3c6   : > { %6715 = vst [vmem:[%s13809_s21 + $0x38] sm:$0xff] %v6683_v33  ;;  %v6682_v24 = vmax.f32 %v6650_v34, 0.0  ;;  %v6653_v36 = vadd.f32 %v13795_v49, %v6615_v0  ;;  %v6614_v54 = vadd.f32 %v6487_v3, %v6308_v4  ;;  %v6191_v31 = vpop.f32.mrf.mxu0  ;;  %v6010_v45 = vadd.f32 %v15085_v19, %v5704_v21  ;;  %v15086_v4 = vld [vmem:[#allocation95_spill] sm:$0xff] }
 0x3c7   : > { %v6310_v47 = vadd.f32 %v6191_v31, %v6004_v1  ;;  %v9739_v30 = vpop.f32.mrf.mxu1  ;;  %v5706_v33 = vadd.f32 %v15087_v53, %v15086_v4 }
 0x3c8   : > { %6714 = vst [vmem:[%s13809_s21 + $0x30] sm:$0xff] %v6682_v24  ;;  %v6685_v29 = vmax.f32 %v6653_v36, 0.0  ;;  %v6652_v59 = vadd.f32 %v13795_v49, %v6614_v54  ;;  %v6617_v38 = vadd.f32 %v9739_v30, %v6311_v52  ;;  %v9662_v2 = vpop.f32.mrf.mxu0  ;;  %v15088_v52 = vld [vmem:[#allocation100_spill] sm:$0xff]  ;;  %v15089_v24 = vld [vmem:[#allocation126_spill] sm:$0xff]  ;;  %v15090_v36 = vld [vmem:[#allocation103_spill] sm:$0xff] }
 0x3c9   : > { %v6313_v14 = vadd.f32 %v9662_v2, %v6007_v41  ;;  %v6497_v35 = vpop.f32.mrf.mxu1  ;;  %v6013_v3 = vadd.f32 %v15088_v52, %v5707_v48  ;;  %v5709_v54 = vadd.f32 %v15090_v36, %v15089_v24  ;;  %v15092_v2 = vld [vmem:[#allocation54_spill] sm:$0xff] }
 0x3ca   : > { %6717 = vst [vmem:[%s13809_s21 + $0x48] sm:$0xff] %v6685_v29  ;;  %v6684_v26 = vmax.f32 %v6652_v59, 0.0  ;;  %v6655_v56 = vadd.f32 %v13795_v49, %v6617_v38  ;;  %v6616_v51 = vadd.f32 %v6497_v35, %v6310_v47  ;;  %v6201_v5 = vpop.f32.mrf.mxu0  ;;  %v15091_v59 = vld [vmem:[#allocation132_spill] sm:$0xff] }
 0x3cb   : > { %v6312_v7 = vadd.f32 %v6201_v5, %v6006_v44  ;;  %v9742_v13 = vpop.f32.mrf.mxu1  ;;  %v6012_v38 = vadd.f32 %v15091_v59, %v5706_v33  ;;  %v15093_v44 = vld [vmem:[#allocation66_spill] sm:$0xff] }
 0x3cc   : > { %6716 = vst [vmem:[%s13809_s21 + $0x40] sm:$0xff] %v6684_v26  ;;  %v6687_v20 = vmax.f32 %v6655_v56, 0.0  ;;  %v6654_v18 = vadd.f32 %v13795_v49, %v6616_v51  ;;  %v6619_v43 = vadd.f32 %v9742_v13, %v6313_v14  ;;  %v9665_v15 = vpop.f32.mrf.mxu0  ;;  %v5708_v8 = vadd.f32 %v15093_v44, %v15092_v2  ;;  %v15096_v13 = vld [vmem:[#allocation102_spill] sm:$0xff] }
 0x3cd   : > { %v6315_v22 = vadd.f32 %v9665_v15, %v6009_v60  ;;  %v6507_v63 = vpop.f32.mrf.mxu1  ;;  %v15094_v60 = vld [vmem:[#allocation101_spill] sm:$0xff] }
 0x3ce   : > { %6719 = vst [vmem:[%s13809_s21 + $0x58] sm:$0xff] %v6687_v20  ;;  %v6686_v42 = vmax.f32 %v6654_v18, 0.0  ;;  %v6657_v23 = vadd.f32 %v13795_v49, %v6619_v43  ;;  %v6618_v40 = vadd.f32 %v6507_v63, %v6312_v7  ;;  %v6211_v58 = vpop.f32.mrf.mxu0  ;;  %v6015_v37 = vadd.f32 %v15094_v60, %v5709_v54  ;;  %v15095_v7 = vld [vmem:[#allocation93_spill] sm:$0xff]  ;;  %v15097_v63 = vld [vmem:[#allocation104_spill] sm:$0xff] }
 0x3cf   : > { %v6314_v25 = vadd.f32 %v6211_v58, %v6008_v11  ;;  %v9745_v57 = vpop.f32.mrf.mxu1  ;;  %v5711_v20 = vadd.f32 %v15096_v13, %v15095_v7 }
 0x3d0   : > { %6718 = vst [vmem:[%s13809_s21 + $0x50] sm:$0xff] %v6686_v42  ;;  %v6689_v39 = vmax.f32 %v6657_v23, 0.0  ;;  %v6656_v27 = vadd.f32 %v13795_v49, %v6618_v40  ;;  %v6621_v28 = vadd.f32 %v9745_v57, %v6315_v22  ;;  %v9668_v10 = vpop.f32.mrf.mxu0  ;;  %v6014_v42 = vadd.f32 %v15097_v63, %v5708_v8  ;;  %v15098_v23 = vld [vmem:[#allocation94_spill] sm:$0xff]  ;;  %v15099_v40 = vld [vmem:[#allocation107_spill] sm:$0xff] }
 0x3d1   : > { %v6317_v34 = vadd.f32 %v9668_v10, %v6011_v32  ;;  %v6517_v0 = vpop.f32.mrf.mxu1  ;;  %v5710_v58 = vadd.f32 %v15099_v40, %v15098_v23  ;;  %v15102_v10 = vld [vmem:[#allocation105_spill] sm:$0xff] }
 0x3d2   : > { %6721 = vst [vmem:[%s13809_s21 + $0x68] sm:$0xff] %v6689_v39  ;;  %v6688_v50 = vmax.f32 %v6656_v27, 0.0  ;;  %v6659_v9 = vadd.f32 %v13795_v49, %v6621_v28  ;;  %v6620_v1 = vadd.f32 %v6517_v0, %v6314_v25  ;;  %v6221_v55 = vpop.f32.mrf.mxu0  ;;  %v15100_v39 = vld [vmem:[#allocation133_spill] sm:$0xff]  ;;  %v15101_v28 = vld [vmem:[#allocation128_spill] sm:$0xff] }
 0x3d3   : > { %v6316_v31 = vadd.f32 %v6221_v55, %v6010_v45  ;;  %v9748_v41 = vpop.f32.mrf.mxu1  ;;  %v6017_v27 = vadd.f32 %v15100_v39, %v5711_v20  ;;  %v5713_v19 = vadd.f32 %v15102_v10, %v15101_v28  ;;  %v15105_v55 = vld [vmem:[#allocation108_spill] sm:$0xff] }
 0x3d4   : > { %6720 = vst [vmem:[%s13809_s21 + $0x60] sm:$0xff] %v6688_v50  ;;  %v6691_v62 = vmax.f32 %v6659_v9, 0.0  ;;  %v6658_v47 = vadd.f32 %v13795_v49, %v6620_v1  ;;  %v6623_v30 = vadd.f32 %v9748_v41, %v6317_v34  ;;  %v9671_v29 = vpop.f32.mrf.mxu0  ;;  %v15103_v50 = vld [vmem:[#allocation106_spill] sm:$0xff]  ;;  %v15104_v1 = vld [vmem:[#allocation24_spill] sm:$0xff] }
 0x3d5   : > { %v6319_v14 = vadd.f32 %v9671_v29, %v6013_v3  ;;  %v6527_v35 = vpop.f32.mrf.mxu1  ;;  %v6016_v9 = vadd.f32 %v15103_v50, %v5710_v58  ;;  %v5712_v52 = vadd.f32 %v15105_v55, %v15104_v1  ;;  %v15108_v29 = vld [vmem:[#allocation6_spill] sm:$0xff] }
 0x3d6   : > { %6723 = vst [vmem:[%s13809_s21 + $0x78] sm:$0xff] %v6691_v62  ;;  %v6690_v26 = vmax.f32 %v6658_v47, 0.0  ;;  %v6661_v56 = vadd.f32 %v13795_v49, %v6623_v30  ;;  %v6622_v51 = vadd.f32 %v6527_v35, %v6316_v31  ;;  %v6231_v5 = vpop.f32.mrf.mxu0  ;;  %v15106_v62 = vld [vmem:[#allocation3_spill] sm:$0xff]  ;;  %v15107_v30 = vld [vmem:[#allocation25_spill] sm:$0xff] }
 0x3d7   : > { %v6318_v18 = vadd.f32 %v6231_v5, %v6012_v38  ;;  %v9751_v43 = vpop.f32.mrf.mxu1  ;;  %v6019_v47 = vadd.f32 %v15106_v62, %v5713_v19  ;;  %v5715_v59 = vadd.f32 %v15108_v29, %v15107_v30  ;;  %v15111_v5 = vld [vmem:[#allocation8_spill] sm:$0xff] }
 0x3d8   : > { %6722 = vst [vmem:[%s13809_s21 + $0x70] sm:$0xff] %v6690_v26  ;;  %v6693_v15 = vmax.f32 %v6661_v56, 0.0  ;;  %v6660_v11 = vadd.f32 %v13795_v49, %v6622_v51  ;;  %v6625_v21 = vadd.f32 %v9751_v43, %v6319_v14  ;;  %v9674_v22 = vpop.f32.mrf.mxu0  ;;  %v15109_v26 = vld [vmem:[#allocation109_spill] sm:$0xff]  ;;  %v15110_v51 = vld [vmem:[#allocation62_spill] sm:$0xff] }
 0x3d9   : > { %v6321_v32 = vadd.f32 %v9674_v22, %v6015_v37  ;;  %v6537_v16 = vpop.f32.mrf.mxu1  ;;  %v6018_v56 = vadd.f32 %v15109_v26, %v5712_v52  ;;  %v5714_v60 = vadd.f32 %v15111_v5, %v15110_v51  ;;  %v15114_v22 = vld [vmem:[#allocation14_spill] sm:$0xff] }
 0x3da   : > { %6725 = vst [vmem:[%s13809_s21 + $0x88] sm:$0xff] %v6693_v15  ;;  %v6692_v46 = vmax.f32 %v6660_v11, 0.0  ;;  %v6663_v48 = vadd.f32 %v13795_v49, %v6625_v21  ;;  %v6624_v25 = vadd.f32 %v6537_v16, %v6318_v18  ;;  %v6241_v57 = vpop.f32.mrf.mxu0  ;;  %v15112_v15 = vld [vmem:[#allocation11_spill] sm:$0xff]  ;;  %v15113_v21 = vld [vmem:[#allocation96_spill] sm:$0xff] }
 0x3db   : > { %v6320_v45 = vadd.f32 %v6241_v57, %v6014_v42  ;;  %v9754_v4 = vpop.f32.mrf.mxu1  ;;  %v6021_v11 = vadd.f32 %v15112_v15, %v5715_v59  ;;  %v5717_v63 = vadd.f32 %v15114_v22, %v15113_v21  ;;  %v15117_v57 = vld [vmem:[#allocation19_spill] sm:$0xff] }
 0x3dc   : > { %6724 = vst [vmem:[%s13809_s21 + $0x80] sm:$0xff] %v6692_v46  ;;  %v6695_v53 = vmax.f32 %v6663_v48, 0.0  ;;  %v6662_v33 = vadd.f32 %v13795_v49, %v6624_v25  ;;  %v6627_v34 = vadd.f32 %v9754_v4, %v6321_v32  ;;  %v9677_v0 = vpop.f32.mrf.mxu0  ;;  %v15115_v46 = vld [vmem:[#allocation17_spill] sm:$0xff]  ;;  %v15116_v25 = vld [vmem:[#allocation99_spill] sm:$0xff] }
 0x3dd   : > { %v6323_v3 = vadd.f32 %v9677_v0, %v6017_v27  ;;  %v6547_v24 = vpop.f32.mrf.mxu1  ;;  %v6020_v48 = vadd.f32 %v15115_v46, %v5714_v60  ;;  %v5716_v39 = vadd.f32 %v15117_v57, %v15116_v25  ;;  %v15120_v0 = vld [vmem:[#allocation55_spill] sm:$0xff] }
 0x3de   : > { %6727 = vst [vmem:[%s13809_s21 + $0x98] sm:$0xff] %v6695_v53  ;;  %v6694_v36 = vmax.f32 %v6662_v33, 0.0  ;;  %v6665_v54 = vadd.f32 %v13795_v49, %v6627_v34  ;;  %v6626_v31 = vadd.f32 %v6547_v24, %v6320_v45  ;;  %v6251_v41 = vpop.f32.mrf.mxu0  ;;  %v15118_v53 = vld [vmem:[#allocation23_spill] sm:$0xff]  ;;  %v15119_v34 = vld [vmem:[#allocation129_spill] sm:$0xff] }
 0x3df   : > { %v6322_v38 = vadd.f32 %v6251_v41, %v6016_v9  ;;  %v9757_v2 = vpop.f32.mrf.mxu1  ;;  %v6023_v33 = vadd.f32 %v15118_v53, %v5717_v63  ;;  %v5719_v50 = vadd.f32 %v15120_v0, %v15119_v34 }
 0x3e0   : > { %6726 = vst [vmem:[%s13809_s21 + $0x90] sm:$0xff] %v6694_v36  ;;  %v6697_v44 = vmax.f32 %v6665_v54, 0.0  ;;  %v6664_v8 = vadd.f32 %v13795_v49, %v6626_v31  ;;  %v6629_v14 = vadd.f32 %v9757_v2, %v6323_v3  ;;  %v9680_v35 = vpop.f32.mrf.mxu0  ;;  %v6022_v36 = vadd.f32 %v13777_v6, %v5716_v39  ;;  %v15121_v54 = vld [vmem:[#allocation64_spill] sm:$0xff] }
 0x3e1   : > { %v6325_v37 = vadd.f32 %v9680_v35, %v6019_v47  ;;  %v6557_v7 = vpop.f32.mrf.mxu1  ;;  %v5718_v31 = vadd.f32 %v13779_v17, %v15121_v54 }
 0x3e2   : > { %6729 = vst [vmem:[%s13809_s21 + $0xa8] sm:$0xff] %v6697_v44  ;;  %v6696_v13 = vmax.f32 %v6664_v8, 0.0  ;;  %v6667_v20 = vadd.f32 %v13795_v49, %v6629_v14  ;;  %v6628_v18 = vadd.f32 %v6557_v7, %v6322_v38  ;;  %v6261_v43 = vpop.f32.mrf.mxu0  ;;  %v6025_v38 = vadd.f32 %v13782_v61, %v5719_v50 }
 0x3e3   : > { %v6324_v42 = vadd.f32 %v6261_v43, %v6018_v56  ;;  %v9760_v23 = vpop.f32.mrf.mxu1  ;;  %v6024_v35 = vadd.f32 %v13787_v12, %v5718_v31 }
 0x3e4   : > { %6728 = vst [vmem:[%s13809_s21 + $0xa0] sm:$0xff] %v6696_v13  ;;  %v6699_v40 = vmax.f32 %v6667_v20, 0.0  ;;  %v6666_v58 = vadd.f32 %v13795_v49, %v6628_v18  ;;  %v6631_v32 = vadd.f32 %v9760_v23, %v6325_v37  ;;  %v9683_v16 = vpop.f32.mrf.mxu0 }
 0x3e5   : > { %v6327_v27 = vadd.f32 %v9683_v16, %v6021_v11  ;;  %v6567_v28 = vpop.f32.mrf.mxu1 }
 0x3e6   : > { %6731 = vst [vmem:[%s13809_s21 + $0xb8] sm:$0xff] %v6699_v40  ;;  %v6698_v10 = vmax.f32 %v6666_v58, 0.0  ;;  %v6669_v19 = vadd.f32 %v13795_v49, %v6631_v32  ;;  %v6630_v45 = vadd.f32 %v6567_v28, %v6324_v42  ;;  %v6271_v4 = vpop.f32.mrf.mxu0 }
 0x3e7   : > { %v6326_v9 = vadd.f32 %v6271_v4, %v6020_v48  ;;  %v9763_v1 = vpop.f32.mrf.mxu1 }
 0x3e8   : > { %6730 = vst [vmem:[%s13809_s21 + $0xb0] sm:$0xff] %v6698_v10  ;;  %v6701_v55 = vmax.f32 %v6669_v19, 0.0  ;;  %v6668_v52 = vadd.f32 %v13795_v49, %v6630_v45  ;;  %v6633_v3 = vadd.f32 %v9763_v1, %v6327_v27  ;;  %v9686_v24 = vpop.f32.mrf.mxu0 }
 0x3e9   : > { %v6329_v41 = vadd.f32 %v9686_v24, %v6023_v33  ;;  %v6577_v62 = vpop.f32.mrf.mxu1 }
 0x3ea   : > { %6733 = vst [vmem:[%s13809_s21 + $0xc8] sm:$0xff] %v6701_v55  ;;  %v6700_v47 = vmax.f32 %v6668_v52, 0.0  ;;  %v6671_v30 = vadd.f32 %v13795_v49, %v6633_v3  ;;  %v6632_v29 = vadd.f32 %v6577_v62, %v6326_v9  ;;  %v6281_v59 = vpop.f32.mrf.mxu0 }
 0x3eb   : > { %v6328_v2 = vadd.f32 %v6281_v59, %v6022_v36  ;;  %v9766_v44 = vpop.f32.mrf.mxu1 }
 0x3ec   : > { %6732 = vst [vmem:[%s13809_s21 + $0xc0] sm:$0xff] %v6700_v47  ;;  %v6703_v8 = vmax.f32 %v6671_v30, 0.0  ;;  %v6670_v6 = vadd.f32 %v13795_v49, %v6632_v29  ;;  %v6635_v14 = vadd.f32 %v9766_v44, %v6329_v41  ;;  %v9689_v17 = vpop.f32.mrf.mxu0 }
 0x3ed   : > { %v6331_v26 = vadd.f32 %v9689_v17, %v6025_v38  ;;  %v6587_v56 = vpop.f32.mrf.mxu1 }
 0x3ee   : > { %6735 = vst [vmem:[%s13809_s21 + $0xd8] sm:$0xff] %v6703_v8  ;;  %v6702_v51 = vmax.f32 %v6670_v6, 0.0  ;;  %v6673_v5 = vadd.f32 %v13795_v49, %v6635_v14  ;;  %v6634_v61 = vadd.f32 %v6587_v56, %v6328_v2  ;;  %v6291_v60 = vpop.f32.mrf.mxu0 }
 0x3ef   : > { %v6330_v37 = vadd.f32 %v6291_v60, %v6024_v35  ;;  %v9769_v7 = vpop.f32.mrf.mxu1 }
 0x3f0   : > { %6734 = vst [vmem:[%s13809_s21 + $0xd0] sm:$0xff] %v6702_v51  ;;  %v6705_v13 = vmax.f32 %v6673_v5, 0.0  ;;  %v6672_v20 = vadd.f32 %v13795_v49, %v6634_v61  ;;  %v6637_v18 = vadd.f32 %v9769_v7, %v6331_v26 }
 0x3f1   : > { %v6597_v43 = vpop.f32.mrf.mxu1 }
 0x3f2   : > { %6737 = vst [vmem:[%s13809_s21 + $0xe8] sm:$0xff] %v6705_v13  ;;  %v6704_v12 = vmax.f32 %v6672_v20, 0.0  ;;  %v6675_v15 = vadd.f32 %v13795_v49, %v6637_v18  ;;  %v6636_v11 = vadd.f32 %v6597_v43, %v6330_v37 }
 0x3f4   : > { %6736 = vst [vmem:[%s13809_s21 + $0xe0] sm:$0xff] %v6704_v12  ;;  %v6707_v21 = vmax.f32 %v6675_v15, 0.0  ;;  %v6674_v22 = vadd.f32 %v13795_v49, %v6636_v11 }
 0x3f6   : > { %6739 = vst [vmem:[%s13809_s21 + $0xf8] sm:$0xff] %v6707_v21  ;;  %v6706_v63 = vmax.f32 %v6674_v22, 0.0 }
 0x3f8   : > { %6738 = vst [vmem:[%s13809_s21 + $0xf0] sm:$0xff] %v6706_v63 }
 0x3f9 PF: > { %s15_s18 = sadd.s32 1, %s9817_s18  }
 0x3fa   : > { %p12_p4 = scmp.ge.s32.totalorder %s15_s18, 4  }
 0x3fc   :  { %14 = sbr.rel (!%p12_p4) target bundleno = 1 (0x1), region = 86 }

</bundles_post_ra>
